<compile_context>
chip_gen: v7x
topology: tpu7x:2x2x1
jax: 0.10.0
libtpu: 0.0.40
codegen_flags: <defaults>
</compile_context>

<pallas_src>
import math

import jax
import jax.numpy as jnp
from jax.experimental import pallas as pl
from jax.experimental.pallas import tpu as pltpu

# ----------------------------------------------------------------------------
# Sizes (small, consistent with FiLMResBlkSelfCross(emb_dim, channels))
# ----------------------------------------------------------------------------
B = 2                      # batch
C = 32                     # channels (divisible by num_heads=8 -> head_dim=4)
H = W = 8                  # spatial
N = H * W
EMB = 16                   # emb_dim
NUM_HEADS = 8
HEAD_DIM = C // NUM_HEADS
GROUPS = min(C // 4, 32)   # = 8, exactly as in the PyTorch module
MLP = 4
EPS = 1e-5

# conv halo scratch: interior stored at sublane-aligned W offset 8; taps read cols 7..16
PAD_H = H + 2
W_OFF = 8
PAD_W = 24

# NOTE: the in-kernel scramble specialization below assumes H*W == B*C (true here: 64).
assert H * W == B * C

PARAM_ORDER = (
    'film_we', 'film_be', 'film_wsb', 'film_bsb',
    'res_g1', 'res_b1', 'res_w1', 'res_cb1', 'res_g2', 'res_b2', 'res_w2', 'res_cb2',
    'sa_g1', 'sa_b1', 'sa_wq', 'sa_bq', 'sa_wkv', 'sa_bkv', 'sa_wo', 'sa_bo',
    'sa_g2', 'sa_b2', 'sa_f1w', 'sa_f1b', 'sa_f2w', 'sa_f2b',
    'ca_g1', 'ca_b1', 'ca_wq', 'ca_bq', 'ca_wkv', 'ca_bkv', 'ca_wo', 'ca_bo',
    'ca_g2', 'ca_b2', 'ca_f1w', 'ca_f1b', 'ca_f2w', 'ca_f2b',
    'gmat', 'hm2', 'hmT2', 'perm',
)


# ----------------------------------------------------------------------------
# In-kernel helpers (pure functions on values / refs)
# ----------------------------------------------------------------------------
def _silu(v):
    return v * (1.0 / (1.0 + jnp.exp(-v)))


def _group_norm(x, gamma, beta, gmat):
    """PyTorch GroupNorm(GROUPS, C): stats per (batch, group) over (HW, C/G).

    gmat is the host-precomputed (C, C) same-group indicator (hoisted constant)."""
    s = jnp.sum(x, axis=1)                                    # (B, C)
    ss = jnp.sum(x * x, axis=1)                               # (B, C)
    gs = jnp.dot(s, gmat, preferred_element_type=jnp.float32)
    gss = jnp.dot(ss, gmat, preferred_element_type=jnp.float32)
    cnt = float(N * (C // GROUPS))
    mean = gs / cnt
    var = gss / cnt - mean * mean                             # biased var (PyTorch)
    inv = jax.lax.rsqrt(var + EPS)
    xn = (x - mean[:, None, :]) * inv[:, None, :]
    return xn * gamma + beta                                  # gamma/beta: (1, C)


def _conv3x3(y, pad_ref, w9, bias):
    """3x3 'same' conv as a single im2col matmul.

    y: (B, N, C) value.  pad_ref: (B, PAD_H, PAD_W, C) VMEM scratch, pre-zeroed;
    the interior is stored at rows 1..H, cols W_OFF..W_OFF+W (sublane-aligned store).
    w9: (9*C, C) stacked taps (dy-major, dx, cin).  bias: (1, C)."""
    pad_ref[:, 1:H + 1, W_OFF:W_OFF + W, :] = y.reshape(B, H, W, C)
    cols = []
    for dy in range(3):
        for dx in range(3):
            c0 = W_OFF - 1 + dx
            cols.append(pad_ref[:, dy:dy + H, c0:c0 + W, :].reshape(B * H * W, C))
    patches = jnp.concatenate(cols, axis=1)                   # (B*H*W, 9*C) = (128, 288)
    z = jnp.dot(patches, w9, preferred_element_type=jnp.float32) + bias
    return z.reshape(B, N, C)


def _mha_batch_axis(xq, kv, wq, bq, wkv, bkv, wo, bo, hm2, hmT2):
    """nn.MultiheadAttention with PyTorch's (L, N, E) convention on (B, N, C) tensors.

    The batch axis is the MHA sequence axis L; HW is the MHA batch.  Fully batched:
    one Q projection, one fused K|V projection, one score matmul against the
    block-diagonal head matrix hm2, one probability-expansion matmul against hmT2,
    and one out-projection.  Returns a (B*N, C) tensor with rows ordered l*N + n."""
    scale = 1.0 / math.sqrt(HEAD_DIM)
    q = jnp.dot(xq.reshape(B * N, C), wq, preferred_element_type=jnp.float32) + bq
    kvp = jnp.dot(kv.reshape(B * N, C), wkv, preferred_element_type=jnp.float32) + bkv
    k_cat = jnp.concatenate([kvp[s * N:(s + 1) * N, :C] for s in range(B)], axis=1)  # (N, B*C)
    v_cat = jnp.concatenate([kvp[s * N:(s + 1) * N, C:] for s in range(B)], axis=1)  # (N, B*C)
    q_rep = jnp.concatenate([q] * B, axis=1)                  # (B*N, B*C): Q_l per key slot
    k_rep = jnp.concatenate([k_cat] * B, axis=0)              # (B*N, B*C): K_s per row block
    v_rep = jnp.concatenate([v_cat] * B, axis=0)              # (B*N, B*C)
    # per-head scores for every (query l, key s): (B*N, B*NUM_HEADS) in one matmul
    sc = jnp.dot(q_rep * k_rep, hm2, preferred_element_type=jnp.float32) * scale
    m = sc[:, :NUM_HEADS]
    for s in range(1, B):
        m = jnp.maximum(m, sc[:, s * NUM_HEADS:(s + 1) * NUM_HEADS])
    ex = [jnp.exp(sc[:, s * NUM_HEADS:(s + 1) * NUM_HEADS] - m) for s in range(B)]
    den = ex[0]
    for s in range(1, B):
        den = den + ex[s]
    inv = 1.0 / den
    p = jnp.concatenate([e * inv for e in ex], axis=1)        # softmax probs (B*N, B*NH)
    pe = jnp.dot(p, hmT2, preferred_element_type=jnp.float32) * v_rep   # (B*N, B*C)
    o = pe[:, :C]
    for s in range(1, B):
        o = o + pe[:, s * C:(s + 1) * C]
    return jnp.dot(o, wo, preferred_element_type=jnp.float32) + bo      # (B*N, C)


def _scramble(a_flat, perm):
    """PyTorch: attn_out.permute(1,2,0).contiguous().view(B,C,H,W), re-expressed
    channels-last: out[b, p, c] = A[p % B, C*b + c, p // B] with A = a_flat.reshape(B,N,C).

    Done in-kernel as 32x32 block transposes + one permutation matmul per batch row.
    a_flat: (B*N, C) attention output, rows ordered l*N + n."""
    blocks = []
    for b2 in range(B):
        g = jnp.concatenate(
            [jnp.transpose(a_flat[r * N + b2 * C:r * N + b2 * C + C, :]) for r in range(B)],
            axis=0)                                           # (B*C, C)
        blocks.append(jnp.dot(perm, g, preferred_element_type=jnp.float32).reshape(1, N, C))
    return jnp.concatenate(blocks, axis=0)                    # (B, N, C)


def _ffn_res(x2, f1w, f1b, f2w, f2b):
    """x2 + ffn(x2) with ffn = 1x1 conv -> SiLU -> 1x1 conv."""
    h = _silu(jnp.dot(x2.reshape(B * N, C), f1w, preferred_element_type=jnp.float32) + f1b)
    o = jnp.dot(h, f2w, preferred_element_type=jnp.float32) + f2b
    return x2 + o.reshape(B, N, C)


def _attn_block(x_q, x_kv, p, pre, self_mode):
    """SelfAttention / CrossAttention: norm1 -> MHA -> scramble -> norm2 -> ffn + skips."""
    xn = _group_norm(x_q, p[pre + 'g1'], p[pre + 'b1'], p['gmat'])
    kv = xn if self_mode else x_kv            # CrossAttention does NOT normalize x_kv
    a = _mha_batch_axis(xn, kv,
                        p[pre + 'wq'], p[pre + 'bq'], p[pre + 'wkv'], p[pre + 'bkv'],
                        p[pre + 'wo'], p[pre + 'bo'], p['hm2'], p['hmT2'])
    s = _scramble(a, p['perm'])
    x2 = _group_norm(s + xn, p[pre + 'g2'], p[pre + 'b2'], p['gmat'])
    return _ffn_res(x2, p[pre + 'f1w'], p[pre + 'f1b'], p[pre + 'f2w'], p[pre + 'f2b'])


# ----------------------------------------------------------------------------
# The single fused kernel
# ----------------------------------------------------------------------------
def fused_kernel(*refs):
    n_in = 3 + len(PARAM_ORDER)
    x_ref, emb_ref, cross_ref = refs[0], refs[1], refs[2]
    out_ref = refs[n_in]
    pad_ref = refs[n_in + 1]
    # every weight / constant loaded exactly once into VMEM values
    p = {name: refs[3 + i][...] for i, name in enumerate(PARAM_ORDER)}

    # zero the conv halo buffer once (both convs overwrite only the interior window)
    pad_ref[...] = jnp.zeros(pad_ref.shape, jnp.float32)

    x = x_ref[...]                                            # (B, N, C)

    # ---- FiLM: fc_emb, then fused [scale | bias] projection (one matmul) ----
    ec = jnp.dot(emb_ref[...], p['film_we'],
                 preferred_element_type=jnp.float32) + p['film_be']       # (B, C)
    sb = jnp.dot(ec, p['film_wsb'],
                 preferred_element_type=jnp.float32) + p['film_bsb']      # (B, 2C)
    film = x * sb[:, None, :C] + sb[:, None, C:]

    # ---- ResBlock: GN+SiLU -> conv3x3 -> GN+SiLU -> conv3x3 -> + skip(film) ----
    y1 = _silu(_group_norm(film, p['res_g1'], p['res_b1'], p['gmat']))
    z1 = _conv3x3(y1, pad_ref, p['res_w1'], p['res_cb1'])
    y2 = _silu(_group_norm(z1, p['res_g2'], p['res_b2'], p['gmat']))
    z2 = _conv3x3(y2, pad_ref, p['res_w2'], p['res_cb2'])
    r = z2 + film

    # ---- SelfAttention ----
    sa_out = _attn_block(r, r, p, 'sa_', True)
    # ---- CrossAttention (kv = raw cross input) ----
    out = _attn_block(sa_out, cross_ref[...], p, 'ca_', False)

    out_ref[...] = out


# ----------------------------------------------------------------------------
# pallas_call wrapper: one call, whole arrays as single full blocks (shapes are tiny)
# ----------------------------------------------------------------------------
def _full_spec(shape):
    nd = len(shape)
    return pl.BlockSpec(tuple(shape), lambda *_, _nd=nd: (0,) * _nd)


def film_resblk_self_cross(x_nchw, emb, cross_nchw, P):
    to_nsc = lambda t: jnp.transpose(t, (0, 2, 3, 1)).reshape(B, N, C)
    args = [to_nsc(x_nchw), emb, to_nsc(cross_nchw)] + [P[k] for k in PARAM_ORDER]
    out = pl.pallas_call(
        fused_kernel,
        grid=(1,),
        in_specs=[_full_spec(a.shape) for a in args],
        out_specs=_full_spec((B, N, C)),
        out_shape=jax.ShapeDtypeStruct((B, N, C), jnp.float32),
        scratch_shapes=[pltpu.VMEM((B, PAD_H, PAD_W, C), jnp.float32)],
        compiler_params=pltpu.CompilerParams(
            dimension_semantics=("arbitrary",),
            vmem_limit_bytes=32 * 1024 * 1024),
    )(*args)
    return jnp.transpose(out.reshape(B, H, W, C), (0, 3, 1, 2))      # back to NCHW


# ----------------------------------------------------------------------------
# Deterministic parameter construction (PyTorch shapes -> fused kernel layout)
# ----------------------------------------------------------------------------
def make_params():
    key_it = iter(jax.random.split(jax.random.PRNGKey(0), 128))

    def nrm(shape, scale=0.1):
        return scale * jax.random.normal(next(key_it), shape, dtype=jnp.float32)

    def linear(in_f, out_f):                  # nn.Linear: weight (out, in)
        w, b = nrm((out_f, in_f)), nrm((out_f,))
        return w.T, b.reshape(1, out_f)

    def gnorm(c):                             # nn.GroupNorm affine params
        return 1.0 + nrm((1, c)), nrm((1, c))

    def conv3_stacked(c):                     # nn.Conv2d 3x3: weight (Cout, Cin, 3, 3)
        w, b = nrm((c, c, 3, 3)), nrm((c,))
        return jnp.transpose(w, (2, 3, 1, 0)).reshape(9 * c, c), b.reshape(1, c)

    def conv1(cin, cout):                     # nn.Conv2d 1x1: weight (Cout, Cin, 1, 1)
        w, b = nrm((cout, cin, 1, 1)), nrm((cout,))
        return w.reshape(cout, cin).T, b.reshape(1, cout)

    def attn_block(c, pre, P):
        P[pre + 'g1'], P[pre + 'b1'] = gnorm(c)
        in_w, in_b = nrm((3 * c, c)), nrm((3 * c,))          # in_proj_weight / bias
        out_w, out_b = nrm((c, c)), nrm((c,))                # out_proj
        P[pre + 'wq'] = in_w[:c].T
        P[pre + 'bq'] = in_b[:c].reshape(1, c)
        P[pre + 'wkv'] = jnp.concatenate([in_w[c:2 * c].T, in_w[2 * c:].T], axis=1)
        P[pre + 'bkv'] = jnp.concatenate([in_b[c:2 * c], in_b[2 * c:]]).reshape(1, 2 * c)
        P[pre + 'wo'] = out_w.T
        P[pre + 'bo'] = out_b.reshape(1, c)
        P[pre + 'g2'], P[pre + 'b2'] = gnorm(c)
        P[pre + 'f1w'], P[pre + 'f1b'] = conv1(c, MLP * c)
        P[pre + 'f2w'], P[pre + 'f2b'] = conv1(MLP * c, c)

    P = {}
    P['film_we'], P['film_be'] = linear(EMB, C)
    ws, bs = linear(C, C)
    wb, bb = linear(C, C)
    P['film_wsb'] = jnp.concatenate([ws, wb], axis=1)        # fused [scale | bias]
    P['film_bsb'] = jnp.concatenate([bs, bb], axis=1)
    P['res_g1'], P['res_b1'] = gnorm(C)
    P['res_w1'], P['res_cb1'] = conv3_stacked(C)
    P['res_g2'], P['res_b2'] = gnorm(C)
    P['res_w2'], P['res_cb2'] = conv3_stacked(C)
    attn_block(C, 'sa_', P)
    attn_block(C, 'ca_', P)

    # host-precomputed constant matrices (hoisted out of the kernel)
    cg = C // GROUPS
    gidx = jnp.arange(C) // cg
    P['gmat'] = (gidx[:, None] == gidx[None, :]).astype(jnp.float32)          # (C, C)
    hm = (jnp.arange(C)[:, None] // HEAD_DIM
          == jnp.arange(NUM_HEADS)[None, :]).astype(jnp.float32)              # (C, NH)
    P['hm2'] = jnp.kron(jnp.eye(B, dtype=jnp.float32), hm)                    # (B*C, B*NH)
    P['hmT2'] = jnp.kron(jnp.eye(B, dtype=jnp.float32), hm.T)                 # (B*NH, B*C)
    pidx = jnp.arange(N)
    jidx = C * (pidx % B) + pidx // B
    P['perm'] = (jidx[:, None] == jnp.arange(B * C)[None, :]).astype(jnp.float32)  # (N, B*C)
    return P


if __name__ == "__main__":
    params = make_params()
    kx, ke, kc = jax.random.split(jax.random.PRNGKey(0), 3)
    x = jax.random.normal(kx, (B, C, H, W), jnp.float32)       # NCHW like PyTorch
    emb = jax.random.normal(ke, (B, EMB), jnp.float32)
    cross = jax.random.normal(kc, (B, C, H, W), jnp.float32)   # same spatial size (required
                                                               # by the PyTorch MHA call)
    out = jax.jit(film_resblk_self_cross)(x, emb, cross, params)
    jax.block_until_ready(out)
    assert out.shape == (B, C, H, W) and out.dtype == jnp.float32
    assert bool(jnp.all(jnp.isfinite(out)))
    print("KERNEL_OK")
</pallas_src>

<mosaic_0001>
module attributes {stable_mosaic.version = 11 : i64} {
  func.func @fused_kernel(%arg0: i32, %arg1: memref<2x64x32xf32, #tpu.memory_space<vmem>>, %arg2: memref<2x16xf32, #tpu.memory_space<vmem>>, %arg3: memref<2x64x32xf32, #tpu.memory_space<vmem>>, %arg4: memref<16x32xf32, #tpu.memory_space<vmem>>, %arg5: memref<1x32xf32, #tpu.memory_space<vmem>>, %arg6: memref<32x64xf32, #tpu.memory_space<vmem>>, %arg7: memref<1x64xf32, #tpu.memory_space<vmem>>, %arg8: memref<1x32xf32, #tpu.memory_space<vmem>>, %arg9: memref<1x32xf32, #tpu.memory_space<vmem>>, %arg10: memref<288x32xf32, #tpu.memory_space<vmem>>, %arg11: memref<1x32xf32, #tpu.memory_space<vmem>>, %arg12: memref<1x32xf32, #tpu.memory_space<vmem>>, %arg13: memref<1x32xf32, #tpu.memory_space<vmem>>, %arg14: memref<288x32xf32, #tpu.memory_space<vmem>>, %arg15: memref<1x32xf32, #tpu.memory_space<vmem>>, %arg16: memref<1x32xf32, #tpu.memory_space<vmem>>, %arg17: memref<1x32xf32, #tpu.memory_space<vmem>>, %arg18: memref<32x32xf32, #tpu.memory_space<vmem>>, %arg19: memref<1x32xf32, #tpu.memory_space<vmem>>, %arg20: memref<32x64xf32, #tpu.memory_space<vmem>>, %arg21: memref<1x64xf32, #tpu.memory_space<vmem>>, %arg22: memref<32x32xf32, #tpu.memory_space<vmem>>, %arg23: memref<1x32xf32, #tpu.memory_space<vmem>>, %arg24: memref<1x32xf32, #tpu.memory_space<vmem>>, %arg25: memref<1x32xf32, #tpu.memory_space<vmem>>, %arg26: memref<32x128xf32, #tpu.memory_space<vmem>>, %arg27: memref<1x128xf32, #tpu.memory_space<vmem>>, %arg28: memref<128x32xf32, #tpu.memory_space<vmem>>, %arg29: memref<1x32xf32, #tpu.memory_space<vmem>>, %arg30: memref<1x32xf32, #tpu.memory_space<vmem>>, %arg31: memref<1x32xf32, #tpu.memory_space<vmem>>, %arg32: memref<32x32xf32, #tpu.memory_space<vmem>>, %arg33: memref<1x32xf32, #tpu.memory_space<vmem>>, %arg34: memref<32x64xf32, #tpu.memory_space<vmem>>, %arg35: memref<1x64xf32, #tpu.memory_space<vmem>>, %arg36: memref<32x32xf32, #tpu.memory_space<vmem>>, %arg37: memref<1x32xf32, #tpu.memory_space<vmem>>, %arg38: memref<1x32xf32, #tpu.memory_space<vmem>>, %arg39: memref<1x32xf32, #tpu.memory_space<vmem>>, %arg40: memref<32x128xf32, #tpu.memory_space<vmem>>, %arg41: memref<1x128xf32, #tpu.memory_space<vmem>>, %arg42: memref<128x32xf32, #tpu.memory_space<vmem>>, %arg43: memref<1x32xf32, #tpu.memory_space<vmem>>, %arg44: memref<32x32xf32, #tpu.memory_space<vmem>>, %arg45: memref<64x16xf32, #tpu.memory_space<vmem>>, %arg46: memref<16x64xf32, #tpu.memory_space<vmem>>, %arg47: memref<64x64xf32, #tpu.memory_space<vmem>>, %arg48: memref<2x64x32xf32, #tpu.memory_space<vmem>>, %arg49: memref<2x10x24x32xf32, #tpu.memory_space<vmem>>) attributes {dimension_semantics = [#tpu.dimension_semantics<arbitrary>], iteration_bounds = array<i64: 1>, scalar_prefetch = 0 : i64, scratch_operands = 1 : i64, tpu.core_type = #tpu.core_type<tc>, window_params = [{pipeline_mode = #tpu.pipeline_mode<synchronous>, transform_indices = @transform_0, window_bounds = array<i64: 2, 64, 32>}, {pipeline_mode = #tpu.pipeline_mode<synchronous>, transform_indices = @transform_1, window_bounds = array<i64: 2, 16>}, {pipeline_mode = #tpu.pipeline_mode<synchronous>, transform_indices = @transform_2, window_bounds = array<i64: 2, 64, 32>}, {pipeline_mode = #tpu.pipeline_mode<synchronous>, transform_indices = @transform_3, window_bounds = array<i64: 16, 32>}, {pipeline_mode = #tpu.pipeline_mode<synchronous>, transform_indices = @transform_4, window_bounds = array<i64: 1, 32>}, {pipeline_mode = #tpu.pipeline_mode<synchronous>, transform_indices = @transform_5, window_bounds = array<i64: 32, 64>}, {pipeline_mode = #tpu.pipeline_mode<synchronous>, transform_indices = @transform_6, window_bounds = array<i64: 1, 64>}, {pipeline_mode = #tpu.pipeline_mode<synchronous>, transform_indices = @transform_7, window_bounds = array<i64: 1, 32>}, {pipeline_mode = #tpu.pipeline_mode<synchronous>, transform_indices = @transform_8, window_bounds = array<i64: 1, 32>}, {pipeline_mode = #tpu.pipeline_mode<synchronous>, transform_indices = @transform_9, window_bounds = array<i64: 288, 32>}, {pipeline_mode = #tpu.pipeline_mode<synchronous>, transform_indices = @transform_10, window_bounds = array<i64: 1, 32>}, {pipeline_mode = #tpu.pipeline_mode<synchronous>, transform_indices = @transform_11, window_bounds = array<i64: 1, 32>}, {pipeline_mode = #tpu.pipeline_mode<synchronous>, transform_indices = @transform_12, window_bounds = array<i64: 1, 32>}, {pipeline_mode = #tpu.pipeline_mode<synchronous>, transform_indices = @transform_13, window_bounds = array<i64: 288, 32>}, {pipeline_mode = #tpu.pipeline_mode<synchronous>, transform_indices = @transform_14, window_bounds = array<i64: 1, 32>}, {pipeline_mode = #tpu.pipeline_mode<synchronous>, transform_indices = @transform_15, window_bounds = array<i64: 1, 32>}, {pipeline_mode = #tpu.pipeline_mode<synchronous>, transform_indices = @transform_16, window_bounds = array<i64: 1, 32>}, {pipeline_mode = #tpu.pipeline_mode<synchronous>, transform_indices = @transform_17, window_bounds = array<i64: 32, 32>}, {pipeline_mode = #tpu.pipeline_mode<synchronous>, transform_indices = @transform_18, window_bounds = array<i64: 1, 32>}, {pipeline_mode = #tpu.pipeline_mode<synchronous>, transform_indices = @transform_19, window_bounds = array<i64: 32, 64>}, {pipeline_mode = #tpu.pipeline_mode<synchronous>, transform_indices = @transform_20, window_bounds = array<i64: 1, 64>}, {pipeline_mode = #tpu.pipeline_mode<synchronous>, transform_indices = @transform_21, window_bounds = array<i64: 32, 32>}, {pipeline_mode = #tpu.pipeline_mode<synchronous>, transform_indices = @transform_22, window_bounds = array<i64: 1, 32>}, {pipeline_mode = #tpu.pipeline_mode<synchronous>, transform_indices = @transform_23, window_bounds = array<i64: 1, 32>}, {pipeline_mode = #tpu.pipeline_mode<synchronous>, transform_indices = @transform_24, window_bounds = array<i64: 1, 32>}, {pipeline_mode = #tpu.pipeline_mode<synchronous>, transform_indices = @transform_25, window_bounds = array<i64: 32, 128>}, {pipeline_mode = #tpu.pipeline_mode<synchronous>, transform_indices = @transform_26, window_bounds = array<i64: 1, 128>}, {pipeline_mode = #tpu.pipeline_mode<synchronous>, transform_indices = @transform_27, window_bounds = array<i64: 128, 32>}, {pipeline_mode = #tpu.pipeline_mode<synchronous>, transform_indices = @transform_28, window_bounds = array<i64: 1, 32>}, {pipeline_mode = #tpu.pipeline_mode<synchronous>, transform_indices = @transform_29, window_bounds = array<i64: 1, 32>}, {pipeline_mode = #tpu.pipeline_mode<synchronous>, transform_indices = @transform_30, window_bounds = array<i64: 1, 32>}, {pipeline_mode = #tpu.pipeline_mode<synchronous>, transform_indices = @transform_31, window_bounds = array<i64: 32, 32>}, {pipeline_mode = #tpu.pipeline_mode<synchronous>, transform_indices = @transform_32, window_bounds = array<i64: 1, 32>}, {pipeline_mode = #tpu.pipeline_mode<synchronous>, transform_indices = @transform_33, window_bounds = array<i64: 32, 64>}, {pipeline_mode = #tpu.pipeline_mode<synchronous>, transform_indices = @transform_34, window_bounds = array<i64: 1, 64>}, {pipeline_mode = #tpu.pipeline_mode<synchronous>, transform_indices = @transform_35, window_bounds = array<i64: 32, 32>}, {pipeline_mode = #tpu.pipeline_mode<synchronous>, transform_indices = @transform_36, window_bounds = array<i64: 1, 32>}, {pipeline_mode = #tpu.pipeline_mode<synchronous>, transform_indices = @transform_37, window_bounds = array<i64: 1, 32>}, {pipeline_mode = #tpu.pipeline_mode<synchronous>, transform_indices = @transform_38, window_bounds = array<i64: 1, 32>}, {pipeline_mode = #tpu.pipeline_mode<synchronous>, transform_indices = @transform_39, window_bounds = array<i64: 32, 128>}, {pipeline_mode = #tpu.pipeline_mode<synchronous>, transform_indices = @transform_40, window_bounds = array<i64: 1, 128>}, {pipeline_mode = #tpu.pipeline_mode<synchronous>, transform_indices = @transform_41, window_bounds = array<i64: 128, 32>}, {pipeline_mode = #tpu.pipeline_mode<synchronous>, transform_indices = @transform_42, window_bounds = array<i64: 1, 32>}, {pipeline_mode = #tpu.pipeline_mode<synchronous>, transform_indices = @transform_43, window_bounds = array<i64: 32, 32>}, {pipeline_mode = #tpu.pipeline_mode<synchronous>, transform_indices = @transform_44, window_bounds = array<i64: 64, 16>}, {pipeline_mode = #tpu.pipeline_mode<synchronous>, transform_indices = @transform_45, window_bounds = array<i64: 16, 64>}, {pipeline_mode = #tpu.pipeline_mode<synchronous>, transform_indices = @transform_46, window_bounds = array<i64: 64, 64>}, {pipeline_mode = #tpu.pipeline_mode<synchronous>, transform_indices = @transform_47, window_bounds = array<i64: 2, 64, 32>}]} {
    %c0 = arith.constant 0 : index
    %c0_0 = arith.constant 0 : index
    %0 = vector.load %arg4[%c0, %c0_0] : memref<16x32xf32, #tpu.memory_space<vmem>>, vector<16x32xf32>
    %c0_1 = arith.constant 0 : index
    %c0_2 = arith.constant 0 : index
    %1 = vector.load %arg5[%c0_1, %c0_2] : memref<1x32xf32, #tpu.memory_space<vmem>>, vector<1x32xf32>
    %c0_3 = arith.constant 0 : index
    %c0_4 = arith.constant 0 : index
    %2 = vector.load %arg6[%c0_3, %c0_4] : memref<32x64xf32, #tpu.memory_space<vmem>>, vector<32x64xf32>
    %c0_5 = arith.constant 0 : index
    %c0_6 = arith.constant 0 : index
    %3 = vector.load %arg7[%c0_5, %c0_6] : memref<1x64xf32, #tpu.memory_space<vmem>>, vector<1x64xf32>
    %c0_7 = arith.constant 0 : index
    %c0_8 = arith.constant 0 : index
    %4 = vector.load %arg8[%c0_7, %c0_8] : memref<1x32xf32, #tpu.memory_space<vmem>>, vector<1x32xf32>
    %c0_9 = arith.constant 0 : index
    %c0_10 = arith.constant 0 : index
    %5 = vector.load %arg9[%c0_9, %c0_10] : memref<1x32xf32, #tpu.memory_space<vmem>>, vector<1x32xf32>
    %c0_11 = arith.constant 0 : index
    %c0_12 = arith.constant 0 : index
    %6 = vector.load %arg10[%c0_11, %c0_12] : memref<288x32xf32, #tpu.memory_space<vmem>>, vector<288x32xf32>
    %c0_13 = arith.constant 0 : index
    %c0_14 = arith.constant 0 : index
    %7 = vector.load %arg11[%c0_13, %c0_14] : memref<1x32xf32, #tpu.memory_space<vmem>>, vector<1x32xf32>
    %c0_15 = arith.constant 0 : index
    %c0_16 = arith.constant 0 : index
    %8 = vector.load %arg12[%c0_15, %c0_16] : memref<1x32xf32, #tpu.memory_space<vmem>>, vector<1x32xf32>
    %c0_17 = arith.constant 0 : index
    %c0_18 = arith.constant 0 : index
    %9 = vector.load %arg13[%c0_17, %c0_18] : memref<1x32xf32, #tpu.memory_space<vmem>>, vector<1x32xf32>
    %c0_19 = arith.constant 0 : index
    %c0_20 = arith.constant 0 : index
    %10 = vector.load %arg14[%c0_19, %c0_20] : memref<288x32xf32, #tpu.memory_space<vmem>>, vector<288x32xf32>
    %c0_21 = arith.constant 0 : index
    %c0_22 = arith.constant 0 : index
    %11 = vector.load %arg15[%c0_21, %c0_22] : memref<1x32xf32, #tpu.memory_space<vmem>>, vector<1x32xf32>
    %c0_23 = arith.constant 0 : index
    %c0_24 = arith.constant 0 : index
    %12 = vector.load %arg16[%c0_23, %c0_24] : memref<1x32xf32, #tpu.memory_space<vmem>>, vector<1x32xf32>
    %c0_25 = arith.constant 0 : index
    %c0_26 = arith.constant 0 : index
    %13 = vector.load %arg17[%c0_25, %c0_26] : memref<1x32xf32, #tpu.memory_space<vmem>>, vector<1x32xf32>
    %c0_27 = arith.constant 0 : index
    %c0_28 = arith.constant 0 : index
    %14 = vector.load %arg18[%c0_27, %c0_28] : memref<32x32xf32, #tpu.memory_space<vmem>>, vector<32x32xf32>
    %c0_29 = arith.constant 0 : index
    %c0_30 = arith.constant 0 : index
    %15 = vector.load %arg19[%c0_29, %c0_30] : memref<1x32xf32, #tpu.memory_space<vmem>>, vector<1x32xf32>
    %c0_31 = arith.constant 0 : index
    %c0_32 = arith.constant 0 : index
    %16 = vector.load %arg20[%c0_31, %c0_32] : memref<32x64xf32, #tpu.memory_space<vmem>>, vector<32x64xf32>
    %c0_33 = arith.constant 0 : index
    %c0_34 = arith.constant 0 : index
    %17 = vector.load %arg21[%c0_33, %c0_34] : memref<1x64xf32, #tpu.memory_space<vmem>>, vector<1x64xf32>
    %c0_35 = arith.constant 0 : index
    %c0_36 = arith.constant 0 : index
    %18 = vector.load %arg22[%c0_35, %c0_36] : memref<32x32xf32, #tpu.memory_space<vmem>>, vector<32x32xf32>
    %c0_37 = arith.constant 0 : index
    %c0_38 = arith.constant 0 : index
    %19 = vector.load %arg23[%c0_37, %c0_38] : memref<1x32xf32, #tpu.memory_space<vmem>>, vector<1x32xf32>
    %c0_39 = arith.constant 0 : index
    %c0_40 = arith.constant 0 : index
    %20 = vector.load %arg24[%c0_39, %c0_40] : memref<1x32xf32, #tpu.memory_space<vmem>>, vector<1x32xf32>
    %c0_41 = arith.constant 0 : index
    %c0_42 = arith.constant 0 : index
    %21 = vector.load %arg25[%c0_41, %c0_42] : memref<1x32xf32, #tpu.memory_space<vmem>>, vector<1x32xf32>
    %c0_43 = arith.constant 0 : index
    %c0_44 = arith.constant 0 : index
    %22 = vector.load %arg26[%c0_43, %c0_44] : memref<32x128xf32, #tpu.memory_space<vmem>>, vector<32x128xf32>
    %c0_45 = arith.constant 0 : index
    %c0_46 = arith.constant 0 : index
    %23 = vector.load %arg27[%c0_45, %c0_46] : memref<1x128xf32, #tpu.memory_space<vmem>>, vector<1x128xf32>
    %c0_47 = arith.constant 0 : index
    %c0_48 = arith.constant 0 : index
    %24 = vector.load %arg28[%c0_47, %c0_48] : memref<128x32xf32, #tpu.memory_space<vmem>>, vector<128x32xf32>
    %c0_49 = arith.constant 0 : index
    %c0_50 = arith.constant 0 : index
    %25 = vector.load %arg29[%c0_49, %c0_50] : memref<1x32xf32, #tpu.memory_space<vmem>>, vector<1x32xf32>
    %c0_51 = arith.constant 0 : index
    %c0_52 = arith.constant 0 : index
    %26 = vector.load %arg30[%c0_51, %c0_52] : memref<1x32xf32, #tpu.memory_space<vmem>>, vector<1x32xf32>
    %c0_53 = arith.constant 0 : index
    %c0_54 = arith.constant 0 : index
    %27 = vector.load %arg31[%c0_53, %c0_54] : memref<1x32xf32, #tpu.memory_space<vmem>>, vector<1x32xf32>
    %c0_55 = arith.constant 0 : index
    %c0_56 = arith.constant 0 : index
    %28 = vector.load %arg32[%c0_55, %c0_56] : memref<32x32xf32, #tpu.memory_space<vmem>>, vector<32x32xf32>
    %c0_57 = arith.constant 0 : index
    %c0_58 = arith.constant 0 : index
    %29 = vector.load %arg33[%c0_57, %c0_58] : memref<1x32xf32, #tpu.memory_space<vmem>>, vector<1x32xf32>
    %c0_59 = arith.constant 0 : index
    %c0_60 = arith.constant 0 : index
    %30 = vector.load %arg34[%c0_59, %c0_60] : memref<32x64xf32, #tpu.memory_space<vmem>>, vector<32x64xf32>
    %c0_61 = arith.constant 0 : index
    %c0_62 = arith.constant 0 : index
    %31 = vector.load %arg35[%c0_61, %c0_62] : memref<1x64xf32, #tpu.memory_space<vmem>>, vector<1x64xf32>
    %c0_63 = arith.constant 0 : index
    %c0_64 = arith.constant 0 : index
    %32 = vector.load %arg36[%c0_63, %c0_64] : memref<32x32xf32, #tpu.memory_space<vmem>>, vector<32x32xf32>
    %c0_65 = arith.constant 0 : index
    %c0_66 = arith.constant 0 : index
    %33 = vector.load %arg37[%c0_65, %c0_66] : memref<1x32xf32, #tpu.memory_space<vmem>>, vector<1x32xf32>
    %c0_67 = arith.constant 0 : index
    %c0_68 = arith.constant 0 : index
    %34 = vector.load %arg38[%c0_67, %c0_68] : memref<1x32xf32, #tpu.memory_space<vmem>>, vector<1x32xf32>
    %c0_69 = arith.constant 0 : index
    %c0_70 = arith.constant 0 : index
    %35 = vector.load %arg39[%c0_69, %c0_70] : memref<1x32xf32, #tpu.memory_space<vmem>>, vector<1x32xf32>
    %c0_71 = arith.constant 0 : index
    %c0_72 = arith.constant 0 : index
    %36 = vector.load %arg40[%c0_71, %c0_72] : memref<32x128xf32, #tpu.memory_space<vmem>>, vector<32x128xf32>
    %c0_73 = arith.constant 0 : index
    %c0_74 = arith.constant 0 : index
    %37 = vector.load %arg41[%c0_73, %c0_74] : memref<1x128xf32, #tpu.memory_space<vmem>>, vector<1x128xf32>
    %c0_75 = arith.constant 0 : index
    %c0_76 = arith.constant 0 : index
    %38 = vector.load %arg42[%c0_75, %c0_76] : memref<128x32xf32, #tpu.memory_space<vmem>>, vector<128x32xf32>
    %c0_77 = arith.constant 0 : index
    %c0_78 = arith.constant 0 : index
    %39 = vector.load %arg43[%c0_77, %c0_78] : memref<1x32xf32, #tpu.memory_space<vmem>>, vector<1x32xf32>
    %c0_79 = arith.constant 0 : index
    %c0_80 = arith.constant 0 : index
    %40 = vector.load %arg44[%c0_79, %c0_80] : memref<32x32xf32, #tpu.memory_space<vmem>>, vector<32x32xf32>
    %c0_81 = arith.constant 0 : index
    %c0_82 = arith.constant 0 : index
    %41 = vector.load %arg45[%c0_81, %c0_82] : memref<64x16xf32, #tpu.memory_space<vmem>>, vector<64x16xf32>
    %c0_83 = arith.constant 0 : index
    %c0_84 = arith.constant 0 : index
    %42 = vector.load %arg46[%c0_83, %c0_84] : memref<16x64xf32, #tpu.memory_space<vmem>>, vector<16x64xf32>
    %c0_85 = arith.constant 0 : index
    %c0_86 = arith.constant 0 : index
    %43 = vector.load %arg47[%c0_85, %c0_86] : memref<64x64xf32, #tpu.memory_space<vmem>>, vector<64x64xf32>
    %cst = arith.constant 0.000000e+00 : f32
    %44 = vector.broadcast %cst : f32 to vector<2x10x24x32xf32>
    %c0_87 = arith.constant 0 : index
    %c0_88 = arith.constant 0 : index
    %c0_89 = arith.constant 0 : index
    %c0_90 = arith.constant 0 : index
    %45 = vector.load %arg49[%c0_87, %c0_88, %c0_89, %c0_90] : memref<2x10x24x32xf32, #tpu.memory_space<vmem>>, vector<2x10x24x32xf32>
    tpu.vector_store %arg49[%c0_87, %c0_88, %c0_89, %c0_90], %44 {strides = array<i32>} : memref<2x10x24x32xf32, #tpu.memory_space<vmem>>, vector<2x10x24x32xf32>,
    %c0_91 = arith.constant 0 : index
    %c0_92 = arith.constant 0 : index
    %c0_93 = arith.constant 0 : index
    %46 = vector.load %arg1[%c0_91, %c0_92, %c0_93] : memref<2x64x32xf32, #tpu.memory_space<vmem>>, vector<2x64x32xf32>
    %c0_94 = arith.constant 0 : index
    %c0_95 = arith.constant 0 : index
    %47 = vector.load %arg2[%c0_94, %c0_95] : memref<2x16xf32, #tpu.memory_space<vmem>>, vector<2x16xf32>
    %cst_96 = arith.constant dense<0.000000e+00> : vector<2x32xf32>
    %48 = tpu.matmul %47, %0, %cst_96 {dimension_numbers = #tpu.dot_dimension_numbers<[1], [0], [0], [1], [0, 0, 1, 1], [], []>} : vector<2x16xf32>, vector<16x32xf32>, vector<2x32xf32> -> vector<2x32xf32>
    %49 = vector.broadcast %1 : vector<1x32xf32> to vector<2x32xf32>
    %50 = arith.addf %48, %49 : vector<2x32xf32>
    %cst_97 = arith.constant dense<0.000000e+00> : vector<2x64xf32>
    %51 = tpu.matmul %50, %2, %cst_97 {dimension_numbers = #tpu.dot_dimension_numbers<[1], [0], [0], [1], [0, 0, 1, 1], [], []>} : vector<2x32xf32>, vector<32x64xf32>, vector<2x64xf32> -> vector<2x64xf32>
    %52 = vector.broadcast %3 : vector<1x64xf32> to vector<2x64xf32>
    %53 = arith.addf %51, %52 : vector<2x64xf32>
    %54 = vector.extract_strided_slice %53 {offsets = [0, 0], sizes = [2, 32], strides = [1, 1]} : vector<2x64xf32> to vector<2x32xf32>
    %55 = vector.shape_cast %54 : vector<2x32xf32> to vector<2x1x32xf32>
    %56 = vector.broadcast %55 : vector<2x1x32xf32> to vector<2x64x32xf32>
    %57 = arith.mulf %46, %56 : vector<2x64x32xf32>
    %58 = vector.extract_strided_slice %53 {offsets = [0, 32], sizes = [2, 32], strides = [1, 1]} : vector<2x64xf32> to vector<2x32xf32>
    %59 = vector.shape_cast %58 : vector<2x32xf32> to vector<2x1x32xf32>
    %60 = vector.broadcast %59 : vector<2x1x32xf32> to vector<2x64x32xf32>
    %61 = arith.addf %57, %60 : vector<2x64x32xf32>
    %cst_98 = arith.constant dense<0.000000e+00> : vector<2x32xf32>
    %62 = vector.multi_reduction <add>, %61, %cst_98 [1] : vector<2x64x32xf32> to vector<2x32xf32>
    %63 = arith.mulf %61, %61 : vector<2x64x32xf32>
    %cst_99 = arith.constant dense<0.000000e+00> : vector<2x32xf32>
    %64 = vector.multi_reduction <add>, %63, %cst_99 [1] : vector<2x64x32xf32> to vector<2x32xf32>
    %cst_100 = arith.constant dense<0.000000e+00> : vector<2x32xf32>
    %65 = tpu.matmul %62, %40, %cst_100 {dimension_numbers = #tpu.dot_dimension_numbers<[1], [0], [0], [1], [0, 0, 1, 1], [], []>} : vector<2x32xf32>, vector<32x32xf32>, vector<2x32xf32> -> vector<2x32xf32>
    %cst_101 = arith.constant dense<0.000000e+00> : vector<2x32xf32>
    %66 = tpu.matmul %64, %40, %cst_101 {dimension_numbers = #tpu.dot_dimension_numbers<[1], [0], [0], [1], [0, 0, 1, 1], [], []>} : vector<2x32xf32>, vector<32x32xf32>, vector<2x32xf32> -> vector<2x32xf32>
    %cst_102 = arith.constant 2.560000e+02 : f32
    %67 = vector.broadcast %cst_102 : f32 to vector<2x32xf32>
    %68 = arith.divf %65, %67 : vector<2x32xf32>
    %cst_103 = arith.constant 2.560000e+02 : f32
    %69 = vector.broadcast %cst_103 : f32 to vector<2x32xf32>
    %70 = arith.divf %66, %69 : vector<2x32xf32>
    %71 = arith.mulf %68, %68 : vector<2x32xf32>
    %72 = arith.subf %70, %71 : vector<2x32xf32>
    %cst_104 = arith.constant 9.99999974E-6 : f32
    %73 = vector.broadcast %cst_104 : f32 to vector<2x32xf32>
    %74 = arith.addf %72, %73 : vector<2x32xf32>
    %75 = math.rsqrt %74 : vector<2x32xf32>
    %76 = vector.shape_cast %68 : vector<2x32xf32> to vector<2x1x32xf32>
    %77 = vector.broadcast %76 : vector<2x1x32xf32> to vector<2x64x32xf32>
    %78 = arith.subf %61, %77 : vector<2x64x32xf32>
    %79 = vector.shape_cast %75 : vector<2x32xf32> to vector<2x1x32xf32>
    %80 = vector.broadcast %79 : vector<2x1x32xf32> to vector<2x64x32xf32>
    %81 = arith.mulf %78, %80 : vector<2x64x32xf32>
    %82 = vector.shape_cast %4 : vector<1x32xf32> to vector<1x1x32xf32>
    %83 = vector.broadcast %82 : vector<1x1x32xf32> to vector<2x64x32xf32>
    %84 = arith.mulf %81, %83 : vector<2x64x32xf32>
    %85 = vector.shape_cast %5 : vector<1x32xf32> to vector<1x1x32xf32>
    %86 = vector.broadcast %85 : vector<1x1x32xf32> to vector<2x64x32xf32>
    %87 = arith.addf %84, %86 : vector<2x64x32xf32>
    %cst_105 = arith.constant 0.000000e+00 : f32
    %88 = vector.broadcast %cst_105 : f32 to vector<2x64x32xf32>
    %89 = arith.subf %88, %87 : vector<2x64x32xf32>
    %90 = math.exp %89 : vector<2x64x32xf32>
    %cst_106 = arith.constant 1.000000e+00 : f32
    %91 = vector.broadcast %cst_106 : f32 to vector<2x64x32xf32>
    %92 = arith.addf %91, %90 : vector<2x64x32xf32>
    %cst_107 = arith.constant 1.000000e+00 : f32
    %93 = vector.broadcast %cst_107 : f32 to vector<2x64x32xf32>
    %94 = arith.divf %93, %92 : vector<2x64x32xf32>
    %95 = arith.mulf %87, %94 : vector<2x64x32xf32>
    %96 = vector.shape_cast %95 : vector<2x64x32xf32> to vector<2x8x8x32xf32>
    %c0_108 = arith.constant 0 : index
    %c1 = arith.constant 1 : index
    %c8 = arith.constant 8 : index
    %c0_109 = arith.constant 0 : index
    %97 = vector.load %arg49[%c0_108, %c1, %c8, %c0_109] : memref<2x10x24x32xf32, #tpu.memory_space<vmem>>, vector<2x8x8x32xf32>
    tpu.vector_store %arg49[%c0_108, %c1, %c8, %c0_109], %96 {strides = array<i32>} : memref<2x10x24x32xf32, #tpu.memory_space<vmem>>, vector<2x8x8x32xf32>,
    %c0_110 = arith.constant 0 : index
    %c0_111 = arith.constant 0 : index
    %c7 = arith.constant 7 : index
    %c0_112 = arith.constant 0 : index
    %98 = vector.load %arg49[%c0_110, %c0_111, %c7, %c0_112] : memref<2x10x24x32xf32, #tpu.memory_space<vmem>>, vector<2x8x8x32xf32>
    %99 = vector.shape_cast %98 : vector<2x8x8x32xf32> to vector<128x32xf32>
    %c0_113 = arith.constant 0 : index
    %c0_114 = arith.constant 0 : index
    %c8_115 = arith.constant 8 : index
    %c0_116 = arith.constant 0 : index
    %100 = vector.load %arg49[%c0_113, %c0_114, %c8_115, %c0_116] : memref<2x10x24x32xf32, #tpu.memory_space<vmem>>, vector<2x8x8x32xf32>
    %101 = vector.shape_cast %100 : vector<2x8x8x32xf32> to vector<128x32xf32>
    %c0_117 = arith.constant 0 : index
    %c0_118 = arith.constant 0 : index
    %c9 = arith.constant 9 : index
    %c0_119 = arith.constant 0 : index
    %102 = vector.load %arg49[%c0_117, %c0_118, %c9, %c0_119] : memref<2x10x24x32xf32, #tpu.memory_space<vmem>>, vector<2x8x8x32xf32>
    %103 = vector.shape_cast %102 : vector<2x8x8x32xf32> to vector<128x32xf32>
    %c0_120 = arith.constant 0 : index
    %c1_121 = arith.constant 1 : index
    %c7_122 = arith.constant 7 : index
    %c0_123 = arith.constant 0 : index
    %104 = vector.load %arg49[%c0_120, %c1_121, %c7_122, %c0_123] : memref<2x10x24x32xf32, #tpu.memory_space<vmem>>, vector<2x8x8x32xf32>
    %105 = vector.shape_cast %104 : vector<2x8x8x32xf32> to vector<128x32xf32>
    %c0_124 = arith.constant 0 : index
    %c1_125 = arith.constant 1 : index
    %c8_126 = arith.constant 8 : index
    %c0_127 = arith.constant 0 : index
    %106 = vector.load %arg49[%c0_124, %c1_125, %c8_126, %c0_127] : memref<2x10x24x32xf32, #tpu.memory_space<vmem>>, vector<2x8x8x32xf32>
    %107 = vector.shape_cast %106 : vector<2x8x8x32xf32> to vector<128x32xf32>
    %c0_128 = arith.constant 0 : index
    %c1_129 = arith.constant 1 : index
    %c9_130 = arith.constant 9 : index
    %c0_131 = arith.constant 0 : index
    %108 = vector.load %arg49[%c0_128, %c1_129, %c9_130, %c0_131] : memref<2x10x24x32xf32, #tpu.memory_space<vmem>>, vector<2x8x8x32xf32>
    %109 = vector.shape_cast %108 : vector<2x8x8x32xf32> to vector<128x32xf32>
    %c0_132 = arith.constant 0 : index
    %c2 = arith.constant 2 : index
    %c7_133 = arith.constant 7 : index
    %c0_134 = arith.constant 0 : index
    %110 = vector.load %arg49[%c0_132, %c2, %c7_133, %c0_134] : memref<2x10x24x32xf32, #tpu.memory_space<vmem>>, vector<2x8x8x32xf32>
    %111 = vector.shape_cast %110 : vector<2x8x8x32xf32> to vector<128x32xf32>
    %c0_135 = arith.constant 0 : index
    %c2_136 = arith.constant 2 : index
    %c8_137 = arith.constant 8 : index
    %c0_138 = arith.constant 0 : index
    %112 = vector.load %arg49[%c0_135, %c2_136, %c8_137, %c0_138] : memref<2x10x24x32xf32, #tpu.memory_space<vmem>>, vector<2x8x8x32xf32>
    %113 = vector.shape_cast %112 : vector<2x8x8x32xf32> to vector<128x32xf32>
    %c0_139 = arith.constant 0 : index
    %c2_140 = arith.constant 2 : index
    %c9_141 = arith.constant 9 : index
    %c0_142 = arith.constant 0 : index
    %114 = vector.load %arg49[%c0_139, %c2_140, %c9_141, %c0_142] : memref<2x10x24x32xf32, #tpu.memory_space<vmem>>, vector<2x8x8x32xf32>
    %115 = vector.shape_cast %114 : vector<2x8x8x32xf32> to vector<128x32xf32>
    %116 = tpu.concatenate %99, %101, %103, %105, %107, %109, %111, %113, %115 in 1 : vector<128x32xf32>, vector<128x32xf32>, vector<128x32xf32>, vector<128x32xf32>, vector<128x32xf32>, vector<128x32xf32>, vector<128x32xf32>, vector<128x32xf32>, vector<128x32xf32> -> vector<128x288xf32>
    %cst_143 = arith.constant dense<0.000000e+00> : vector<128x32xf32>
    %117 = tpu.matmul %116, %6, %cst_143 {dimension_numbers = #tpu.dot_dimension_numbers<[1], [0], [0], [1], [0, 0, 1, 1], [], []>} : vector<128x288xf32>, vector<288x32xf32>, vector<128x32xf32> -> vector<128x32xf32>
    %118 = vector.broadcast %7 : vector<1x32xf32> to vector<128x32xf32>
    %119 = arith.addf %117, %118 : vector<128x32xf32>
    %120 = vector.shape_cast %119 : vector<128x32xf32> to vector<2x64x32xf32>
    %cst_144 = arith.constant dense<0.000000e+00> : vector<2x32xf32>
    %121 = vector.multi_reduction <add>, %120, %cst_144 [1] : vector<2x64x32xf32> to vector<2x32xf32>
    %122 = arith.mulf %120, %120 : vector<2x64x32xf32>
    %cst_145 = arith.constant dense<0.000000e+00> : vector<2x32xf32>
    %123 = vector.multi_reduction <add>, %122, %cst_145 [1] : vector<2x64x32xf32> to vector<2x32xf32>
    %cst_146 = arith.constant dense<0.000000e+00> : vector<2x32xf32>
    %124 = tpu.matmul %121, %40, %cst_146 {dimension_numbers = #tpu.dot_dimension_numbers<[1], [0], [0], [1], [0, 0, 1, 1], [], []>} : vector<2x32xf32>, vector<32x32xf32>, vector<2x32xf32> -> vector<2x32xf32>
    %cst_147 = arith.constant dense<0.000000e+00> : vector<2x32xf32>
    %125 = tpu.matmul %123, %40, %cst_147 {dimension_numbers = #tpu.dot_dimension_numbers<[1], [0], [0], [1], [0, 0, 1, 1], [], []>} : vector<2x32xf32>, vector<32x32xf32>, vector<2x32xf32> -> vector<2x32xf32>
    %cst_148 = arith.constant 2.560000e+02 : f32
    %126 = vector.broadcast %cst_148 : f32 to vector<2x32xf32>
    %127 = arith.divf %124, %126 : vector<2x32xf32>
    %cst_149 = arith.constant 2.560000e+02 : f32
    %128 = vector.broadcast %cst_149 : f32 to vector<2x32xf32>
    %129 = arith.divf %125, %128 : vector<2x32xf32>
    %130 = arith.mulf %127, %127 : vector<2x32xf32>
    %131 = arith.subf %129, %130 : vector<2x32xf32>
    %cst_150 = arith.constant 9.99999974E-6 : f32
    %132 = vector.broadcast %cst_150 : f32 to vector<2x32xf32>
    %133 = arith.addf %131, %132 : vector<2x32xf32>
    %134 = math.rsqrt %133 : vector<2x32xf32>
    %135 = vector.shape_cast %127 : vector<2x32xf32> to vector<2x1x32xf32>
    %136 = vector.broadcast %135 : vector<2x1x32xf32> to vector<2x64x32xf32>
    %137 = arith.subf %120, %136 : vector<2x64x32xf32>
    %138 = vector.shape_cast %134 : vector<2x32xf32> to vector<2x1x32xf32>
    %139 = vector.broadcast %138 : vector<2x1x32xf32> to vector<2x64x32xf32>
    %140 = arith.mulf %137, %139 : vector<2x64x32xf32>
    %141 = vector.shape_cast %8 : vector<1x32xf32> to vector<1x1x32xf32>
    %142 = vector.broadcast %141 : vector<1x1x32xf32> to vector<2x64x32xf32>
    %143 = arith.mulf %140, %142 : vector<2x64x32xf32>
    %144 = vector.shape_cast %9 : vector<1x32xf32> to vector<1x1x32xf32>
    %145 = vector.broadcast %144 : vector<1x1x32xf32> to vector<2x64x32xf32>
    %146 = arith.addf %143, %145 : vector<2x64x32xf32>
    %cst_151 = arith.constant 0.000000e+00 : f32
    %147 = vector.broadcast %cst_151 : f32 to vector<2x64x32xf32>
    %148 = arith.subf %147, %146 : vector<2x64x32xf32>
    %149 = math.exp %148 : vector<2x64x32xf32>
    %cst_152 = arith.constant 1.000000e+00 : f32
    %150 = vector.broadcast %cst_152 : f32 to vector<2x64x32xf32>
    %151 = arith.addf %150, %149 : vector<2x64x32xf32>
    %cst_153 = arith.constant 1.000000e+00 : f32
    %152 = vector.broadcast %cst_153 : f32 to vector<2x64x32xf32>
    %153 = arith.divf %152, %151 : vector<2x64x32xf32>
    %154 = arith.mulf %146, %153 : vector<2x64x32xf32>
    %155 = vector.shape_cast %154 : vector<2x64x32xf32> to vector<2x8x8x32xf32>
    %c0_154 = arith.constant 0 : index
    %c1_155 = arith.constant 1 : index
    %c8_156 = arith.constant 8 : index
    %c0_157 = arith.constant 0 : index
    %156 = vector.load %arg49[%c0_154, %c1_155, %c8_156, %c0_157] : memref<2x10x24x32xf32, #tpu.memory_space<vmem>>, vector<2x8x8x32xf32>
    tpu.vector_store %arg49[%c0_154, %c1_155, %c8_156, %c0_157], %155 {strides = array<i32>} : memref<2x10x24x32xf32, #tpu.memory_space<vmem>>, vector<2x8x8x32xf32>,
    %c0_158 = arith.constant 0 : index
    %c0_159 = arith.constant 0 : index
    %c7_160 = arith.constant 7 : index
    %c0_161 = arith.constant 0 : index
    %157 = vector.load %arg49[%c0_158, %c0_159, %c7_160, %c0_161] : memref<2x10x24x32xf32, #tpu.memory_space<vmem>>, vector<2x8x8x32xf32>
    %158 = vector.shape_cast %157 : vector<2x8x8x32xf32> to vector<128x32xf32>
    %c0_162 = arith.constant 0 : index
    %c0_163 = arith.constant 0 : index
    %c8_164 = arith.constant 8 : index
    %c0_165 = arith.constant 0 : index
    %159 = vector.load %arg49[%c0_162, %c0_163, %c8_164, %c0_165] : memref<2x10x24x32xf32, #tpu.memory_space<vmem>>, vector<2x8x8x32xf32>
    %160 = vector.shape_cast %159 : vector<2x8x8x32xf32> to vector<128x32xf32>
    %c0_166 = arith.constant 0 : index
    %c0_167 = arith.constant 0 : index
    %c9_168 = arith.constant 9 : index
    %c0_169 = arith.constant 0 : index
    %161 = vector.load %arg49[%c0_166, %c0_167, %c9_168, %c0_169] : memref<2x10x24x32xf32, #tpu.memory_space<vmem>>, vector<2x8x8x32xf32>
    %162 = vector.shape_cast %161 : vector<2x8x8x32xf32> to vector<128x32xf32>
    %c0_170 = arith.constant 0 : index
    %c1_171 = arith.constant 1 : index
    %c7_172 = arith.constant 7 : index
    %c0_173 = arith.constant 0 : index
    %163 = vector.load %arg49[%c0_170, %c1_171, %c7_172, %c0_173] : memref<2x10x24x32xf32, #tpu.memory_space<vmem>>, vector<2x8x8x32xf32>
    %164 = vector.shape_cast %163 : vector<2x8x8x32xf32> to vector<128x32xf32>
    %c0_174 = arith.constant 0 : index
    %c1_175 = arith.constant 1 : index
    %c8_176 = arith.constant 8 : index
    %c0_177 = arith.constant 0 : index
    %165 = vector.load %arg49[%c0_174, %c1_175, %c8_176, %c0_177] : memref<2x10x24x32xf32, #tpu.memory_space<vmem>>, vector<2x8x8x32xf32>
    %166 = vector.shape_cast %165 : vector<2x8x8x32xf32> to vector<128x32xf32>
    %c0_178 = arith.constant 0 : index
    %c1_179 = arith.constant 1 : index
    %c9_180 = arith.constant 9 : index
    %c0_181 = arith.constant 0 : index
    %167 = vector.load %arg49[%c0_178, %c1_179, %c9_180, %c0_181] : memref<2x10x24x32xf32, #tpu.memory_space<vmem>>, vector<2x8x8x32xf32>
    %168 = vector.shape_cast %167 : vector<2x8x8x32xf32> to vector<128x32xf32>
    %c0_182 = arith.constant 0 : index
    %c2_183 = arith.constant 2 : index
    %c7_184 = arith.constant 7 : index
    %c0_185 = arith.constant 0 : index
    %169 = vector.load %arg49[%c0_182, %c2_183, %c7_184, %c0_185] : memref<2x10x24x32xf32, #tpu.memory_space<vmem>>, vector<2x8x8x32xf32>
    %170 = vector.shape_cast %169 : vector<2x8x8x32xf32> to vector<128x32xf32>
    %c0_186 = arith.constant 0 : index
    %c2_187 = arith.constant 2 : index
    %c8_188 = arith.constant 8 : index
    %c0_189 = arith.constant 0 : index
    %171 = vector.load %arg49[%c0_186, %c2_187, %c8_188, %c0_189] : memref<2x10x24x32xf32, #tpu.memory_space<vmem>>, vector<2x8x8x32xf32>
    %172 = vector.shape_cast %171 : vector<2x8x8x32xf32> to vector<128x32xf32>
    %c0_190 = arith.constant 0 : index
    %c2_191 = arith.constant 2 : index
    %c9_192 = arith.constant 9 : index
    %c0_193 = arith.constant 0 : index
    %173 = vector.load %arg49[%c0_190, %c2_191, %c9_192, %c0_193] : memref<2x10x24x32xf32, #tpu.memory_space<vmem>>, vector<2x8x8x32xf32>
    %174 = vector.shape_cast %173 : vector<2x8x8x32xf32> to vector<128x32xf32>
    %175 = tpu.concatenate %158, %160, %162, %164, %166, %168, %170, %172, %174 in 1 : vector<128x32xf32>, vector<128x32xf32>, vector<128x32xf32>, vector<128x32xf32>, vector<128x32xf32>, vector<128x32xf32>, vector<128x32xf32>, vector<128x32xf32>, vector<128x32xf32> -> vector<128x288xf32>
    %cst_194 = arith.constant dense<0.000000e+00> : vector<128x32xf32>
    %176 = tpu.matmul %175, %10, %cst_194 {dimension_numbers = #tpu.dot_dimension_numbers<[1], [0], [0], [1], [0, 0, 1, 1], [], []>} : vector<128x288xf32>, vector<288x32xf32>, vector<128x32xf32> -> vector<128x32xf32>
    %177 = vector.broadcast %11 : vector<1x32xf32> to vector<128x32xf32>
    %178 = arith.addf %176, %177 : vector<128x32xf32>
    %179 = vector.shape_cast %178 : vector<128x32xf32> to vector<2x64x32xf32>
    %180 = arith.addf %179, %61 : vector<2x64x32xf32>
    %cst_195 = arith.constant dense<0.000000e+00> : vector<2x32xf32>
    %181 = vector.multi_reduction <add>, %180, %cst_195 [1] : vector<2x64x32xf32> to vector<2x32xf32>
    %182 = arith.mulf %180, %180 : vector<2x64x32xf32>
    %cst_196 = arith.constant dense<0.000000e+00> : vector<2x32xf32>
    %183 = vector.multi_reduction <add>, %182, %cst_196 [1] : vector<2x64x32xf32> to vector<2x32xf32>
    %cst_197 = arith.constant dense<0.000000e+00> : vector<2x32xf32>
    %184 = tpu.matmul %181, %40, %cst_197 {dimension_numbers = #tpu.dot_dimension_numbers<[1], [0], [0], [1], [0, 0, 1, 1], [], []>} : vector<2x32xf32>, vector<32x32xf32>, vector<2x32xf32> -> vector<2x32xf32>
    %cst_198 = arith.constant dense<0.000000e+00> : vector<2x32xf32>
    %185 = tpu.matmul %183, %40, %cst_198 {dimension_numbers = #tpu.dot_dimension_numbers<[1], [0], [0], [1], [0, 0, 1, 1], [], []>} : vector<2x32xf32>, vector<32x32xf32>, vector<2x32xf32> -> vector<2x32xf32>
    %cst_199 = arith.constant 2.560000e+02 : f32
    %186 = vector.broadcast %cst_199 : f32 to vector<2x32xf32>
    %187 = arith.divf %184, %186 : vector<2x32xf32>
    %cst_200 = arith.constant 2.560000e+02 : f32
    %188 = vector.broadcast %cst_200 : f32 to vector<2x32xf32>
    %189 = arith.divf %185, %188 : vector<2x32xf32>
    %190 = arith.mulf %187, %187 : vector<2x32xf32>
    %191 = arith.subf %189, %190 : vector<2x32xf32>
    %cst_201 = arith.constant 9.99999974E-6 : f32
    %192 = vector.broadcast %cst_201 : f32 to vector<2x32xf32>
    %193 = arith.addf %191, %192 : vector<2x32xf32>
    %194 = math.rsqrt %193 : vector<2x32xf32>
    %195 = vector.shape_cast %187 : vector<2x32xf32> to vector<2x1x32xf32>
    %196 = vector.broadcast %195 : vector<2x1x32xf32> to vector<2x64x32xf32>
    %197 = arith.subf %180, %196 : vector<2x64x32xf32>
    %198 = vector.shape_cast %194 : vector<2x32xf32> to vector<2x1x32xf32>
    %199 = vector.broadcast %198 : vector<2x1x32xf32> to vector<2x64x32xf32>
    %200 = arith.mulf %197, %199 : vector<2x64x32xf32>
    %201 = vector.shape_cast %12 : vector<1x32xf32> to vector<1x1x32xf32>
    %202 = vector.broadcast %201 : vector<1x1x32xf32> to vector<2x64x32xf32>
    %203 = arith.mulf %200, %202 : vector<2x64x32xf32>
    %204 = vector.shape_cast %13 : vector<1x32xf32> to vector<1x1x32xf32>
    %205 = vector.broadcast %204 : vector<1x1x32xf32> to vector<2x64x32xf32>
    %206 = arith.addf %203, %205 : vector<2x64x32xf32>
    %207 = vector.shape_cast %206 : vector<2x64x32xf32> to vector<128x32xf32>
    %cst_202 = arith.constant dense<0.000000e+00> : vector<128x32xf32>
    %208 = tpu.matmul %207, %14, %cst_202 {dimension_numbers = #tpu.dot_dimension_numbers<[1], [0], [0], [1], [0, 0, 1, 1], [], []>} : vector<128x32xf32>, vector<32x32xf32>, vector<128x32xf32> -> vector<128x32xf32>
    %209 = vector.broadcast %15 : vector<1x32xf32> to vector<128x32xf32>
    %210 = arith.addf %208, %209 : vector<128x32xf32>
    %211 = vector.shape_cast %206 : vector<2x64x32xf32> to vector<128x32xf32>
    %cst_203 = arith.constant dense<0.000000e+00> : vector<128x64xf32>
    %212 = tpu.matmul %211, %16, %cst_203 {dimension_numbers = #tpu.dot_dimension_numbers<[1], [0], [0], [1], [0, 0, 1, 1], [], []>} : vector<128x32xf32>, vector<32x64xf32>, vector<128x64xf32> -> vector<128x64xf32>
    %213 = vector.broadcast %17 : vector<1x64xf32> to vector<128x64xf32>
    %214 = arith.addf %212, %213 : vector<128x64xf32>
    %215 = vector.extract_strided_slice %214 {offsets = [0, 0], sizes = [64, 32], strides = [1, 1]} : vector<128x64xf32> to vector<64x32xf32>
    %216 = vector.extract_strided_slice %214 {offsets = [64, 0], sizes = [64, 32], strides = [1, 1]} : vector<128x64xf32> to vector<64x32xf32>
    %217 = tpu.concatenate %215, %216 in 1 : vector<64x32xf32>, vector<64x32xf32> -> vector<64x64xf32>
    %218 = vector.extract_strided_slice %214 {offsets = [0, 32], sizes = [64, 32], strides = [1, 1]} : vector<128x64xf32> to vector<64x32xf32>
    %219 = vector.extract_strided_slice %214 {offsets = [64, 32], sizes = [64, 32], strides = [1, 1]} : vector<128x64xf32> to vector<64x32xf32>
    %220 = tpu.concatenate %218, %219 in 1 : vector<64x32xf32>, vector<64x32xf32> -> vector<64x64xf32>
    %221 = tpu.concatenate %210, %210 in 1 : vector<128x32xf32>, vector<128x32xf32> -> vector<128x64xf32>
    %222 = tpu.concatenate %217, %217 in 0 : vector<64x64xf32>, vector<64x64xf32> -> vector<128x64xf32>
    %223 = tpu.concatenate %220, %220 in 0 : vector<64x64xf32>, vector<64x64xf32> -> vector<128x64xf32>
    %224 = arith.mulf %221, %222 : vector<128x64xf32>
    %cst_204 = arith.constant dense<0.000000e+00> : vector<128x16xf32>
    %225 = tpu.matmul %224, %41, %cst_204 {dimension_numbers = #tpu.dot_dimension_numbers<[1], [0], [0], [1], [0, 0, 1, 1], [], []>} : vector<128x64xf32>, vector<64x16xf32>, vector<128x16xf32> -> vector<128x16xf32>
    %cst_205 = arith.constant 5.000000e-01 : f32
    %226 = vector.broadcast %cst_205 : f32 to vector<128x16xf32>
    %227 = arith.mulf %225, %226 : vector<128x16xf32>
    %228 = vector.extract_strided_slice %227 {offsets = [0, 0], sizes = [128, 8], strides = [1, 1]} : vector<128x16xf32> to vector<128x8xf32>
    %229 = vector.extract_strided_slice %227 {offsets = [0, 8], sizes = [128, 8], strides = [1, 1]} : vector<128x16xf32> to vector<128x8xf32>
    %230 = arith.maximumf %228, %229 : vector<128x8xf32>
    %231 = vector.extract_strided_slice %227 {offsets = [0, 0], sizes = [128, 8], strides = [1, 1]} : vector<128x16xf32> to vector<128x8xf32>
    %232 = arith.subf %231, %230 : vector<128x8xf32>
    %233 = math.exp %232 : vector<128x8xf32>
    %234 = vector.extract_strided_slice %227 {offsets = [0, 8], sizes = [128, 8], strides = [1, 1]} : vector<128x16xf32> to vector<128x8xf32>
    %235 = arith.subf %234, %230 : vector<128x8xf32>
    %236 = math.exp %235 : vector<128x8xf32>
    %237 = arith.addf %233, %236 : vector<128x8xf32>
    %cst_206 = arith.constant 1.000000e+00 : f32
    %238 = vector.broadcast %cst_206 : f32 to vector<128x8xf32>
    %239 = arith.divf %238, %237 : vector<128x8xf32>
    %240 = arith.mulf %233, %239 : vector<128x8xf32>
    %241 = arith.mulf %236, %239 : vector<128x8xf32>
    %242 = tpu.concatenate %240, %241 in 1 : vector<128x8xf32>, vector<128x8xf32> -> vector<128x16xf32>
    %cst_207 = arith.constant dense<0.000000e+00> : vector<128x64xf32>
    %243 = tpu.matmul %242, %42, %cst_207 {dimension_numbers = #tpu.dot_dimension_numbers<[1], [0], [0], [1], [0, 0, 1, 1], [], []>} : vector<128x16xf32>, vector<16x64xf32>, vector<128x64xf32> -> vector<128x64xf32>
    %244 = arith.mulf %243, %223 : vector<128x64xf32>
    %245 = vector.extract_strided_slice %244 {offsets = [0, 0], sizes = [128, 32], strides = [1, 1]} : vector<128x64xf32> to vector<128x32xf32>
    %246 = vector.extract_strided_slice %244 {offsets = [0, 32], sizes = [128, 32], strides = [1, 1]} : vector<128x64xf32> to vector<128x32xf32>
    %247 = arith.addf %245, %246 : vector<128x32xf32>
    %cst_208 = arith.constant dense<0.000000e+00> : vector<128x32xf32>
    %248 = tpu.matmul %247, %18, %cst_208 {dimension_numbers = #tpu.dot_dimension_numbers<[1], [0], [0], [1], [0, 0, 1, 1], [], []>} : vector<128x32xf32>, vector<32x32xf32>, vector<128x32xf32> -> vector<128x32xf32>
    %249 = vector.broadcast %19 : vector<1x32xf32> to vector<128x32xf32>
    %250 = arith.addf %248, %249 : vector<128x32xf32>
    %251 = vector.extract_strided_slice %250 {offsets = [0, 0], sizes = [32, 32], strides = [1, 1]} : vector<128x32xf32> to vector<32x32xf32>
    %252 = tpu.transpose %251, [1, 0] : vector<32x32xf32> -> vector<32x32xf32>
    %253 = vector.extract_strided_slice %250 {offsets = [64, 0], sizes = [32, 32], strides = [1, 1]} : vector<128x32xf32> to vector<32x32xf32>
    %254 = tpu.transpose %253, [1, 0] : vector<32x32xf32> -> vector<32x32xf32>
    %255 = tpu.concatenate %252, %254 in 0 : vector<32x32xf32>, vector<32x32xf32> -> vector<64x32xf32>
    %cst_209 = arith.constant dense<0.000000e+00> : vector<64x32xf32>
    %256 = tpu.matmul %43, %255, %cst_209 {dimension_numbers = #tpu.dot_dimension_numbers<[1], [0], [0], [1], [0, 0, 1, 1], [], []>} : vector<64x64xf32>, vector<64x32xf32>, vector<64x32xf32> -> vector<64x32xf32>
    %257 = vector.shape_cast %256 : vector<64x32xf32> to vector<1x64x32xf32>
    %258 = vector.extract_strided_slice %250 {offsets = [32, 0], sizes = [32, 32], strides = [1, 1]} : vector<128x32xf32> to vector<32x32xf32>
    %259 = tpu.transpose %258, [1, 0] : vector<32x32xf32> -> vector<32x32xf32>
    %260 = vector.extract_strided_slice %250 {offsets = [96, 0], sizes = [32, 32], strides = [1, 1]} : vector<128x32xf32> to vector<32x32xf32>
    %261 = tpu.transpose %260, [1, 0] : vector<32x32xf32> -> vector<32x32xf32>
    %262 = tpu.concatenate %259, %261 in 0 : vector<32x32xf32>, vector<32x32xf32> -> vector<64x32xf32>
    %cst_210 = arith.constant dense<0.000000e+00> : vector<64x32xf32>
    %263 = tpu.matmul %43, %262, %cst_210 {dimension_numbers = #tpu.dot_dimension_numbers<[1], [0], [0], [1], [0, 0, 1, 1], [], []>} : vector<64x64xf32>, vector<64x32xf32>, vector<64x32xf32> -> vector<64x32xf32>
    %264 = vector.shape_cast %263 : vector<64x32xf32> to vector<1x64x32xf32>
    %265 = tpu.concatenate %257, %264 in 0 : vector<1x64x32xf32>, vector<1x64x32xf32> -> vector<2x64x32xf32>
    %266 = arith.addf %265, %206 : vector<2x64x32xf32>
    %cst_211 = arith.constant dense<0.000000e+00> : vector<2x32xf32>
    %267 = vector.multi_reduction <add>, %266, %cst_211 [1] : vector<2x64x32xf32> to vector<2x32xf32>
    %268 = arith.mulf %266, %266 : vector<2x64x32xf32>
    %cst_212 = arith.constant dense<0.000000e+00> : vector<2x32xf32>
    %269 = vector.multi_reduction <add>, %268, %cst_212 [1] : vector<2x64x32xf32> to vector<2x32xf32>
    %cst_213 = arith.constant dense<0.000000e+00> : vector<2x32xf32>
    %270 = tpu.matmul %267, %40, %cst_213 {dimension_numbers = #tpu.dot_dimension_numbers<[1], [0], [0], [1], [0, 0, 1, 1], [], []>} : vector<2x32xf32>, vector<32x32xf32>, vector<2x32xf32> -> vector<2x32xf32>
    %cst_214 = arith.constant dense<0.000000e+00> : vector<2x32xf32>
    %271 = tpu.matmul %269, %40, %cst_214 {dimension_numbers = #tpu.dot_dimension_numbers<[1], [0], [0], [1], [0, 0, 1, 1], [], []>} : vector<2x32xf32>, vector<32x32xf32>, vector<2x32xf32> -> vector<2x32xf32>
    %cst_215 = arith.constant 2.560000e+02 : f32
    %272 = vector.broadcast %cst_215 : f32 to vector<2x32xf32>
    %273 = arith.divf %270, %272 : vector<2x32xf32>
    %cst_216 = arith.constant 2.560000e+02 : f32
    %274 = vector.broadcast %cst_216 : f32 to vector<2x32xf32>
    %275 = arith.divf %271, %274 : vector<2x32xf32>
    %276 = arith.mulf %273, %273 : vector<2x32xf32>
    %277 = arith.subf %275, %276 : vector<2x32xf32>
    %cst_217 = arith.constant 9.99999974E-6 : f32
    %278 = vector.broadcast %cst_217 : f32 to vector<2x32xf32>
    %279 = arith.addf %277, %278 : vector<2x32xf32>
    %280 = math.rsqrt %279 : vector<2x32xf32>
    %281 = vector.shape_cast %273 : vector<2x32xf32> to vector<2x1x32xf32>
    %282 = vector.broadcast %281 : vector<2x1x32xf32> to vector<2x64x32xf32>
    %283 = arith.subf %266, %282 : vector<2x64x32xf32>
    %284 = vector.shape_cast %280 : vector<2x32xf32> to vector<2x1x32xf32>
    %285 = vector.broadcast %284 : vector<2x1x32xf32> to vector<2x64x32xf32>
    %286 = arith.mulf %283, %285 : vector<2x64x32xf32>
    %287 = vector.shape_cast %20 : vector<1x32xf32> to vector<1x1x32xf32>
    %288 = vector.broadcast %287 : vector<1x1x32xf32> to vector<2x64x32xf32>
    %289 = arith.mulf %286, %288 : vector<2x64x32xf32>
    %290 = vector.shape_cast %21 : vector<1x32xf32> to vector<1x1x32xf32>
    %291 = vector.broadcast %290 : vector<1x1x32xf32> to vector<2x64x32xf32>
    %292 = arith.addf %289, %291 : vector<2x64x32xf32>
    %293 = vector.shape_cast %292 : vector<2x64x32xf32> to vector<128x32xf32>
    %cst_218 = arith.constant dense<0.000000e+00> : vector<128x128xf32>
    %294 = tpu.matmul %293, %22, %cst_218 {dimension_numbers = #tpu.dot_dimension_numbers<[1], [0], [0], [1], [0, 0, 1, 1], [], []>} : vector<128x32xf32>, vector<32x128xf32>, vector<128x128xf32> -> vector<128x128xf32>
    %295 = vector.broadcast %23 : vector<1x128xf32> to vector<128x128xf32>
    %296 = arith.addf %294, %295 : vector<128x128xf32>
    %cst_219 = arith.constant 0.000000e+00 : f32
    %297 = vector.broadcast %cst_219 : f32 to vector<128x128xf32>
    %298 = arith.subf %297, %296 : vector<128x128xf32>
    %299 = math.exp %298 : vector<128x128xf32>
    %cst_220 = arith.constant 1.000000e+00 : f32
    %300 = vector.broadcast %cst_220 : f32 to vector<128x128xf32>
    %301 = arith.addf %300, %299 : vector<128x128xf32>
    %cst_221 = arith.constant 1.000000e+00 : f32
    %302 = vector.broadcast %cst_221 : f32 to vector<128x128xf32>
    %303 = arith.divf %302, %301 : vector<128x128xf32>
    %304 = arith.mulf %296, %303 : vector<128x128xf32>
    %cst_222 = arith.constant dense<0.000000e+00> : vector<128x32xf32>
    %305 = tpu.matmul %304, %24, %cst_222 {dimension_numbers = #tpu.dot_dimension_numbers<[1], [0], [0], [1], [0, 0, 1, 1], [], []>} : vector<128x128xf32>, vector<128x32xf32>, vector<128x32xf32> -> vector<128x32xf32>
    %306 = vector.broadcast %25 : vector<1x32xf32> to vector<128x32xf32>
    %307 = arith.addf %305, %306 : vector<128x32xf32>
    %308 = vector.shape_cast %307 : vector<128x32xf32> to vector<2x64x32xf32>
    %309 = arith.addf %292, %308 : vector<2x64x32xf32>
    %c0_223 = arith.constant 0 : index
    %c0_224 = arith.constant 0 : index
    %c0_225 = arith.constant 0 : index
    %310 = vector.load %arg3[%c0_223, %c0_224, %c0_225] : memref<2x64x32xf32, #tpu.memory_space<vmem>>, vector<2x64x32xf32>
    %cst_226 = arith.constant dense<0.000000e+00> : vector<2x32xf32>
    %311 = vector.multi_reduction <add>, %309, %cst_226 [1] : vector<2x64x32xf32> to vector<2x32xf32>
    %312 = arith.mulf %309, %309 : vector<2x64x32xf32>
    %cst_227 = arith.constant dense<0.000000e+00> : vector<2x32xf32>
    %313 = vector.multi_reduction <add>, %312, %cst_227 [1] : vector<2x64x32xf32> to vector<2x32xf32>
    %cst_228 = arith.constant dense<0.000000e+00> : vector<2x32xf32>
    %314 = tpu.matmul %311, %40, %cst_228 {dimension_numbers = #tpu.dot_dimension_numbers<[1], [0], [0], [1], [0, 0, 1, 1], [], []>} : vector<2x32xf32>, vector<32x32xf32>, vector<2x32xf32> -> vector<2x32xf32>
    %cst_229 = arith.constant dense<0.000000e+00> : vector<2x32xf32>
    %315 = tpu.matmul %313, %40, %cst_229 {dimension_numbers = #tpu.dot_dimension_numbers<[1], [0], [0], [1], [0, 0, 1, 1], [], []>} : vector<2x32xf32>, vector<32x32xf32>, vector<2x32xf32> -> vector<2x32xf32>
    %cst_230 = arith.constant 2.560000e+02 : f32
    %316 = vector.broadcast %cst_230 : f32 to vector<2x32xf32>
    %317 = arith.divf %314, %316 : vector<2x32xf32>
    %cst_231 = arith.constant 2.560000e+02 : f32
    %318 = vector.broadcast %cst_231 : f32 to vector<2x32xf32>
    %319 = arith.divf %315, %318 : vector<2x32xf32>
    %320 = arith.mulf %317, %317 : vector<2x32xf32>
    %321 = arith.subf %319, %320 : vector<2x32xf32>
    %cst_232 = arith.constant 9.99999974E-6 : f32
    %322 = vector.broadcast %cst_232 : f32 to vector<2x32xf32>
    %323 = arith.addf %321, %322 : vector<2x32xf32>
    %324 = math.rsqrt %323 : vector<2x32xf32>
    %325 = vector.shape_cast %317 : vector<2x32xf32> to vector<2x1x32xf32>
    %326 = vector.broadcast %325 : vector<2x1x32xf32> to vector<2x64x32xf32>
    %327 = arith.subf %309, %326 : vector<2x64x32xf32>
    %328 = vector.shape_cast %324 : vector<2x32xf32> to vector<2x1x32xf32>
    %329 = vector.broadcast %328 : vector<2x1x32xf32> to vector<2x64x32xf32>
    %330 = arith.mulf %327, %329 : vector<2x64x32xf32>
    %331 = vector.shape_cast %26 : vector<1x32xf32> to vector<1x1x32xf32>
    %332 = vector.broadcast %331 : vector<1x1x32xf32> to vector<2x64x32xf32>
    %333 = arith.mulf %330, %332 : vector<2x64x32xf32>
    %334 = vector.shape_cast %27 : vector<1x32xf32> to vector<1x1x32xf32>
    %335 = vector.broadcast %334 : vector<1x1x32xf32> to vector<2x64x32xf32>
    %336 = arith.addf %333, %335 : vector<2x64x32xf32>
    %337 = vector.shape_cast %336 : vector<2x64x32xf32> to vector<128x32xf32>
    %cst_233 = arith.constant dense<0.000000e+00> : vector<128x32xf32>
    %338 = tpu.matmul %337, %28, %cst_233 {dimension_numbers = #tpu.dot_dimension_numbers<[1], [0], [0], [1], [0, 0, 1, 1], [], []>} : vector<128x32xf32>, vector<32x32xf32>, vector<128x32xf32> -> vector<128x32xf32>
    %339 = vector.broadcast %29 : vector<1x32xf32> to vector<128x32xf32>
    %340 = arith.addf %338, %339 : vector<128x32xf32>
    %341 = vector.shape_cast %310 : vector<2x64x32xf32> to vector<128x32xf32>
    %cst_234 = arith.constant dense<0.000000e+00> : vector<128x64xf32>
    %342 = tpu.matmul %341, %30, %cst_234 {dimension_numbers = #tpu.dot_dimension_numbers<[1], [0], [0], [1], [0, 0, 1, 1], [], []>} : vector<128x32xf32>, vector<32x64xf32>, vector<128x64xf32> -> vector<128x64xf32>
    %343 = vector.broadcast %31 : vector<1x64xf32> to vector<128x64xf32>
    %344 = arith.addf %342, %343 : vector<128x64xf32>
    %345 = vector.extract_strided_slice %344 {offsets = [0, 0], sizes = [64, 32], strides = [1, 1]} : vector<128x64xf32> to vector<64x32xf32>
    %346 = vector.extract_strided_slice %344 {offsets = [64, 0], sizes = [64, 32], strides = [1, 1]} : vector<128x64xf32> to vector<64x32xf32>
    %347 = tpu.concatenate %345, %346 in 1 : vector<64x32xf32>, vector<64x32xf32> -> vector<64x64xf32>
    %348 = vector.extract_strided_slice %344 {offsets = [0, 32], sizes = [64, 32], strides = [1, 1]} : vector<128x64xf32> to vector<64x32xf32>
    %349 = vector.extract_strided_slice %344 {offsets = [64, 32], sizes = [64, 32], strides = [1, 1]} : vector<128x64xf32> to vector<64x32xf32>
    %350 = tpu.concatenate %348, %349 in 1 : vector<64x32xf32>, vector<64x32xf32> -> vector<64x64xf32>
    %351 = tpu.concatenate %340, %340 in 1 : vector<128x32xf32>, vector<128x32xf32> -> vector<128x64xf32>
    %352 = tpu.concatenate %347, %347 in 0 : vector<64x64xf32>, vector<64x64xf32> -> vector<128x64xf32>
    %353 = tpu.concatenate %350, %350 in 0 : vector<64x64xf32>, vector<64x64xf32> -> vector<128x64xf32>
    %354 = arith.mulf %351, %352 : vector<128x64xf32>
    %cst_235 = arith.constant dense<0.000000e+00> : vector<128x16xf32>
    %355 = tpu.matmul %354, %41, %cst_235 {dimension_numbers = #tpu.dot_dimension_numbers<[1], [0], [0], [1], [0, 0, 1, 1], [], []>} : vector<128x64xf32>, vector<64x16xf32>, vector<128x16xf32> -> vector<128x16xf32>
    %cst_236 = arith.constant 5.000000e-01 : f32
    %356 = vector.broadcast %cst_236 : f32 to vector<128x16xf32>
    %357 = arith.mulf %355, %356 : vector<128x16xf32>
    %358 = vector.extract_strided_slice %357 {offsets = [0, 0], sizes = [128, 8], strides = [1, 1]} : vector<128x16xf32> to vector<128x8xf32>
    %359 = vector.extract_strided_slice %357 {offsets = [0, 8], sizes = [128, 8], strides = [1, 1]} : vector<128x16xf32> to vector<128x8xf32>
    %360 = arith.maximumf %358, %359 : vector<128x8xf32>
    %361 = vector.extract_strided_slice %357 {offsets = [0, 0], sizes = [128, 8], strides = [1, 1]} : vector<128x16xf32> to vector<128x8xf32>
    %362 = arith.subf %361, %360 : vector<128x8xf32>
    %363 = math.exp %362 : vector<128x8xf32>
    %364 = vector.extract_strided_slice %357 {offsets = [0, 8], sizes = [128, 8], strides = [1, 1]} : vector<128x16xf32> to vector<128x8xf32>
    %365 = arith.subf %364, %360 : vector<128x8xf32>
    %366 = math.exp %365 : vector<128x8xf32>
    %367 = arith.addf %363, %366 : vector<128x8xf32>
    %cst_237 = arith.constant 1.000000e+00 : f32
    %368 = vector.broadcast %cst_237 : f32 to vector<128x8xf32>
    %369 = arith.divf %368, %367 : vector<128x8xf32>
    %370 = arith.mulf %363, %369 : vector<128x8xf32>
    %371 = arith.mulf %366, %369 : vector<128x8xf32>
    %372 = tpu.concatenate %370, %371 in 1 : vector<128x8xf32>, vector<128x8xf32> -> vector<128x16xf32>
    %cst_238 = arith.constant dense<0.000000e+00> : vector<128x64xf32>
    %373 = tpu.matmul %372, %42, %cst_238 {dimension_numbers = #tpu.dot_dimension_numbers<[1], [0], [0], [1], [0, 0, 1, 1], [], []>} : vector<128x16xf32>, vector<16x64xf32>, vector<128x64xf32> -> vector<128x64xf32>
    %374 = arith.mulf %373, %353 : vector<128x64xf32>
    %375 = vector.extract_strided_slice %374 {offsets = [0, 0], sizes = [128, 32], strides = [1, 1]} : vector<128x64xf32> to vector<128x32xf32>
    %376 = vector.extract_strided_slice %374 {offsets = [0, 32], sizes = [128, 32], strides = [1, 1]} : vector<128x64xf32> to vector<128x32xf32>
    %377 = arith.addf %375, %376 : vector<128x32xf32>
    %cst_239 = arith.constant dense<0.000000e+00> : vector<128x32xf32>
    %378 = tpu.matmul %377, %32, %cst_239 {dimension_numbers = #tpu.dot_dimension_numbers<[1], [0], [0], [1], [0, 0, 1, 1], [], []>} : vector<128x32xf32>, vector<32x32xf32>, vector<128x32xf32> -> vector<128x32xf32>
    %379 = vector.broadcast %33 : vector<1x32xf32> to vector<128x32xf32>
    %380 = arith.addf %378, %379 : vector<128x32xf32>
    %381 = vector.extract_strided_slice %380 {offsets = [0, 0], sizes = [32, 32], strides = [1, 1]} : vector<128x32xf32> to vector<32x32xf32>
    %382 = tpu.transpose %381, [1, 0] : vector<32x32xf32> -> vector<32x32xf32>
    %383 = vector.extract_strided_slice %380 {offsets = [64, 0], sizes = [32, 32], strides = [1, 1]} : vector<128x32xf32> to vector<32x32xf32>
    %384 = tpu.transpose %383, [1, 0] : vector<32x32xf32> -> vector<32x32xf32>
    %385 = tpu.concatenate %382, %384 in 0 : vector<32x32xf32>, vector<32x32xf32> -> vector<64x32xf32>
    %cst_240 = arith.constant dense<0.000000e+00> : vector<64x32xf32>
    %386 = tpu.matmul %43, %385, %cst_240 {dimension_numbers = #tpu.dot_dimension_numbers<[1], [0], [0], [1], [0, 0, 1, 1], [], []>} : vector<64x64xf32>, vector<64x32xf32>, vector<64x32xf32> -> vector<64x32xf32>
    %387 = vector.shape_cast %386 : vector<64x32xf32> to vector<1x64x32xf32>
    %388 = vector.extract_strided_slice %380 {offsets = [32, 0], sizes = [32, 32], strides = [1, 1]} : vector<128x32xf32> to vector<32x32xf32>
    %389 = tpu.transpose %388, [1, 0] : vector<32x32xf32> -> vector<32x32xf32>
    %390 = vector.extract_strided_slice %380 {offsets = [96, 0], sizes = [32, 32], strides = [1, 1]} : vector<128x32xf32> to vector<32x32xf32>
    %391 = tpu.transpose %390, [1, 0] : vector<32x32xf32> -> vector<32x32xf32>
    %392 = tpu.concatenate %389, %391 in 0 : vector<32x32xf32>, vector<32x32xf32> -> vector<64x32xf32>
    %cst_241 = arith.constant dense<0.000000e+00> : vector<64x32xf32>
    %393 = tpu.matmul %43, %392, %cst_241 {dimension_numbers = #tpu.dot_dimension_numbers<[1], [0], [0], [1], [0, 0, 1, 1], [], []>} : vector<64x64xf32>, vector<64x32xf32>, vector<64x32xf32> -> vector<64x32xf32>
    %394 = vector.shape_cast %393 : vector<64x32xf32> to vector<1x64x32xf32>
    %395 = tpu.concatenate %387, %394 in 0 : vector<1x64x32xf32>, vector<1x64x32xf32> -> vector<2x64x32xf32>
    %396 = arith.addf %395, %336 : vector<2x64x32xf32>
    %cst_242 = arith.constant dense<0.000000e+00> : vector<2x32xf32>
    %397 = vector.multi_reduction <add>, %396, %cst_242 [1] : vector<2x64x32xf32> to vector<2x32xf32>
    %398 = arith.mulf %396, %396 : vector<2x64x32xf32>
    %cst_243 = arith.constant dense<0.000000e+00> : vector<2x32xf32>
    %399 = vector.multi_reduction <add>, %398, %cst_243 [1] : vector<2x64x32xf32> to vector<2x32xf32>
    %cst_244 = arith.constant dense<0.000000e+00> : vector<2x32xf32>
    %400 = tpu.matmul %397, %40, %cst_244 {dimension_numbers = #tpu.dot_dimension_numbers<[1], [0], [0], [1], [0, 0, 1, 1], [], []>} : vector<2x32xf32>, vector<32x32xf32>, vector<2x32xf32> -> vector<2x32xf32>
    %cst_245 = arith.constant dense<0.000000e+00> : vector<2x32xf32>
    %401 = tpu.matmul %399, %40, %cst_245 {dimension_numbers = #tpu.dot_dimension_numbers<[1], [0], [0], [1], [0, 0, 1, 1], [], []>} : vector<2x32xf32>, vector<32x32xf32>, vector<2x32xf32> -> vector<2x32xf32>
    %cst_246 = arith.constant 2.560000e+02 : f32
    %402 = vector.broadcast %cst_246 : f32 to vector<2x32xf32>
    %403 = arith.divf %400, %402 : vector<2x32xf32>
    %cst_247 = arith.constant 2.560000e+02 : f32
    %404 = vector.broadcast %cst_247 : f32 to vector<2x32xf32>
    %405 = arith.divf %401, %404 : vector<2x32xf32>
    %406 = arith.mulf %403, %403 : vector<2x32xf32>
    %407 = arith.subf %405, %406 : vector<2x32xf32>
    %cst_248 = arith.constant 9.99999974E-6 : f32
    %408 = vector.broadcast %cst_248 : f32 to vector<2x32xf32>
    %409 = arith.addf %407, %408 : vector<2x32xf32>
    %410 = math.rsqrt %409 : vector<2x32xf32>
    %411 = vector.shape_cast %403 : vector<2x32xf32> to vector<2x1x32xf32>
    %412 = vector.broadcast %411 : vector<2x1x32xf32> to vector<2x64x32xf32>
    %413 = arith.subf %396, %412 : vector<2x64x32xf32>
    %414 = vector.shape_cast %410 : vector<2x32xf32> to vector<2x1x32xf32>
    %415 = vector.broadcast %414 : vector<2x1x32xf32> to vector<2x64x32xf32>
    %416 = arith.mulf %413, %415 : vector<2x64x32xf32>
    %417 = vector.shape_cast %34 : vector<1x32xf32> to vector<1x1x32xf32>
    %418 = vector.broadcast %417 : vector<1x1x32xf32> to vector<2x64x32xf32>
    %419 = arith.mulf %416, %418 : vector<2x64x32xf32>
    %420 = vector.shape_cast %35 : vector<1x32xf32> to vector<1x1x32xf32>
    %421 = vector.broadcast %420 : vector<1x1x32xf32> to vector<2x64x32xf32>
    %422 = arith.addf %419, %421 : vector<2x64x32xf32>
    %423 = vector.shape_cast %422 : vector<2x64x32xf32> to vector<128x32xf32>
    %cst_249 = arith.constant dense<0.000000e+00> : vector<128x128xf32>
    %424 = tpu.matmul %423, %36, %cst_249 {dimension_numbers = #tpu.dot_dimension_numbers<[1], [0], [0], [1], [0, 0, 1, 1], [], []>} : vector<128x32xf32>, vector<32x128xf32>, vector<128x128xf32> -> vector<128x128xf32>
    %425 = vector.broadcast %37 : vector<1x128xf32> to vector<128x128xf32>
    %426 = arith.addf %424, %425 : vector<128x128xf32>
    %cst_250 = arith.constant 0.000000e+00 : f32
    %427 = vector.broadcast %cst_250 : f32 to vector<128x128xf32>
    %428 = arith.subf %427, %426 : vector<128x128xf32>
    %429 = math.exp %428 : vector<128x128xf32>
    %cst_251 = arith.constant 1.000000e+00 : f32
    %430 = vector.broadcast %cst_251 : f32 to vector<128x128xf32>
    %431 = arith.addf %430, %429 : vector<128x128xf32>
    %cst_252 = arith.constant 1.000000e+00 : f32
    %432 = vector.broadcast %cst_252 : f32 to vector<128x128xf32>
    %433 = arith.divf %432, %431 : vector<128x128xf32>
    %434 = arith.mulf %426, %433 : vector<128x128xf32>
    %cst_253 = arith.constant dense<0.000000e+00> : vector<128x32xf32>
    %435 = tpu.matmul %434, %38, %cst_253 {dimension_numbers = #tpu.dot_dimension_numbers<[1], [0], [0], [1], [0, 0, 1, 1], [], []>} : vector<128x128xf32>, vector<128x32xf32>, vector<128x32xf32> -> vector<128x32xf32>
    %436 = vector.broadcast %39 : vector<1x32xf32> to vector<128x32xf32>
    %437 = arith.addf %435, %436 : vector<128x32xf32>
    %438 = vector.shape_cast %437 : vector<128x32xf32> to vector<2x64x32xf32>
    %439 = arith.addf %422, %438 : vector<2x64x32xf32>
    %c0_254 = arith.constant 0 : index
    %c0_255 = arith.constant 0 : index
    %c0_256 = arith.constant 0 : index
    %440 = vector.load %arg48[%c0_254, %c0_255, %c0_256] : memref<2x64x32xf32, #tpu.memory_space<vmem>>, vector<2x64x32xf32>
    tpu.vector_store %arg48[%c0_254, %c0_255, %c0_256], %439 {strides = array<i32>} : memref<2x64x32xf32, #tpu.memory_space<vmem>>, vector<2x64x32xf32>,
    return
  }
  func.func @transform_0(%arg0: i32) -> (i32, i32, i32) {
    %c0_i32 = arith.constant 0 : i32
    %c0_i32_0 = arith.constant 0 : i32
    %c0_i32_1 = arith.constant 0 : i32
    %c0_i32_2 = arith.constant 0 : i32
    return %c0_i32, %c0_i32_0, %c0_i32_1 : i32, i32, i32
  }
  func.func @transform_1(%arg0: i32) -> (i32, i32) {
    %c0_i32 = arith.constant 0 : i32
    %c0_i32_0 = arith.constant 0 : i32
    %c0_i32_1 = arith.constant 0 : i32
    return %c0_i32, %c0_i32_0 : i32, i32
  }
  func.func @transform_2(%arg0: i32) -> (i32, i32, i32) {
    %c0_i32 = arith.constant 0 : i32
    %c0_i32_0 = arith.constant 0 : i32
    %c0_i32_1 = arith.constant 0 : i32
    %c0_i32_2 = arith.constant 0 : i32
    return %c0_i32, %c0_i32_0, %c0_i32_1 : i32, i32, i32
  }
  func.func @transform_3(%arg0: i32) -> (i32, i32) {
    %c0_i32 = arith.constant 0 : i32
    %c0_i32_0 = arith.constant 0 : i32
    %c0_i32_1 = arith.constant 0 : i32
    return %c0_i32, %c0_i32_0 : i32, i32
  }
  func.func @transform_4(%arg0: i32) -> (i32, i32) {
    %c0_i32 = arith.constant 0 : i32
    %c0_i32_0 = arith.constant 0 : i32
    %c0_i32_1 = arith.constant 0 : i32
    return %c0_i32, %c0_i32_0 : i32, i32
  }
  func.func @transform_5(%arg0: i32) -> (i32, i32) {
    %c0_i32 = arith.constant 0 : i32
    %c0_i32_0 = arith.constant 0 : i32
    %c0_i32_1 = arith.constant 0 : i32
    return %c0_i32, %c0_i32_0 : i32, i32
  }
  func.func @transform_6(%arg0: i32) -> (i32, i32) {
    %c0_i32 = arith.constant 0 : i32
    %c0_i32_0 = arith.constant 0 : i32
    %c0_i32_1 = arith.constant 0 : i32
    return %c0_i32, %c0_i32_0 : i32, i32
  }
  func.func @transform_7(%arg0: i32) -> (i32, i32) {
    %c0_i32 = arith.constant 0 : i32
    %c0_i32_0 = arith.constant 0 : i32
    %c0_i32_1 = arith.constant 0 : i32
    return %c0_i32, %c0_i32_0 : i32, i32
  }
  func.func @transform_8(%arg0: i32) -> (i32, i32) {
    %c0_i32 = arith.constant 0 : i32
    %c0_i32_0 = arith.constant 0 : i32
    %c0_i32_1 = arith.constant 0 : i32
    return %c0_i32, %c0_i32_0 : i32, i32
  }
  func.func @transform_9(%arg0: i32) -> (i32, i32) {
    %c0_i32 = arith.constant 0 : i32
    %c0_i32_0 = arith.constant 0 : i32
    %c0_i32_1 = arith.constant 0 : i32
    return %c0_i32, %c0_i32_0 : i32, i32
  }
  func.func @transform_10(%arg0: i32) -> (i32, i32) {
    %c0_i32 = arith.constant 0 : i32
    %c0_i32_0 = arith.constant 0 : i32
    %c0_i32_1 = arith.constant 0 : i32
    return %c0_i32, %c0_i32_0 : i32, i32
  }
  func.func @transform_11(%arg0: i32) -> (i32, i32) {
    %c0_i32 = arith.constant 0 : i32
    %c0_i32_0 = arith.constant 0 : i32
    %c0_i32_1 = arith.constant 0 : i32
    return %c0_i32, %c0_i32_0 : i32, i32
  }
  func.func @transform_12(%arg0: i32) -> (i32, i32) {
    %c0_i32 = arith.constant 0 : i32
    %c0_i32_0 = arith.constant 0 : i32
    %c0_i32_1 = arith.constant 0 : i32
    return %c0_i32, %c0_i32_0 : i32, i32
  }
  func.func @transform_13(%arg0: i32) -> (i32, i32) {
    %c0_i32 = arith.constant 0 : i32
    %c0_i32_0 = arith.constant 0 : i32
    %c0_i32_1 = arith.constant 0 : i32
    return %c0_i32, %c0_i32_0 : i32, i32
  }
  func.func @transform_14(%arg0: i32) -> (i32, i32) {
    %c0_i32 = arith.constant 0 : i32
    %c0_i32_0 = arith.constant 0 : i32
    %c0_i32_1 = arith.constant 0 : i32
    return %c0_i32, %c0_i32_0 : i32, i32
  }
  func.func @transform_15(%arg0: i32) -> (i32, i32) {
    %c0_i32 = arith.constant 0 : i32
    %c0_i32_0 = arith.constant 0 : i32
    %c0_i32_1 = arith.constant 0 : i32
    return %c0_i32, %c0_i32_0 : i32, i32
  }
  func.func @transform_16(%arg0: i32) -> (i32, i32) {
    %c0_i32 = arith.constant 0 : i32
    %c0_i32_0 = arith.constant 0 : i32
    %c0_i32_1 = arith.constant 0 : i32
    return %c0_i32, %c0_i32_0 : i32, i32
  }
  func.func @transform_17(%arg0: i32) -> (i32, i32) {
    %c0_i32 = arith.constant 0 : i32
    %c0_i32_0 = arith.constant 0 : i32
    %c0_i32_1 = arith.constant 0 : i32
    return %c0_i32, %c0_i32_0 : i32, i32
  }
  func.func @transform_18(%arg0: i32) -> (i32, i32) {
    %c0_i32 = arith.constant 0 : i32
    %c0_i32_0 = arith.constant 0 : i32
    %c0_i32_1 = arith.constant 0 : i32
    return %c0_i32, %c0_i32_0 : i32, i32
  }
  func.func @transform_19(%arg0: i32) -> (i32, i32) {
    %c0_i32 = arith.constant 0 : i32
    %c0_i32_0 = arith.constant 0 : i32
    %c0_i32_1 = arith.constant 0 : i32
    return %c0_i32, %c0_i32_0 : i32, i32
  }
  func.func @transform_20(%arg0: i32) -> (i32, i32) {
    %c0_i32 = arith.constant 0 : i32
    %c0_i32_0 = arith.constant 0 : i32
    %c0_i32_1 = arith.constant 0 : i32
    return %c0_i32, %c0_i32_0 : i32, i32
  }
  func.func @transform_21(%arg0: i32) -> (i32, i32) {
    %c0_i32 = arith.constant 0 : i32
    %c0_i32_0 = arith.constant 0 : i32
    %c0_i32_1 = arith.constant 0 : i32
    return %c0_i32, %c0_i32_0 : i32, i32
  }
  func.func @transform_22(%arg0: i32) -> (i32, i32) {
    %c0_i32 = arith.constant 0 : i32
    %c0_i32_0 = arith.constant 0 : i32
    %c0_i32_1 = arith.constant 0 : i32
    return %c0_i32, %c0_i32_0 : i32, i32
  }
  func.func @transform_23(%arg0: i32) -> (i32, i32) {
    %c0_i32 = arith.constant 0 : i32
    %c0_i32_0 = arith.constant 0 : i32
    %c0_i32_1 = arith.constant 0 : i32
    return %c0_i32, %c0_i32_0 : i32, i32
  }
  func.func @transform_24(%arg0: i32) -> (i32, i32) {
    %c0_i32 = arith.constant 0 : i32
    %c0_i32_0 = arith.constant 0 : i32
    %c0_i32_1 = arith.constant 0 : i32
    return %c0_i32, %c0_i32_0 : i32, i32
  }
  func.func @transform_25(%arg0: i32) -> (i32, i32) {
    %c0_i32 = arith.constant 0 : i32
    %c0_i32_0 = arith.constant 0 : i32
    %c0_i32_1 = arith.constant 0 : i32
    return %c0_i32, %c0_i32_0 : i32, i32
  }
  func.func @transform_26(%arg0: i32) -> (i32, i32) {
    %c0_i32 = arith.constant 0 : i32
    %c0_i32_0 = arith.constant 0 : i32
    %c0_i32_1 = arith.constant 0 : i32
    return %c0_i32, %c0_i32_0 : i32, i32
  }
  func.func @transform_27(%arg0: i32) -> (i32, i32) {
    %c0_i32 = arith.constant 0 : i32
    %c0_i32_0 = arith.constant 0 : i32
    %c0_i32_1 = arith.constant 0 : i32
    return %c0_i32, %c0_i32_0 : i32, i32
  }
  func.func @transform_28(%arg0: i32) -> (i32, i32) {
    %c0_i32 = arith.constant 0 : i32
    %c0_i32_0 = arith.constant 0 : i32
    %c0_i32_1 = arith.constant 0 : i32
    return %c0_i32, %c0_i32_0 : i32, i32
  }
  func.func @transform_29(%arg0: i32) -> (i32, i32) {
    %c0_i32 = arith.constant 0 : i32
    %c0_i32_0 = arith.constant 0 : i32
    %c0_i32_1 = arith.constant 0 : i32
    return %c0_i32, %c0_i32_0 : i32, i32
  }
  func.func @transform_30(%arg0: i32) -> (i32, i32) {
    %c0_i32 = arith.constant 0 : i32
    %c0_i32_0 = arith.constant 0 : i32
    %c0_i32_1 = arith.constant 0 : i32
    return %c0_i32, %c0_i32_0 : i32, i32
  }
  func.func @transform_31(%arg0: i32) -> (i32, i32) {
    %c0_i32 = arith.constant 0 : i32
    %c0_i32_0 = arith.constant 0 : i32
    %c0_i32_1 = arith.constant 0 : i32
    return %c0_i32, %c0_i32_0 : i32, i32
  }
  func.func @transform_32(%arg0: i32) -> (i32, i32) {
    %c0_i32 = arith.constant 0 : i32
    %c0_i32_0 = arith.constant 0 : i32
    %c0_i32_1 = arith.constant 0 : i32
    return %c0_i32, %c0_i32_0 : i32, i32
  }
  func.func @transform_33(%arg0: i32) -> (i32, i32) {
    %c0_i32 = arith.constant 0 : i32
    %c0_i32_0 = arith.constant 0 : i32
    %c0_i32_1 = arith.constant 0 : i32
    return %c0_i32, %c0_i32_0 : i32, i32
  }
  func.func @transform_34(%arg0: i32) -> (i32, i32) {
    %c0_i32 = arith.constant 0 : i32
    %c0_i32_0 = arith.constant 0 : i32
    %c0_i32_1 = arith.constant 0 : i32
    return %c0_i32, %c0_i32_0 : i32, i32
  }
  func.func @transform_35(%arg0: i32) -> (i32, i32) {
    %c0_i32 = arith.constant 0 : i32
    %c0_i32_0 = arith.constant 0 : i32
    %c0_i32_1 = arith.constant 0 : i32
    return %c0_i32, %c0_i32_0 : i32, i32
  }
  func.func @transform_36(%arg0: i32) -> (i32, i32) {
    %c0_i32 = arith.constant 0 : i32
    %c0_i32_0 = arith.constant 0 : i32
    %c0_i32_1 = arith.constant 0 : i32
    return %c0_i32, %c0_i32_0 : i32, i32
  }
  func.func @transform_37(%arg0: i32) -> (i32, i32) {
    %c0_i32 = arith.constant 0 : i32
    %c0_i32_0 = arith.constant 0 : i32
    %c0_i32_1 = arith.constant 0 : i32
    return %c0_i32, %c0_i32_0 : i32, i32
  }
  func.func @transform_38(%arg0: i32) -> (i32, i32) {
    %c0_i32 = arith.constant 0 : i32
    %c0_i32_0 = arith.constant 0 : i32
    %c0_i32_1 = arith.constant 0 : i32
    return %c0_i32, %c0_i32_0 : i32, i32
  }
  func.func @transform_39(%arg0: i32) -> (i32, i32) {
    %c0_i32 = arith.constant 0 : i32
    %c0_i32_0 = arith.constant 0 : i32
    %c0_i32_1 = arith.constant 0 : i32
    return %c0_i32, %c0_i32_0 : i32, i32
  }
  func.func @transform_40(%arg0: i32) -> (i32, i32) {
    %c0_i32 = arith.constant 0 : i32
    %c0_i32_0 = arith.constant 0 : i32
    %c0_i32_1 = arith.constant 0 : i32
    return %c0_i32, %c0_i32_0 : i32, i32
  }
  func.func @transform_41(%arg0: i32) -> (i32, i32) {
    %c0_i32 = arith.constant 0 : i32
    %c0_i32_0 = arith.constant 0 : i32
    %c0_i32_1 = arith.constant 0 : i32
    return %c0_i32, %c0_i32_0 : i32, i32
  }
  func.func @transform_42(%arg0: i32) -> (i32, i32) {
    %c0_i32 = arith.constant 0 : i32
    %c0_i32_0 = arith.constant 0 : i32
    %c0_i32_1 = arith.constant 0 : i32
    return %c0_i32, %c0_i32_0 : i32, i32
  }
  func.func @transform_43(%arg0: i32) -> (i32, i32) {
    %c0_i32 = arith.constant 0 : i32
    %c0_i32_0 = arith.constant 0 : i32
    %c0_i32_1 = arith.constant 0 : i32
    return %c0_i32, %c0_i32_0 : i32, i32
  }
  func.func @transform_44(%arg0: i32) -> (i32, i32) {
    %c0_i32 = arith.constant 0 : i32
    %c0_i32_0 = arith.constant 0 : i32
    %c0_i32_1 = arith.constant 0 : i32
    return %c0_i32, %c0_i32_0 : i32, i32
  }
  func.func @transform_45(%arg0: i32) -> (i32, i32) {
    %c0_i32 = arith.constant 0 : i32
    %c0_i32_0 = arith.constant 0 : i32
    %c0_i32_1 = arith.constant 0 : i32
    return %c0_i32, %c0_i32_0 : i32, i32
  }
  func.func @transform_46(%arg0: i32) -> (i32, i32) {
    %c0_i32 = arith.constant 0 : i32
    %c0_i32_0 = arith.constant 0 : i32
    %c0_i32_1 = arith.constant 0 : i32
    return %c0_i32, %c0_i32_0 : i32, i32
  }
  func.func @transform_47(%arg0: i32) -> (i32, i32, i32) {
    %c0_i32 = arith.constant 0 : i32
    %c0_i32_0 = arith.constant 0 : i32
    %c0_i32_1 = arith.constant 0 : i32
    %c0_i32_2 = arith.constant 0 : i32
    return %c0_i32, %c0_i32_0, %c0_i32_1 : i32, i32, i32
  }
}

</mosaic_0001>

<bundles_post_ra>
// kernel: film_resblk_self_cross.1
= control target key start
LH: loop header
LB: loop body
LE: loop exit
PB: predicated region body
PF: predicated region fallthrough
CT: control target
= control target key end

     0   :  { %s13910_s6 = smov 1   ;;  %s13911_s10 = smov 2   ;;  %s18584_s0 = inlined_call_operand.smem [shape: u32[48], index: -1, kind: input, shape index: {}] }
   0x1   :  { %s13982_s5 = sld [smem:[%s18584_s0]]   ;;  %s13912_s14 = smov 3  }
   0x2   :  { %s13987_s9 = sld [smem:[%s18584_s0 + %s13910_s6]]   ;;  %s13913_s18 = smov 4  }
   0x3   :  { %s13992_s13 = sld [smem:[%s18584_s0 + %s13911_s10]]   ;;  %s13914_s22 = smov 5  }
   0x4   :  { %s13997_s17 = sld [smem:[%s18584_s0 + %s13912_s14]]   ;;  %s13915_s26 = smov 6  }
   0x5   :  { %s14002_s21 = sld [smem:[%s18584_s0 + %s13913_s18]]   ;;  %s13916_s30 = smov 7  }
   0x6   :  { %s14007_s25 = sld [smem:[%s18584_s0 + %s13914_s22]]   ;;  %s13917_s4 = smov 8  }
   0x7   :  { %s14012_s29 = sld [smem:[%s18584_s0 + %s13915_s26]]   ;;  %s13918_s10 = smov 9  }
   0x8   :  { %s14017_s3 = sld [smem:[%s18584_s0 + %s13916_s30]]   ;;  %s13919_s15 = smov 10  }
   0x9   :  { %18684 = sst [smem:[#allocation20_spill]] %s13992_s13  ;;  %s13920_s20 = smov 11  }
   0xa   :  { %s14022_s8 = sld [smem:[%s18584_s0 + %s13917_s4]]   ;;  %s13921_s26 = smov 12  }
   0xb   :  { %s14027_s14 = sld [smem:[%s18584_s0 + %s13918_s10]]   ;;  %s13922_s1 = smov 13  }
   0xc   :  { %s14032_s19 = sld [smem:[%s18584_s0 + %s13919_s15]]   ;;  %s13923_s7 = smov 14  }
   0xd   :  { %s14037_s24 = sld [smem:[%s18584_s0 + %s13920_s20]]   ;;  %s13924_s15 = smov 15  }
   0xe   :  { %18685 = sst [smem:[#allocation21_spill]] %s14017_s3  ;;  %s13925_s22 = smov 16  }
   0xf   :  { %s14042_s30 = sld [smem:[%s18584_s0 + %s13921_s26]]   ;;  %s13926_s28 = smov 17  }
  0x10   :  { %18686 = sst [smem:[#allocation22_spill]] %s14022_s8 }
  0x11   :  { %s14047_s6 = sld [smem:[%s18584_s0 + %s13922_s1]]  }
  0x12   :  { %18687 = sst [smem:[#allocation23_spill]] %s14032_s19 }
  0x13   :  { %18688 = sst [smem:[#allocation24_spill]] %s14037_s24 }
  0x14   :  { %s14052_s12 = sld [smem:[%s18584_s0 + %s13923_s7]]   ;;  %s13927_s7 = smov 18  }
  0x15   :  { %18689 = sst [smem:[#allocation25_spill]] %s14042_s30 }
  0x16   :  { %s14057_s20 = sld [smem:[%s18584_s0 + %s13924_s15]]   ;;  %s13928_s15 = smov 19  }
  0x17   :  { %18690 = sst [smem:[#allocation26_spill]] %s14047_s6 }
  0x18   :  { %s14062_s27 = sld [smem:[%s18584_s0 + %s13925_s22]]   ;;  %s13929_s22 = smov 20  }
  0x19   :  { %s14067_s4 = sld [smem:[%s18584_s0 + %s13926_s28]]   ;;  %s13930_s28 = smov 21  }
  0x1a   :  { %18691 = sst [smem:[#allocation27_spill]] %s14052_s12 }
  0x1b   :  { %s14072_s13 = sld [smem:[%s18584_s0 + %s13927_s7]]   ;;  %s13931_s7 = smov 22  }
  0x1c   :  { %18692 = sst [smem:[#allocation28_spill]] %s14057_s20 }
  0x1d   :  { %s14077_s20 = sld [smem:[%s18584_s0 + %s13928_s15]]   ;;  %s13932_s15 = smov 23  }
  0x1e   :  { %18693 = sst [smem:[#allocation29_spill]] %s14062_s27 }
  0x1f   :  { %18694 = sst [smem:[#allocation30_spill]] %s14067_s4 }
  0x20   :  { %s14082_s27 = sld [smem:[%s18584_s0 + %s13929_s22]]   ;;  %s13933_s22 = smov 24  }
  0x21   :  { %18695 = sst [smem:[#allocation31_spill]] %s14072_s13 }
  0x22   :  { %s14087_s4 = sld [smem:[%s18584_s0 + %s13930_s28]]   ;;  %s13934_s28 = smov 25  }
  0x23   :  { %18696 = sst [smem:[#allocation32_spill]] %s14077_s20 }
  0x24   :  { %s14092_s13 = sld [smem:[%s18584_s0 + %s13931_s7]]   ;;  %s13935_s7 = smov 26  }
  0x25   :  { %s14097_s12 = sld [smem:[%s18584_s0 + %s13932_s15]]   ;;  %s13936_s15 = smov 27  }
  0x26   :  { %18697 = sst [smem:[#allocation33_spill]] %s14082_s27 }
  0x27   :  { %s14102_s27 = sld [smem:[%s18584_s0 + %s13933_s22]]   ;;  %s13937_s22 = smov 28  }
  0x28   :  { %18698 = sst [smem:[#allocation34_spill]] %s14087_s4 }
  0x29   :  { %s14107_s4 = sld [smem:[%s18584_s0 + %s13934_s28]]   ;;  %s13938_s28 = smov 29  }
  0x2a   :  { %18699 = sst [smem:[#allocation35_spill]] %s14092_s13 }
  0x2b   :  { %18700 = sst [smem:[#allocation36_spill]] %s14097_s12 }
  0x2c   :  { %s14112_s13 = sld [smem:[%s18584_s0 + %s13935_s7]]   ;;  %s13939_s7 = smov 30  }
  0x2d   :  { %18701 = sst [smem:[#allocation37_spill]] %s14102_s27 }
  0x2e   :  { %s14117_s12 = sld [smem:[%s18584_s0 + %s13936_s15]]   ;;  %s13940_s15 = smov 31  }
  0x2f   :  { %18702 = sst [smem:[#allocation38_spill]] %s14107_s4 }
  0x30   :  { %s14122_s27 = sld [smem:[%s18584_s0 + %s13937_s22]]   ;;  %s13941_s22 = smov 32  }
  0x31   :  { %s14127_s4 = sld [smem:[%s18584_s0 + %s13938_s28]]   ;;  %s13942_s28 = smov 33  }
  0x32   :  { %18703 = sst [smem:[#allocation39_spill]] %s14112_s13 }
  0x33   :  { %s14132_s13 = sld [smem:[%s18584_s0 + %s13939_s7]]   ;;  %s13943_s7 = smov 34  }
  0x34   :  { %18704 = sst [smem:[#allocation40_spill]] %s14117_s12 }
  0x35   :  { %s14137_s12 = sld [smem:[%s18584_s0 + %s13940_s15]]   ;;  %s13944_s15 = smov 35  }
  0x36   :  { %18705 = sst [smem:[#allocation41_spill]] %s14122_s27 }
  0x37   :  { %18706 = sst [smem:[#allocation42_spill]] %s14127_s4 }
  0x38   :  { %s14142_s27 = sld [smem:[%s18584_s0 + %s13941_s22]]   ;;  %s13945_s22 = smov 36  }
  0x39   :  { %18707 = sst [smem:[#allocation43_spill]] %s14132_s13 }
  0x3a   :  { %s14147_s4 = sld [smem:[%s18584_s0 + %s13942_s28]]   ;;  %s13946_s28 = smov 37  }
  0x3b   :  { %18708 = sst [smem:[#allocation44_spill]] %s14137_s12 }
  0x3c   :  { %s14152_s13 = sld [smem:[%s18584_s0 + %s13943_s7]]   ;;  %s13947_s7 = smov 38  }
  0x3d   :  { %s14157_s12 = sld [smem:[%s18584_s0 + %s13944_s15]]   ;;  %s13948_s15 = smov 39  }
  0x3e   :  { %18709 = sst [smem:[#allocation45_spill]] %s14142_s27 }
  0x3f   :  { %s14162_s27 = sld [smem:[%s18584_s0 + %s13945_s22]]   ;;  %s13949_s22 = smov 40  }
  0x40   :  { %18710 = sst [smem:[#allocation46_spill]] %s14147_s4 }
  0x41   :  { %s14167_s4 = sld [smem:[%s18584_s0 + %s13946_s28]]   ;;  %s13950_s28 = smov 41  }
  0x42   :  { %s14172_s20 = sld [smem:[%s18584_s0 + %s13947_s7]]   ;;  %s13951_s7 = smov 42  }
  0x43   :  { %18711 = sst [smem:[#allocation47_spill]] %s14157_s12 }
  0x44   :  { %s14177_s12 = sld [smem:[%s18584_s0 + %s13948_s15]]   ;;  %s13952_s15 = smov 43  }
  0x45   :  { %s14182_s30 = sld [smem:[%s18584_s0 + %s13949_s22]]   ;;  %s13953_s22 = smov 44  }
  0x46   :  { %s14187_s24 = sld [smem:[%s18584_s0 + %s13950_s28]]   ;;  %s13954_s28 = smov 45  }
  0x47   :  { %s14192_s6 = sld [smem:[%s18584_s0 + %s13951_s7]]   ;;  %s13955_s7 = smov 46  }
  0x48   :  { %s14202_s19 = sld [smem:[%s18584_s0 + %s13953_s22]]  }
  0x49   :  { %s14212_s8 = sld [smem:[%s18584_s0 + %s13955_s7]]  }
  0x4a   :  { %18712 = sst [smem:[#allocation48_spill]] %s14177_s12 }
  0x4b   :  { %s14197_s12 = sld [smem:[%s18584_s0 + %s13952_s15]]   ;;  %s13956_s15 = smov 47  }
  0x4c   :  { %18713 = sst [smem:[#allocation49_spill]] %s14187_s24 }
  0x4d   :  { %s14207_s24 = sld [smem:[%s18584_s0 + %s13954_s28]]  }
  0x4e   :  { %s14217_s3 = sld [smem:[%s18584_s0 + %s13956_s15]]  }
  0x4f   :  { %100 = vsyncpa [#allocation4], 0 }
  0x50   :  { %101 = vsyncpa [#allocation7], 0 }
  0x51   :  { %102 = vsyncpa [#allocation10], 0 }
  0x52   :  { %103 = vsyncpa [#allocation13], 0 }
  0x53   :  { %104 = vsyncpa [#allocation5], 0  ;;  %s13957_s22 = smov [#allocation6]   ;;  %s13958_s26 = smov [#allocation9]  }
  0x54   :  { %s191_s23 = sshll.u32 %s13957_s22, 4  ;;  %s211_s28 = sshll.u32 %s13958_s26, 4  ;;  %s192_s23 = int_to_ptr.vmem [resolvable:$true] %s191_s23  ;;  %s212_s28 = int_to_ptr.vmem [resolvable:$true] %s211_s28 }
  0x55   :  { %s13746_s1 = scalar_lea.hbm %s14162_s27, 16 }
  0x56   :  { %p13747_p0 = scmp.ne.s32.totalorder %s14162_s27, %s13746_s1  ;;  %p13750_p1 = scmp.lt.u32.totalorder %s13746_s1, %s14162_s27 }
  0x58   :  { %p13752_p2 = pnand %p13750_p1, %p13747_p0 }
  0x5a   :  { %13755 = shalt.err (!%p13752_p2)
}
  0x5b   :  { %s13756_s0 = scalar_lea.vmem %s192_s23, 16  ;;  %s13760_s2 = scalar_lea.vmem %s192_s23, 32 }
  0x5c   :  { %p13757_p3 = scmp.ne.s32.totalorder %s192_s23, %s13756_s0  ;;  %p13761_p4 = scmp.lt.s32.totalorder %s192_s23, %s192_s23 }
  0x5d   :  { %p13762_p5 = scmp.lt.s32.totalorder %s13760_s2, %s13756_s0 }
  0x5f   :  { %p13763_p6 = por %p13762_p5, %p13761_p4 }
  0x61   :  { %p13764_p7 = pnand %p13763_p6, %p13757_p3 }
  0x63   :  { %13767 = shalt.err (!%p13764_p7)
}
  0x64   :  { %194 = dma.hbm_to_vmem [thread:$0]  %s14162_s27, 16, %s192_s23, [#allocation7]  }
  0x65   :  { %s13768_s7 = scalar_lea.hbm %s14172_s20, 16 }
  0x66   :  { %p13769_p8 = scmp.ne.s32.totalorder %s14172_s20, %s13768_s7  ;;  %p13772_p9 = scmp.lt.u32.totalorder %s13768_s7, %s14172_s20 }
  0x68   :  { %p13774_p10 = pnand %p13772_p9, %p13769_p8 }
  0x6a   :  { %13777 = shalt.err (!%p13774_p10)
}
  0x6b   :  { %s13778_s10 = scalar_lea.vmem %s212_s28, 16  ;;  %s13782_s11 = scalar_lea.vmem %s212_s28, 32 }
  0x6c   :  { %p13779_p11 = scmp.ne.s32.totalorder %s212_s28, %s13778_s10  ;;  %p13783_p12 = scmp.lt.s32.totalorder %s212_s28, %s212_s28 }
  0x6d   :  { %p13784_p13 = scmp.lt.s32.totalorder %s13782_s11, %s13778_s10 }
  0x6f   :  { %p13785_p0 = por %p13784_p13, %p13783_p12 }
  0x71   :  { %p13786_p1 = pnand %p13785_p0, %p13779_p11 }
  0x73   :  { %13789 = shalt.err (!%p13786_p1)
}
  0x74   :  { %214 = dma.hbm_to_vmem [thread:$0]  %s14172_s20, 16, %s212_s28, [#allocation10]  }
  0x75   :  { %s13959_s15 = smov [#allocation3]   ;;  %s13960_s16 = smov [#allocation8]  }
  0x76   :  { %s179_s27 = sshll.u32 %s13959_s15, 4  ;;  %s201_s18 = sshll.u32 %s13960_s16, 4  ;;  %s180_s27 = int_to_ptr.vmem [resolvable:$true] %s179_s27  ;;  %s202_s18 = int_to_ptr.vmem [resolvable:$true] %s201_s18 }
  0x77   :  { %s13790_s22 = scalar_lea.hbm %s14152_s13, 16 }
  0x78   :  { %p13791_p2 = scmp.ne.s32.totalorder %s14152_s13, %s13790_s22  ;;  %p13794_p3 = scmp.lt.u32.totalorder %s13790_s22, %s14152_s13 }
  0x7a   :  { %p13796_p4 = pnand %p13794_p3, %p13791_p2 }
  0x7c   :  { %13799 = shalt.err (!%p13796_p4)
}
  0x7d   :  { %s13800_s23 = scalar_lea.vmem %s180_s27, 16  ;;  %s13804_s26 = scalar_lea.vmem %s180_s27, 32 }
  0x7e   :  { %p13801_p5 = scmp.ne.s32.totalorder %s180_s27, %s13800_s23  ;;  %p13805_p6 = scmp.lt.s32.totalorder %s180_s27, %s180_s27 }
  0x7f   :  { %p13806_p7 = scmp.lt.s32.totalorder %s13804_s26, %s13800_s23 }
  0x81   :  { %p13807_p8 = por %p13806_p7, %p13805_p6 }
  0x83   :  { %p13808_p9 = pnand %p13807_p8, %p13801_p5 }
  0x85   :  { %13811 = shalt.err (!%p13808_p9)
}
  0x86   :  { %182 = dma.hbm_to_vmem [thread:$0]  %s14152_s13, 16, %s180_s27, [#allocation4]  }
  0x87   :  { %s13812_s20 = scalar_lea.hbm %s14167_s4, 16 }
  0x88   :  { %p13813_p10 = scmp.ne.s32.totalorder %s14167_s4, %s13812_s20  ;;  %p13816_p11 = scmp.lt.u32.totalorder %s13812_s20, %s14167_s4 }
  0x8a   :  { %p13818_p12 = pnand %p13816_p11, %p13813_p10 }
  0x8c   :  { %13821 = shalt.err (!%p13818_p12)
}
  0x8d   :  { %s13822_s28 = scalar_lea.vmem %s202_s18, 16  ;;  %s13826_s1 = scalar_lea.vmem %s202_s18, 32 }
  0x8e   :  { %p13823_p13 = scmp.ne.s32.totalorder %s202_s18, %s13822_s28  ;;  %p13827_p0 = scmp.lt.s32.totalorder %s202_s18, %s202_s18 }
  0x8f   :  { %p13828_p1 = scmp.lt.s32.totalorder %s13826_s1, %s13822_s28 }
  0x91   :  { %p13829_p2 = por %p13828_p1, %p13827_p0 }
  0x93   :  { %p13830_p3 = pnand %p13829_p2, %p13823_p13 }
  0x95   :  { %13833 = shalt.err (!%p13830_p3)
}
  0x96   :  { %204 = dma.hbm_to_vmem [thread:$0]  %s14167_s4, 16, %s202_s18, [#allocation7]  }
  0x97   :  { %s13961_s0 = smov [#allocation11]   ;;  %s13962_s2 = smov [#allocation12]  }
  0x98   :  { %s223_s13 = sshll.u32 %s13961_s0, 4  ;;  %s235_s7 = sshll.u32 %s13962_s2, 4  ;;  %s224_s13 = int_to_ptr.vmem [resolvable:$true] %s223_s13  ;;  %s236_s7 = int_to_ptr.vmem [resolvable:$true] %s235_s7 }
  0x99   :  { %s13834_s10 = scalar_lea.hbm %s14182_s30, 16 }
  0x9a   :  { %p13835_p4 = scmp.ne.s32.totalorder %s14182_s30, %s13834_s10  ;;  %p13838_p5 = scmp.lt.u32.totalorder %s13834_s10, %s14182_s30 }
  0x9c   :  { %p13840_p6 = pnand %p13838_p5, %p13835_p4 }
  0x9e   :  { %13843 = shalt.err (!%p13840_p6)
}
  0x9f   :  { %s13844_s11 = scalar_lea.vmem %s224_s13, 16  ;;  %s13848_s15 = scalar_lea.vmem %s224_s13, 32 }
  0xa0   :  { %p13845_p7 = scmp.ne.s32.totalorder %s224_s13, %s13844_s11  ;;  %p13849_p8 = scmp.lt.s32.totalorder %s224_s13, %s224_s13 }
  0xa1   :  { %p13850_p9 = scmp.lt.s32.totalorder %s13848_s15, %s13844_s11 }
  0xa3   :  { %p13851_p10 = por %p13850_p9, %p13849_p8 }
  0xa5   :  { %p13852_p11 = pnand %p13851_p10, %p13845_p7 }
  0xa7   :  { %13855 = shalt.err (!%p13852_p11)
}
  0xa8   :  { %226 = dma.hbm_to_vmem [thread:$0]  %s14182_s30, 16, %s224_s13, [#allocation10]  }
  0xa9   :  { %s13856_s4 = scalar_lea.hbm %s14192_s6, 16 }
  0xaa   :  { %p13857_p12 = scmp.ne.s32.totalorder %s14192_s6, %s13856_s4  ;;  %p13860_p13 = scmp.lt.u32.totalorder %s13856_s4, %s14192_s6 }
  0xac   :  { %p13862_p0 = pnand %p13860_p13, %p13857_p12 }
  0xae   :  { %13865 = shalt.err (!%p13862_p0)
}
  0xaf   :  { %s13866_s27 = scalar_lea.vmem %s236_s7, 16  ;;  %s13870_s16 = scalar_lea.vmem %s236_s7, 32 }
  0xb0   :  { %p13867_p1 = scmp.ne.s32.totalorder %s236_s7, %s13866_s27  ;;  %p13871_p2 = scmp.lt.s32.totalorder %s236_s7, %s236_s7 }
  0xb1   :  { %p13872_p3 = scmp.lt.s32.totalorder %s13870_s16, %s13866_s27 }
  0xb3   :  { %p13873_p4 = por %p13872_p3, %p13871_p2 }
  0xb5   :  { %p13874_p5 = pnand %p13873_p4, %p13867_p1 }
  0xb7   :  { %13877 = shalt.err (!%p13874_p5)
}
  0xb8   :  { %238 = dma.hbm_to_vmem [thread:$0]  %s14192_s6, 16, %s236_s7, [#allocation13]  }
  0xb9   :  { %13900 = dma.done.wait [#allocation4], 16  }
  0xba   :  { %13901 = vsyncadd [#allocation4], 4294967280 }
  0xbb   :  { %13902 = dma.done.wait [#allocation7], 32  }
  0xbc   :  { %13903 = vsyncadd [#allocation7], 4294967264 }
  0xbd   :  { %13904 = dma.done.wait [#allocation10], 32  }
  0xbe   :  { %13905 = vsyncadd [#allocation10], 4294967264 }
  0xbf   :  { %13906 = dma.done.wait [#allocation13], 16  }
  0xc0   :  { %13907 = vsyncadd [#allocation13], 4294967280  ;;  %v18597_v0 = vmov 0.0|0.0   ;;  %vm13964_vm0 = vmmov 0   ;;  %v18599_v1 = vmov 0.0   ;;  %v265_v2 = vld [vmem:[%s13997_s17] sm:$0xff]  ;;  %v696_v18 = vlaneseq }
  0xc1   :  { %12341 = vmatprep.subr.bf16.mxu0 %v18597_v0  ;;  %11515 = vmatprep.mubr.msk.f32.mxu0 %vm13964_vm0, %v18599_v1  ;;  %v266_v3 = vld [vmem:[%s13997_s17 + $0x8] sm:$0xff]  ;;  %v268_v5 = vld [vmem:[%s14007_s25] sm:$0xff]  ;;  %vm539_vm1 = vcmask 130048   ;;  %v270_v9 = vld [vmem:[%s14007_s25 + $0x10] sm:$0xff]  ;;  %vm455_vm2 = vcmask 261120   ;;  %vm865_vm3 = vcmask 1041409  }
  0xc2   :  { %12356 = vmatprep.subr.bf16.mxu1 %v18597_v0  ;;  %11548 = vmatprep.mubr.msk.f32.mxu1 %vm13964_vm0, %v18599_v1  ;;  %v12342_v4 = vpack.c.bf16 %v266_v3, %v265_v2  ;;  %v269_v6 = vld [vmem:[%s14007_s25 + $0x8] sm:$0xff]  ;;  %v532_v7 = vld [vmem:[%s13987_s9] sm:$0x3]  ;;  %v271_v10 = vld [vmem:[%s14007_s25 + $0x18] sm:$0xff]  ;;  %456 = vst.msk [vmem:[#allocation2] sm:$0xff] %vm455_vm2, %v18599_v1  ;;  %v697_v20 = vshrl.u32 %v696_v18, 7 }
  0xc3   :  { %v12345_v8 = vpack.c.bf16 %v269_v6, %v268_v5  ;;  %v12348_v11 = vpack.c.bf16 %v271_v10, %v270_v9  ;;  %457 = vst.msk [vmem:[#allocation2 + $0x8] sm:$0xff] %vm455_vm2, %v18599_v1  ;;  %458 = vst.msk [vmem:[#allocation2 + $0x10] sm:$0xff] %vm455_vm2, %v18599_v1  ;;  %v10575_v12 = vld [vmem:[%s14002_s21] ss:$0 sm:$0xff]  ;;  %v13966_v16 = vmov 1966171168  }
  0xc4   :  { %12343 = vmatpush3.bf16.msra.mxu0 %v12342_v4  ;;  %459 = vst.msk [vmem:[#allocation2 + $0x18] sm:$0xff] %vm455_vm2, %v18599_v1  ;;  %460 = vst.msk [vmem:[#allocation2 + $0x20] sm:$0xff] %vm455_vm2, %v18599_v1  ;;  %v694_v17 = vunpack.c.l.s4 %v13966_v16  ;;  %v10577_v21 = vld [vmem:[%s14012_s29] ss:$0 sm:$0xff]  ;;  %v434_v27 = vld [vmem:[%s14197_s12 + $0x8] sm:$0xff]  ;;  %v14396_v32 = vsub.s32 0, %v697_v20 }
  0xc5   :  { %12344 = vmatprep.subr.bf16.mxu0 %v18597_v0  ;;  %461 = vst.msk [vmem:[#allocation2 + $0x28] sm:$0xff] %vm455_vm2, %v18599_v1  ;;  %462 = vst.msk [vmem:[#allocation2 + $0x30] sm:$0xff] %vm455_vm2, %v18599_v1  ;;  %v433_v26 = vld [vmem:[%s14197_s12] sm:$0xff]  ;;  %v435_v28 = vld [vmem:[%s14197_s12 + $0x10] sm:$0xff]  ;;  %s13967_s9 = smov 96   ;;  %s18724_s17 = sld [smem:[#allocation22_spill]] }
  0xc6   :  { %463 = vst.msk [vmem:[#allocation2 + $0x38] sm:$0xff] %vm455_vm2, %v18599_v1  ;;  %464 = vst.msk [vmem:[#allocation2 + $0x40] sm:$0xff] %vm455_vm2, %v18599_v1  ;;  %v695_v19 = vunpack.c.0.s8 %v694_v17  ;;  %v14392_v29 = vpack.c.bf16 %v434_v27, %v433_v26  ;;  %v436_v30 = vld [vmem:[%s14197_s12 + $0x18] sm:$0xff]  ;;  %v516_v39 = vld [vmem:[%s13982_s5] sm:$0xff]  ;;  %s13968_s21 = smov 32   ;;  %s13969_s25 = smov 64  }
  0xc7   :  { %11516 = vmatmul.mubr.msk.f32.vlgmr.msra.gmra.mrb[0].mxu0 %vm539_vm1, %v532_v7  ;;  %465 = vst.msk [vmem:[#allocation2 + $0x48] sm:$0xff] %vm455_vm2, %v18599_v1  ;;  %466 = vst.msk [vmem:[#allocation2 + $0x50] sm:$0xff] %vm455_vm2, %v18599_v1  ;;  %v14400_v33 = vpack.c.bf16 %v436_v30, %v435_v28  ;;  %v517_v40 = vld [vmem:[%s13982_s5 + $0x8] sm:$0xff]  ;;  %v518_v41 = vld [vmem:[%s13982_s5 + $0x10] sm:$0xff]  ;;  %vm1837_vm4 = vcmask 523264   ;;  %vm1854_vm5 = vcmask 785408  }
  0xc8   :  { %12346 = vmatpush3.bf16.msra.mxu0 %v12345_v8  ;;  %11526 = vmatprep.mubr.msk.f32.mxu0 %vm13964_vm0, %v18599_v1  ;;  %467 = vst.msk [vmem:[#allocation2 + $0x58] sm:$0xff] %vm455_vm2, %v18599_v1  ;;  %468 = vst.msk [vmem:[#allocation2 + $0x60] sm:$0xff] %vm455_vm2, %v18599_v1  ;;  %v14387_v22 = vsub.s32 %v695_v19, %v697_v20  ;;  %v519_v42 = vld [vmem:[%s13982_s5 + $0x18] sm:$0xff]  ;;  %v520_v43 = vld [vmem:[%s13982_s5 + $0x20] sm:$0xff]  ;;  %s18725_s29 = sld [smem:[#allocation23_spill]]  ;;  %s18729_s30 = sld [smem:[#allocation24_spill]] }
  0xc9   :  { %12347 = vmatprep.subr.bf16.mxu0 %v18597_v0  ;;  %469 = vst.msk [vmem:[#allocation2 + $0x68] sm:$0xff] %vm455_vm2, %v18599_v1  ;;  %470 = vst.msk [vmem:[#allocation2 + $0x70] sm:$0xff] %vm455_vm2, %v18599_v1  ;;  %12358 = vmatpush3.bf16.msra.mxu1 %v14392_v29  ;;  %v521_v44 = vld [vmem:[%s13982_s5 + $0x28] sm:$0xff]  ;;  %v522_v45 = vld [vmem:[%s13982_s5 + $0x30] sm:$0xff]  ;;  %s18730_s6 = sld [smem:[#allocation25_spill]]  ;;  %s18731_s12 = sld [smem:[#allocation32_spill]] }
  0xca   :  { %471 = vst.msk [vmem:[#allocation2 + $0x78] sm:$0xff] %vm455_vm2, %v18599_v1  ;;  %472 = vst.msk [vmem:[#allocation2 + $0x80] sm:$0xff] %vm455_vm2, %v18599_v1  ;;  %12359 = vmatprep.subr.bf16.mxu1 %v18597_v0  ;;  %v523_v46 = vld [vmem:[%s13982_s5 + $0x38] sm:$0xff]  ;;  %v524_v49 = vld [vmem:[%s13982_s5 + $0x40] sm:$0xff]  ;;  %s18732_s18 = sld [smem:[#allocation27_spill]]  ;;  %s18738_s22 = sld [smem:[#allocation30_spill]] }
  0xcb   :  { %473 = vst.msk [vmem:[#allocation2 + $0x88] sm:$0xff] %vm455_vm2, %v18599_v1  ;;  %474 = vst.msk [vmem:[#allocation2 + $0x90] sm:$0xff] %vm455_vm2, %v18599_v1  ;;  %v525_v53 = vld [vmem:[%s13982_s5 + $0x48] sm:$0xff]  ;;  %v526_v54 = vld [vmem:[%s13982_s5 + $0x50] sm:$0xff]  ;;  %s18740_s23 = sld [smem:[#allocation28_spill]]  ;;  %s18742_s26 = sld [smem:[#allocation29_spill]] }
  0xcc   :  { %12349 = vmatpush3.bf16.msra.mxu0 %v12348_v11  ;;  %475 = vst.msk [vmem:[#allocation2 + $0x98] sm:$0xff] %vm455_vm2, %v18599_v1  ;;  %476 = vst.msk [vmem:[#allocation2 + $0xa0] sm:$0xff] %vm455_vm2, %v18599_v1  ;;  %v527_v59 = vld [vmem:[%s13982_s5 + $0x58] sm:$0xff]  ;;  %v528_v60 = vld [vmem:[%s13982_s5 + $0x60] sm:$0xff]  ;;  %s18756_s20 = sld [smem:[#allocation31_spill]]  ;;  %s18757_s28 = sld [smem:[#allocation33_spill]] }
  0xcd   :  { %12350 = vmatprep.subr.bf16.mxu0 %v18597_v0  ;;  %477 = vst.msk [vmem:[#allocation2 + $0xa8] sm:$0xff] %vm455_vm2, %v18599_v1  ;;  %478 = vst.msk [vmem:[#allocation2 + $0xb0] sm:$0xff] %vm455_vm2, %v18599_v1  ;;  %12361 = vmatpush3.bf16.msra.mxu1 %v14400_v33  ;;  %v529_v2 = vld [vmem:[%s13982_s5 + $0x68] sm:$0xff]  ;;  %v530_v4 = vld [vmem:[%s13982_s5 + $0x70] sm:$0xff]  ;;  %s13971_s1 = smov 8   ;;  %vm5354_vm6 = vcmask 64512  }
  0xce   :  { %479 = vst.msk [vmem:[#allocation2 + $0xb8] sm:$0xff] %vm455_vm2, %v18599_v1  ;;  %480 = vst.msk [vmem:[#allocation2 + $0xc0] sm:$0xff] %vm455_vm2, %v18599_v1  ;;  %s18788_s0 = sld [smem:[#allocation35_spill]]  ;;  %s18806_s13 = sld [smem:[#allocation38_spill]] }
  0xcf   :  { %481 = vst.msk [vmem:[#allocation2 + $0xc8] sm:$0xff] %vm455_vm2, %v18599_v1  ;;  %482 = vst.msk [vmem:[#allocation2 + $0xd0] sm:$0xff] %vm455_vm2, %v18599_v1  ;;  %s18808_s2 = sld [smem:[#allocation36_spill]]  ;;  %s18810_s7 = sld [smem:[#allocation37_spill]] }
  0xd0   :  { %483 = vst.msk [vmem:[#allocation2 + $0xd8] sm:$0xff] %vm455_vm2, %v18599_v1  ;;  %484 = vst.msk [vmem:[#allocation2 + $0xe0] sm:$0xff] %vm455_vm2, %v18599_v1  ;;  %s18811_s10 = sld [smem:[#allocation40_spill]]  ;;  %s18812_s11 = sld [smem:[#allocation39_spill]] }
  0xd1   :  { %485 = vst.msk [vmem:[#allocation2 + $0xe8] sm:$0xff] %vm455_vm2, %v18599_v1  ;;  %486 = vst.msk [vmem:[#allocation2 + $0xf0] sm:$0xff] %vm455_vm2, %v18599_v1  ;;  %s18813_s15 = sld [smem:[#allocation46_spill]]  ;;  %s18814_s4 = sld [smem:[#allocation20_spill]] }
  0xd2   :  { %487 = vst.msk [vmem:[#allocation2 + $0xf8] sm:$0xff] %vm455_vm2, %v18599_v1  ;;  %488 = vst.msk [vmem:[#allocation2 + $0x100] sm:$0xff] %vm455_vm2, %v18599_v1  ;;  %s18816_s27 = sld [smem:[#allocation41_spill]]  ;;  %s18817_s16 = sld [smem:[#allocation44_spill]] }
  0xd3   :  { %489 = vst.msk [vmem:[#allocation2 + $0x108] sm:$0xff] %vm455_vm2, %v18599_v1  ;;  %490 = vst.msk [vmem:[#allocation2 + $0x110] sm:$0xff] %vm455_vm2, %v18599_v1 }
  0xd4   :  { %491 = vst.msk [vmem:[#allocation2 + $0x118] sm:$0xff] %vm455_vm2, %v18599_v1  ;;  %492 = vst.msk [vmem:[#allocation2 + $0x120] sm:$0xff] %vm455_vm2, %v18599_v1 }
  0xd5   :  { %493 = vst.msk [vmem:[#allocation2 + $0x128] sm:$0xff] %vm455_vm2, %v18599_v1  ;;  %494 = vst.msk [vmem:[#allocation2 + $0x130] sm:$0xff] %vm455_vm2, %v18599_v1 }
  0xd6   :  { %495 = vst.msk [vmem:[#allocation2 + $0x138] sm:$0xff] %vm455_vm2, %v18599_v1  ;;  %496 = vst.msk [vmem:[#allocation2 + $0x140] sm:$0xff] %vm455_vm2, %v18599_v1 }
  0xd7   :  { %497 = vst.msk [vmem:[#allocation2 + $0x148] sm:$0xff] %vm455_vm2, %v18599_v1  ;;  %498 = vst.msk [vmem:[#allocation2 + $0x150] sm:$0xff] %vm455_vm2, %v18599_v1 }
  0xd8   :  { %499 = vst.msk [vmem:[#allocation2 + $0x158] sm:$0xff] %vm455_vm2, %v18599_v1  ;;  %500 = vst.msk [vmem:[#allocation2 + $0x160] sm:$0xff] %vm455_vm2, %v18599_v1 }
  0xd9   :  { %501 = vst.msk [vmem:[#allocation2 + $0x168] sm:$0xff] %vm455_vm2, %v18599_v1  ;;  %502 = vst.msk [vmem:[#allocation2 + $0x170] sm:$0xff] %vm455_vm2, %v18599_v1 }
  0xda   :  { %503 = vst.msk [vmem:[#allocation2 + $0x178] sm:$0xff] %vm455_vm2, %v18599_v1  ;;  %504 = vst.msk [vmem:[#allocation2 + $0x180] sm:$0xff] %vm455_vm2, %v18599_v1 }
  0xdb   :  { %505 = vst.msk [vmem:[#allocation2 + $0x188] sm:$0xff] %vm455_vm2, %v18599_v1  ;;  %506 = vst.msk [vmem:[#allocation2 + $0x190] sm:$0xff] %vm455_vm2, %v18599_v1 }
  0xdc   :  { %507 = vst.msk [vmem:[#allocation2 + $0x198] sm:$0xff] %vm455_vm2, %v18599_v1  ;;  %508 = vst.msk [vmem:[#allocation2 + $0x1a0] sm:$0xff] %vm455_vm2, %v18599_v1 }
  0xdd   :  { %509 = vst.msk [vmem:[#allocation2 + $0x1a8] sm:$0xff] %vm455_vm2, %v18599_v1  ;;  %510 = vst.msk [vmem:[#allocation2 + $0x1b0] sm:$0xff] %vm455_vm2, %v18599_v1 }
  0xde   :  { %511 = vst.msk [vmem:[#allocation2 + $0x1b8] sm:$0xff] %vm455_vm2, %v18599_v1  ;;  %512 = vst.msk [vmem:[#allocation2 + $0x1c0] sm:$0xff] %vm455_vm2, %v18599_v1 }
  0xdf   :  { %513 = vst.msk [vmem:[#allocation2 + $0x1c8] sm:$0xff] %vm455_vm2, %v18599_v1  ;;  %514 = vst.msk [vmem:[#allocation2 + $0x1d0] sm:$0xff] %vm455_vm2, %v18599_v1 }
  0xe0   :  { %515 = vst.msk [vmem:[#allocation2 + $0x1d8] sm:$0xff] %vm455_vm2, %v18599_v1  ;;  %18714 = vst [vmem:[#allocation50_spill] sm:$0xff] %v14387_v22 }
  0xe1   :  { %18715 = vst [vmem:[#allocation51_spill] sm:$0xff] %v14392_v29  ;;  %18716 = vst [vmem:[#allocation52_spill] sm:$0xff] %v14396_v32 }
  0xe2   :  { %18717 = vst [vmem:[#allocation53_spill] sm:$0xff] %v14400_v33 }
 0x19a   :  { %v609_v13 = vpop.f32.mrb[0].mxu0 }
 0x19b   :  { %v610_v14 = vadd.f32 %v10575_v12, %v609_v13  ;;  %v11517_v15 = vpop.f32.mrb[1].mxu0 }
 0x19d   :  { %11527 = vmatmul.mubr.msk.f32.vlgmr.msra.gmra.mrb[2].mxu0 %vm455_vm2, %v610_v14  ;;  %v531_v14 = vld [vmem:[%s13982_s5 + $0x78] sm:$0xff]  ;;  %s18723_s5 = sld [smem:[#allocation21_spill]] }
 0x19e   :  { %11537 = vmatprep.mubr.msk.f32.mxu0 %vm13964_vm0, %v18599_v1  ;;  %12352 = vmatpush3.bf16.msra.mxu0 %v14392_v29 }
 0x19f   :  { %12353 = vmatprep.subr.bf16.mxu0 %v18597_v0 }
 0x1a2   :  { %12355 = vmatpush3.bf16.msra.mxu0 %v14400_v33 }
 0x270   :  { %v688_v23 = vpop.f32.mrb[2].mxu0 }
 0x271   :  { %v689_v24 = vadd.f32 %v10577_v21, %v688_v23  ;;  %v11528_v25 = vpop.f32.mrb[3].mxu0 }
 0x273   :  { %v699_v31 = vrot.slane %v689_v24, %v14387_v22 }
 0x275   :  { %v700_v34 = vcombine.high %v699_v31, %v699_v31  ;;  %v707_v35 = vrot.slane %v699_v31, %v14387_v22 }
 0x277   :  { %v714_v36 = vrot.slane %v700_v34, %v14387_v22  ;;  %v718_v37 = vrot.slane %v707_v35, %v14396_v32 }
 0x279   :  { %741 = vrot.lane.b32.xlu0 %v718_v37, %s13967_s9  ;;  %v722_v38 = vrot.slane %v714_v36, %v14396_v32  ;;  %v725_v47 = vmul.f32 %v718_v37, %v516_v39  ;;  %v726_v48 = vmul.f32 %v718_v37, %v517_v40  ;;  %v727_v51 = vmul.f32 %v718_v37, %v518_v41 }
 0x27a   :  { %v728_v52 = vmul.f32 %v718_v37, %v519_v42  ;;  %v729_v55 = vmul.f32 %v718_v37, %v520_v43  ;;  %v730_v56 = vmul.f32 %v718_v37, %v521_v44  ;;  %v731_v61 = vmul.f32 %v718_v37, %v522_v45 }
 0x27b   :  { %v732_v62 = vmul.f32 %v718_v37, %v523_v46  ;;  %v733_v3 = vmul.f32 %v722_v38, %v524_v49  ;;  %v734_v5 = vmul.f32 %v722_v38, %v525_v53  ;;  %v735_v6 = vmul.f32 %v722_v38, %v526_v54 }
 0x27c   :  { %v736_v11 = vmul.f32 %v722_v38, %v527_v59  ;;  %v737_v12 = vmul.f32 %v722_v38, %v528_v60  ;;  %v738_v15 = vmul.f32 %v722_v38, %v529_v2  ;;  %v739_v21 = vmul.f32 %v722_v38, %v530_v4 }
 0x27d   :  { %743 = vrot.lane.b32.xlu0 %v722_v38, %s13967_s9  ;;  %v740_v30 = vmul.f32 %v722_v38, %v531_v14 }
 0x2eb   :  { %v742_v50 = vpop.permute.xlu0 %741 }
 0x2ec   :  { %v14423_v57 = vadd.f32 %v742_v50, %v725_v47  ;;  %v14425_v58 = vadd.f32 %v742_v50, %v726_v48  ;;  %v14429_v63 = vadd.f32 %v742_v50, %v727_v51  ;;  %v14437_v9 = vadd.f32 %v742_v50, %v728_v52 }
 0x2ed   :  { %v14446_v19 = vadd.f32 %v742_v50, %v729_v55  ;;  %v14448_v20 = vadd.f32 %v742_v50, %v730_v56  ;;  %v14458_v28 = vadd.f32 %v742_v50, %v731_v61  ;;  %v14462_v35 = vadd.f32 %v742_v50, %v732_v62 }
 0x2ee   :  { %v763_v7 = vsel %vm455_vm2, %v14423_v57, 0.0  ;;  %v764_v8 = vsel %vm455_vm2, %v14425_v58, 0.0  ;;  %v766_v23 = vsel %vm455_vm2, %v14429_v63, 0.0  ;;  %v768_v31 = vsel %vm455_vm2, %v14437_v9, 0.0 }
 0x2ef   :  { %v744_v10 = vpop.permute.xlu0 %743  ;;  %v765_v13 = vadd.f32 %v764_v8, %v763_v7  ;;  %v770_v41 = vsel %vm455_vm2, %v14446_v19, 0.0  ;;  %v772_v38 = vsel %vm455_vm2, %v14448_v20, 0.0  ;;  %v805_v45 = vmul.f32 %v14423_v57, %v14423_v57 }
 0x2f0   :  { %v14440_v16 = vadd.f32 %v744_v10, %v733_v3  ;;  %v14442_v17 = vadd.f32 %v744_v10, %v734_v5  ;;  %v14444_v18 = vadd.f32 %v744_v10, %v735_v6  ;;  %v14452_v24 = vadd.f32 %v744_v10, %v736_v11 }
 0x2f1   :  { %v767_v25 = vadd.f32 %v766_v23, %v765_v13  ;;  %v14464_v36 = vadd.f32 %v744_v10, %v737_v12  ;;  %v14468_v40 = vadd.f32 %v744_v10, %v738_v15  ;;  %v806_v46 = vmul.f32 %v14425_v58, %v14425_v58 }
 0x2f2   :  { %18718 = vst [vmem:[#allocation54_spill] sm:$0xff] %v14452_v24  ;;  %v784_v26 = vsel %vm455_vm2, %v14440_v16, 0.0  ;;  %v785_v27 = vsel %vm455_vm2, %v14442_v17, 0.0  ;;  %v787_v39 = vsel %vm455_vm2, %v14444_v18, 0.0  ;;  %v789_v44 = vsel %vm455_vm2, %v14452_v24, 0.0 }
 0x2f3   :  { %v786_v34 = vadd.f32 %v785_v27, %v784_v26  ;;  %18719 = vst [vmem:[#allocation55_spill] sm:$0xff] %v14464_v36  ;;  %v769_v37 = vadd.f32 %v768_v31, %v767_v25  ;;  %18720 = vst [vmem:[#allocation56_spill] sm:$0xff] %v14468_v40  ;;  %v14480_v47 = vadd.f32 %v744_v10, %v739_v21  ;;  %v774_v49 = vsel %vm455_vm2, %v14458_v28, 0.0 }
 0x2f4   :  { %v14482_v48 = vadd.f32 %v744_v10, %v740_v30  ;;  %v776_v52 = vsel %vm455_vm2, %v14462_v35, 0.0  ;;  %v791_v53 = vsel %vm455_vm2, %v14464_v36, 0.0  ;;  %v807_v54 = vmul.f32 %v14429_v63, %v14429_v63 }
 0x2f5   :  { %v788_v42 = vadd.f32 %v787_v39, %v786_v34  ;;  %v771_v43 = vadd.f32 %v770_v41, %v769_v37  ;;  %18721 = vst [vmem:[#allocation57_spill] sm:$0xff] %v14480_v47  ;;  %v793_v56 = vsel %vm455_vm2, %v14468_v40, 0.0  ;;  %v808_v59 = vmul.f32 %v14437_v9, %v14437_v9 }
 0x2f6   :  { %18722 = vst [vmem:[#allocation58_spill] sm:$0xff] %v14482_v48  ;;  %v813_v60 = vmul.f32 %v14440_v16, %v14440_v16  ;;  %v814_v62 = vmul.f32 %v14442_v17, %v14442_v17  ;;  %v821_v2 = vsel %vm455_vm2, %v805_v45, 0.0  ;;  %v822_v3 = vsel %vm455_vm2, %v806_v46, 0.0 }
 0x2f7   :  { %v790_v50 = vadd.f32 %v789_v44, %v788_v42  ;;  %v773_v51 = vadd.f32 %v772_v38, %v771_v43  ;;  %v795_v5 = vsel %vm455_vm2, %v14480_v47, 0.0  ;;  %v797_v6 = vsel %vm455_vm2, %v14482_v48, 0.0 }
 0x2f8   :  { %v823_v7 = vadd.f32 %v822_v3, %v821_v2  ;;  %v809_v10 = vmul.f32 %v14446_v19, %v14446_v19  ;;  %v815_v11 = vmul.f32 %v14444_v18, %v14444_v18  ;;  %v824_v12 = vsel %vm455_vm2, %v807_v54, 0.0 }
 0x2f9   :  { %v792_v55 = vadd.f32 %v791_v53, %v790_v50  ;;  %v775_v61 = vadd.f32 %v774_v49, %v773_v51  ;;  %v810_v14 = vmul.f32 %v14448_v20, %v14448_v20  ;;  %v842_v21 = vsel %vm455_vm2, %v813_v60, 0.0 }
 0x2fa   :  { %v825_v15 = vadd.f32 %v824_v12, %v823_v7  ;;  %v816_v25 = vmul.f32 %v14452_v24, %v14452_v24  ;;  %v826_v26 = vsel %vm455_vm2, %v808_v59, 0.0  ;;  %v843_v27 = vsel %vm455_vm2, %v814_v62, 0.0 }
 0x2fb   :  { %v794_v4 = vadd.f32 %v793_v56, %v792_v55  ;;  %v777_v8 = vadd.f32 %v776_v52, %v775_v61  ;;  %v811_v31 = vmul.f32 %v14458_v28, %v14458_v28  ;;  %v844_v37 = vadd.f32 %v843_v27, %v842_v21 }
 0x2fc   :  { %v827_v34 = vadd.f32 %v826_v26, %v825_v15  ;;  %v817_v41 = vmul.f32 %v14464_v36, %v14464_v36  ;;  %v828_v38 = vsel %vm455_vm2, %v809_v10, 0.0  ;;  %v845_v42 = vsel %vm455_vm2, %v815_v11, 0.0 }
 0x2fd   :  { %v796_v13 = vadd.f32 %v795_v5, %v794_v4  ;;  %v778_v23 = vrot.slane %v777_v8, 4  ;;  %v812_v44 = vmul.f32 %v14462_v35, %v14462_v35  ;;  %v846_v46 = vadd.f32 %v845_v42, %v844_v37 }
 0x2fe   :  { %v829_v45 = vadd.f32 %v828_v38, %v827_v34  ;;  %v818_v50 = vmul.f32 %v14468_v40, %v14468_v40  ;;  %v830_v51 = vsel %vm455_vm2, %v810_v14, 0.0  ;;  %v847_v52 = vsel %vm455_vm2, %v816_v25, 0.0 }
 0x2ff   :  { %v798_v30 = vadd.f32 %v797_v6, %v796_v13  ;;  %v779_v39 = vadd.f32 %v778_v23, %v777_v8  ;;  %v848_v55 = vadd.f32 %v847_v52, %v846_v46  ;;  %v819_v59 = vmul.f32 %v14480_v47, %v14480_v47 }
 0x300   :  { %v831_v54 = vadd.f32 %v830_v51, %v829_v45  ;;  %v832_v60 = vsel %vm455_vm2, %v811_v31, 0.0  ;;  %v849_v61 = vsel %vm455_vm2, %v817_v41, 0.0  ;;  %v820_v4 = vmul.f32 %v14482_v48, %v14482_v48  ;;  %v309_v51 = vld [vmem:[%s14027_s14 + $0x110] sm:$0xff] }
 0x301   :  { %v799_v43 = vrot.slane %v798_v30, 4  ;;  %v780_v49 = vrot.slane %v779_v39, 2  ;;  %v850_v3 = vadd.f32 %v849_v61, %v848_v55  ;;  %v834_v5 = vsel %vm455_vm2, %v812_v44, 0.0 }
 0x302   :  { %v833_v2 = vadd.f32 %v832_v60, %v831_v54  ;;  %v851_v6 = vsel %vm455_vm2, %v818_v50, 0.0  ;;  %v853_v12 = vsel %vm455_vm2, %v819_v59, 0.0  ;;  %v855_v21 = vsel %vm455_vm2, %v820_v4, 0.0  ;;  %v308_v50 = vld [vmem:[%s14027_s14 + $0x108] sm:$0xff] }
 0x303   :  { %v800_v53 = vadd.f32 %v799_v43, %v798_v30  ;;  %v781_v56 = vadd.f32 %v780_v49, %v779_v39  ;;  %v852_v11 = vadd.f32 %v851_v6, %v850_v3  ;;  %v307_v49 = vld [vmem:[%s14027_s14 + $0x100] sm:$0xff] }
 0x304   :  { %v835_v10 = vadd.f32 %v834_v5, %v833_v2  ;;  %v12394_v52 = vpack.c.bf16 %v308_v50, %v307_v49 }
 0x305   :  { %v801_v62 = vrot.slane %v800_v53, 2  ;;  %v782_v7 = vrot.slane %v781_v56, 1  ;;  %v854_v15 = vadd.f32 %v853_v12, %v852_v11 }
 0x306   :  { %v836_v14 = vrot.slane %v835_v10, 4  ;;  %12395 = vmatprep.subr.bf16.mxu1 %v12394_v52 }
 0x307   :  { %v802_v8 = vadd.f32 %v801_v62, %v800_v53  ;;  %v783_v23 = vadd.f32 %v782_v7, %v781_v56  ;;  %v856_v27 = vadd.f32 %v855_v21, %v854_v15  ;;  %v310_v53 = vld [vmem:[%s14027_s14 + $0x118] sm:$0xff] }
 0x308   :  { %v837_v26 = vadd.f32 %v836_v14, %v835_v10  ;;  %v12398_v54 = vpack.c.bf16 %v310_v53, %v309_v51  ;;  %v14587_v53 = vld [vmem:[%s18724_s17] ss:$0 sm:$0xff]  ;;  %s18828_s17 = sld [smem:[#allocation43_spill]] }
 0x309   :  { %v803_v13 = vrot.slane %v802_v8, 1  ;;  %v857_v34 = vrot.slane %v856_v27, 4 }
 0x30a   :  { %v838_v31 = vrot.slane %v837_v26, 2 }
 0x30b   :  { %v804_v25 = vadd.f32 %v803_v13, %v802_v8  ;;  %v858_v39 = vadd.f32 %v857_v34, %v856_v27 }
 0x30c   :  { %v839_v37 = vadd.f32 %v838_v31, %v837_v26 }
 0x30d   :  { %v866_v30 = vsel %vm865_vm3, %v804_v25, %v783_v23  ;;  %v859_v41 = vrot.slane %v858_v39, 2 }
 0x30e   :  { %11538 = vmatmul.mubr.msk.f32.vlgmr.msra.gmra.mrb[4].mxu0 %vm455_vm2, %v866_v30  ;;  %v840_v38 = vrot.slane %v839_v37, 1 }
 0x30f   :  { %v860_v42 = vadd.f32 %v859_v41, %v858_v39 }
 0x310   :  { %v841_v44 = vadd.f32 %v840_v38, %v839_v37 }
 0x311   :  { %v861_v43 = vrot.slane %v860_v42, 1 }
 0x313   :  { %v862_v45 = vadd.f32 %v861_v43, %v860_v42 }
 0x315   :  { %v941_v46 = vsel %vm865_vm3, %v862_v45, %v841_v44 }
 0x316   :  { %11549 = vmatmul.mubr.msk.f32.vlgmr.msra.gmra.mrb[0].mxu1 %vm455_vm2, %v941_v46  ;;  %v14581_v46 = vld [vmem:[%s18723_s5] ss:$0 sm:$0xff]  ;;  %s18827_s5 = sld [smem:[#allocation42_spill]] }
 0x317   :  { %12397 = vmatpush3.bf16.msra.mxu1 %v12394_v52 }
 0x318   :  { %12399 = vmatprep.subr.bf16.mxu1 %v12398_v54 }
 0x31b   :  { %12401 = vmatpush3.bf16.msra.mxu1 %v12398_v54 }
 0x31c   :  { %12402 = vmatprep.subr.bf16.mxu1 %v18597_v0 }
 0x3e1   :  { %v935_v55 = vpop.f32.mrb[4].mxu0 }
 0x3e2   :  { %v11539_v56 = vpop.f32.mrb[5].mxu0  ;;  %v1015_v59 = vmul.f32 0.00390625, %v935_v55 }
 0x3e4   :  { %v1017_v60 = vmul.f32 %v1015_v59, %v1015_v59  ;;  %v1028_v5 = vrot.slane %v1015_v59, %v14387_v22 }
 0x3e6   :  { %v1029_v6 = vcombine.high %v1028_v5, %v1028_v5  ;;  %v1036_v7 = vrot.slane %v1028_v5, %v14387_v22 }
 0x3e8   :  { %v1043_v8 = vrot.slane %v1029_v6, %v14387_v22  ;;  %v1047_v10 = vrot.slane %v1036_v7, %v14396_v32 }
 0x3e9   :  { %v1010_v61 = vpop.f32.mrb[0].mxu1 }
 0x3ea   :  { %v1016_v62 = vmul.f32 0.00390625, %v1010_v61  ;;  %v11550_v2 = vpop.f32.mrb[1].mxu1  ;;  %v14554_v12 = vrot.slane %v1043_v8, %v14396_v32  ;;  %v1054_v14 = vsub.f32 %v14423_v57, %v1047_v10  ;;  %v1055_v15 = vsub.f32 %v14425_v58, %v1047_v10 }
 0x3eb   :  { %v1056_v21 = vsub.f32 %v14429_v63, %v1047_v10  ;;  %v1057_v23 = vsub.f32 %v14437_v9, %v1047_v10  ;;  %v1058_v27 = vsub.f32 %v14446_v19, %v1047_v10  ;;  %v1059_v30 = vsub.f32 %v14448_v20, %v1047_v10 }
 0x3ec   :  { %v1018_v3 = vsub.f32 %v1016_v62, %v1017_v60  ;;  %v1060_v31 = vsub.f32 %v14458_v28, %v1047_v10  ;;  %v1061_v34 = vsub.f32 %v14462_v35, %v1047_v10  ;;  %v1063_v37 = vsub.f32 %v14442_v17, %v14554_v12 }
 0x3ed   :  { %v1064_v39 = vsub.f32 %v14444_v18, %v14554_v12  ;;  %v1065_v42 = vsub.f32 %v14452_v24, %v14554_v12  ;;  %v1066_v43 = vsub.f32 %v14464_v36, %v14554_v12  ;;  %v1067_v44 = vsub.f32 %v14468_v40, %v14554_v12 }
 0x3ee   :  { %v1019_v4 = vadd.f32 1e-05, %v1018_v3  ;;  %v1068_v45 = vsub.f32 %v14480_v47, %v14554_v12 }
 0x3f0   :  { %13278 = vrsqrt.f32 %v1019_v4 }
 0x3fa   :  { %v13279_v11 = vpop.eup %13278 }
 0x3fb   :  { %v1077_v13 = vrot.slane %v13279_v11, %v14387_v22 }
 0x3fd   :  { %v1078_v25 = vcombine.high %v1077_v13, %v1077_v13  ;;  %v1085_v26 = vrot.slane %v1077_v13, %v14387_v22 }
 0x3ff   :  { %v1092_v41 = vrot.slane %v1078_v25, %v14387_v22  ;;  %v1096_v38 = vrot.slane %v1085_v26, %v14396_v32 }
 0x401   :  { %v14584_v49 = vrot.slane %v1092_v41, %v14396_v32  ;;  %v1105_v50 = vmul.f32 %v1096_v38, %v1056_v21  ;;  %v1104_v51 = vmul.f32 %v1096_v38, %v1055_v15  ;;  %v1106_v52 = vmul.f32 %v1096_v38, %v1057_v23 }
 0x402   :  { %v1103_v54 = vmul.f32 %v1096_v38, %v1054_v14  ;;  %v1107_v55 = vmul.f32 %v1096_v38, %v1058_v27  ;;  %v1108_v56 = vmul.f32 %v1096_v38, %v1059_v30  ;;  %v1109_v59 = vmul.f32 %v1096_v38, %v1060_v31 }
 0x403   :  { %v1126_v60 = vmul.f32 %v14581_v46, %v1104_v51  ;;  %v1127_v61 = vmul.f32 %v14581_v46, %v1105_v50  ;;  %v1128_v62 = vmul.f32 %v14581_v46, %v1106_v52  ;;  %v1110_v2 = vmul.f32 %v1096_v38, %v1061_v34 }
 0x404   :  { %v1125_v3 = vmul.f32 %v14581_v46, %v1103_v54  ;;  %v1129_v4 = vmul.f32 %v14581_v46, %v1107_v55  ;;  %v1130_v5 = vmul.f32 %v14581_v46, %v1108_v56  ;;  %v1131_v6 = vmul.f32 %v14581_v46, %v1109_v59 }
 0x405   :  { %v14597_v7 = vadd.f32 %v14587_v53, %v1126_v60  ;;  %v14600_v8 = vadd.f32 %v14587_v53, %v1127_v61  ;;  %v14603_v10 = vadd.f32 %v14587_v53, %v1128_v62  ;;  %v1132_v11 = vmul.f32 %v14581_v46, %v1110_v2 }
 0x406   :  { %v14607_v13 = vadd.f32 %v14587_v53, %v1125_v3  ;;  %v14610_v14 = vadd.f32 %v14587_v53, %v1129_v4  ;;  %v14613_v15 = vadd.f32 %v14587_v53, %v1130_v5  ;;  %v14616_v21 = vadd.f32 %v14587_v53, %v1131_v6 }
 0x407   :  { %v1164_v23 = vsub.f32 0.0, %v14597_v7  ;;  %v1165_v25 = vsub.f32 0.0, %v14600_v8  ;;  %v1166_v26 = vsub.f32 0.0, %v14603_v10  ;;  %v14622_v27 = vadd.f32 %v14587_v53, %v1132_v11 }
 0x408   :  { %v1163_v30 = vsub.f32 0.0, %v14607_v13  ;;  %v1167_v31 = vsub.f32 0.0, %v14610_v14  ;;  %v1168_v34 = vsub.f32 0.0, %v14613_v15  ;;  %v1169_v41 = vsub.f32 0.0, %v14616_v21 }
 0x409   :  { %v1181_v38 = vmul.f32 1.442695, %v1164_v23  ;;  %v1183_v50 = vmul.f32 1.442695, %v1165_v25  ;;  %v1185_v51 = vmul.f32 1.442695, %v1166_v26  ;;  %v1112_v52 = vmul.f32 %v14584_v49, %v1063_v37 }
 0x40a   :  { %v1179_v54 = vmul.f32 1.442695, %v1163_v30  ;;  %v1187_v55 = vmul.f32 1.442695, %v1167_v31  ;;  %v1189_v56 = vmul.f32 1.442695, %v1168_v34  ;;  %v1113_v59 = vmul.f32 %v14584_v49, %v1064_v39 }
 0x40b   :  { %13280 = vpow2.f32 %v1181_v38  ;;  %v1191_v60 = vmul.f32 1.442695, %v1169_v41  ;;  %v1170_v61 = vsub.f32 0.0, %v14622_v27  ;;  %v1134_v62 = vmul.f32 %v14581_v46, %v1112_v52  ;;  %v292_v52 = vld [vmem:[%s14027_s14 + $0x88] sm:$0xff] }
 0x40c   :  { %13282 = vpow2.f32 %v1183_v50  ;;  %v1135_v2 = vmul.f32 %v14581_v46, %v1113_v59  ;;  %v1114_v3 = vmul.f32 %v14584_v49, %v1065_v42  ;;  %v1115_v4 = vmul.f32 %v14584_v49, %v1066_v43 }
 0x40d   :  { %13284 = vpow2.f32 %v1185_v51  ;;  %v1193_v37 = vmul.f32 1.442695, %v1170_v61  ;;  %v14636_v5 = vadd.f32 %v14587_v53, %v1134_v62  ;;  %v1116_v39 = vmul.f32 %v14584_v49, %v1067_v44  ;;  %v291_v51 = vld [vmem:[%s14027_s14 + $0x80] sm:$0xff] }
 0x40e   :  { %13286 = vpow2.f32 %v1179_v54  ;;  %v14640_v6 = vadd.f32 %v14587_v53, %v1135_v2  ;;  %v1136_v11 = vmul.f32 %v14581_v46, %v1114_v3  ;;  %v1137_v23 = vmul.f32 %v14581_v46, %v1115_v4  ;;  %v293_v4 = vld [vmem:[%s14027_s14 + $0x90] sm:$0xff] }
 0x40f   :  { %13288 = vpow2.f32 %v1187_v55  ;;  %v1172_v42 = vsub.f32 0.0, %v14636_v5  ;;  %v1138_v43 = vmul.f32 %v14581_v46, %v1116_v39  ;;  %v1117_v25 = vmul.f32 %v14584_v49, %v1068_v45 }
 0x410   :  { %13290 = vpow2.f32 %v1189_v56  ;;  %v1173_v44 = vsub.f32 0.0, %v14640_v6  ;;  %v14649_v26 = vadd.f32 %v14587_v53, %v1136_v11  ;;  %v14652_v30 = vadd.f32 %v14587_v53, %v1137_v23  ;;  %v275_v56 = vld [vmem:[%s14027_s14] sm:$0xff] }
 0x411   :  { %v1062_v31 = vsub.f32 %v14440_v16, %v14554_v12  ;;  %v1069_v34 = vsub.f32 %v14482_v48, %v14554_v12  ;;  %13292 = vpow2.f32 %v1191_v60  ;;  %v1197_v41 = vmul.f32 1.442695, %v1172_v42  ;;  %v276_v12 = vld [vmem:[%s14027_s14 + $0x8] sm:$0xff] }
 0x412   :  { %13294 = vpow2.f32 %v1193_v37  ;;  %v1199_v45 = vmul.f32 1.442695, %v1173_v44  ;;  %v1174_v38 = vsub.f32 0.0, %v14649_v26  ;;  %v1175_v50 = vsub.f32 0.0, %v14652_v30  ;;  %v294_v37 = vld [vmem:[%s14027_s14 + $0x98] sm:$0xff] }
 0x413   :  { %13296 = vpow2.f32 %v1197_v41  ;;  %v14663_v54 = vadd.f32 %v14587_v53, %v1138_v43  ;;  %v1118_v55 = vmul.f32 %v14584_v49, %v1069_v34  ;;  %v1111_v61 = vmul.f32 %v14584_v49, %v1062_v31  ;;  %v277_v43 = vld [vmem:[%s14027_s14 + $0x10] sm:$0xff]  ;;  %v278_v44 = vld [vmem:[%s14027_s14 + $0x18] sm:$0xff]  ;;  %v296_v31 = vld [vmem:[%s14027_s14 + $0xa8] sm:$0xff] }
 0x414   :  { %13298 = vpow2.f32 %v1199_v45  ;;  %v1201_v59 = vmul.f32 1.442695, %v1174_v38  ;;  %v1203_v60 = vmul.f32 1.442695, %v1175_v50  ;;  %v1139_v2 = vmul.f32 %v14581_v46, %v1117_v25  ;;  %v295_v25 = vld [vmem:[%s14027_s14 + $0xa0] sm:$0xff] }
 0x415   :  { %v13281_v62 = vpop.eup %13280  ;;  %v12362_v3 = vpack.c.bf16 %v292_v52, %v291_v51  ;;  %v1140_v23 = vmul.f32 %v14581_v46, %v1118_v55  ;;  %v12364_v42 = vpack.c.bf16 %v276_v12, %v275_v56  ;;  %v1176_v49 = vsub.f32 0.0, %v14663_v54 }
 0x416   :  { %v13283_v39 = vpop.eup %13282  ;;  %v1212_v11 = vadd.f32 1.0, %v13281_v62  ;;  %13300 = vpow2.f32 %v1201_v59  ;;  %v1133_v50 = vmul.f32 %v14581_v46, %v1111_v61  ;;  %v12366_v51 = vpack.c.bf16 %v294_v37, %v293_v4  ;;  %v279_v59 = vld [vmem:[%s14027_s14 + $0x20] sm:$0xff]  ;;  %v297_v61 = vld [vmem:[%s14027_s14 + $0xb0] sm:$0xff] }
 0x417   :  { %v13285_v34 = vpop.eup %13284  ;;  %v1213_v41 = vadd.f32 1.0, %v13283_v39  ;;  %13302 = vpow2.f32 %v1203_v60  ;;  %12363 = vmatprep.subr.bf16.mxu0 %v12362_v3  ;;  %v14680_v56 = vadd.f32 %v14587_v53, %v1139_v2  ;;  %v12368_v12 = vpack.c.bf16 %v278_v44, %v277_v43  ;;  %v280_v60 = vld [vmem:[%s14027_s14 + $0x28] sm:$0xff] }
 0x418   :  { %v13287_v45 = vpop.eup %13286  ;;  %13304 = vrcp.f32 %v1212_v11  ;;  %v1214_v38 = vadd.f32 1.0, %v13285_v34  ;;  %12365 = vmatpush3.bf16.msra.mxu0 %v12364_v42  ;;  %v14685_v39 = vadd.f32 %v14587_v53, %v1140_v23  ;;  %v12370_v46 = vpack.c.bf16 %v296_v31, %v295_v25  ;;  %v298_v11 = vld [vmem:[%s14027_s14 + $0xb8] sm:$0xff]  ;;  %v281_v31 = vld [vmem:[%s14027_s14 + $0x30] sm:$0xff] }
 0x419   :  { %v13289_v52 = vpop.eup %13288  ;;  %13306 = vrcp.f32 %v1213_v41  ;;  %v1211_v55 = vadd.f32 1.0, %v13287_v45  ;;  %12367 = vmatprep.subr.bf16.mxu0 %v12366_v51  ;;  %v14690_v43 = vadd.f32 %v14587_v53, %v1133_v50  ;;  %v12372_v23 = vpack.c.bf16 %v280_v60, %v279_v59  ;;  %v282_v45 = vld [vmem:[%s14027_s14 + $0x38] sm:$0xff]  ;;  %v299_v50 = vld [vmem:[%s14027_s14 + $0xc0] sm:$0xff] }
 0x41a   :  { %v13291_v62 = vpop.eup %13290  ;;  %13308 = vrcp.f32 %v1214_v38  ;;  %v1215_v3 = vadd.f32 1.0, %v13289_v52  ;;  %v1177_v41 = vsub.f32 0.0, %v14680_v56  ;;  %v12374_v25 = vpack.c.bf16 %v298_v11, %v297_v61  ;;  %v283_v11 = vld [vmem:[%s14027_s14 + $0x40] sm:$0xff] }
 0x41b   :  { %v13293_v4 = vpop.eup %13292  ;;  %13310 = vrcp.f32 %v1211_v55  ;;  %v1216_v37 = vadd.f32 1.0, %v13291_v62  ;;  %v1205_v52 = vmul.f32 1.442695, %v1176_v49  ;;  %v1178_v53 = vsub.f32 0.0, %v14685_v39  ;;  %v300_v55 = vld [vmem:[%s14027_s14 + $0xc8] sm:$0xff] }
 0x41c   :  { %v13295_v2 = vpop.eup %13294  ;;  %13312 = vrcp.f32 %v1215_v3  ;;  %v1217_v42 = vadd.f32 1.0, %v13293_v4  ;;  %12369 = vmatpush3.bf16.msra.mxu0 %v12368_v12  ;;  %v1171_v60 = vsub.f32 0.0, %v14690_v43  ;;  %v12376_v62 = vpack.c.bf16 %v282_v45, %v281_v31  ;;  %v284_v4 = vld [vmem:[%s14027_s14 + $0x48] sm:$0xff] }
 0x41d   :  { %v13297_v44 = vpop.eup %13296  ;;  %13314 = vrcp.f32 %v1216_v37  ;;  %v1218_v34 = vadd.f32 1.0, %v13295_v2  ;;  %12371 = vmatprep.subr.bf16.mxu0 %v12370_v46  ;;  %v1207_v49 = vmul.f32 1.442695, %v1177_v41  ;;  %v12378_v61 = vpack.c.bf16 %v300_v55, %v299_v50  ;;  %v285_v50 = vld [vmem:[%s14027_s14 + $0x50] sm:$0xff] }
 0x41e   :  { %v13299_v38 = vpop.eup %13298  ;;  %13316 = vrcp.f32 %v1217_v42  ;;  %v1220_v51 = vadd.f32 1.0, %v13297_v44  ;;  %v1209_v42 = vmul.f32 1.442695, %v1178_v53  ;;  %v301_v44 = vld [vmem:[%s14027_s14 + $0xd0] sm:$0xff]  ;;  %v1195_v41 = vmul.f32 1.442695, %v1171_v60 }
 0x41f   :  { %13318 = vrcp.f32 %v1218_v34  ;;  %v1221_v12 = vadd.f32 1.0, %v13299_v38  ;;  %v302_v34 = vld [vmem:[%s14027_s14 + $0xd8] sm:$0xff] }
 0x420   :  { %v13301_v59 = vpop.eup %13300  ;;  %13320 = vrcp.f32 %v1220_v51  ;;  %12373 = vmatpush3.bf16.msra.mxu0 %v12372_v23  ;;  %v12382_v53 = vpack.c.bf16 %v302_v34, %v301_v44 }
 0x421   :  { %v13303_v3 = vpop.eup %13302  ;;  %13322 = vrcp.f32 %v1221_v12  ;;  %v1222_v46 = vadd.f32 1.0, %v13301_v59  ;;  %12375 = vmatprep.subr.bf16.mxu0 %v12374_v25  ;;  %v12380_v25 = vpack.c.bf16 %v284_v4, %v283_v11  ;;  %v303_v12 = vld [vmem:[%s14027_s14 + $0xe0] sm:$0xff]  ;;  %v304_v59 = vld [vmem:[%s14027_s14 + $0xe8] sm:$0xff] }
 0x422   :  { %v13305_v37 = vpop.eup %13304  ;;  %v1223_v2 = vadd.f32 1.0, %v13303_v3  ;;  %13324 = vpow2.f32 %v1205_v52  ;;  %v287_v11 = vld [vmem:[%s14027_s14 + $0x60] sm:$0xff]  ;;  %v288_v4 = vld [vmem:[%s14027_s14 + $0x68] sm:$0xff] }
 0x423   :  { %v13307_v38 = vpop.eup %13306  ;;  %v1260_v23 = vmul.f32 %v13305_v37, %v14597_v7  ;;  %13326 = vrcp.f32 %v1222_v46  ;;  %v286_v7 = vld [vmem:[%s14027_s14 + $0x58] sm:$0xff] }
 0x424   :  { %v13309_v31 = vpop.eup %13308  ;;  %v1261_v45 = vmul.f32 %v13307_v38, %v14600_v8  ;;  %13328 = vrcp.f32 %v1223_v2  ;;  %12377 = vmatpush3.bf16.msra.mxu0 %v12376_v62  ;;  %v305_v2 = vld [vmem:[%s14027_s14 + $0xf0] sm:$0xff]  ;;  %v1308_v38 = vld [vmem:[#allocation2 + $0x8] sm:$0xff] }
 0x425   :  { %v13311_v51 = vpop.eup %13310  ;;  %1277 = vst.msk [vmem:[#allocation2 + $0x38] sm:$0xff] %vm455_vm2, %v1260_v23  ;;  %v1262_v52 = vmul.f32 %v13309_v31, %v14603_v10  ;;  %13330 = vpow2.f32 %v1207_v49  ;;  %12379 = vmatprep.subr.bf16.mxu0 %v12378_v61  ;;  %v12386_v61 = vpack.c.bf16 %v304_v59, %v303_v12  ;;  %v12388_v31 = vpack.c.bf16 %v288_v4, %v287_v11 }
 0x426   :  { %v13313_v55 = vpop.eup %13312  ;;  %1278 = vst.msk [vmem:[#allocation2 + $0x50] sm:$0xff] %vm455_vm2, %v1261_v45  ;;  %v1259_v8 = vmul.f32 %v13311_v51, %v14607_v13  ;;  %13332 = vpow2.f32 %v1209_v42  ;;  %v12384_v13 = vpack.c.bf16 %v286_v7, %v285_v50  ;;  %v289_v45 = vld [vmem:[%s14027_s14 + $0x70] sm:$0xff] }
 0x427   :  { %v13315_v60 = vpop.eup %13314  ;;  %1279 = vst.msk [vmem:[#allocation2 + $0x68] sm:$0xff] %vm455_vm2, %v1262_v52  ;;  %v1263_v10 = vmul.f32 %v13313_v55, %v14610_v14  ;;  %13334 = vpow2.f32 %v1195_v41  ;;  %v290_v52 = vld [vmem:[%s14027_s14 + $0x78] sm:$0xff] }
 0x428   :  { %v13317_v62 = vpop.eup %13316  ;;  %1276 = vst.msk [vmem:[#allocation2 + $0x20] sm:$0xff] %vm455_vm2, %v1259_v8  ;;  %v1264_v3 = vmul.f32 %v13315_v60, %v14613_v15  ;;  %12381 = vmatpush3.bf16.msra.mxu0 %v12380_v25  ;;  %v306_v15 = vld [vmem:[%s14027_s14 + $0xf8] sm:$0xff]  ;;  %s18726_s14 = sld [smem:[#allocation26_spill]] }
 0x429   :  { %v13319_v46 = vpop.eup %13318  ;;  %1280 = vst.msk [vmem:[#allocation2 + $0x80] sm:$0xff] %vm455_vm2, %v1263_v10  ;;  %v1265_v49 = vmul.f32 %v13317_v62, %v14616_v21  ;;  %12383 = vmatprep.subr.bf16.mxu0 %v12382_v53  ;;  %v12390_v51 = vpack.c.bf16 %v306_v15, %v305_v2  ;;  %v12392_v62 = vpack.c.bf16 %v290_v52, %v289_v45 }
 0x42a   :  { %v13321_v14 = vpop.eup %13320  ;;  %1281 = vst.msk [vmem:[#allocation2 + $0x98] sm:$0xff] %vm455_vm2, %v1264_v3  ;;  %v1266_v37 = vmul.f32 %v13319_v46, %v14622_v27  ;;  %v1324_v3 = vld [vmem:[#allocation2 + $0x9] sm:$0xff] }
 0x42b   :  { %v13323_v42 = vpop.eup %13322  ;;  %1282 = vst.msk [vmem:[#allocation2 + $0xb0] sm:$0xff] %vm455_vm2, %v1265_v49  ;;  %v1268_v44 = vmul.f32 %v13321_v14, %v14636_v5 }
 0x42c   :  { %v13325_v34 = vpop.eup %13324  ;;  %v14727_v21 = vld [vmem:[#allocation2 + $0x39] sm:$0xff]  ;;  %1283 = vst.msk [vmem:[#allocation2 + $0xc8] sm:$0xff] %vm455_vm2, %v1266_v37  ;;  %v1269_v23 = vmul.f32 %v13323_v42, %v14640_v6  ;;  %12385 = vmatpush3.bf16.msra.mxu0 %v12384_v13 }
 0x42d   :  { %v13327_v27 = vpop.eup %13326  ;;  %11559 = vmatprep.mubr.msk.f32.mxu1 %vm455_vm2, %v14727_v21  ;;  %v14734_v41 = vld [vmem:[#allocation2 + $0x51] sm:$0xff]  ;;  %1285 = vst.msk [vmem:[#allocation2 + $0x128] sm:$0xff] %vm455_vm2, %v1268_v44  ;;  %v1224_v5 = vadd.f32 1.0, %v13325_v34  ;;  %12387 = vmatprep.subr.bf16.mxu0 %v12386_v61 }
 0x42e   :  { %v14736_v25 = vld [vmem:[#allocation2 + $0x38] sm:$0xff]  ;;  %v13329_v53 = vpop.eup %13328  ;;  %11560 = vmatmul.mubr.msk.f32.vlgmr.msra.gmra.mrb[2].mxu1 %vm455_vm2, %v14734_v41  ;;  %v14742_v6 = vld [vmem:[#allocation2 + $0x69] sm:$0xff]  ;;  %1286 = vst.msk [vmem:[#allocation2 + $0x140] sm:$0xff] %vm455_vm2, %v1269_v23  ;;  %v1270_v50 = vmul.f32 %v13327_v27, %v14649_v26 }
 0x42f   :  { %v13331_v7 = vpop.eup %13330  ;;  %11562 = vmatprep.mubr.msk.f32.mxu1 %vm455_vm2, %v14742_v6  ;;  %v1372_v55 = vld [vmem:[#allocation2 + $0x21] sm:$0xff]  ;;  %v1271_v12 = vmul.f32 %v13329_v53, %v14652_v30  ;;  %v14754_v26 = vld [vmem:[#allocation2 + $0x37] sm:$0xff]  ;;  %v14756_v13 = vld [vmem:[#allocation2 + $0x4f] sm:$0xff]  ;;  %13336 = vrcp.f32 %v1224_v5  ;;  %12404 = vmatpush3.bf16.msra.mxu1 %v14392_v29  ;;  %v12828_v44 = vpack.i.bf16 %v14736_v25, %v14734_v41 }
 0x430   :  { %v14748_v8 = vld [vmem:[#allocation2 + $0x1f] sm:$0xff]  ;;  %v13333_v59 = vpop.eup %13332  ;;  %v12798_v60 = vpack.i.bf16 %v1308_v38, %v1372_v55  ;;  %1287 = vst.msk [vmem:[#allocation2 + $0x158] sm:$0xff] %vm455_vm2, %v1270_v50  ;;  %12389 = vmatpush3.bf16.msra.mxu0 %v12388_v31  ;;  %v1225_v46 = vadd.f32 1.0, %v13331_v7  ;;  %12405 = vmatprep.subr.bf16.mxu1 %v18597_v0  ;;  %v12803_v4 = vpack.i.bf16 %v1324_v3, %v14754_v26  ;;  %v14791_v23 = vld [vmem:[#allocation2 + $0x68] sm:$0xff]  ;;  %v14793_v31 = vld [vmem:[#allocation2 + $0x50] sm:$0xff] }
 0x431   :  { %v12808_v10 = vpack.i.bf16 %v14748_v8, %v14736_v25  ;;  %1288 = vst.msk [vmem:[#allocation2 + $0x170] sm:$0xff] %vm455_vm2, %v1271_v12  ;;  %12391 = vmatprep.subr.bf16.mxu0 %v12390_v51  ;;  %v13335_v30 = vpop.eup %13334  ;;  %v14762_v49 = vld [vmem:[#allocation2 + $0x81] sm:$0xff]  ;;  %v1226_v61 = vadd.f32 1.0, %v13333_v59  ;;  %v14766_v11 = vld [vmem:[#allocation2 + $0x99] sm:$0xff]  ;;  %v12818_v14 = vpack.i.bf16 %v1372_v55, %v14756_v13  ;;  %v12838_v5 = vpack.i.bf16 %v14756_v13, %v14791_v23 }
 0x432   :  { %12799 = vrot.lane.b32.xlu1 %v12798_v60, %s13968_s21  ;;  %11563 = vmatmul.mubr.msk.f32.gmra.mrb[4].mxu1 %vm455_vm2, %v14762_v49  ;;  %13338 = vrcp.f32 %v1225_v46  ;;  %v14773_v37 = vld [vmem:[#allocation2 + $0x20] sm:$0xff]  ;;  %v1219_v2 = vadd.f32 1.0, %v13335_v30  ;;  %v14778_v15 = vld [vmem:[#allocation2 + $0xb1] sm:$0xff]  ;;  %v12823_v51 = vpack.i.bf16 %v14754_v26, %v14793_v31 }
 0x433   :  { %12809 = vrot.lane.b32.xlu0 %v12808_v10, %s13967_s9  ;;  %11565 = vmatprep.mubr.msk.f32.mxu1 %vm455_vm2, %v14766_v11  ;;  %13340 = vrcp.f32 %v1226_v61  ;;  %v14782_v42 = vld [vmem:[#allocation2 + $0xc9] sm:$0xff]  ;;  %v12813_v34 = vpack.i.bf16 %v14773_v37, %v14727_v21  ;;  %v1428_v38 = vld [vmem:[#allocation2 + $0xe1] sm:$0xff]  ;;  %v14842_v46 = vld [vmem:[#allocation2 + $0x98] sm:$0xff] }
 0x434   :  { %12393 = vmatpush3.bf16.msra.mxu0 %v12392_v62  ;;  %12407 = vmatpush3.bf16.msra.mxu1 %v14400_v33  ;;  %13342 = vrcp.f32 %v1219_v2  ;;  %v14798_v27 = vld [vmem:[#allocation2 + $0x129] sm:$0xff]  ;;  %v14807_v50 = vld [vmem:[#allocation2 + $0x7f] sm:$0xff] }
 0x435   :  { %12408 = vmatprep.subr.bf16.mxu1 %v18597_v0  ;;  %v14809_v7 = vld [vmem:[#allocation2 + $0x67] sm:$0xff]  ;;  %v12848_v10 = vpack.i.bf16 %v14734_v41, %v14807_v50  ;;  %v12843_v41 = vpack.i.bf16 %v14793_v31, %v14742_v6 }
 0x436   :  { %12804 = vrot.lane.b32.xlu1 %v12803_v4, %s13969_s25  ;;  %11566 = vmatmul.mubr.msk.f32.gmra.mrb[6].mxu1 %vm455_vm2, %v14778_v15  ;;  %v14813_v12 = vld [vmem:[#allocation2 + $0x141] sm:$0xff]  ;;  %v12833_v62 = vpack.i.bf16 %v14727_v21, %v14809_v7  ;;  %v12858_v21 = vpack.i.bf16 %v14791_v23, %v14762_v49  ;;  %v12868_v4 = vpack.i.bf16 %v14807_v50, %v14842_v46 }
 0x437   :  { %12819 = vrot.lane.b32.xlu0 %v12818_v14, %s13969_s25  ;;  %11568 = vmatprep.mubr.msk.f32.mxu1 %vm455_vm2, %v14782_v42  ;;  %v14844_v30 = vld [vmem:[#allocation2 + $0x80] sm:$0xff] }
 0x438   :  { %v12853_v14 = vpack.i.bf16 %v14809_v7, %v14844_v30 }
 0x439   :  { %v13337_v45 = vpop.eup %13336 }
 0x43a   :  { %12814 = vrot.lane.b32.xlu1 %v12813_v34, %s13968_s21  ;;  %11569 = vmatmul.mubr.msk.f32.gmra.mrb[8].mxu1 %vm455_vm2, %v1428_v38  ;;  %v1272_v52 = vmul.f32 %v13337_v45, %v14663_v54  ;;  %v14819_v54 = vld [vmem:[#allocation2 + $0x159] sm:$0xff] }
 0x43b   :  { %12829 = vrot.lane.b32.xlu0 %v12828_v44, %s13968_s21  ;;  %11571 = vmatprep.mubr.msk.f32.mxu1 %vm455_vm2, %v14798_v27  ;;  %v14864_v44 = vld [vmem:[#allocation2 + $0xaf] sm:$0xff]  ;;  %v14866_v34 = vld [vmem:[#allocation2 + $0x97] sm:$0xff] }
 0x43c   :  { %v13339_v53 = vpop.eup %13338  ;;  %1289 = vst.msk [vmem:[#allocation2 + $0x188] sm:$0xff] %vm455_vm2, %v1272_v52  ;;  %v12878_v38 = vpack.i.bf16 %v14762_v49, %v14864_v44  ;;  %v12863_v45 = vpack.i.bf16 %v14742_v6, %v14866_v34  ;;  %v14880_v52 = vld [vmem:[#allocation2 + $0xc8] sm:$0xff] }
 0x43d   :  { %v13341_v55 = vpop.eup %13340  ;;  %v1273_v59 = vmul.f32 %v13339_v53, %v14680_v56  ;;  %v14832_v56 = vld [vmem:[#allocation2 + $0x171] sm:$0xff]  ;;  %v12898_v6 = vpack.i.bf16 %v14864_v44, %v14880_v52 }
 0x43e   :  { %12824 = vrot.lane.b32.xlu1 %v12823_v51, %s13967_s9  ;;  %11572 = vmatmul.mubr.msk.f32.gmra.mrb[10].mxu1 %vm455_vm2, %v14813_v12  ;;  %v1274_v60 = vmul.f32 %v13341_v55, %v14685_v39  ;;  %v13343_v3 = vpop.eup %13342  ;;  %v12873_v51 = vpack.i.bf16 %v14844_v30, %v14766_v11  ;;  %v14882_v53 = vld [vmem:[#allocation2 + $0xb0] sm:$0xff]  ;;  %v1396_v55 = vld [vmem:[#allocation2 + $0xdf] sm:$0xff] }
 0x43f   :  { %12839 = vrot.lane.b32.xlu0 %v12838_v5, %s13967_s9  ;;  %11574 = vmatprep.mubr.msk.f32.mxu1 %vm455_vm2, %v14819_v54  ;;  %1290 = vst.msk [vmem:[#allocation2 + $0x1a0] sm:$0xff] %vm455_vm2, %v1273_v59  ;;  %v1267_v39 = vmul.f32 %v13343_v3, %v14690_v43  ;;  %v12888_v5 = vpack.i.bf16 %v14842_v46, %v14778_v15  ;;  %v1395_v59 = vld [vmem:[#allocation2 + $0xc7] sm:$0xff] }
 0x440   :  { %1291 = vst.msk [vmem:[#allocation2 + $0x1b8] sm:$0xff] %vm455_vm2, %v1274_v60  ;;  %v12883_v49 = vpack.i.bf16 %v14866_v34, %v14882_v53  ;;  %v12908_v60 = vpack.i.bf16 %v14778_v15, %v1396_v55 }
 0x441   :  { %1284 = vst.msk [vmem:[#allocation2 + $0x110] sm:$0xff] %vm455_vm2, %v1267_v39  ;;  %v12903_v39 = vpack.i.bf16 %v14882_v53, %v14782_v42 }
 0x442   :  { %12834 = vrot.lane.b32.xlu1 %v12833_v62, %s13969_s25  ;;  %11575 = vmatmul.mubr.msk.f32.gmra.mrb[12].mxu1 %vm455_vm2, %v14832_v56  ;;  %v1316_v62 = vld [vmem:[#allocation2 + $0xf8] sm:$0xff] }
 0x443   :  { %12849 = vrot.lane.b32.xlu0 %v12848_v10, %s13969_s25  ;;  %v14848_v43 = vld [vmem:[#allocation2 + $0x189] sm:$0xff]  ;;  %v12893_v10 = vpack.i.bf16 %v14766_v11, %v1395_v59 }
 0x444   :  { %11577 = vmatprep.mubr.msk.f32.mxu1 %vm455_vm2, %v14848_v43 }
 0x446   :  { %12844 = vrot.lane.b32.xlu1 %v12843_v41, %s13968_s21  ;;  %v14852_v61 = vld [vmem:[#allocation2 + $0x1a1] sm:$0xff] }
 0x447   :  { %12859 = vrot.lane.b32.xlu0 %v12858_v21, %s13968_s21  ;;  %11578 = vmatmul.mubr.msk.f32.gmra.mrb[14].mxu1 %vm455_vm2, %v14852_v61  ;;  %v14860_v2 = vld [vmem:[#allocation2 + $0x1b9] sm:$0xff] }
 0x448   :  { %11580 = vmatprep.mubr.msk.f32.mxu1 %vm455_vm2, %v14860_v2  ;;  %v1380_v3 = vld [vmem:[#allocation2 + $0x111] sm:$0xff]  ;;  %v1412_v41 = vld [vmem:[#allocation2 + $0xe0] sm:$0xff] }
 0x449   :  { %v12918_v21 = vpack.i.bf16 %v1316_v62, %v1380_v3  ;;  %v12913_v11 = vpack.i.bf16 %v1395_v59, %v1412_v41  ;;  %v14922_v59 = vld [vmem:[#allocation2 + $0x158] sm:$0xff] }
 0x44a   :  { %12854 = vrot.lane.b32.xlu1 %v12853_v14, %s13967_s9  ;;  %v14900_v14 = vld [vmem:[#allocation2 + $0x128] sm:$0xff] }
 0x44b   :  { %12869 = vrot.lane.b32.xlu0 %v12868_v4, %s13967_s9  ;;  %v14898_v4 = vld [vmem:[#allocation2 + $0x10f] sm:$0xff] }
 0x44c   :  { %v12928_v15 = vpack.i.bf16 %v14898_v4, %v14900_v14 }
 0x44e   :  { %12864 = vrot.lane.b32.xlu1 %v12863_v45, %s13969_s25  ;;  %v14906_v45 = vld [vmem:[#allocation2 + $0x127] sm:$0xff] }
 0x44f   :  { %12879 = vrot.lane.b32.xlu0 %v12878_v38, %s13969_s25  ;;  %v1332_v38 = vld [vmem:[#allocation2 + $0xf9] sm:$0xff] }
 0x450   :  { %v12923_v42 = vpack.i.bf16 %v1332_v38, %v14906_v45  ;;  %v14948_v38 = vld [vmem:[#allocation2 + $0x188] sm:$0xff] }
 0x452   :  { %12874 = vrot.lane.b32.xlu1 %v12873_v51, %s13968_s21 }
 0x453   :  { %12889 = vrot.lane.b32.xlu0 %v12888_v5, %s13968_s21  ;;  %v14908_v5 = vld [vmem:[#allocation2 + $0x13f] sm:$0xff] }
 0x454   :  { %v12938_v51 = vpack.i.bf16 %v1380_v3, %v14908_v5  ;;  %v14932_v3 = vld [vmem:[#allocation2 + $0x16f] sm:$0xff] }
 0x456   :  { %12884 = vrot.lane.b32.xlu1 %v12883_v49, %s13967_s9  ;;  %v12948_v49 = vpack.i.bf16 %v14900_v14, %v14813_v12 }
 0x457   :  { %12899 = vrot.lane.b32.xlu0 %v12898_v6, %s13967_s9  ;;  %v14914_v6 = vld [vmem:[#allocation2 + $0x110] sm:$0xff] }
 0x458   :  { %v12933_v55 = vpack.i.bf16 %v14914_v6, %v14798_v27 }
 0x45a   :  { %12894 = vrot.lane.b32.xlu1 %v12893_v10, %s13969_s25  ;;  %v12958_v10 = vpack.i.bf16 %v14908_v5, %v14922_v59 }
 0x45b   :  { %12909 = vrot.lane.b32.xlu0 %v12908_v60, %s13969_s25  ;;  %v14924_v60 = vld [vmem:[#allocation2 + $0x140] sm:$0xff] }
 0x45c   :  { %v12943_v62 = vpack.i.bf16 %v14906_v45, %v14924_v60 }
 0x45e   :  { %12904 = vrot.lane.b32.xlu1 %v12903_v39, %s13968_s21  ;;  %v14934_v39 = vld [vmem:[#allocation2 + $0x157] sm:$0xff] }
 0x45f   :  { %12919 = vrot.lane.b32.xlu0 %v12918_v21, %s13968_s21  ;;  %v12968_v21 = vpack.i.bf16 %v14813_v12, %v14932_v3  ;;  %v12953_v41 = vpack.i.bf16 %v14798_v27, %v14934_v39  ;;  %v12988_v27 = vpack.i.bf16 %v14932_v3, %v14948_v38 }
 0x462   :  { %12914 = vrot.lane.b32.xlu1 %v12913_v11, %s13967_s9  ;;  %v12978_v11 = vpack.i.bf16 %v14922_v59, %v14832_v56 }
 0x463   :  { %12929 = vrot.lane.b32.xlu0 %v12928_v15, %s13967_s9  ;;  %v12963_v15 = vpack.i.bf16 %v14924_v60, %v14819_v54 }
 0x466   :  { %12924 = vrot.lane.b32.xlu1 %v12923_v42, %s13969_s25  ;;  %v14950_v42 = vld [vmem:[#allocation2 + $0x170] sm:$0xff] }
 0x467   :  { %12939 = vrot.lane.b32.xlu0 %v12938_v51, %s13969_s25  ;;  %v12973_v12 = vpack.i.bf16 %v14934_v39, %v14950_v42  ;;  %v14958_v51 = vld [vmem:[#allocation2 + $0x19f] sm:$0xff] }
 0x46a   :  { %12934 = vrot.lane.b32.xlu1 %v12933_v55, %s13968_s21  ;;  %v12998_v55 = vpack.i.bf16 %v14832_v56, %v14958_v51 }
 0x46b   :  { %12949 = vrot.lane.b32.xlu0 %v12948_v49, %s13968_s21  ;;  %v14960_v49 = vld [vmem:[#allocation2 + $0x187] sm:$0xff] }
 0x46e   :  { %12944 = vrot.lane.b32.xlu1 %v12943_v62, %s13967_s9  ;;  %v13008_v62 = vpack.i.bf16 %v14948_v38, %v14852_v61 }
 0x46f   :  { %12959 = vrot.lane.b32.xlu0 %v12958_v10, %s13967_s9  ;;  %v12983_v10 = vpack.i.bf16 %v14819_v54, %v14960_v49 }
 0x472   :  { %12954 = vrot.lane.b32.xlu1 %v12953_v41, %s13969_s25  ;;  %v14974_v41 = vld [vmem:[#allocation2 + $0x1b8] sm:$0xff] }
 0x473   :  { %12969 = vrot.lane.b32.xlu0 %v12968_v21, %s13969_s25  ;;  %v12993_v21 = vpack.i.bf16 %v14950_v42, %v14848_v43  ;;  %v13018_v54 = vpack.i.bf16 %v14958_v51, %v14974_v41 }
 0x476   :  { %12964 = vrot.lane.b32.xlu1 %v12963_v15, %s13968_s21  ;;  %v1404_v15 = vld [vmem:[#allocation2 + $0x1cf] sm:$0xff] }
 0x477   :  { %12979 = vrot.lane.b32.xlu0 %v12978_v11, %s13968_s21  ;;  %v14976_v11 = vld [vmem:[#allocation2 + $0x1a0] sm:$0xff] }
 0x478   :  { %v13003_v56 = vpack.i.bf16 %v14960_v49, %v14976_v11 }
 0x47a   :  { %12974 = vrot.lane.b32.xlu1 %v12973_v12, %s13967_s9  ;;  %v1436_v12 = vld [vmem:[#allocation2 + $0x1d1] sm:$0xff] }
 0x47b   :  { %12989 = vrot.lane.b32.xlu0 %v12988_v27, %s13967_s9  ;;  %v1403_v27 = vld [vmem:[#allocation2 + $0x1b7] sm:$0xff]  ;;  %11581 = vmatmul.mubr.msk.f32.gmra.mrb[16].mxu1 %vm455_vm2, %v1436_v12  ;;  %v1292_v12 = vld [vmem:[#allocation2 + $0x7] sm:$0xff] }
 0x47c   :  { %11591 = vmatprep.mubr.msk.f32.mxu1 %vm13964_vm0, %v18599_v1 }
 0x47e   :  { %12984 = vrot.lane.b32.xlu1 %v12983_v10, %s13969_s25  ;;  %v13013_v10 = vpack.i.bf16 %v14848_v43, %v1403_v27 }
 0x47f   :  { %12999 = vrot.lane.b32.xlu0 %v12998_v55, %s13969_s25  ;;  %v13028_v55 = vpack.i.bf16 %v14852_v61, %v1404_v15 }
 0x482   :  { %12994 = vrot.lane.b32.xlu1 %v12993_v21, %s13968_s21  ;;  %v1420_v21 = vld [vmem:[#allocation2 + $0x1d0] sm:$0xff] }
 0x483   :  { %13009 = vrot.lane.b32.xlu0 %v13008_v62, %s13968_s21  ;;  %v13023_v62 = vpack.i.bf16 %v14976_v11, %v14860_v2 }
 0x486   :  { %13004 = vrot.lane.b32.xlu1 %v13003_v56, %s13967_s9 }
 0x487   :  { %13019 = vrot.lane.b32.xlu0 %v13018_v54, %s13967_s9  ;;  %v13033_v54 = vpack.i.bf16 %v1403_v27, %v1420_v21 }
 0x48a   :  { %13014 = vrot.lane.b32.xlu1 %v13013_v10, %s13969_s25 }
 0x48b   :  { %13029 = vrot.lane.b32.xlu0 %v13028_v55, %s13969_s25 }
 0x48e   :  { %13024 = vrot.lane.b32.xlu1 %v13023_v62, %s13968_s21 }
 0x492   :  { %13034 = vrot.lane.b32.xlu1 %v13033_v54, %s13967_s9 }
 0x4a4   :  { %v12800_v56 = vpop.permute.xlu1 %12799 }
 0x4a5   :  { %v12810_v61 = vpop.permute.xlu0 %12809  ;;  %v12802_v15 = vunpack.i.h.bf16 %v12800_v56  ;;  %v12801_v43 = vunpack.i.l.bf16 %v12800_v56 }
 0x4a6   :  { %v12812_v10 = vunpack.i.h.bf16 %v12810_v61  ;;  %v12811_v47 = vunpack.i.l.bf16 %v12810_v61 }
 0x4a7   :  { %v1871_v2 = vsel %vm455_vm2, %v14773_v37, %v12801_v43  ;;  %v1821_v27 = vsel %vm455_vm2, %v1292_v12, %v12802_v15 }
 0x4a8   :  { %v12805_v0 = vpop.permute.xlu1 %12804 }
 0x4a9   :  { %v12820_v1 = vpop.permute.xlu0 %12819  ;;  %v12807_v55 = vunpack.i.h.bf16 %v12805_v0  ;;  %v12806_v48 = vunpack.i.l.bf16 %v12805_v0 }
 0x4aa   :  { %v12822_v15 = vunpack.i.h.bf16 %v12820_v1 }
 0x4ab   :  { %v1887_v62 = vsel %vm1837_vm4, %v1871_v2, %v12806_v48  ;;  %v1838_v21 = vsel %vm1837_vm4, %v1821_v27, %v12807_v55  ;;  %v12821_v48 = vunpack.i.l.bf16 %v12820_v1 }
 0x4ac   :  { %v12815_v56 = vpop.permute.xlu1 %12814  ;;  %v1903_v40 = vsel %vm1854_vm5, %v1887_v62, %v12811_v47  ;;  %v1855_v36 = vsel %vm1854_vm5, %v1838_v21, %v12812_v10 }
 0x4ad   :  { %v12830_v54 = vpop.permute.xlu0 %12829  ;;  %v12817_v24 = vunpack.i.h.bf16 %v12815_v56  ;;  %v12816_v0 = vunpack.i.l.bf16 %v12815_v56  ;;  %2037 = vmatprep.mubr.f32.mxu0 %v1903_v40 }
 0x4ae   :  { %2038 = vmatmul.mubr.f32.vlgmr.msra.gmra.mrb[6].mxu0 %v1855_v36  ;;  %v12832_v27 = vunpack.i.h.bf16 %v12830_v54  ;;  %v12831_v47 = vunpack.i.l.bf16 %v12830_v54 }
 0x4af   :  { %v1872_v61 = vsel %vm455_vm2, %v14736_v25, %v12816_v0  ;;  %v1822_v37 = vsel %vm455_vm2, %v14748_v8, %v12817_v24 }
 0x4b0   :  { %v12825_v12 = vpop.permute.xlu1 %12824  ;;  %v1888_v10 = vsel %vm1837_vm4, %v1872_v61, %v12821_v48  ;;  %v1839_v62 = vsel %vm1837_vm4, %v1822_v37, %v12822_v15  ;;  %v1873_v0 = vsel %vm455_vm2, %v14793_v31, %v12831_v47  ;;  %v1823_v54 = vsel %vm455_vm2, %v14754_v26, %v12832_v27 }
 0x4b1   :  { %v12840_v43 = vpop.permute.xlu0 %12839  ;;  %v12827_v55 = vunpack.i.h.bf16 %v12825_v12  ;;  %v12826_v2 = vunpack.i.l.bf16 %v12825_v12 }
 0x4b2   :  { %v12842_v1 = vunpack.i.h.bf16 %v12840_v43  ;;  %v12841_v56 = vunpack.i.l.bf16 %v12840_v43 }
 0x4b3   :  { %v1904_v36 = vsel %vm1854_vm5, %v1888_v10, %v12826_v2  ;;  %v1856_v40 = vsel %vm1854_vm5, %v1839_v62, %v12827_v55 }
 0x4b4   :  { %v12835_v21 = vpop.permute.xlu1 %12834  ;;  %2042 = vmatprep.mubr.f32.mxu0 %v1904_v36 }
 0x4b5   :  { %v12850_v25 = vpop.permute.xlu0 %12849  ;;  %v12837_v24 = vunpack.i.h.bf16 %v12835_v21  ;;  %v12836_v8 = vunpack.i.l.bf16 %v12835_v21  ;;  %2043 = vmatmul.mubr.f32.gmra.mrb[8].mxu0 %v1856_v40 }
 0x4b6   :  { %v12852_v43 = vunpack.i.h.bf16 %v12850_v25  ;;  %v12851_v27 = vunpack.i.l.bf16 %v12850_v25 }
 0x4b7   :  { %v1889_v61 = vsel %vm1837_vm4, %v1873_v0, %v12836_v8  ;;  %v1840_v37 = vsel %vm1837_vm4, %v1823_v54, %v12837_v24 }
 0x4b8   :  { %v12845_v48 = vpop.permute.xlu1 %12844  ;;  %v1905_v12 = vsel %vm1854_vm5, %v1889_v61, %v12841_v56  ;;  %v1857_v55 = vsel %vm1854_vm5, %v1840_v37, %v12842_v1 }
 0x4b9   :  { %v12860_v15 = vpop.permute.xlu0 %12859  ;;  %v12847_v2 = vunpack.i.h.bf16 %v12845_v48  ;;  %v12846_v10 = vunpack.i.l.bf16 %v12845_v48  ;;  %2047 = vmatprep.mubr.f32.mxu0 %v1905_v12 }
 0x4ba   :  { %2048 = vmatmul.mubr.f32.gmra.mrb[10].mxu0 %v1857_v55  ;;  %v12862_v21 = vunpack.i.h.bf16 %v12860_v15  ;;  %v12861_v24 = vunpack.i.l.bf16 %v12860_v15 }
 0x4bb   :  { %v1874_v31 = vsel %vm455_vm2, %v14791_v23, %v12846_v10  ;;  %v1824_v26 = vsel %vm455_vm2, %v14756_v13, %v12847_v2 }
 0x4bc   :  { %v12855_v62 = vpop.permute.xlu1 %12854  ;;  %v1890_v8 = vsel %vm1837_vm4, %v1874_v31, %v12851_v27  ;;  %v1841_v1 = vsel %vm1837_vm4, %v1824_v26, %v12852_v43  ;;  %v1875_v48 = vsel %vm455_vm2, %v14844_v30, %v12861_v24  ;;  %v1825_v15 = vsel %vm455_vm2, %v14809_v7, %v12862_v21 }
 0x4bd   :  { %v12870_v47 = vpop.permute.xlu0 %12869  ;;  %v12857_v36 = vunpack.i.h.bf16 %v12855_v62  ;;  %v12856_v40 = vunpack.i.l.bf16 %v12855_v62 }
 0x4be   :  { %v12872_v25 = vunpack.i.h.bf16 %v12870_v47  ;;  %v12871_v37 = vunpack.i.l.bf16 %v12870_v47 }
 0x4bf   :  { %v1906_v56 = vsel %vm1854_vm5, %v1890_v8, %v12856_v40  ;;  %v1858_v0 = vsel %vm1854_vm5, %v1841_v1, %v12857_v36 }
 0x4c0   :  { %v12865_v54 = vpop.permute.xlu1 %12864  ;;  %2052 = vmatprep.mubr.f32.mxu0 %v1906_v56 }
 0x4c1   :  { %v12880_v23 = vpop.permute.xlu0 %12879  ;;  %v12867_v13 = vunpack.i.h.bf16 %v12865_v54  ;;  %v12866_v61 = vunpack.i.l.bf16 %v12865_v54  ;;  %2053 = vmatmul.mubr.f32.gmra.mrb[12].mxu0 %v1858_v0 }
 0x4c2   :  { %v12882_v47 = vunpack.i.h.bf16 %v12880_v23  ;;  %v12881_v62 = vunpack.i.l.bf16 %v12880_v23 }
 0x4c3   :  { %v1891_v12 = vsel %vm1837_vm4, %v1875_v48, %v12866_v61  ;;  %v1842_v55 = vsel %vm1837_vm4, %v1825_v15, %v12867_v13 }
 0x4c4   :  { %v12875_v10 = vpop.permute.xlu1 %12874  ;;  %v1907_v31 = vsel %vm1854_vm5, %v1891_v12, %v12871_v37  ;;  %v1859_v26 = vsel %vm1854_vm5, %v1842_v55, %v12872_v25 }
 0x4c5   :  { %v12890_v2 = vpop.permute.xlu0 %12889  ;;  %v12877_v43 = vunpack.i.h.bf16 %v12875_v10  ;;  %v12876_v27 = vunpack.i.l.bf16 %v12875_v10  ;;  %2057 = vmatprep.mubr.f32.mxu0 %v1907_v31 }
 0x4c6   :  { %2058 = vmatmul.mubr.f32.gmra.mrb[14].mxu0 %v1859_v26  ;;  %v12892_v8 = vunpack.i.h.bf16 %v12890_v2  ;;  %v12891_v1 = vunpack.i.l.bf16 %v12890_v2 }
 0x4c7   :  { %v1876_v30 = vsel %vm455_vm2, %v14842_v46, %v12876_v27  ;;  %v1826_v7 = vsel %vm455_vm2, %v14807_v50, %v12877_v43 }
 0x4c8   :  { %v12885_v40 = vpop.permute.xlu1 %12884  ;;  %v1892_v56 = vsel %vm1837_vm4, %v1876_v30, %v12881_v62  ;;  %v1843_v0 = vsel %vm1837_vm4, %v1826_v7, %v12882_v47  ;;  %v1877_v48 = vsel %vm455_vm2, %v14882_v53, %v12891_v1  ;;  %v1827_v15 = vsel %vm455_vm2, %v14866_v34, %v12892_v8 }
 0x4c9   :  { %v12900_v36 = vpop.permute.xlu0 %12899  ;;  %v12887_v21 = vunpack.i.h.bf16 %v12885_v40  ;;  %v12886_v24 = vunpack.i.l.bf16 %v12885_v40 }
 0x4ca   :  { %v12902_v23 = vunpack.i.h.bf16 %v12900_v36  ;;  %v12901_v37 = vunpack.i.l.bf16 %v12900_v36 }
 0x4cb   :  { %v1908_v54 = vsel %vm1854_vm5, %v1892_v56, %v12886_v24  ;;  %v1860_v13 = vsel %vm1854_vm5, %v1843_v0, %v12887_v21 }
 0x4cc   :  { %v12895_v61 = vpop.permute.xlu1 %12894  ;;  %2062 = vmatprep.mubr.f32.mxu0 %v1908_v54 }
 0x4cd   :  { %v12910_v46 = vpop.permute.xlu0 %12909  ;;  %v12897_v50 = vunpack.i.h.bf16 %v12895_v61  ;;  %v12896_v25 = vunpack.i.l.bf16 %v12895_v61  ;;  %2063 = vmatmul.mubr.f32.gmra.mrb[16].mxu0 %v1860_v13 }
 0x4ce   :  { %v12912_v30 = vunpack.i.h.bf16 %v12910_v46  ;;  %v12911_v7 = vunpack.i.l.bf16 %v12910_v46 }
 0x4cf   :  { %v1893_v12 = vsel %vm1837_vm4, %v1877_v48, %v12896_v25  ;;  %v1844_v55 = vsel %vm1837_vm4, %v1827_v15, %v12897_v50 }
 0x4d0   :  { %v12905_v2 = vpop.permute.xlu1 %12904  ;;  %v1909_v31 = vsel %vm1854_vm5, %v1893_v12, %v12901_v37  ;;  %v1861_v26 = vsel %vm1854_vm5, %v1844_v55, %v12902_v23 }
 0x4d1   :  { %v12920_v10 = vpop.permute.xlu0 %12919  ;;  %v12907_v43 = vunpack.i.h.bf16 %v12905_v2  ;;  %v12906_v27 = vunpack.i.l.bf16 %v12905_v2  ;;  %2067 = vmatprep.mubr.f32.mxu0 %v1909_v31 }
 0x4d2   :  { %2068 = vmatmul.mubr.f32.gmra.mrb[18].mxu0 %v1861_v26  ;;  %v12922_v21 = vunpack.i.h.bf16 %v12920_v10  ;;  %v12921_v24 = vunpack.i.l.bf16 %v12920_v10 }
 0x4d3   :  { %v1878_v53 = vsel %vm455_vm2, %v14880_v52, %v12906_v27  ;;  %v1828_v34 = vsel %vm455_vm2, %v14864_v44, %v12907_v43  ;;  %v1300_v52 = vld [vmem:[#allocation2 + $0xf7] sm:$0xff] }
 0x4d4   :  { %v12915_v47 = vpop.permute.xlu1 %12914  ;;  %v1894_v8 = vsel %vm1837_vm4, %v1878_v53, %v12911_v7  ;;  %v1845_v1 = vsel %vm1837_vm4, %v1828_v34, %v12912_v30  ;;  %v1879_v25 = vsel %vm455_vm2, %v14914_v6, %v12921_v24  ;;  %v1829_v23 = vsel %vm455_vm2, %v1300_v52, %v12922_v21 }
 0x4d5   :  { %v12930_v62 = vpop.permute.xlu0 %12929  ;;  %v12917_v36 = vunpack.i.h.bf16 %v12915_v47  ;;  %v12916_v40 = vunpack.i.l.bf16 %v12915_v47 }
 0x4d6   :  { %v12932_v61 = vunpack.i.h.bf16 %v12930_v62  ;;  %v12931_v50 = vunpack.i.l.bf16 %v12930_v62 }
 0x4d7   :  { %v1910_v56 = vsel %vm1854_vm5, %v1894_v8, %v12916_v40  ;;  %v1862_v0 = vsel %vm1854_vm5, %v1845_v1, %v12917_v36 }
 0x4d8   :  { %2072 = vmatprep.mubr.f32.mxu0 %v1910_v56  ;;  %v12925_v54 = vpop.permute.xlu1 %12924 }
 0x4d9   :  { %v12940_v44 = vpop.permute.xlu0 %12939  ;;  %v12927_v13 = vunpack.i.h.bf16 %v12925_v54  ;;  %v12926_v46 = vunpack.i.l.bf16 %v12925_v54  ;;  %2073 = vmatmul.mubr.f32.gmra.mrb[20].mxu0 %v1862_v0 }
 0x4da   :  { %v12942_v43 = vunpack.i.h.bf16 %v12940_v44  ;;  %v12941_v27 = vunpack.i.l.bf16 %v12940_v44 }
 0x4db   :  { %v1895_v37 = vsel %vm1837_vm4, %v1879_v25, %v12926_v46  ;;  %v1846_v48 = vsel %vm1837_vm4, %v1829_v23, %v12927_v13 }
 0x4dc   :  { %v12935_v12 = vpop.permute.xlu1 %12934  ;;  %v1911_v55 = vsel %vm1854_vm5, %v1895_v37, %v12931_v50  ;;  %v1863_v2 = vsel %vm1854_vm5, %v1846_v48, %v12932_v61 }
 0x4dd   :  { %v12950_v15 = vpop.permute.xlu0 %12949  ;;  %v12937_v10 = vunpack.i.h.bf16 %v12935_v12  ;;  %v12936_v31 = vunpack.i.l.bf16 %v12935_v12  ;;  %2077 = vmatprep.mubr.f32.mxu0 %v1911_v55 }
 0x4de   :  { %2078 = vmatmul.mubr.f32.gmra.mrb[22].mxu0 %v1863_v2  ;;  %v12952_v47 = vunpack.i.h.bf16 %v12950_v15  ;;  %v12951_v62 = vunpack.i.l.bf16 %v12950_v15 }
 0x4df   :  { %v1880_v26 = vsel %vm455_vm2, %v14900_v14, %v12936_v31  ;;  %v1830_v6 = vsel %vm455_vm2, %v14898_v4, %v12937_v10 }
 0x4e0   :  { %v12945_v34 = vpop.permute.xlu1 %12944  ;;  %v1896_v36 = vsel %vm1837_vm4, %v1880_v26, %v12941_v27  ;;  %v1847_v40 = vsel %vm1837_vm4, %v1830_v6, %v12942_v43  ;;  %v1881_v52 = vsel %vm455_vm2, %v14924_v60, %v12951_v62  ;;  %v1831_v54 = vsel %vm455_vm2, %v14906_v45, %v12952_v47 }
 0x4e1   :  { %v12960_v53 = vpop.permute.xlu0 %12959  ;;  %v12947_v30 = vunpack.i.h.bf16 %v12945_v34  ;;  %v12946_v7 = vunpack.i.l.bf16 %v12945_v34 }
 0x4e2   :  { %v12962_v56 = vunpack.i.h.bf16 %v12960_v53  ;;  %v12961_v0 = vunpack.i.l.bf16 %v12960_v53 }
 0x4e3   :  { %v1912_v21 = vsel %vm1854_vm5, %v1896_v36, %v12946_v7  ;;  %v1864_v24 = vsel %vm1854_vm5, %v1847_v40, %v12947_v30 }
 0x4e4   :  { %v12955_v8 = vpop.permute.xlu1 %12954  ;;  %2082 = vmatprep.mubr.f32.mxu0 %v1912_v21 }
 0x4e5   :  { %v12970_v14 = vpop.permute.xlu0 %12969  ;;  %v12957_v4 = vunpack.i.h.bf16 %v12955_v8  ;;  %v12956_v1 = vunpack.i.l.bf16 %v12955_v8  ;;  %2083 = vmatmul.mubr.f32.gmra.mrb[24].mxu0 %v1864_v24 }
 0x4e6   :  { %v12972_v48 = vunpack.i.h.bf16 %v12970_v14  ;;  %v12971_v15 = vunpack.i.l.bf16 %v12970_v14 }
 0x4e7   :  { %v1897_v44 = vsel %vm1837_vm4, %v1881_v52, %v12956_v1  ;;  %v1848_v13 = vsel %vm1837_vm4, %v1831_v54, %v12957_v4 }
 0x4e8   :  { %v12965_v61 = vpop.permute.xlu1 %12964  ;;  %v1913_v50 = vsel %vm1854_vm5, %v1897_v44, %v12961_v0  ;;  %v1865_v25 = vsel %vm1854_vm5, %v1848_v13, %v12962_v56 }
 0x4e9   :  { %v12980_v46 = vpop.permute.xlu0 %12979  ;;  %v12967_v23 = vunpack.i.h.bf16 %v12965_v61  ;;  %v12966_v37 = vunpack.i.l.bf16 %v12965_v61  ;;  %2087 = vmatprep.mubr.f32.mxu0 %v1913_v50 }
 0x4ea   :  { %2088 = vmatmul.mubr.f32.gmra.mrb[26].mxu0 %v1865_v25  ;;  %v12982_v31 = vunpack.i.h.bf16 %v12980_v46  ;;  %v12981_v26 = vunpack.i.l.bf16 %v12980_v46 }
 0x4eb   :  { %v1882_v60 = vsel %vm455_vm2, %v14922_v59, %v12966_v37  ;;  %v1832_v45 = vsel %vm455_vm2, %v14908_v5, %v12967_v23 }
 0x4ec   :  { %v12975_v55 = vpop.permute.xlu1 %12974  ;;  %v1898_v6 = vsel %vm1837_vm4, %v1882_v60, %v12971_v15  ;;  %v1849_v43 = vsel %vm1837_vm4, %v1832_v45, %v12972_v48  ;;  %v1883_v62 = vsel %vm455_vm2, %v14950_v42, %v12981_v26  ;;  %v1833_v36 = vsel %vm455_vm2, %v14934_v39, %v12982_v31 }
 0x4ed   :  { %v12990_v12 = vpop.permute.xlu0 %12989  ;;  %v12977_v2 = vunpack.i.h.bf16 %v12975_v55  ;;  %v12976_v10 = vunpack.i.l.bf16 %v12975_v55 }
 0x4ee   :  { %v12992_v7 = vunpack.i.h.bf16 %v12990_v12  ;;  %v12991_v47 = vunpack.i.l.bf16 %v12990_v12 }
 0x4ef   :  { %v1914_v27 = vsel %vm1854_vm5, %v1898_v6, %v12976_v10  ;;  %v1866_v53 = vsel %vm1854_vm5, %v1849_v43, %v12977_v2 }
 0x4f0   :  { %v12985_v34 = vpop.permute.xlu1 %12984  ;;  %2092 = vmatprep.mubr.f32.mxu0 %v1914_v27 }
 0x4f1   :  { %v13000_v59 = vpop.permute.xlu0 %12999  ;;  %v12987_v5 = vunpack.i.h.bf16 %v12985_v34  ;;  %v12986_v30 = vunpack.i.l.bf16 %v12985_v34  ;;  %2093 = vmatmul.mubr.f32.gmra.mrb[28].mxu0 %v1866_v53 }
 0x4f2   :  { %v13002_v0 = vunpack.i.h.bf16 %v13000_v59  ;;  %v13001_v52 = vunpack.i.l.bf16 %v13000_v59 }
 0x4f3   :  { %v1899_v40 = vsel %vm1837_vm4, %v1883_v62, %v12986_v30  ;;  %v1850_v21 = vsel %vm1837_vm4, %v1833_v36, %v12987_v5 }
 0x4f4   :  { %v12995_v24 = vpop.permute.xlu1 %12994  ;;  %v1915_v14 = vsel %vm1854_vm5, %v1899_v40, %v12991_v47  ;;  %v1867_v8 = vsel %vm1854_vm5, %v1850_v21, %v12992_v7 }
 0x4f5   :  { %v13010_v4 = vpop.permute.xlu0 %13009  ;;  %v12997_v1 = vunpack.i.h.bf16 %v12995_v24  ;;  %v12996_v56 = vunpack.i.l.bf16 %v12995_v24  ;;  %2097 = vmatprep.mubr.f32.mxu0 %v1915_v14 }
 0x4f6   :  { %2098 = vmatmul.mubr.f32.gmra.mrb[30].mxu0 %v1867_v8  ;;  %v13012_v46 = vunpack.i.h.bf16 %v13010_v4  ;;  %v13011_v61 = vunpack.i.l.bf16 %v13010_v4 }
 0x4f7   :  { %v1884_v42 = vsel %vm455_vm2, %v14948_v38, %v12996_v56  ;;  %v1834_v39 = vsel %vm455_vm2, %v14932_v3, %v12997_v1 }
 0x4f8   :  { %v13005_v54 = vpop.permute.xlu1 %13004  ;;  %v1900_v50 = vsel %vm1837_vm4, %v1884_v42, %v13001_v52  ;;  %v1851_v25 = vsel %vm1837_vm4, %v1834_v39, %v13002_v0  ;;  %v1885_v12 = vsel %vm455_vm2, %v14976_v11, %v13011_v61  ;;  %v1835_v55 = vsel %vm455_vm2, %v14960_v49, %v13012_v46  ;;  %v15134_v61 = vld [vmem:[%s18725_s29] ss:$0 sm:$0xff]  ;;  %s13972_s29 = smov [#allocation14]  }
 0x4f9   :  { %v13007_v44 = vunpack.i.h.bf16 %v13005_v54  ;;  %v13006_v13 = vunpack.i.l.bf16 %v13005_v54  ;;  %v13020_v23 = vpop.permute.xlu0 %13019 }
 0x4fa   :  { %v13022_v48 = vunpack.i.h.bf16 %v13020_v23  ;;  %v13021_v15 = vunpack.i.l.bf16 %v13020_v23 }
 0x4fb   :  { %v1916_v37 = vsel %vm1854_vm5, %v1900_v50, %v13006_v13  ;;  %v1868_v60 = vsel %vm1854_vm5, %v1851_v25, %v13007_v44 }
 0x4fc   :  { %v13015_v38 = vpop.permute.xlu1 %13014  ;;  %2102 = vmatprep.mubr.f32.mxu0 %v1916_v37 }
 0x4fd   :  { %v13017_v45 = vunpack.i.h.bf16 %v13015_v38  ;;  %v13016_v3 = vunpack.i.l.bf16 %v13015_v38  ;;  %2103 = vmatmul.mubr.f32.gmra.mrb[32].mxu0 %v1868_v60  ;;  %v13030_v43 = vpop.permute.xlu0 %13029 }
 0x4fe   :  { %v13032_v5 = vunpack.i.h.bf16 %v13030_v43  ;;  %v13031_v30 = vunpack.i.l.bf16 %v13030_v43 }
 0x4ff   :  { %v1901_v2 = vsel %vm1837_vm4, %v1885_v12, %v13016_v3  ;;  %v1852_v10 = vsel %vm1837_vm4, %v1835_v55, %v13017_v45 }
 0x500   :  { %v13025_v31 = vpop.permute.xlu1 %13024  ;;  %v1917_v26 = vsel %vm1854_vm5, %v1901_v2, %v13021_v15  ;;  %v1869_v6 = vsel %vm1854_vm5, %v1852_v10, %v13022_v48 }
 0x501   :  { %v13027_v27 = vunpack.i.h.bf16 %v13025_v31  ;;  %v13026_v53 = vunpack.i.l.bf16 %v13025_v31  ;;  %2107 = vmatprep.mubr.f32.mxu0 %v1917_v26  ;;  %v11561_v59 = vpop.f32.mrb[2].mxu1 }
 0x502   :  { %2108 = vmatmul.mubr.f32.gmra.mrb[34].mxu0 %v1869_v6  ;;  %v2184_v34 = vpop.f32.mrb[3].mxu1 }
 0x503   :  { %v1886_v11 = vsel %vm455_vm2, %v14974_v41, %v13026_v53  ;;  %v1836_v49 = vsel %vm455_vm2, %v14958_v51, %v13027_v27 }
 0x504   :  { %v13035_v7 = vpop.permute.xlu1 %13034  ;;  %v1902_v36 = vsel %vm1837_vm4, %v1886_v11, %v13031_v30  ;;  %v1853_v21 = vsel %vm1837_vm4, %v1836_v49, %v13032_v5 }
 0x505   :  { %v13037_v47 = vunpack.i.h.bf16 %v13035_v7  ;;  %v13036_v62 = vunpack.i.l.bf16 %v13035_v7  ;;  %v11564_v40 = vpop.f32.mrb[4].mxu1 }
 0x506   :  { %v2194_v8 = vpop.f32.mrb[5].mxu1 }
 0x507   :  { %v1918_v24 = vsel %vm1854_vm5, %v1902_v36, %v13036_v62  ;;  %v1870_v14 = vsel %vm1854_vm5, %v1853_v21, %v13037_v47 }
 0x508   :  { %2112 = vmatprep.mubr.f32.mxu0 %v1918_v24 }
 0x509   :  { %2113 = vmatmul.mubr.f32.gmra.mrb[36].mxu0 %v1870_v14  ;;  %v11567_v41 = vpop.f32.mrb[6].mxu1 }
 0x50a   :  { %v2204_v51 = vpop.f32.mrb[7].mxu1 }
 0x50d   :  { %v11570_v4 = vpop.f32.mrb[8].mxu1 }
 0x50e   :  { %v2214_v1 = vpop.f32.mrb[9].mxu1 }
 0x511   :  { %v11573_v56 = vpop.f32.mrb[10].mxu1 }
 0x512   :  { %v2224_v42 = vpop.f32.mrb[11].mxu1 }
 0x515   :  { %v15123_v39 = vpop.f32.mrb[12].mxu1 }
 0x516   :  { %v2234_v0 = vpop.f32.mrb[13].mxu1 }
 0x51a   :  { %v15125_v52 = vpop.f32.mrb[14].mxu1 }
 0x51b   :  { %v15127_v54 = vpop.f32.mrb[15].mxu1 }
 0x54e   :  { %v15129_v44 = vpop.f32.mrb[16].mxu1 }
 0x54f   :  { %v15131_v13 = vpop.f32.mrb[17].mxu1 }
 0x581   :  { %v10921_v46 = vpop.f32.mrb[6].mxu0 }
 0x582   :  { %v10922_v50 = vpop.f32.mrb[7].mxu0 }
 0x583   :  { %v10923_v25 = vadd.f32 %v10922_v50, %v10921_v46 }
 0x585   :  { %v2040_v23 = vadd.f32 %v10923_v25, %v15134_v61 }
 0x587   :  { %v15137_v37 = vadd.f32 %v2184_v34, %v2040_v23 }
 0x588   :  { %v10924_v60 = vpop.f32.mrb[8].mxu0 }
 0x589   :  { %v10925_v38 = vpop.f32.mrb[9].mxu0 }
 0x58a   :  { %v10926_v45 = vadd.f32 %v10925_v38, %v10924_v60 }
 0x58c   :  { %v2045_v3 = vadd.f32 %v10926_v45, %v15134_v61 }
 0x58d   :  { %v10927_v48 = vpop.f32.mrb[10].mxu0 }
 0x58e   :  { %v15140_v15 = vadd.f32 %v11561_v59, %v2045_v3  ;;  %v10928_v12 = vpop.f32.mrb[11].mxu0 }
 0x58f   :  { %v10929_v55 = vadd.f32 %v10928_v12, %v10927_v48 }
 0x591   :  { %v2050_v2 = vadd.f32 %v10929_v55, %v15134_v61 }
 0x593   :  { %v15143_v10 = vadd.f32 %v2194_v8, %v2050_v2 }
 0x594   :  { %v10930_v31 = vpop.f32.mrb[12].mxu0 }
 0x595   :  { %v10931_v26 = vpop.f32.mrb[13].mxu0 }
 0x596   :  { %v10932_v6 = vadd.f32 %v10931_v26, %v10930_v31 }
 0x598   :  { %v2055_v43 = vadd.f32 %v10932_v6, %v15134_v61 }
 0x599   :  { %v10933_v27 = vpop.f32.mrb[14].mxu0 }
 0x59a   :  { %v15146_v53 = vadd.f32 %v11564_v40, %v2055_v43  ;;  %v10934_v34 = vpop.f32.mrb[15].mxu0 }
 0x59b   :  { %v10935_v11 = vadd.f32 %v10934_v34, %v10933_v27 }
 0x59d   :  { %v2060_v49 = vadd.f32 %v10935_v11, %v15134_v61 }
 0x59f   :  { %v15149_v59 = vadd.f32 %v2204_v51, %v2060_v49 }
 0x5a0   :  { %v10936_v5 = vpop.f32.mrb[16].mxu0 }
 0x5a1   :  { %v10937_v30 = vpop.f32.mrb[17].mxu0 }
 0x5a2   :  { %v10938_v7 = vadd.f32 %v10937_v30, %v10936_v5  ;;  %v2305_v5 = vmul.f32 %v15137_v37, %v15137_v37  ;;  %v2307_v30 = vmul.f32 %v15143_v10, %v15143_v10 }
 0x5a4   :  { %v2065_v47 = vadd.f32 %v10938_v7, %v15134_v61 }
 0x5a5   :  { %v10939_v62 = vpop.f32.mrb[18].mxu0 }
 0x5a6   :  { %v15152_v36 = vadd.f32 %v11567_v41, %v2065_v47  ;;  %v10940_v21 = vpop.f32.mrb[19].mxu0 }
 0x5a7   :  { %v10941_v24 = vadd.f32 %v10940_v21, %v10939_v62  ;;  %v2263_v62 = vsel %vm455_vm2, %v15137_v37, 0.0 }
 0x5a9   :  { %v2070_v14 = vadd.f32 %v10941_v24, %v15134_v61  ;;  %v2266_v24 = vsel %vm455_vm2, %v15143_v10, 0.0 }
 0x5ab   :  { %v15155_v40 = vadd.f32 %v2214_v1, %v2070_v14  ;;  %v2308_v14 = vmul.f32 %v15146_v53, %v15146_v53 }
 0x5ac   :  { %v10942_v8 = vpop.f32.mrb[20].mxu0 }
 0x5ad   :  { %v10943_v46 = vpop.f32.mrb[21].mxu0 }
 0x5ae   :  { %v10944_v50 = vadd.f32 %v10943_v46, %v10942_v8 }
 0x5b0   :  { %v2075_v51 = vadd.f32 %v10944_v50, %v15134_v61  ;;  %v2321_v50 = vsel %vm455_vm2, %v2305_v5, 0.0 }
 0x5b1   :  { %v10945_v25 = vpop.f32.mrb[22].mxu0 }
 0x5b2   :  { %v15158_v23 = vadd.f32 %v11570_v4, %v2075_v51  ;;  %v10946_v60 = vpop.f32.mrb[23].mxu0  ;;  %v2268_v51 = vsel %vm455_vm2, %v15146_v53, 0.0 }
 0x5b3   :  { %v10947_v38 = vadd.f32 %v10946_v60, %v10945_v25  ;;  %v2309_v25 = vmul.f32 %v15149_v59, %v15149_v59 }
 0x5b5   :  { %v2080_v45 = vadd.f32 %v10947_v38, %v15134_v61 }
 0x5b7   :  { %v15161_v41 = vadd.f32 %v2224_v42, %v2080_v45  ;;  %v2306_v42 = vmul.f32 %v15140_v15, %v15140_v15 }
 0x5b8   :  { %v10948_v3 = vpop.f32.mrb[24].mxu0 }
 0x5b9   :  { %v10949_v48 = vpop.f32.mrb[25].mxu0  ;;  %v2322_v21 = vsel %vm455_vm2, %v2306_v42, 0.0  ;;  %v2274_v42 = vsel %vm455_vm2, %v15155_v40, 0.0 }
 0x5ba   :  { %v10950_v12 = vadd.f32 %v10949_v48, %v10948_v3  ;;  %v2323_v60 = vadd.f32 %v2322_v21, %v2321_v50  ;;  %v2326_v3 = vsel %vm455_vm2, %v2308_v14, 0.0  ;;  %v2270_v48 = vsel %vm455_vm2, %v15149_v59, 0.0 }
 0x5bb   :  { %v2311_v50 = vmul.f32 %v15155_v40, %v15155_v40 }
 0x5bc   :  { %v2085_v1 = vadd.f32 %v10950_v12, %v15134_v61 }
 0x5bd   :  { %v10951_v55 = vpop.f32.mrb[26].mxu0 }
 0x5be   :  { %v15164_v2 = vadd.f32 %v11573_v56, %v2085_v1  ;;  %v10952_v31 = vpop.f32.mrb[27].mxu0  ;;  %v2264_v56 = vsel %vm455_vm2, %v15140_v15, 0.0 }
 0x5bf   :  { %v10953_v26 = vadd.f32 %v10952_v31, %v10951_v55  ;;  %v2265_v8 = vadd.f32 %v2264_v56, %v2263_v62 }
 0x5c0   :  { %v2285_v62 = vsel %vm455_vm2, %v15164_v2, 0.0 }
 0x5c1   :  { %v2090_v6 = vadd.f32 %v10953_v26, %v15134_v61  ;;  %v2267_v38 = vadd.f32 %v2266_v24, %v2265_v8  ;;  %v2328_v26 = vsel %vm455_vm2, %v2309_v25, 0.0 }
 0x5c3   :  { %v15167_v4 = vadd.f32 %v2234_v0, %v2090_v6  ;;  %v2269_v55 = vadd.f32 %v2268_v51, %v2267_v38  ;;  %v2272_v6 = vsel %vm455_vm2, %v15152_v36, 0.0  ;;  %v2284_v51 = vsel %vm455_vm2, %v15161_v41, 0.0 }
 0x5c4   :  { %v10954_v43 = vpop.f32.mrb[28].mxu0 }
 0x5c5   :  { %v10955_v27 = vpop.f32.mrb[29].mxu0  ;;  %v2315_v21 = vmul.f32 %v15167_v4, %v15167_v4 }
 0x5c6   :  { %v10956_v34 = vadd.f32 %v10955_v27, %v10954_v43 }
 0x5c8   :  { %v2095_v11 = vadd.f32 %v10956_v34, %v15134_v61  ;;  %v2271_v34 = vadd.f32 %v2270_v48, %v2269_v55  ;;  %v2286_v48 = vadd.f32 %v2285_v62, %v2284_v51  ;;  %v2345_v55 = vsel %vm455_vm2, %v2315_v21, 0.0 }
 0x5c9   :  { %v10957_v49 = vpop.f32.mrb[30].mxu0 }
 0x5ca   :  { %v15179_v0 = vadd.f32 %v15123_v39, %v2095_v11  ;;  %v10958_v7 = vpop.f32.mrb[31].mxu0  ;;  %v2324_v39 = vsel %vm455_vm2, %v2307_v30, 0.0  ;;  %v2314_v11 = vmul.f32 %v15164_v2, %v15164_v2  ;;  %v2273_v56 = vadd.f32 %v2272_v6, %v2271_v34 }
 0x5cb   :  { %v10959_v47 = vadd.f32 %v10958_v7, %v10957_v49  ;;  %v2325_v1 = vadd.f32 %v2324_v39, %v2323_v60  ;;  %v2276_v30 = vsel %vm455_vm2, %v15158_v23, 0.0  ;;  %v2287_v60 = vsel %vm455_vm2, %v15167_v4, 0.0 }
 0x5cc   :  { %v2343_v25 = vsel %vm455_vm2, %v2314_v11, 0.0 }
 0x5cd   :  { %v2100_v46 = vadd.f32 %v10959_v47, %v15134_v61  ;;  %v2327_v27 = vadd.f32 %v2326_v3, %v2325_v1  ;;  %v2313_v47 = vmul.f32 %v15161_v41, %v15161_v41  ;;  %v2312_v3 = vmul.f32 %v15158_v23, %v15158_v23 }
 0x5cf   :  { %v15196_v45 = vadd.f32 %v15127_v54, %v2100_v46  ;;  %v2310_v54 = vmul.f32 %v15152_v36, %v15152_v36  ;;  %v2329_v5 = vadd.f32 %v2328_v26, %v2327_v27  ;;  %v2275_v46 = vadd.f32 %v2274_v42, %v2273_v56 }
 0x5d0   :  { %v10960_v12 = vpop.f32.mrb[32].mxu0  ;;  %v2342_v1 = vsel %vm455_vm2, %v2313_v47, 0.0  ;;  %v2288_v27 = vadd.f32 %v2287_v60, %v2286_v48 }
 0x5d1   :  { %v10961_v31 = vpop.f32.mrb[33].mxu0  ;;  %v2330_v8 = vsel %vm455_vm2, %v2310_v54, 0.0  ;;  %v2277_v38 = vadd.f32 %v2276_v30, %v2275_v46  ;;  %v2317_v26 = vmul.f32 %v15196_v45, %v15196_v45  ;;  %v2332_v54 = vsel %vm455_vm2, %v2311_v50, 0.0 }
 0x5d2   :  { %v10962_v43 = vadd.f32 %v10961_v31, %v10960_v12  ;;  %v2289_v31 = vsel %vm455_vm2, %v15179_v0, 0.0  ;;  %v2331_v6 = vadd.f32 %v2330_v8, %v2329_v5  ;;  %v2291_v11 = vsel %vm455_vm2, %v15196_v45, 0.0 }
 0x5d3   :  { %v2278_v30 = vrot.slane %v2277_v38, 4  ;;  %v2290_v47 = vadd.f32 %v2289_v31, %v2288_v27 }
 0x5d4   :  { %v2105_v49 = vadd.f32 %v10962_v43, %v15134_v61  ;;  %v2344_v43 = vadd.f32 %v2343_v25, %v2342_v1  ;;  %v2333_v46 = vadd.f32 %v2332_v54, %v2331_v6 }
 0x5d5   :  { %v10963_v7 = vpop.f32.mrb[34].mxu0 }
 0x5d6   :  { %v15220_v24 = vadd.f32 %v15125_v52, %v2105_v49  ;;  %v10964_v14 = vpop.f32.mrb[35].mxu0  ;;  %v2316_v52 = vmul.f32 %v15179_v0, %v15179_v0  ;;  %v2346_v5 = vadd.f32 %v2345_v55, %v2344_v43 }
 0x5d7   :  { %v10965_v39 = vadd.f32 %v10964_v14, %v10963_v7  ;;  %v2334_v7 = vsel %vm455_vm2, %v2312_v3, 0.0 }
 0x5d8   :  { %v2347_v42 = vsel %vm455_vm2, %v2316_v52, 0.0  ;;  %v2318_v49 = vmul.f32 %v15220_v24, %v15220_v24  ;;  %v2293_v21 = vsel %vm455_vm2, %v15220_v24, 0.0  ;;  %v2279_v52 = vadd.f32 %v2278_v30, %v2277_v38 }
 0x5d9   :  { %v2110_v12 = vadd.f32 %v10965_v39, %v15134_v61  ;;  %v2348_v50 = vadd.f32 %v2347_v42, %v2346_v5  ;;  %v2292_v39 = vadd.f32 %v2291_v11, %v2290_v47  ;;  %v2335_v3 = vadd.f32 %v2334_v7, %v2333_v46 }
 0x5da   :  { %v2351_v25 = vsel %vm455_vm2, %v2318_v49, 0.0  ;;  %v2280_v27 = vrot.slane %v2279_v52, 2 }
 0x5db   :  { %v15242_v34 = vadd.f32 %v15131_v13, %v2110_v12  ;;  %v2349_v13 = vsel %vm455_vm2, %v2317_v26, 0.0  ;;  %v2294_v48 = vadd.f32 %v2293_v21, %v2292_v39  ;;  %v2336_v54 = vrot.slane %v2335_v3, 4 }
 0x5dc   :  { %v10966_v56 = vpop.f32.mrb[36].mxu0  ;;  %v2350_v12 = vadd.f32 %v2349_v13, %v2348_v50 }
 0x5dd   :  { %v10967_v62 = vpop.f32.mrb[37].mxu0  ;;  %v2319_v14 = vmul.f32 %v15242_v34, %v15242_v34  ;;  %v2295_v51 = vsel %vm455_vm2, %v15242_v34, 0.0  ;;  %v2337_v30 = vadd.f32 %v2336_v54, %v2335_v3  ;;  %v349_v54 = vld [vmem:[%s18726_s14 + $0x118] sm:$0xff] }
 0x5de   :  { %v10968_v8 = vadd.f32 %v10967_v62, %v10966_v56  ;;  %v2296_v31 = vadd.f32 %v2295_v51, %v2294_v48  ;;  %v2352_v26 = vadd.f32 %v2351_v25, %v2350_v12  ;;  %v2281_v56 = vadd.f32 %v2280_v27, %v2279_v52  ;;  %v348_v27 = vld [vmem:[%s18726_s14 + $0x110] sm:$0xff] }
 0x5df   :  { %v2353_v1 = vsel %vm455_vm2, %v2319_v14, 0.0  ;;  %v2338_v21 = vrot.slane %v2337_v30, 2  ;;  %v18727_v52 = vmov 0.0   ;;  %v18728_v48 = vmov 0.0|0.0  }
 0x5e0   :  { %v2115_v60 = vadd.f32 %v10968_v8, %v15134_v61  ;;  %v2354_v61 = vadd.f32 %v2353_v1, %v2352_v26  ;;  %v2282_v13 = vrot.slane %v2281_v56, 1  ;;  %v346_v26 = vld [vmem:[%s18726_s14 + $0x100] sm:$0xff] }
 0x5e1   :  { %v2339_v51 = vadd.f32 %v2338_v21, %v2337_v30 }
 0x5e2   :  { %v15262_v55 = vadd.f32 %v15129_v44, %v2115_v60  ;;  %v2283_v50 = vadd.f32 %v2282_v13, %v2281_v56 }
 0x5e3   :  { %v2340_v3 = vrot.slane %v2339_v51, 1 }
 0x5e4   :  { %v2297_v6 = vsel %vm455_vm2, %v15262_v55, 0.0  ;;  %v2320_v43 = vmul.f32 %v15262_v55, %v15262_v55 }
 0x5e5   :  { %v2298_v38 = vadd.f32 %v2297_v6, %v2296_v31  ;;  %v2341_v1 = vadd.f32 %v2340_v3, %v2339_v51  ;;  %v347_v6 = vld [vmem:[%s18726_s14 + $0x108] sm:$0xff] }
 0x5e6   :  { %v2355_v42 = vsel %vm455_vm2, %v2320_v43, 0.0  ;;  %v12446_v43 = vpack.c.bf16 %v347_v6, %v346_v26 }
 0x5e7   :  { %v2299_v11 = vrot.slane %v2298_v38, 4  ;;  %v2356_v49 = vadd.f32 %v2355_v42, %v2354_v61  ;;  %v12450_v61 = vpack.c.bf16 %v349_v54, %v348_v27 }
 0x5e8   :  { %12447 = vmatprep.subr.bf16.mxu0 %v12446_v43 }
 0x5e9   :  { %v2300_v44 = vadd.f32 %v2299_v11, %v2298_v38  ;;  %v2357_v7 = vrot.slane %v2356_v49, 4  ;;  %12449 = vmatpush3.bf16.msra.mxu0 %v12446_v43 }
 0x5ea   :  { %12451 = vmatprep.subr.bf16.mxu0 %v12450_v61 }
 0x5eb   :  { %v2301_v5 = vrot.slane %v2300_v44, 2  ;;  %v2358_v47 = vadd.f32 %v2357_v7, %v2356_v49 }
 0x5ed   :  { %v2302_v62 = vadd.f32 %v2301_v5, %v2300_v44  ;;  %v2359_v14 = vrot.slane %v2358_v47, 2  ;;  %12453 = vmatpush3.bf16.msra.mxu0 %v12450_v61 }
 0x5ee   :  { %12454 = vmatprep.subr.bf16.mxu0 %v18728_v48 }
 0x5ef   :  { %v2303_v8 = vrot.slane %v2302_v62, 1  ;;  %v2360_v46 = vadd.f32 %v2359_v14, %v2358_v47 }
 0x5f1   :  { %v2304_v39 = vadd.f32 %v2303_v8, %v2302_v62  ;;  %v2361_v60 = vrot.slane %v2360_v46, 1 }
 0x5f3   :  { %v2365_v25 = vsel %vm865_vm3, %v2304_v39, %v2283_v50  ;;  %v2362_v12 = vadd.f32 %v2361_v60, %v2360_v46 }
 0x5f4   :  { %11592 = vmatmul.mubr.msk.f32.vlgmr.msra.gmra.mrb[18].mxu1 %vm455_vm2, %v2365_v25 }
 0x5f5   :  { %12410 = vmatpush3.bf16.msra.mxu1 %v14392_v29  ;;  %11602 = vmatprep.mubr.msk.f32.mxu1 %vm13964_vm0, %v18727_v52  ;;  %v2440_v31 = vsel %vm865_vm3, %v2362_v12, %v2341_v1 }
 0x5f6   :  { %12411 = vmatprep.subr.bf16.mxu1 %v18728_v48 }
 0x5f9   :  { %12413 = vmatpush3.bf16.msra.mxu1 %v14400_v33 }
 0x5fc   :  { %11603 = vmatmul.mubr.msk.f32.vlgmr.msra.gmra.mrb[20].mxu1 %vm455_vm2, %v2440_v31 }
 0x6c7   :  { %v2434_v38 = vpop.f32.mrb[18].mxu1 }
 0x6c8   :  { %v11593_v42 = vpop.f32.mrb[19].mxu1  ;;  %v2513_v49 = vmul.f32 0.00390625, %v2434_v38 }
 0x6ca   :  { %v2515_v30 = vmul.f32 %v2513_v49, %v2513_v49  ;;  %v2526_v5 = vrot.slane %v2513_v49, %v14387_v22 }
 0x6cc   :  { %v2527_v62 = vcombine.high %v2526_v5, %v2526_v5  ;;  %v2534_v13 = vrot.slane %v2526_v5, %v14387_v22 }
 0x6ce   :  { %v2541_v21 = vrot.slane %v2527_v62, %v14387_v22  ;;  %v2545_v14 = vrot.slane %v2534_v13, %v14396_v32  ;;  %v10603_v62 = vld [vmem:[%s18730_s6] ss:$0 sm:$0xff] }
 0x6cf   :  { %v2509_v11 = vpop.f32.mrb[20].mxu1 }
 0x6d0   :  { %v11604_v56 = vpop.f32.mrb[21].mxu1  ;;  %v2514_v44 = vmul.f32 0.00390625, %v2509_v11  ;;  %v2549_v46 = vrot.slane %v2541_v21, %v14396_v32  ;;  %v2552_v39 = vsub.f32 %v15137_v37, %v2545_v14  ;;  %v2553_v51 = vsub.f32 %v15140_v15, %v2545_v14 }
 0x6d1   :  { %v2554_v25 = vsub.f32 %v15143_v10, %v2545_v14  ;;  %v2555_v60 = vsub.f32 %v15146_v53, %v2545_v14  ;;  %v2556_v3 = vsub.f32 %v15149_v59, %v2545_v14  ;;  %v2557_v12 = vsub.f32 %v15152_v36, %v2545_v14 }
 0x6d2   :  { %v2516_v7 = vsub.f32 %v2514_v44, %v2515_v30  ;;  %v2558_v26 = vsub.f32 %v15155_v40, %v2545_v14  ;;  %v2559_v6 = vsub.f32 %v15158_v23, %v2545_v14  ;;  %v2560_v37 = vsub.f32 %v15161_v41, %v2549_v46 }
 0x6d3   :  { %v2561_v15 = vsub.f32 %v15164_v2, %v2549_v46  ;;  %v2562_v10 = vsub.f32 %v15167_v4, %v2549_v46  ;;  %v2563_v53 = vsub.f32 %v15179_v0, %v2549_v46  ;;  %v2564_v43 = vsub.f32 %v15196_v45, %v2549_v46  ;;  %v10602_v4 = vld [vmem:[%s18729_s30] ss:$0 sm:$0xff] }
 0x6d4   :  { %v2517_v47 = vadd.f32 1e-05, %v2516_v7  ;;  %v2565_v27 = vsub.f32 %v15220_v24, %v2549_v46  ;;  %v2566_v40 = vsub.f32 %v15242_v34, %v2549_v46  ;;  %v2567_v23 = vsub.f32 %v15262_v55, %v2549_v46 }
 0x6d6   :  { %13344 = vrsqrt.f32 %v2517_v47 }
 0x6e0   :  { %v13345_v8 = vpop.eup %13344 }
 0x6e1   :  { %v2575_v50 = vrot.slane %v13345_v8, %v14387_v22 }
 0x6e3   :  { %v2576_v1 = vcombine.high %v2575_v50, %v2575_v50  ;;  %v2583_v31 = vrot.slane %v2575_v50, %v14387_v22 }
 0x6e5   :  { %v2590_v59 = vrot.slane %v2576_v1, %v14387_v22  ;;  %v2594_v36 = vrot.slane %v2583_v31, %v14396_v32 }
 0x6e7   :  { %v2598_v41 = vrot.slane %v2590_v59, %v14396_v32  ;;  %v2601_v54 = vmul.f32 %v2594_v36, %v2552_v39  ;;  %v2602_v2 = vmul.f32 %v2594_v36, %v2553_v51  ;;  %v2603_v61 = vmul.f32 %v2594_v36, %v2554_v25 }
 0x6e8   :  { %v2604_v0 = vmul.f32 %v2594_v36, %v2555_v60  ;;  %v2605_v38 = vmul.f32 %v2594_v36, %v2556_v3  ;;  %v2606_v42 = vmul.f32 %v2594_v36, %v2557_v12  ;;  %v2607_v11 = vmul.f32 %v2594_v36, %v2558_v26 }
 0x6e9   :  { %v2608_v49 = vmul.f32 %v2594_v36, %v2559_v6  ;;  %v2609_v56 = vmul.f32 %v2598_v41, %v2560_v37  ;;  %v2610_v45 = vmul.f32 %v2598_v41, %v2561_v15  ;;  %v2611_v30 = vmul.f32 %v2598_v41, %v2562_v10 }
 0x6ea   :  { %v2612_v24 = vmul.f32 %v2598_v41, %v2563_v53  ;;  %v2613_v44 = vmul.f32 %v2598_v41, %v2564_v43  ;;  %v2614_v34 = vmul.f32 %v2598_v41, %v2565_v27  ;;  %v2615_v7 = vmul.f32 %v2598_v41, %v2566_v40 }
 0x6eb   :  { %v2616_v55 = vmul.f32 %v2598_v41, %v2567_v23  ;;  %v2623_v5 = vmul.f32 %v10602_v4, %v2601_v54  ;;  %v2624_v47 = vmul.f32 %v10602_v4, %v2602_v2  ;;  %v2625_v13 = vmul.f32 %v10602_v4, %v2603_v61 }
 0x6ec   :  { %v2626_v21 = vmul.f32 %v10602_v4, %v2604_v0  ;;  %v2627_v14 = vmul.f32 %v10602_v4, %v2605_v38  ;;  %v2628_v8 = vmul.f32 %v10602_v4, %v2606_v42  ;;  %v2629_v46 = vmul.f32 %v10602_v4, %v2607_v11 }
 0x6ed   :  { %v15311_v50 = vadd.f32 %v10603_v62, %v2623_v5  ;;  %v15313_v39 = vadd.f32 %v10603_v62, %v2624_v47  ;;  %v2630_v51 = vmul.f32 %v10602_v4, %v2608_v49  ;;  %v15315_v25 = vadd.f32 %v10603_v62, %v2625_v13 }
 0x6ee   :  { %v15317_v60 = vadd.f32 %v10603_v62, %v2626_v21  ;;  %v2631_v3 = vmul.f32 %v10602_v4, %v2609_v56  ;;  %v15319_v12 = vadd.f32 %v10603_v62, %v2627_v14  ;;  %v2632_v1 = vmul.f32 %v10602_v4, %v2610_v45 }
 0x6ef   :  { %v15321_v31 = vadd.f32 %v10603_v62, %v2628_v8  ;;  %v2633_v26 = vmul.f32 %v10602_v4, %v2611_v30  ;;  %v15323_v6 = vadd.f32 %v10603_v62, %v2629_v46  ;;  %v2661_v37 = vsub.f32 0.0, %v15311_v50  ;;  %v330_v46 = vld [vmem:[%s18726_s14 + $0x80] sm:$0xff] }
 0x6f0   :  { %v2662_v15 = vsub.f32 0.0, %v15313_v39  ;;  %v2634_v10 = vmul.f32 %v10602_v4, %v2612_v24  ;;  %v15327_v53 = vadd.f32 %v10603_v62, %v2630_v51  ;;  %v2663_v59 = vsub.f32 0.0, %v15315_v25  ;;  %v331_v51 = vld [vmem:[%s18726_s14 + $0x88] sm:$0xff] }
 0x6f1   :  { %v2664_v36 = vsub.f32 0.0, %v15317_v60  ;;  %v2635_v43 = vmul.f32 %v10602_v4, %v2613_v44  ;;  %v2636_v27 = vmul.f32 %v10602_v4, %v2614_v34  ;;  %v15331_v40 = vadd.f32 %v10603_v62, %v2631_v3 }
 0x6f2   :  { %v2665_v23 = vsub.f32 0.0, %v15319_v12  ;;  %v2637_v41 = vmul.f32 %v10602_v4, %v2615_v7  ;;  %v2638_v54 = vmul.f32 %v10602_v4, %v2616_v55  ;;  %v15334_v2 = vadd.f32 %v10603_v62, %v2632_v1 }
 0x6f3   :  { %v2666_v61 = vsub.f32 0.0, %v15321_v31  ;;  %v15337_v0 = vadd.f32 %v10603_v62, %v2633_v26  ;;  %v2667_v38 = vsub.f32 0.0, %v15323_v6  ;;  %v2677_v42 = vmul.f32 1.442695, %v2661_v37  ;;  %v314_v37 = vld [vmem:[%s18726_s14] sm:$0xff] }
 0x6f4   :  { %v2679_v11 = vmul.f32 1.442695, %v2662_v15  ;;  %v15340_v49 = vadd.f32 %v10603_v62, %v2634_v10  ;;  %v2668_v56 = vsub.f32 0.0, %v15327_v53  ;;  %v2681_v45 = vmul.f32 1.442695, %v2663_v59  ;;  %v315_v15 = vld [vmem:[%s18726_s14 + $0x8] sm:$0xff] }
 0x6f5   :  { %v2683_v30 = vmul.f32 1.442695, %v2664_v36  ;;  %v15343_v24 = vadd.f32 %v10603_v62, %v2635_v43  ;;  %v2669_v4 = vsub.f32 0.0, %v15331_v40  ;;  %13346 = vpow2.f32 %v2677_v42  ;;  %v333_v43 = vld [vmem:[%s18726_s14 + $0x98] sm:$0xff]  ;;  %v335_v42 = vld [vmem:[%s18726_s14 + $0xa8] sm:$0xff] }
 0x6f6   :  { %v2685_v44 = vmul.f32 1.442695, %v2665_v23  ;;  %v15346_v34 = vadd.f32 %v10603_v62, %v2636_v27  ;;  %v2670_v7 = vsub.f32 0.0, %v15334_v2  ;;  %13348 = vpow2.f32 %v2679_v11  ;;  %v316_v27 = vld [vmem:[%s18726_s14 + $0x10] sm:$0xff]  ;;  %v317_v23 = vld [vmem:[%s18726_s14 + $0x18] sm:$0xff] }
 0x6f7   :  { %v2687_v55 = vmul.f32 1.442695, %v2666_v61  ;;  %v15349_v5 = vadd.f32 %v10603_v62, %v2637_v41  ;;  %v2671_v47 = vsub.f32 0.0, %v15337_v0  ;;  %13350 = vpow2.f32 %v2681_v45 }
 0x6f8   :  { %v2689_v13 = vmul.f32 1.442695, %v2667_v38  ;;  %v15352_v21 = vadd.f32 %v10603_v62, %v2638_v54  ;;  %v2672_v14 = vsub.f32 0.0, %v15340_v49  ;;  %13352 = vpow2.f32 %v2683_v30  ;;  %v332_v62 = vld [vmem:[%s18726_s14 + $0x90] sm:$0xff]  ;;  %v334_v38 = vld [vmem:[%s18726_s14 + $0xa0] sm:$0xff] }
 0x6f9   :  { %v2691_v8 = vmul.f32 1.442695, %v2668_v56  ;;  %v2673_v3 = vsub.f32 0.0, %v15343_v24  ;;  %13354 = vpow2.f32 %v2685_v44  ;;  %v2693_v1 = vmul.f32 1.442695, %v2669_v4  ;;  %v318_v44 = vld [vmem:[%s18726_s14 + $0x20] sm:$0xff] }
 0x6fa   :  { %v12414_v26 = vpack.c.bf16 %v331_v51, %v330_v46  ;;  %v2674_v10 = vsub.f32 0.0, %v15346_v34  ;;  %13356 = vpow2.f32 %v2687_v55  ;;  %v2695_v59 = vmul.f32 1.442695, %v2670_v7  ;;  %v319_v7 = vld [vmem:[%s18726_s14 + $0x28] sm:$0xff] }
 0x6fb   :  { %v12416_v36 = vpack.c.bf16 %v315_v15, %v314_v37  ;;  %v2675_v41 = vsub.f32 0.0, %v15349_v5  ;;  %13358 = vpow2.f32 %v2689_v13  ;;  %v2697_v54 = vmul.f32 1.442695, %v2671_v47  ;;  %v336_v47 = vld [vmem:[%s18726_s14 + $0xb0] sm:$0xff]  ;;  %v337_v13 = vld [vmem:[%s18726_s14 + $0xb8] sm:$0xff] }
 0x6fc   :  { %12415 = vmatprep.subr.bf16.mxu1 %v12414_v26  ;;  %v12418_v61 = vpack.c.bf16 %v333_v43, %v332_v62  ;;  %v2676_v11 = vsub.f32 0.0, %v15352_v21  ;;  %13360 = vpow2.f32 %v2691_v8  ;;  %v2699_v56 = vmul.f32 1.442695, %v2672_v14  ;;  %v320_v15 = vld [vmem:[%s18726_s14 + $0x30] sm:$0xff]  ;;  %v321_v62 = vld [vmem:[%s18726_s14 + $0x38] sm:$0xff]  ;;  %v339_v43 = vld [vmem:[%s18726_s14 + $0xc8] sm:$0xff] }
 0x6fd   :  { %12417 = vmatpush3.bf16.msra.mxu1 %v12416_v36  ;;  %v12420_v45 = vpack.c.bf16 %v317_v23, %v316_v27  ;;  %13362 = vpow2.f32 %v2693_v1  ;;  %v2701_v30 = vmul.f32 1.442695, %v2673_v3  ;;  %v12422_v4 = vpack.c.bf16 %v335_v42, %v334_v38  ;;  %v338_v36 = vld [vmem:[%s18726_s14 + $0xc0] sm:$0xff] }
 0x6fe   :  { %12419 = vmatprep.subr.bf16.mxu1 %v12418_v61  ;;  %13364 = vpow2.f32 %v2695_v59  ;;  %v2703_v55 = vmul.f32 1.442695, %v2674_v10  ;;  %v2705_v51 = vmul.f32 1.442695, %v2675_v41  ;;  %v2707_v14 = vmul.f32 1.442695, %v2676_v11 }
 0x6ff   :  { %v13347_v46 = vpop.eup %13346  ;;  %13366 = vpow2.f32 %v2697_v54  ;;  %v12424_v3 = vpack.c.bf16 %v319_v7, %v318_v44  ;;  %v12426_v37 = vpack.c.bf16 %v337_v13, %v336_v47  ;;  %v12428_v61 = vpack.c.bf16 %v321_v62, %v320_v15  ;;  %v340_v44 = vld [vmem:[%s18726_s14 + $0xd0] sm:$0xff]  ;;  %v341_v7 = vld [vmem:[%s18726_s14 + $0xd8] sm:$0xff] }
 0x700   :  { %v13349_v8 = vpop.eup %13348  ;;  %13368 = vpow2.f32 %v2699_v56  ;;  %v2709_v26 = vadd.f32 1.0, %v13347_v46  ;;  %v12430_v11 = vpack.c.bf16 %v339_v43, %v338_v36  ;;  %v322_v56 = vld [vmem:[%s18726_s14 + $0x40] sm:$0xff] }
 0x701   :  { %12421 = vmatpush3.bf16.msra.mxu1 %v12420_v45  ;;  %v13351_v1 = vpop.eup %13350  ;;  %13370 = vpow2.f32 %v2701_v30  ;;  %v2710_v59 = vadd.f32 1.0, %v13349_v8  ;;  %v323_v45 = vld [vmem:[%s18726_s14 + $0x48] sm:$0xff] }
 0x702   :  { %12423 = vmatprep.subr.bf16.mxu1 %v12422_v4  ;;  %v13353_v10 = vpop.eup %13352  ;;  %13372 = vpow2.f32 %v2703_v55  ;;  %v2711_v23 = vadd.f32 1.0, %v13351_v1  ;;  %v324_v1 = vld [vmem:[%s18726_s14 + $0x50] sm:$0xff] }
 0x703   :  { %v13355_v27 = vpop.eup %13354  ;;  %13374 = vpow2.f32 %v2705_v51  ;;  %v2712_v54 = vadd.f32 1.0, %v13353_v10  ;;  %v12432_v51 = vpack.c.bf16 %v323_v45, %v322_v56  ;;  %v342_v45 = vld [vmem:[%s18726_s14 + $0xe0] sm:$0xff] }
 0x704   :  { %v13357_v41 = vpop.eup %13356  ;;  %13376 = vpow2.f32 %v2707_v14  ;;  %v2713_v42 = vadd.f32 1.0, %v13355_v27 }
 0x705   :  { %12425 = vmatpush3.bf16.msra.mxu1 %v12424_v3  ;;  %v13359_v38 = vpop.eup %13358  ;;  %13378 = vrcp.f32 %v2709_v26  ;;  %v2714_v4 = vadd.f32 1.0, %v13357_v41  ;;  %v12434_v3 = vpack.c.bf16 %v341_v7, %v340_v44  ;;  %v325_v26 = vld [vmem:[%s18726_s14 + $0x58] sm:$0xff] }
 0x706   :  { %12427 = vmatprep.subr.bf16.mxu1 %v12426_v37  ;;  %v13361_v30 = vpop.eup %13360  ;;  %13380 = vrcp.f32 %v2710_v59  ;;  %v2715_v47 = vadd.f32 1.0, %v13359_v38  ;;  %v12436_v43 = vpack.c.bf16 %v325_v26, %v324_v1  ;;  %v328_v1 = vld [vmem:[%s18726_s14 + $0x70] sm:$0xff] }
 0x707   :  { %v13363_v55 = vpop.eup %13362  ;;  %13382 = vrcp.f32 %v2711_v23  ;;  %v2716_v46 = vadd.f32 1.0, %v13361_v30  ;;  %v343_v30 = vld [vmem:[%s18726_s14 + $0xe8] sm:$0xff] }
 0x708   :  { %v13365_v13 = vpop.eup %13364  ;;  %13384 = vrcp.f32 %v2712_v54  ;;  %v2717_v14 = vadd.f32 1.0, %v13363_v55  ;;  %v12438_v55 = vpack.c.bf16 %v343_v30, %v342_v45 }
 0x709   :  { %12429 = vmatpush3.bf16.msra.mxu1 %v12428_v61  ;;  %v13367_v8 = vpop.eup %13366  ;;  %13386 = vrcp.f32 %v2713_v42  ;;  %v2718_v15 = vadd.f32 1.0, %v13365_v13 }
 0x70a   :  { %12431 = vmatprep.subr.bf16.mxu1 %v12430_v11  ;;  %v13369_v37 = vpop.eup %13368  ;;  %13388 = vrcp.f32 %v2714_v4  ;;  %v2719_v10 = vadd.f32 1.0, %v13367_v8  ;;  %v326_v4 = vld [vmem:[%s18726_s14 + $0x60] sm:$0xff] }
 0x70b   :  { %v13371_v62 = vpop.eup %13370  ;;  %13390 = vrcp.f32 %v2715_v47  ;;  %v2720_v36 = vadd.f32 1.0, %v13369_v37  ;;  %v327_v47 = vld [vmem:[%s18726_s14 + $0x68] sm:$0xff] }
 0x70c   :  { %v13373_v59 = vpop.eup %13372  ;;  %13392 = vrcp.f32 %v2716_v46  ;;  %v2721_v23 = vadd.f32 1.0, %v13371_v62 }
 0x70d   :  { %12433 = vmatpush3.bf16.msra.mxu1 %v12432_v51  ;;  %v13375_v27 = vpop.eup %13374  ;;  %13394 = vrcp.f32 %v2717_v14  ;;  %v2722_v54 = vadd.f32 1.0, %v13373_v59 }
 0x70e   :  { %12435 = vmatprep.subr.bf16.mxu1 %v12434_v3  ;;  %v13377_v41 = vpop.eup %13376  ;;  %13396 = vrcp.f32 %v2718_v15  ;;  %v2723_v38 = vadd.f32 1.0, %v13375_v27  ;;  %v344_v3 = vld [vmem:[%s18726_s14 + $0xf0] sm:$0xff] }
 0x70f   :  { %v13379_v61 = vpop.eup %13378  ;;  %13398 = vrcp.f32 %v2719_v10  ;;  %v2724_v11 = vadd.f32 1.0, %v13377_v41 }
 0x710   :  { %v13381_v42 = vpop.eup %13380  ;;  %13400 = vrcp.f32 %v2720_v36  ;;  %v2757_v56 = vmul.f32 %v13379_v61, %v15311_v50  ;;  %v12440_v50 = vpack.c.bf16 %v327_v47, %v326_v4 }
 0x711   :  { %12437 = vmatpush3.bf16.msra.mxu1 %v12436_v43  ;;  %v13383_v44 = vpop.eup %13382  ;;  %13402 = vrcp.f32 %v2721_v23  ;;  %v2758_v7 = vmul.f32 %v13381_v42, %v15313_v39  ;;  %v2805_v43 = vld [vmem:[#allocation2 + $0x8] sm:$0xff] }
 0x712   :  { %v13385_v13 = vpop.eup %13384  ;;  %13404 = vrcp.f32 %v2722_v54  ;;  %v2759_v46 = vmul.f32 %v13383_v44, %v15315_v25  ;;  %2773 = vst.msk [vmem:[#allocation2 + $0x20] sm:$0xff] %vm455_vm2, %v2757_v56  ;;  %12439 = vmatprep.subr.bf16.mxu1 %v12438_v55  ;;  %v345_v25 = vld [vmem:[%s18726_s14 + $0xf8] sm:$0xff]  ;;  %v2821_v23 = vld [vmem:[#allocation2 + $0x9] sm:$0xff] }
 0x713   :  { %v13387_v51 = vpop.eup %13386  ;;  %13406 = vrcp.f32 %v2723_v38  ;;  %v2760_v8 = vmul.f32 %v13385_v13, %v15317_v60  ;;  %2774 = vst.msk [vmem:[#allocation2 + $0x38] sm:$0xff] %vm455_vm2, %v2758_v7  ;;  %v12442_v15 = vpack.c.bf16 %v345_v25, %v344_v3  ;;  %v329_v60 = vld [vmem:[%s18726_s14 + $0x78] sm:$0xff]  ;;  %s10513_s14 = sshll.u32 %s13972_s29, 4  ;;  %s10514_s14 = int_to_ptr.vmem [resolvable:$true] %s10513_s14 }
 0x714   :  { %v13389_v39 = vpop.eup %13388  ;;  %13408 = vrcp.f32 %v2724_v11  ;;  %v2761_v14 = vmul.f32 %v13387_v51, %v15319_v12  ;;  %2775 = vst.msk [vmem:[#allocation2 + $0x50] sm:$0xff] %vm455_vm2, %v2759_v46  ;;  %v12444_v59 = vpack.c.bf16 %v329_v60, %v328_v1  ;;  %s13878_s30 = scalar_lea.vmem %s10514_s14, 2048  ;;  %p13883_p7 = scmp.lt.s32.totalorder %s10514_s14, %s10514_s14 }
 0x715   :  { %12441 = vmatpush3.bf16.msra.mxu1 %v12440_v50  ;;  %v13391_v26 = vpop.eup %13390  ;;  %v2762_v37 = vmul.f32 %v13389_v39, %v15321_v31  ;;  %2776 = vst.msk [vmem:[#allocation2 + $0x68] sm:$0xff] %vm455_vm2, %v2760_v8  ;;  %p13879_p6 = scmp.ne.s32.totalorder %s10514_s14, %s13878_s30  ;;  %p13884_p8 = scmp.lt.s32.totalorder %s13878_s30, %s13878_s30 }
 0x716   :  { %v13393_v62 = vpop.eup %13392  ;;  %v2763_v10 = vmul.f32 %v13391_v26, %v15323_v6  ;;  %2777 = vst.msk [vmem:[#allocation2 + $0x80] sm:$0xff] %vm455_vm2, %v2761_v14  ;;  %12443 = vmatprep.subr.bf16.mxu1 %v12442_v15  ;;  %v2924_v26 = vld [vmem:[#allocation2 + $0xe1] sm:$0xff] }
 0x717   :  { %v13395_v12 = vpop.eup %13394  ;;  %v2764_v36 = vmul.f32 %v13393_v62, %v15327_v53  ;;  %2778 = vst.msk [vmem:[#allocation2 + $0x98] sm:$0xff] %vm455_vm2, %v2762_v37  ;;  %p13885_p9 = por %p13884_p8, %p13883_p7 }
 0x718   :  { %v13397_v27 = vpop.eup %13396  ;;  %v2765_v31 = vmul.f32 %v13395_v12, %v15331_v40  ;;  %2779 = vst.msk [vmem:[#allocation2 + $0xb0] sm:$0xff] %vm455_vm2, %v2763_v10 }
 0x719   :  { %12445 = vmatpush3.bf16.msra.mxu1 %v12444_v59  ;;  %v13399_v41 = vpop.eup %13398  ;;  %v2766_v6 = vmul.f32 %v13397_v27, %v15334_v2  ;;  %2780 = vst.msk [vmem:[#allocation2 + $0xc8] sm:$0xff] %vm455_vm2, %v2764_v36  ;;  %v2869_v54 = vld [vmem:[#allocation2 + $0x21] sm:$0xff]  ;;  %p13886_p10 = pnand %p13885_p9, %p13879_p6 }
 0x71a   :  { %v13401_v61 = vpop.eup %13400  ;;  %v2767_v53 = vmul.f32 %v13399_v41, %v15337_v0  ;;  %2781 = vst.msk [vmem:[#allocation2 + $0x110] sm:$0xff] %vm455_vm2, %v2765_v31  ;;  %v2917_v38 = vld [vmem:[#allocation2 + $0x39] sm:$0xff]  ;;  %v13038_v11 = vpack.i.bf16 %v2805_v43, %v2869_v54 }
 0x71b   :  { %v15411_v42 = vld [vmem:[#allocation2 + $0x37] sm:$0xff]  ;;  %v13403_v40 = vpop.eup %13402  ;;  %v2768_v56 = vmul.f32 %v13401_v61, %v15340_v49  ;;  %2782 = vst.msk [vmem:[#allocation2 + $0x128] sm:$0xff] %vm455_vm2, %v2766_v6  ;;  %11613 = vmatprep.mubr.msk.f32.mxu0 %vm455_vm2, %v2917_v38  ;;  %v15419_v30 = vld [vmem:[#allocation2 + $0x1f] sm:$0xff]  ;;  %v15447_v8 = vld [vmem:[#allocation2 + $0x4f] sm:$0xff] }
 0x71c   :  { %v15416_v2 = vld [vmem:[#allocation2 + $0x51] sm:$0xff]  ;;  %v13043_v45 = vpack.i.bf16 %v2821_v23, %v15411_v42  ;;  %v13405_v4 = vpop.eup %13404  ;;  %v2769_v44 = vmul.f32 %v13403_v40, %v15343_v24  ;;  %2783 = vst.msk [vmem:[#allocation2 + $0x140] sm:$0xff] %vm455_vm2, %v2767_v53  ;;  %v15427_v49 = vld [vmem:[#allocation2 + $0x69] sm:$0xff]  ;;  %13039 = vrot.lane.b32.xlu0 %v13038_v11, %s13968_s21  ;;  %v15430_v7 = vld [vmem:[#allocation2 + $0x20] sm:$0xff]  ;;  %v13058_v39 = vpack.i.bf16 %v2869_v54, %v15447_v8 }
 0x71d   :  { %v15421_v0 = vld [vmem:[#allocation2 + $0x38] sm:$0xff]  ;;  %11614 = vmatmul.mubr.msk.f32.vlgmr.msra.gmra.mrb[38].mxu0 %vm455_vm2, %v15416_v2  ;;  %v13407_v55 = vpop.eup %13406  ;;  %v2770_v47 = vmul.f32 %v13405_v4, %v15346_v34  ;;  %2784 = vst.msk [vmem:[#allocation2 + $0x158] sm:$0xff] %vm455_vm2, %v2768_v56  ;;  %v15444_v34 = vld [vmem:[#allocation2 + $0x81] sm:$0xff]  ;;  %v13053_v51 = vpack.i.bf16 %v15430_v7, %v2917_v38 }
 0x71e   :  { %11616 = vmatprep.mubr.msk.f32.mxu0 %vm455_vm2, %v15427_v49  ;;  %13044 = vrot.lane.b32.xlu1 %v13043_v45, %s13969_s25  ;;  %v13409_v24 = vpop.eup %13408  ;;  %v2771_v13 = vmul.f32 %v13407_v55, %v15349_v5  ;;  %2785 = vst.msk [vmem:[#allocation2 + $0x170] sm:$0xff] %vm455_vm2, %v2769_v44  ;;  %v13048_v46 = vpack.i.bf16 %v15419_v30, %v15421_v0  ;;  %v15453_v5 = vld [vmem:[#allocation2 + $0x99] sm:$0xff]  ;;  %v15474_v1 = vld [vmem:[#allocation2 + $0x67] sm:$0xff] }
 0x71f   :  { %12456 = vmatpush3.bf16.msra.mxu0 %v14392_v29  ;;  %v2772_v50 = vmul.f32 %v13409_v24, %v15352_v21  ;;  %2786 = vst.msk [vmem:[#allocation2 + $0x188] sm:$0xff] %vm455_vm2, %v2770_v47  ;;  %v15456_v21 = vld [vmem:[#allocation2 + $0x50] sm:$0xff]  ;;  %v13068_v37 = vpack.i.bf16 %v15421_v0, %v15416_v2  ;;  %v13073_v15 = vpack.i.bf16 %v2917_v38, %v15474_v1  ;;  %v15482_v60 = vld [vmem:[#allocation2 + $0x68] sm:$0xff]  ;;  %v15497_v36 = vld [vmem:[#allocation2 + $0x7f] sm:$0xff] }
 0x720   :  { %12457 = vmatprep.subr.bf16.mxu0 %v18728_v48  ;;  %2787 = vst.msk [vmem:[#allocation2 + $0x1a0] sm:$0xff] %vm455_vm2, %v2771_v13  ;;  %13049 = vrot.lane.b32.xlu0 %v13048_v46, %s13967_s9  ;;  %v15464_v14 = vld [vmem:[#allocation2 + $0xb1] sm:$0xff]  ;;  %v13063_v3 = vpack.i.bf16 %v15411_v42, %v15456_v21  ;;  %v15471_v25 = vld [vmem:[#allocation2 + $0xc9] sm:$0xff]  ;;  %v13078_v10 = vpack.i.bf16 %v15447_v8, %v15482_v60  ;;  %v15504_v27 = vld [vmem:[#allocation2 + $0x80] sm:$0xff] }
 0x721   :  { %11617 = vmatmul.mubr.msk.f32.gmra.mrb[40].mxu0 %vm455_vm2, %v15444_v34  ;;  %2788 = vst.msk [vmem:[#allocation2 + $0x1b8] sm:$0xff] %vm455_vm2, %v2772_v50  ;;  %v13083_v12 = vpack.i.bf16 %v15456_v21, %v15427_v49  ;;  %v13088_v31 = vpack.i.bf16 %v15416_v2, %v15497_v36  ;;  %v13093_v41 = vpack.i.bf16 %v15474_v1, %v15504_v27  ;;  %v15520_v54 = vld [vmem:[#allocation2 + $0x97] sm:$0xff]  ;;  %v15545_v45 = vld [vmem:[#allocation2 + $0xaf] sm:$0xff]  ;;  %v2891_v55 = vld [vmem:[#allocation2 + $0xc7] sm:$0xff] }
 0x722   :  { %11619 = vmatprep.mubr.msk.f32.mxu0 %vm455_vm2, %v15453_v5  ;;  %13054 = vrot.lane.b32.xlu1 %v13053_v51, %s13968_s21  ;;  %v15486_v62 = vld [vmem:[#allocation2 + $0x129] sm:$0xff]  ;;  %v13098_v61 = vpack.i.bf16 %v15482_v60, %v15444_v34  ;;  %v13103_v38 = vpack.i.bf16 %v15427_v49, %v15520_v54  ;;  %v15531_v11 = vld [vmem:[#allocation2 + $0x98] sm:$0xff]  ;;  %v13113_v2 = vpack.i.bf16 %v15504_v27, %v15453_v5  ;;  %v2908_v51 = vld [vmem:[#allocation2 + $0xe0] sm:$0xff] }
 0x723   :  { %12459 = vmatpush3.bf16.msra.mxu0 %v14400_v33  ;;  %v15493_v59 = vld [vmem:[#allocation2 + $0x141] sm:$0xff]  ;;  %v13108_v56 = vpack.i.bf16 %v15497_v36, %v15531_v11  ;;  %v15548_v4 = vld [vmem:[#allocation2 + $0xb0] sm:$0xff]  ;;  %v13118_v44 = vpack.i.bf16 %v15444_v34, %v15545_v45  ;;  %v13128_v47 = vpack.i.bf16 %v15531_v11, %v15464_v14  ;;  %v13133_v24 = vpack.i.bf16 %v15453_v5, %v2891_v55 }
 0x724   :  { %12460 = vmatprep.subr.bf16.mxu0 %v18728_v48  ;;  %13059 = vrot.lane.b32.xlu0 %v13058_v39, %s13969_s25  ;;  %v15502_v43 = vld [vmem:[#allocation2 + $0x159] sm:$0xff]  ;;  %v13123_v49 = vpack.i.bf16 %v15520_v54, %v15548_v4  ;;  %v15560_v13 = vld [vmem:[#allocation2 + $0xc8] sm:$0xff]  ;;  %v13143_v50 = vpack.i.bf16 %v15548_v4, %v15471_v25  ;;  %v13153_v39 = vpack.i.bf16 %v2891_v55, %v2908_v51 }
 0x725   :  { %11620 = vmatmul.mubr.msk.f32.gmra.mrb[42].mxu0 %vm455_vm2, %v15464_v14  ;;  %v15511_v23 = vld [vmem:[#allocation2 + $0x171] sm:$0xff]  ;;  %v13138_v46 = vpack.i.bf16 %v15545_v45, %v15560_v13  ;;  %v2892_v34 = vld [vmem:[#allocation2 + $0xdf] sm:$0xff] }
 0x726   :  { %11622 = vmatprep.mubr.msk.f32.mxu0 %vm455_vm2, %v15471_v25  ;;  %13064 = vrot.lane.b32.xlu1 %v13063_v3, %s13967_s9  ;;  %v15518_v6 = vld [vmem:[#allocation2 + $0x189] sm:$0xff]  ;;  %v13148_v5 = vpack.i.bf16 %v15464_v14, %v2892_v34  ;;  %v2813_v3 = vld [vmem:[#allocation2 + $0xf8] sm:$0xff] }
 0x727   :  { %v15527_v53 = vld [vmem:[#allocation2 + $0x1a1] sm:$0xff]  ;;  %v15581_v14 = vld [vmem:[#allocation2 + $0x110] sm:$0xff] }
 0x728   :  { %13069 = vrot.lane.b32.xlu0 %v13068_v37, %s13968_s21  ;;  %v15536_v40 = vld [vmem:[#allocation2 + $0x1b9] sm:$0xff]  ;;  %v15613_v34 = vld [vmem:[#allocation2 + $0x16f] sm:$0xff] }
 0x729   :  { %11623 = vmatmul.mubr.msk.f32.gmra.mrb[44].mxu0 %vm455_vm2, %v2924_v26  ;;  %v2877_v26 = vld [vmem:[#allocation2 + $0x111] sm:$0xff]  ;;  %v2829_v37 = vld [vmem:[#allocation2 + $0xf9] sm:$0xff] }
 0x72a   :  { %13074 = vrot.lane.b32.xlu1 %v13073_v15, %s13969_s25  ;;  %11625 = vmatprep.mubr.msk.f32.mxu0 %vm455_vm2, %v15486_v62  ;;  %v15572_v15 = vld [vmem:[#allocation2 + $0x127] sm:$0xff]  ;;  %v15616_v51 = vld [vmem:[#allocation2 + $0x170] sm:$0xff] }
 0x72b   :  { %v13163_v25 = vpack.i.bf16 %v2829_v37, %v15572_v15  ;;  %v15631_v37 = vld [vmem:[#allocation2 + $0x188] sm:$0xff] }
 0x72c   :  { %13079 = vrot.lane.b32.xlu0 %v13078_v10, %s13967_s9  ;;  %v13158_v10 = vpack.i.bf16 %v2813_v3, %v2877_v26 }
 0x72d   :  { %11626 = vmatmul.mubr.msk.f32.gmra.mrb[46].mxu0 %vm455_vm2, %v15493_v59 }
 0x72e   :  { %13084 = vrot.lane.b32.xlu1 %v13083_v12, %s13968_s21  ;;  %11628 = vmatprep.mubr.msk.f32.mxu0 %vm455_vm2, %v15502_v43  ;;  %v15576_v12 = vld [vmem:[#allocation2 + $0x10f] sm:$0xff] }
 0x730   :  { %13089 = vrot.lane.b32.xlu0 %v13088_v31, %s13969_s25  ;;  %v15578_v31 = vld [vmem:[#allocation2 + $0x128] sm:$0xff] }
 0x731   :  { %11629 = vmatmul.mubr.msk.f32.gmra.mrb[48].mxu0 %vm455_vm2, %v15511_v23  ;;  %v13188_v55 = vpack.i.bf16 %v15578_v31, %v15493_v59 }
 0x732   :  { %13094 = vrot.lane.b32.xlu1 %v13093_v41, %s13967_s9  ;;  %11631 = vmatprep.mubr.msk.f32.mxu0 %vm455_vm2, %v15518_v6  ;;  %v13168_v41 = vpack.i.bf16 %v15576_v12, %v15578_v31 }
 0x734   :  { %13099 = vrot.lane.b32.xlu0 %v13098_v61, %s13968_s21  ;;  %v13173_v61 = vpack.i.bf16 %v15581_v14, %v15486_v62 }
 0x735   :  { %11632 = vmatmul.mubr.msk.f32.gmra.mrb[50].mxu0 %vm455_vm2, %v15527_v53 }
 0x736   :  { %13104 = vrot.lane.b32.xlu1 %v13103_v38, %s13969_s25  ;;  %11634 = vmatprep.mubr.msk.f32.mxu0 %vm455_vm2, %v15536_v40  ;;  %v15588_v38 = vld [vmem:[#allocation2 + $0x13f] sm:$0xff] }
 0x738   :  { %13109 = vrot.lane.b32.xlu0 %v13108_v56, %s13967_s9  ;;  %v15591_v56 = vld [vmem:[#allocation2 + $0x140] sm:$0xff] }
 0x73a   :  { %13114 = vrot.lane.b32.xlu1 %v13113_v2, %s13968_s21  ;;  %v13178_v2 = vpack.i.bf16 %v2877_v26, %v15588_v38 }
 0x73c   :  { %13119 = vrot.lane.b32.xlu0 %v13118_v44, %s13969_s25  ;;  %v13183_v44 = vpack.i.bf16 %v15572_v15, %v15591_v56 }
 0x73e   :  { %13124 = vrot.lane.b32.xlu1 %v13123_v49, %s13967_s9  ;;  %v15598_v49 = vld [vmem:[#allocation2 + $0x157] sm:$0xff] }
 0x740   :  { %13129 = vrot.lane.b32.xlu0 %v13128_v47, %s13968_s21  ;;  %v13193_v47 = vpack.i.bf16 %v15486_v62, %v15598_v49  ;;  %v13208_v62 = vpack.i.bf16 %v15493_v59, %v15613_v34  ;;  %v13228_v59 = vpack.i.bf16 %v15613_v34, %v15631_v37 }
 0x742   :  { %13134 = vrot.lane.b32.xlu1 %v13133_v24, %s13969_s25  ;;  %v15605_v24 = vld [vmem:[#allocation2 + $0x158] sm:$0xff] }
 0x743   :  { %v13218_v3 = vpack.i.bf16 %v15605_v24, %v15511_v23 }
 0x744   :  { %13139 = vrot.lane.b32.xlu0 %v13138_v46, %s13967_s9  ;;  %v13198_v46 = vpack.i.bf16 %v15588_v38, %v15605_v24 }
 0x746   :  { %13144 = vrot.lane.b32.xlu1 %v13143_v50, %s13968_s21  ;;  %v13203_v50 = vpack.i.bf16 %v15591_v56, %v15502_v43 }
 0x748   :  { %13149 = vrot.lane.b32.xlu0 %v13148_v5, %s13969_s25  ;;  %v13213_v5 = vpack.i.bf16 %v15598_v49, %v15616_v51 }
 0x74a   :  { %13154 = vrot.lane.b32.xlu1 %v13153_v39, %s13967_s9  ;;  %v15624_v39 = vld [vmem:[#allocation2 + $0x187] sm:$0xff] }
 0x74b   :  { %v13223_v26 = vpack.i.bf16 %v15502_v43, %v15624_v39 }
 0x74c   :  { %13159 = vrot.lane.b32.xlu0 %v13158_v10, %s13968_s21  ;;  %v13233_v10 = vpack.i.bf16 %v15616_v51, %v15518_v6 }
 0x74e   :  { %13164 = vrot.lane.b32.xlu1 %v13163_v25, %s13969_s25  ;;  %v15639_v25 = vld [vmem:[#allocation2 + $0x19f] sm:$0xff] }
 0x74f   :  { %v13238_v43 = vpack.i.bf16 %v15511_v23, %v15639_v25 }
 0x750   :  { %13169 = vrot.lane.b32.xlu0 %v13168_v41, %s13967_s9  ;;  %v15642_v41 = vld [vmem:[#allocation2 + $0x1a0] sm:$0xff] }
 0x752   :  { %13174 = vrot.lane.b32.xlu1 %v13173_v61, %s13968_s21  ;;  %v13243_v61 = vpack.i.bf16 %v15624_v39, %v15642_v41 }
 0x754   :  { %13179 = vrot.lane.b32.xlu0 %v13178_v2, %s13969_s25  ;;  %v2899_v2 = vld [vmem:[#allocation2 + $0x1b7] sm:$0xff] }
 0x756   :  { %13184 = vrot.lane.b32.xlu1 %v13183_v44, %s13967_s9  ;;  %v13248_v44 = vpack.i.bf16 %v15631_v37, %v15527_v53 }
 0x758   :  { %13189 = vrot.lane.b32.xlu0 %v13188_v55, %s13968_s21  ;;  %v13253_v55 = vpack.i.bf16 %v15518_v6, %v2899_v2  ;;  %v2916_v6 = vld [vmem:[#allocation2 + $0x1d0] sm:$0xff] }
 0x75a   :  { %13194 = vrot.lane.b32.xlu1 %v13193_v47, %s13969_s25  ;;  %v15654_v47 = vld [vmem:[#allocation2 + $0x1b8] sm:$0xff] }
 0x75b   :  { %v13258_v23 = vpack.i.bf16 %v15639_v25, %v15654_v47 }
 0x75c   :  { %13199 = vrot.lane.b32.xlu0 %v13198_v46, %s13967_s9  ;;  %v2932_v46 = vld [vmem:[#allocation2 + $0x1d1] sm:$0xff] }
 0x75d   :  { %11635 = vmatmul.mubr.msk.f32.gmra.mrb[52].mxu0 %vm455_vm2, %v2932_v46 }
 0x75e   :  { %13204 = vrot.lane.b32.xlu1 %v13203_v50, %s13968_s21  ;;  %11645 = vmatprep.mubr.msk.f32.mxu0 %vm13964_vm0, %v18727_v52  ;;  %v13263_v50 = vpack.i.bf16 %v15642_v41, %v15536_v40 }
 0x760   :  { %13209 = vrot.lane.b32.xlu0 %v13208_v62, %s13969_s25  ;;  %v2900_v62 = vld [vmem:[#allocation2 + $0x1cf] sm:$0xff] }
 0x762   :  { %13214 = vrot.lane.b32.xlu1 %v13213_v5, %s13967_s9  ;;  %v13268_v5 = vpack.i.bf16 %v15527_v53, %v2900_v62 }
 0x764   :  { %13219 = vrot.lane.b32.xlu0 %v13218_v3, %s13968_s21  ;;  %v13273_v3 = vpack.i.bf16 %v2899_v2, %v2916_v6 }
 0x766   :  { %13224 = vrot.lane.b32.xlu1 %v13223_v26, %s13969_s25 }
 0x768   :  { %13229 = vrot.lane.b32.xlu0 %v13228_v59, %s13967_s9  ;;  %v2789_v59 = vld [vmem:[#allocation2 + $0x7] sm:$0xff] }
 0x76a   :  { %13234 = vrot.lane.b32.xlu1 %v13233_v10, %s13968_s21 }
 0x76c   :  { %13239 = vrot.lane.b32.xlu0 %v13238_v43, %s13969_s25 }
 0x76e   :  { %13244 = vrot.lane.b32.xlu1 %v13243_v61, %s13967_s9 }
 0x770   :  { %13249 = vrot.lane.b32.xlu0 %v13248_v44, %s13968_s21 }
 0x772   :  { %13254 = vrot.lane.b32.xlu1 %v13253_v55, %s13969_s25 }
 0x774   :  { %13259 = vrot.lane.b32.xlu0 %v13258_v23, %s13967_s9 }
 0x776   :  { %13264 = vrot.lane.b32.xlu1 %v13263_v50, %s13968_s21 }
 0x778   :  { %13269 = vrot.lane.b32.xlu0 %v13268_v5, %s13969_s25  ;;  %s18843_s25 = sld [smem:[#allocation45_spill]] }
 0x77a   :  { %13274 = vrot.lane.b32.xlu1 %v13273_v3, %s13967_s9 }
 0x78e   :  { %v13040_v26 = vpop.permute.xlu0 %13039 }
 0x78f   :  { %v13042_v43 = vunpack.i.h.bf16 %v13040_v26  ;;  %v13041_v61 = vunpack.i.l.bf16 %v13040_v26 }
 0x790   :  { %v13045_v10 = vpop.permute.xlu1 %13044 }
 0x791   :  { %v13047_v44 = vunpack.i.h.bf16 %v13045_v10  ;;  %v13046_v40 = vunpack.i.l.bf16 %v13045_v10  ;;  %v3365_v55 = vsel %vm455_vm2, %v15430_v7, %v13041_v61  ;;  %v3317_v46 = vsel %vm455_vm2, %v2789_v59, %v13042_v43 }
 0x792   :  { %v13050_v23 = vpop.permute.xlu0 %13049 }
 0x793   :  { %v13052_v50 = vunpack.i.h.bf16 %v13050_v23  ;;  %v13051_v53 = vunpack.i.l.bf16 %v13050_v23  ;;  %v3381_v5 = vsel %vm1837_vm4, %v3365_v55, %v13046_v40  ;;  %v3333_v3 = vsel %vm1837_vm4, %v3317_v46, %v13047_v44 }
 0x794   :  { %v13055_v2 = vpop.permute.xlu1 %13054 }
 0x795   :  { %v13057_v62 = vunpack.i.h.bf16 %v13055_v2  ;;  %v13056_v6 = vunpack.i.l.bf16 %v13055_v2  ;;  %v3397_v32 = vsel %vm1854_vm5, %v3381_v5, %v13051_v53  ;;  %v3349_v26 = vsel %vm1854_vm5, %v3333_v3, %v13052_v50 }
 0x796   :  { %3531 = vmatprep.mubr.f32.mxu1 %v3397_v32  ;;  %v13060_v10 = vpop.permute.xlu0 %13059 }
 0x797   :  { %v13062_v22 = vunpack.i.h.bf16 %v13060_v10  ;;  %v13061_v7 = vunpack.i.l.bf16 %v13060_v10  ;;  %3532 = vmatmul.mubr.f32.vlgmr.msra.gmra.mrb[22].mxu1 %v3349_v26  ;;  %v3366_v23 = vsel %vm455_vm2, %v15421_v0, %v13056_v6  ;;  %v3318_v40 = vsel %vm455_vm2, %v15419_v30, %v13057_v62 }
 0x798   :  { %v13065_v61 = vpop.permute.xlu1 %13064 }
 0x799   :  { %v13067_v59 = vunpack.i.h.bf16 %v13065_v61  ;;  %v13066_v43 = vunpack.i.l.bf16 %v13065_v61  ;;  %v3382_v44 = vsel %vm1837_vm4, %v3366_v23, %v13061_v7  ;;  %v3334_v55 = vsel %vm1837_vm4, %v3318_v40, %v13062_v22 }
 0x79a   :  { %v13070_v46 = vpop.permute.xlu0 %13069 }
 0x79b   :  { %v3398_v32 = vsel %vm1854_vm5, %v3382_v44, %v13066_v43  ;;  %v3350_v50 = vsel %vm1854_vm5, %v3334_v55, %v13067_v59  ;;  %v13072_v53 = vunpack.i.h.bf16 %v13070_v46  ;;  %v13071_v2 = vunpack.i.l.bf16 %v13070_v46 }
 0x79c   :  { %v13075_v5 = vpop.permute.xlu1 %13074  ;;  %3536 = vmatprep.mubr.f32.mxu1 %v3398_v32 }
 0x79d   :  { %v13077_v3 = vunpack.i.h.bf16 %v13075_v5  ;;  %v13076_v26 = vunpack.i.l.bf16 %v13075_v5  ;;  %3537 = vmatmul.mubr.f32.gmra.mrb[24].mxu1 %v3350_v50  ;;  %v3367_v0 = vsel %vm455_vm2, %v15456_v21, %v13071_v2  ;;  %v3319_v30 = vsel %vm455_vm2, %v15411_v42, %v13072_v53 }
 0x79e   :  { %v13080_v62 = vpop.permute.xlu0 %13079 }
 0x79f   :  { %v13082_v22 = vunpack.i.h.bf16 %v13080_v62  ;;  %v13081_v6 = vunpack.i.l.bf16 %v13080_v62  ;;  %v3383_v59 = vsel %vm1837_vm4, %v3367_v0, %v13076_v26  ;;  %v3335_v43 = vsel %vm1837_vm4, %v3319_v30, %v13077_v3 }
 0x7a0   :  { %v13085_v10 = vpop.permute.xlu1 %13084 }
 0x7a1   :  { %v13087_v7 = vunpack.i.h.bf16 %v13085_v10  ;;  %v13086_v61 = vunpack.i.l.bf16 %v13085_v10  ;;  %v3399_v23 = vsel %vm1854_vm5, %v3383_v59, %v13081_v6  ;;  %v3351_v40 = vsel %vm1854_vm5, %v3335_v43, %v13082_v22 }
 0x7a2   :  { %v13090_v44 = vpop.permute.xlu0 %13089  ;;  %3541 = vmatprep.mubr.f32.mxu1 %v3399_v23 }
 0x7a3   :  { %v13092_v21 = vunpack.i.h.bf16 %v13090_v44  ;;  %v13091_v55 = vunpack.i.l.bf16 %v13090_v44  ;;  %3542 = vmatmul.mubr.f32.gmra.mrb[26].mxu1 %v3351_v40  ;;  %v3368_v50 = vsel %vm455_vm2, %v15482_v60, %v13086_v61  ;;  %v3320_v53 = vsel %vm455_vm2, %v15447_v8, %v13087_v7 }
 0x7a4   :  { %v13095_v46 = vpop.permute.xlu1 %13094 }
 0x7a5   :  { %v13097_v42 = vunpack.i.h.bf16 %v13095_v46  ;;  %v13096_v32 = vunpack.i.l.bf16 %v13095_v46  ;;  %v3384_v2 = vsel %vm1837_vm4, %v3368_v50, %v13091_v55  ;;  %v3336_v5 = vsel %vm1837_vm4, %v3320_v53, %v13092_v21 }
 0x7a6   :  { %v13100_v3 = vpop.permute.xlu0 %13099 }
 0x7a7   :  { %v3400_v26 = vsel %vm1854_vm5, %v3384_v2, %v13096_v32  ;;  %v3352_v0 = vsel %vm1854_vm5, %v3336_v5, %v13097_v42  ;;  %v13102_v30 = vunpack.i.h.bf16 %v13100_v3  ;;  %v13101_v62 = vunpack.i.l.bf16 %v13100_v3 }
 0x7a8   :  { %v13105_v22 = vpop.permute.xlu1 %13104  ;;  %3546 = vmatprep.mubr.f32.mxu1 %v3400_v26 }
 0x7a9   :  { %v13107_v6 = vunpack.i.h.bf16 %v13105_v22  ;;  %v13106_v10 = vunpack.i.l.bf16 %v13105_v22  ;;  %3547 = vmatmul.mubr.f32.gmra.mrb[28].mxu1 %v3352_v0  ;;  %v3369_v60 = vsel %vm455_vm2, %v15504_v27, %v13101_v62  ;;  %v3321_v8 = vsel %vm455_vm2, %v15474_v1, %v13102_v30 }
 0x7aa   :  { %v13110_v7 = vpop.permute.xlu0 %13109 }
 0x7ab   :  { %v13112_v61 = vunpack.i.h.bf16 %v13110_v7  ;;  %v13111_v59 = vunpack.i.l.bf16 %v13110_v7  ;;  %v3385_v44 = vsel %vm1837_vm4, %v3369_v60, %v13106_v10  ;;  %v3337_v21 = vsel %vm1837_vm4, %v3321_v8, %v13107_v6 }
 0x7ac   :  { %v13115_v43 = vpop.permute.xlu1 %13114 }
 0x7ad   :  { %v13117_v23 = vunpack.i.h.bf16 %v13115_v43  ;;  %v13116_v40 = vunpack.i.l.bf16 %v13115_v43  ;;  %v3401_v55 = vsel %vm1854_vm5, %v3385_v44, %v13111_v59  ;;  %v3353_v46 = vsel %vm1854_vm5, %v3337_v21, %v13112_v61 }
 0x7ae   :  { %v13120_v42 = vpop.permute.xlu0 %13119  ;;  %3551 = vmatprep.mubr.f32.mxu1 %v3401_v55 }
 0x7af   :  { %v13122_v27 = vunpack.i.h.bf16 %v13120_v42  ;;  %v13121_v32 = vunpack.i.l.bf16 %v13120_v42  ;;  %3552 = vmatmul.mubr.f32.gmra.mrb[30].mxu1 %v3353_v46  ;;  %v3370_v2 = vsel %vm455_vm2, %v15531_v11, %v13116_v40  ;;  %v3322_v5 = vsel %vm455_vm2, %v15497_v36, %v13117_v23 }
 0x7b0   :  { %v13125_v50 = vpop.permute.xlu1 %13124 }
 0x7b1   :  { %v13127_v1 = vunpack.i.h.bf16 %v13125_v50  ;;  %v13126_v53 = vunpack.i.l.bf16 %v13125_v50  ;;  %v3386_v3 = vsel %vm1837_vm4, %v3370_v2, %v13121_v32  ;;  %v3338_v26 = vsel %vm1837_vm4, %v3322_v5, %v13122_v27 }
 0x7b2   :  { %v13130_v0 = vpop.permute.xlu0 %13129 }
 0x7b3   :  { %v3402_v30 = vsel %vm1854_vm5, %v3386_v3, %v13126_v53  ;;  %v3354_v62 = vsel %vm1854_vm5, %v3338_v26, %v13127_v1  ;;  %v13132_v22 = vunpack.i.h.bf16 %v13130_v0  ;;  %v13131_v6 = vunpack.i.l.bf16 %v13130_v0 }
 0x7b4   :  { %v13135_v10 = vpop.permute.xlu1 %13134  ;;  %3556 = vmatprep.mubr.f32.mxu1 %v3402_v30  ;;  %v2797_v30 = vld [vmem:[#allocation2 + $0xf7] sm:$0xff] }
 0x7b5   :  { %v13137_v60 = vunpack.i.h.bf16 %v13135_v10  ;;  %v13136_v8 = vunpack.i.l.bf16 %v13135_v10  ;;  %3557 = vmatmul.mubr.f32.gmra.mrb[32].mxu1 %v3354_v62  ;;  %v3371_v11 = vsel %vm455_vm2, %v15548_v4, %v13131_v6  ;;  %v3323_v36 = vsel %vm455_vm2, %v15520_v54, %v13132_v22 }
 0x7b6   :  { %v13140_v7 = vpop.permute.xlu0 %13139 }
 0x7b7   :  { %v13142_v61 = vunpack.i.h.bf16 %v13140_v7  ;;  %v13141_v59 = vunpack.i.l.bf16 %v13140_v7  ;;  %v3387_v44 = vsel %vm1837_vm4, %v3371_v11, %v13136_v8  ;;  %v3339_v21 = vsel %vm1837_vm4, %v3323_v36, %v13137_v60 }
 0x7b8   :  { %v13145_v43 = vpop.permute.xlu1 %13144 }
 0x7b9   :  { %v13147_v23 = vunpack.i.h.bf16 %v13145_v43  ;;  %v13146_v40 = vunpack.i.l.bf16 %v13145_v43  ;;  %v3403_v55 = vsel %vm1854_vm5, %v3387_v44, %v13141_v59  ;;  %v3355_v46 = vsel %vm1854_vm5, %v3339_v21, %v13142_v61 }
 0x7ba   :  { %v13150_v42 = vpop.permute.xlu0 %13149  ;;  %3561 = vmatprep.mubr.f32.mxu1 %v3403_v55 }
 0x7bb   :  { %v13152_v4 = vunpack.i.h.bf16 %v13150_v42  ;;  %v13151_v27 = vunpack.i.l.bf16 %v13150_v42  ;;  %3562 = vmatmul.mubr.f32.gmra.mrb[34].mxu1 %v3355_v46  ;;  %v3372_v1 = vsel %vm455_vm2, %v15560_v13, %v13146_v40  ;;  %v3324_v53 = vsel %vm455_vm2, %v15545_v45, %v13147_v23 }
 0x7bc   :  { %v13155_v32 = vpop.permute.xlu1 %13154 }
 0x7bd   :  { %v13157_v54 = vunpack.i.h.bf16 %v13155_v32  ;;  %v13156_v50 = vunpack.i.l.bf16 %v13155_v32  ;;  %v3388_v2 = vsel %vm1837_vm4, %v3372_v1, %v13151_v27  ;;  %v3340_v5 = vsel %vm1837_vm4, %v3324_v53, %v13152_v4 }
 0x7be   :  { %v13160_v3 = vpop.permute.xlu0 %13159 }
 0x7bf   :  { %v3404_v26 = vsel %vm1854_vm5, %v3388_v2, %v13156_v50  ;;  %v3356_v0 = vsel %vm1854_vm5, %v3340_v5, %v13157_v54  ;;  %v13162_v22 = vunpack.i.h.bf16 %v13160_v3  ;;  %v13161_v6 = vunpack.i.l.bf16 %v13160_v3 }
 0x7c0   :  { %v13165_v62 = vpop.permute.xlu1 %13164  ;;  %3566 = vmatprep.mubr.f32.mxu1 %v3404_v26 }
 0x7c1   :  { %v13167_v10 = vunpack.i.h.bf16 %v13165_v62  ;;  %v13166_v60 = vunpack.i.l.bf16 %v13165_v62  ;;  %3567 = vmatmul.mubr.f32.gmra.mrb[36].mxu1 %v3356_v0  ;;  %v3373_v45 = vsel %vm455_vm2, %v15581_v14, %v13161_v6  ;;  %v3325_v13 = vsel %vm455_vm2, %v2797_v30, %v13162_v22 }
 0x7c2   :  { %v13170_v8 = vpop.permute.xlu0 %13169 }
 0x7c3   :  { %v13172_v11 = vunpack.i.h.bf16 %v13170_v8  ;;  %v13171_v36 = vunpack.i.l.bf16 %v13170_v8  ;;  %v3389_v43 = vsel %vm1837_vm4, %v3373_v45, %v13166_v60  ;;  %v3341_v23 = vsel %vm1837_vm4, %v3325_v13, %v13167_v10 }
 0x7c4   :  { %v13175_v7 = vpop.permute.xlu1 %13174 }
 0x7c5   :  { %v13177_v61 = vunpack.i.h.bf16 %v13175_v7  ;;  %v13176_v59 = vunpack.i.l.bf16 %v13175_v7  ;;  %v3405_v40 = vsel %vm1854_vm5, %v3389_v43, %v13171_v36  ;;  %v3357_v44 = vsel %vm1854_vm5, %v3341_v23, %v13172_v11 }
 0x7c6   :  { %3571 = vmatprep.mubr.f32.mxu1 %v3405_v40  ;;  %v13180_v21 = vpop.permute.xlu0 %13179 }
 0x7c7   :  { %v13182_v55 = vunpack.i.h.bf16 %v13180_v21  ;;  %v13181_v14 = vunpack.i.l.bf16 %v13180_v21  ;;  %3572 = vmatmul.mubr.f32.gmra.mrb[38].mxu1 %v3357_v44  ;;  %v3374_v27 = vsel %vm455_vm2, %v15578_v31, %v13176_v59  ;;  %v3326_v32 = vsel %vm455_vm2, %v15576_v12, %v13177_v61 }
 0x7c8   :  { %v13185_v46 = vpop.permute.xlu1 %13184 }
 0x7c9   :  { %v13187_v42 = vunpack.i.h.bf16 %v13185_v46  ;;  %v13186_v4 = vunpack.i.l.bf16 %v13185_v46  ;;  %v3390_v54 = vsel %vm1837_vm4, %v3374_v27, %v13181_v14  ;;  %v3342_v50 = vsel %vm1837_vm4, %v3326_v32, %v13182_v55 }
 0x7ca   :  { %v13190_v1 = vpop.permute.xlu0 %13189 }
 0x7cb   :  { %v3406_v53 = vsel %vm1854_vm5, %v3390_v54, %v13186_v4  ;;  %v3358_v2 = vsel %vm1854_vm5, %v3342_v50, %v13187_v42  ;;  %v13192_v5 = vunpack.i.h.bf16 %v13190_v1  ;;  %v13191_v3 = vunpack.i.l.bf16 %v13190_v1 }
 0x7cc   :  { %v13195_v26 = vpop.permute.xlu1 %13194  ;;  %3576 = vmatprep.mubr.f32.mxu1 %v3406_v53 }
 0x7cd   :  { %v13197_v0 = vunpack.i.h.bf16 %v13195_v26  ;;  %v13196_v30 = vunpack.i.l.bf16 %v13195_v26  ;;  %3577 = vmatmul.mubr.f32.gmra.mrb[40].mxu1 %v3358_v2  ;;  %v3375_v31 = vsel %vm455_vm2, %v15591_v56, %v13191_v3  ;;  %v3327_v12 = vsel %vm455_vm2, %v15572_v15, %v13192_v5 }
 0x7ce   :  { %v13200_v62 = vpop.permute.xlu0 %13199 }
 0x7cf   :  { %v13202_v22 = vunpack.i.h.bf16 %v13200_v62  ;;  %v13201_v6 = vunpack.i.l.bf16 %v13200_v62  ;;  %v3391_v13 = vsel %vm1837_vm4, %v3375_v31, %v13196_v30  ;;  %v3343_v8 = vsel %vm1837_vm4, %v3327_v12, %v13197_v0 }
 0x7d0   :  { %v13205_v10 = vpop.permute.xlu1 %13204 }
 0x7d1   :  { %v13207_v60 = vunpack.i.h.bf16 %v13205_v10  ;;  %v13206_v45 = vunpack.i.l.bf16 %v13205_v10  ;;  %v3407_v11 = vsel %vm1854_vm5, %v3391_v13, %v13201_v6  ;;  %v3359_v36 = vsel %vm1854_vm5, %v3343_v8, %v13202_v22 }
 0x7d2   :  { %v13210_v7 = vpop.permute.xlu0 %13209  ;;  %3581 = vmatprep.mubr.f32.mxu1 %v3407_v11 }
 0x7d3   :  { %v13212_v56 = vunpack.i.h.bf16 %v13210_v7  ;;  %v13211_v61 = vunpack.i.l.bf16 %v13210_v7  ;;  %3582 = vmatmul.mubr.f32.gmra.mrb[42].mxu1 %v3359_v36  ;;  %v3376_v23 = vsel %vm455_vm2, %v15605_v24, %v13206_v45  ;;  %v3328_v40 = vsel %vm455_vm2, %v15588_v38, %v13207_v60 }
 0x7d4   :  { %v13215_v59 = vpop.permute.xlu1 %13214 }
 0x7d5   :  { %v13217_v15 = vunpack.i.h.bf16 %v13215_v59  ;;  %v13216_v43 = vunpack.i.l.bf16 %v13215_v59  ;;  %v3392_v44 = vsel %vm1837_vm4, %v3376_v23, %v13211_v61  ;;  %v3344_v21 = vsel %vm1837_vm4, %v3328_v40, %v13212_v56 }
 0x7d6   :  { %v13220_v55 = vpop.permute.xlu0 %13219 }
 0x7d7   :  { %v3408_v14 = vsel %vm1854_vm5, %v3392_v44, %v13216_v43  ;;  %v3360_v46 = vsel %vm1854_vm5, %v3344_v21, %v13217_v15  ;;  %v13222_v42 = vunpack.i.h.bf16 %v13220_v55  ;;  %v13221_v4 = vunpack.i.l.bf16 %v13220_v55 }
 0x7d8   :  { %v13225_v27 = vpop.permute.xlu1 %13224  ;;  %3586 = vmatprep.mubr.f32.mxu1 %v3408_v14 }
 0x7d9   :  { %v13227_v32 = vunpack.i.h.bf16 %v13225_v27  ;;  %v13226_v54 = vunpack.i.l.bf16 %v13225_v27  ;;  %3587 = vmatmul.mubr.f32.gmra.mrb[44].mxu1 %v3360_v46  ;;  %v3377_v24 = vsel %vm455_vm2, %v15616_v51, %v13221_v4  ;;  %v3329_v38 = vsel %vm455_vm2, %v15598_v49, %v13222_v42 }
 0x7da   :  { %v13230_v50 = vpop.permute.xlu0 %13229 }
 0x7db   :  { %v13232_v1 = vunpack.i.h.bf16 %v13230_v50  ;;  %v13231_v53 = vunpack.i.l.bf16 %v13230_v50  ;;  %v3393_v26 = vsel %vm1837_vm4, %v3377_v24, %v13226_v54  ;;  %v3345_v0 = vsel %vm1837_vm4, %v3329_v38, %v13227_v32 }
 0x7dc   :  { %v13235_v2 = vpop.permute.xlu1 %13234 }
 0x7dd   :  { %v13237_v5 = vunpack.i.h.bf16 %v13235_v2  ;;  %v13236_v3 = vunpack.i.l.bf16 %v13235_v2  ;;  %v3409_v30 = vsel %vm1854_vm5, %v3393_v26, %v13231_v53  ;;  %v3361_v31 = vsel %vm1854_vm5, %v3345_v0, %v13232_v1 }
 0x7de   :  { %v13240_v12 = vpop.permute.xlu0 %13239  ;;  %3591 = vmatprep.mubr.f32.mxu1 %v3409_v30 }
 0x7df   :  { %v13242_v51 = vunpack.i.h.bf16 %v13240_v12  ;;  %v13241_v62 = vunpack.i.l.bf16 %v13240_v12  ;;  %3592 = vmatmul.mubr.f32.gmra.mrb[46].mxu1 %v3361_v31  ;;  %v3378_v10 = vsel %vm455_vm2, %v15631_v37, %v13236_v3  ;;  %v3330_v60 = vsel %vm455_vm2, %v15613_v34, %v13237_v5 }
 0x7e0   :  { %v13245_v22 = vpop.permute.xlu1 %13244 }
 0x7e1   :  { %v13247_v49 = vunpack.i.h.bf16 %v13245_v22  ;;  %v13246_v6 = vunpack.i.l.bf16 %v13245_v22  ;;  %v3394_v45 = vsel %vm1837_vm4, %v3378_v10, %v13241_v62  ;;  %v3346_v13 = vsel %vm1837_vm4, %v3330_v60, %v13242_v51 }
 0x7e2   :  { %v13250_v8 = vpop.permute.xlu0 %13249 }
 0x7e3   :  { %v3410_v11 = vsel %vm1854_vm5, %v3394_v45, %v13246_v6  ;;  %v3362_v36 = vsel %vm1854_vm5, %v3346_v13, %v13247_v49  ;;  %v13252_v7 = vunpack.i.h.bf16 %v13250_v8  ;;  %v13251_v56 = vunpack.i.l.bf16 %v13250_v8  ;;  %v358_v13 = vld [vmem:[%s18731_s12] sm:$0xff]  ;;  %v359_v8 = vld [vmem:[%s18731_s12 + $0x8] sm:$0xff] }
 0x7e4   :  { %v13255_v61 = vpop.permute.xlu1 %13254  ;;  %3596 = vmatprep.mubr.f32.mxu1 %v3410_v11  ;;  %v12474_v11 = vpack.c.bf16 %v359_v8, %v358_v13 }
 0x7e5   :  { %v13257_v59 = vunpack.i.h.bf16 %v13255_v61  ;;  %v13256_v15 = vunpack.i.l.bf16 %v13255_v61  ;;  %3597 = vmatmul.mubr.f32.gmra.mrb[48].mxu1 %v3362_v36  ;;  %v3379_v37 = vsel %vm455_vm2, %v15642_v41, %v13251_v56  ;;  %v3331_v34 = vsel %vm455_vm2, %v15624_v39, %v13252_v7  ;;  %v15813_v7 = vld [vmem:[%s18732_s18] ss:$0 sm:$0xff] }
 0x7e6   :  { %v13260_v43 = vpop.permute.xlu0 %13259  ;;  %12475 = vmatprep.subr.bf16.mxu1 %v12474_v11 }
 0x7e7   :  { %v13262_v23 = vunpack.i.h.bf16 %v13260_v43  ;;  %v13261_v40 = vunpack.i.l.bf16 %v13260_v43  ;;  %v3395_v14 = vsel %vm1837_vm4, %v3379_v37, %v13256_v15  ;;  %v3347_v46 = vsel %vm1837_vm4, %v3331_v34, %v13257_v59  ;;  %12477 = vmatpush3.bf16.msra.mxu1 %v12474_v11 }
 0x7e8   :  { %v13265_v44 = vpop.permute.xlu1 %13264 }
 0x7e9   :  { %v13267_v21 = vunpack.i.h.bf16 %v13265_v44  ;;  %v13266_v55 = vunpack.i.l.bf16 %v13265_v44  ;;  %v3411_v42 = vsel %vm1854_vm5, %v3395_v14, %v13261_v40  ;;  %v3363_v4 = vsel %vm1854_vm5, %v3347_v46, %v13262_v23 }
 0x7ea   :  { %v13270_v27 = vpop.permute.xlu0 %13269  ;;  %3601 = vmatprep.mubr.f32.mxu1 %v3411_v42 }
 0x7eb   :  { %v13272_v41 = vunpack.i.h.bf16 %v13270_v27  ;;  %v13271_v32 = vunpack.i.l.bf16 %v13270_v27  ;;  %3602 = vmatmul.mubr.f32.gmra.mrb[50].mxu1 %v3363_v4  ;;  %v3380_v38 = vsel %vm455_vm2, %v15654_v47, %v13266_v55  ;;  %v3332_v50 = vsel %vm455_vm2, %v15639_v25, %v13267_v21 }
 0x7ec   :  { %v13275_v54 = vpop.permute.xlu1 %13274 }
 0x7ed   :  { %v13277_v39 = vunpack.i.h.bf16 %v13275_v54  ;;  %v13276_v24 = vunpack.i.l.bf16 %v13275_v54  ;;  %v3396_v1 = vsel %vm1837_vm4, %v3380_v38, %v13271_v32  ;;  %v3348_v53 = vsel %vm1837_vm4, %v3332_v50, %v13272_v41 }
 0x7ef   :  { %v3412_v2 = vsel %vm1854_vm5, %v3396_v1, %v13276_v24  ;;  %v3364_v5 = vsel %vm1854_vm5, %v3348_v53, %v13277_v39 }
 0x7f0   :  { %v11615_v3 = vpop.f32.mrb[38].mxu0  ;;  %3606 = vmatprep.mubr.f32.mxu1 %v3412_v2 }
 0x7f1   :  { %v3678_v26 = vpop.f32.mrb[39].mxu0  ;;  %3607 = vmatmul.mubr.f32.gmra.mrb[52].mxu1 %v3364_v5 }
 0x7f4   :  { %v11618_v0 = vpop.f32.mrb[40].mxu0 }
 0x7f5   :  { %v3688_v30 = vpop.f32.mrb[41].mxu0 }
 0x7f8   :  { %v11621_v47 = vpop.f32.mrb[42].mxu0 }
 0x7f9   :  { %v3698_v31 = vpop.f32.mrb[43].mxu0 }
 0x7fc   :  { %v11624_v12 = vpop.f32.mrb[44].mxu0 }
 0x7fd   :  { %v3708_v25 = vpop.f32.mrb[45].mxu0 }
 0x800   :  { %v15796_v51 = vpop.f32.mrb[46].mxu0 }
 0x801   :  { %v3718_v62 = vpop.f32.mrb[47].mxu0 }
 0x804   :  { %v15798_v22 = vpop.f32.mrb[48].mxu0 }
 0x805   :  { %v15800_v49 = vpop.f32.mrb[49].mxu0 }
 0x808   :  { %v15802_v6 = vpop.f32.mrb[50].mxu0 }
 0x809   :  { %v15804_v10 = vpop.f32.mrb[51].mxu0 }
 0x830   :  { %v15806_v60 = vpop.f32.mrb[52].mxu0 }
 0x831   :  { %v15808_v45 = vpop.f32.mrb[53].mxu0 }
 0x86a   :  { %v11031_v36 = vpop.f32.mrb[22].mxu1 }
 0x86b   :  { %v11032_v56 = vpop.f32.mrb[23].mxu1 }
 0x86c   :  { %v11033_v61 = vadd.f32 %v11032_v56, %v11031_v36 }
 0x86e   :  { %v3534_v59 = vadd.f32 %v11033_v61, %v15813_v7 }
 0x870   :  { %v11034_v15 = vpop.f32.mrb[24].mxu1  ;;  %v3679_v37 = vadd.f32 %v3678_v26, %v3534_v59 }
 0x871   :  { %v11035_v34 = vpop.f32.mrb[25].mxu1 }
 0x872   :  { %v11036_v43 = vadd.f32 %v11035_v34, %v11034_v15 }
 0x874   :  { %v3539_v23 = vadd.f32 %v11036_v43, %v15813_v7 }
 0x876   :  { %v3684_v40 = vadd.f32 %v11615_v3, %v3539_v23  ;;  %v11037_v44 = vpop.f32.mrb[26].mxu1 }
 0x877   :  { %v11038_v21 = vpop.f32.mrb[27].mxu1 }
 0x878   :  { %v11039_v55 = vadd.f32 %v11038_v21, %v11037_v44 }
 0x87a   :  { %v3544_v14 = vadd.f32 %v11039_v55, %v15813_v7 }
 0x87c   :  { %v11040_v46 = vpop.f32.mrb[28].mxu1  ;;  %v3689_v42 = vadd.f32 %v3688_v30, %v3544_v14 }
 0x87d   :  { %v11041_v4 = vpop.f32.mrb[29].mxu1 }
 0x87e   :  { %v11042_v27 = vadd.f32 %v11041_v4, %v11040_v46 }
 0x880   :  { %v3549_v41 = vadd.f32 %v11042_v27, %v15813_v7 }
 0x882   :  { %v3694_v32 = vadd.f32 %v11618_v0, %v3549_v41  ;;  %v11043_v54 = vpop.f32.mrb[30].mxu1 }
 0x883   :  { %v11044_v39 = vpop.f32.mrb[31].mxu1 }
 0x884   :  { %v11045_v24 = vadd.f32 %v11044_v39, %v11043_v54 }
 0x886   :  { %v3554_v38 = vadd.f32 %v11045_v24, %v15813_v7  ;;  %v15835_v24 = vadd.f32 %v3689_v42, %v14429_v63 }
 0x888   :  { %v11046_v50 = vpop.f32.mrb[32].mxu1  ;;  %v3699_v1 = vadd.f32 %v3698_v31, %v3554_v38 }
 0x889   :  { %v11047_v53 = vpop.f32.mrb[33].mxu1 }
 0x88a   :  { %v11048_v2 = vadd.f32 %v11047_v53, %v11046_v50  ;;  %v15840_v50 = vadd.f32 %v3694_v32, %v14437_v9 }
 0x88c   :  { %v3559_v5 = vadd.f32 %v11048_v2, %v15813_v7  ;;  %v3818_v32 = vmul.f32 %v15840_v50, %v15840_v50 }
 0x88e   :  { %v3704_v3 = vadd.f32 %v11621_v47, %v3559_v5  ;;  %v11049_v26 = vpop.f32.mrb[34].mxu1 }
 0x88f   :  { %v11050_v13 = vpop.f32.mrb[35].mxu1 }
 0x890   :  { %v11051_v30 = vadd.f32 %v11050_v13, %v11049_v26  ;;  %v15857_v53 = vadd.f32 %v3704_v3, %v14448_v20  ;;  %v3778_v3 = vsel %vm455_vm2, %v15840_v50, 0.0 }
 0x892   :  { %v3564_v8 = vadd.f32 %v11051_v30, %v15813_v7 }
 0x894   :  { %v11052_v11 = vpop.f32.mrb[36].mxu1  ;;  %v3709_v36 = vadd.f32 %v3708_v25, %v3564_v8 }
 0x895   :  { %v11053_v0 = vpop.f32.mrb[37].mxu1 }
 0x896   :  { %v11054_v56 = vadd.f32 %v11053_v0, %v11052_v11  ;;  %v3836_v11 = vsel %vm455_vm2, %v3818_v32, 0.0  ;;  %v3820_v0 = vmul.f32 %v15857_v53, %v15857_v53 }
 0x898   :  { %v3569_v61 = vadd.f32 %v11054_v56, %v15813_v7 }
 0x89a   :  { %v3714_v59 = vadd.f32 %v11624_v12, %v3569_v61  ;;  %v11055_v15 = vpop.f32.mrb[38].mxu1  ;;  %v15828_v12 = vadd.f32 %v3684_v40, %v14425_v58 }
 0x89b   :  { %v11056_v34 = vpop.f32.mrb[39].mxu1 }
 0x89c   :  { %v11057_v31 = vadd.f32 %v11056_v34, %v11055_v15  ;;  %v3774_v42 = vsel %vm455_vm2, %v15828_v12, 0.0 }
 0x89e   :  { %v3574_v43 = vadd.f32 %v11057_v31, %v15813_v7 }
 0x8a0   :  { %v11058_v23 = vpop.f32.mrb[40].mxu1  ;;  %v3719_v44 = vadd.f32 %v3718_v62, %v3574_v43  ;;  %v15832_v62 = vadd.f32 %v3679_v37, %v14423_v57  ;;  %v15848_v57 = vadd.f32 %v3699_v1, %v14446_v19 }
 0x8a1   :  { %v11059_v47 = vpop.f32.mrb[41].mxu1 }
 0x8a2   :  { %v11060_v21 = vadd.f32 %v11059_v47, %v11058_v23  ;;  %v3815_v40 = vmul.f32 %v15832_v62, %v15832_v62  ;;  %v3773_v5 = vsel %vm455_vm2, %v15832_v62, 0.0  ;;  %v3819_v13 = vmul.f32 %v15848_v57, %v15848_v57 }
 0x8a3   :  { %v3775_v30 = vadd.f32 %v3774_v42, %v3773_v5  ;;  %v3780_v34 = vsel %vm455_vm2, %v15848_v57, 0.0  ;;  %v15878_v47 = vadd.f32 %v3709_v36, %v14458_v28 }
 0x8a4   :  { %v3579_v55 = vadd.f32 %v11060_v21, %v15813_v7  ;;  %v3831_v1 = vsel %vm455_vm2, %v3815_v40, 0.0  ;;  %v3838_v23 = vsel %vm455_vm2, %v3819_v13, 0.0 }
 0x8a6   :  { %v3724_v14 = vadd.f32 %v15796_v51, %v3579_v55  ;;  %v11061_v46 = vpop.f32.mrb[42].mxu1  ;;  %v3816_v51 = vmul.f32 %v15828_v12, %v15828_v12 }
 0x8a7   :  { %v11062_v25 = vpop.f32.mrb[43].mxu1 }
 0x8a8   :  { %v11063_v4 = vadd.f32 %v11062_v25, %v11061_v46  ;;  %v3832_v9 = vsel %vm455_vm2, %v3816_v51, 0.0  ;;  %v15881_v21 = vadd.f32 %v3724_v14, %v14442_v17 }
 0x8a9   :  { %v3833_v8 = vadd.f32 %v3832_v9, %v3831_v1  ;;  %v3821_v9 = vmul.f32 %v15878_v47, %v15878_v47 }
 0x8aa   :  { %v3584_v27 = vadd.f32 %v11063_v4, %v15813_v7  ;;  %v3782_v4 = vsel %vm455_vm2, %v15857_v53, 0.0  ;;  %v3795_v40 = vsel %vm455_vm2, %v15881_v21, 0.0 }
 0x8ac   :  { %v11064_v41 = vpop.f32.mrb[44].mxu1  ;;  %v3729_v54 = vadd.f32 %v15800_v49, %v3584_v27  ;;  %v3817_v49 = vmul.f32 %v15835_v24, %v15835_v24  ;;  %v15886_v27 = vadd.f32 %v3714_v59, %v14462_v35  ;;  %v18733_v35 = vld [vmem:[#allocation54_spill] sm:$0xff] }
 0x8ad   :  { %v11065_v39 = vpop.f32.mrb[45].mxu1 }
 0x8ae   :  { %v11066_v38 = vadd.f32 %v11065_v39, %v11064_v41  ;;  %v3834_v26 = vsel %vm455_vm2, %v3817_v49, 0.0  ;;  %v15890_v41 = vadd.f32 %v3719_v44, %v14440_v16  ;;  %v15893_v28 = vadd.f32 %v3729_v54, %v14444_v18 }
 0x8af   :  { %v3835_v15 = vadd.f32 %v3834_v26, %v3833_v8  ;;  %v3784_v39 = vsel %vm455_vm2, %v15878_v47, 0.0  ;;  %v3786_v18 = vsel %vm455_vm2, %v15886_v27, 0.0 }
 0x8b0   :  { %v3589_v58 = vadd.f32 %v11066_v38, %v15813_v7  ;;  %v3824_v38 = vmul.f32 %v15881_v21, %v15881_v21  ;;  %v3825_v49 = vmul.f32 %v15893_v28, %v15893_v28  ;;  %v3794_v32 = vsel %vm455_vm2, %v15890_v41, 0.0 }
 0x8b1   :  { %v3837_v25 = vadd.f32 %v3836_v11, %v3835_v15  ;;  %v3796_v8 = vadd.f32 %v3795_v40, %v3794_v32  ;;  %v3842_v15 = vsel %vm455_vm2, %v3821_v9, 0.0 }
 0x8b2   :  { %v3734_v63 = vadd.f32 %v15798_v22, %v3589_v58  ;;  %v11067_v37 = vpop.f32.mrb[46].mxu1  ;;  %v3776_v22 = vsel %vm455_vm2, %v15835_v24, 0.0  ;;  %v3823_v58 = vmul.f32 %v15890_v41, %v15890_v41  ;;  %v3853_v5 = vsel %vm455_vm2, %v3824_v38, 0.0 }
 0x8b3   :  { %v11068_v2 = vpop.f32.mrb[47].mxu1  ;;  %v3777_v61 = vadd.f32 %v3776_v22, %v3775_v30  ;;  %v3839_v14 = vadd.f32 %v3838_v23, %v3837_v25  ;;  %v18735_v22 = vld [vmem:[#allocation56_spill] sm:$0xff]  ;;  %v3822_v30 = vmul.f32 %v15886_v27, %v15886_v27  ;;  %v3855_v11 = vsel %vm455_vm2, %v3825_v49, 0.0 }
 0x8b4   :  { %v11069_v19 = vadd.f32 %v11068_v2, %v11067_v37  ;;  %v15901_v59 = vadd.f32 %v3734_v63, %v18733_v35  ;;  %v18734_v37 = vld [vmem:[#allocation55_spill] sm:$0xff] }
 0x8b5   :  { %v3779_v46 = vadd.f32 %v3778_v3, %v3777_v61  ;;  %v3852_v3 = vsel %vm455_vm2, %v3823_v58, 0.0  ;;  %v3844_v38 = vsel %vm455_vm2, %v3822_v30, 0.0 }
 0x8b6   :  { %v3594_v20 = vadd.f32 %v11069_v19, %v15813_v7  ;;  %v3797_v19 = vsel %vm455_vm2, %v15893_v28, 0.0  ;;  %v3826_v1 = vmul.f32 %v15901_v59, %v15901_v59 }
 0x8b7   :  { %v3781_v36 = vadd.f32 %v3780_v34, %v3779_v46  ;;  %v3854_v34 = vadd.f32 %v3853_v5, %v3852_v3 }
 0x8b8   :  { %v11070_v56 = vpop.f32.mrb[48].mxu1  ;;  %v3739_v31 = vadd.f32 %v15804_v10, %v3594_v20  ;;  %v3840_v10 = vsel %vm455_vm2, %v3820_v0, 0.0  ;;  %v3799_v0 = vsel %vm455_vm2, %v15901_v59, 0.0 }
 0x8b9   :  { %v11071_v43 = vpop.f32.mrb[49].mxu1  ;;  %v3783_v16 = vadd.f32 %v3782_v4, %v3781_v36  ;;  %v3841_v44 = vadd.f32 %v3840_v10, %v3839_v14  ;;  %v18736_v14 = vld [vmem:[#allocation57_spill] sm:$0xff] }
 0x8ba   :  { %v11072_v55 = vadd.f32 %v11071_v43, %v11070_v56  ;;  %v15913_v63 = vadd.f32 %v3739_v31, %v18734_v37  ;;  %v3798_v31 = vadd.f32 %v3797_v19, %v3796_v8 }
 0x8bc   :  { %v3599_v17 = vadd.f32 %v11072_v55, %v15813_v7  ;;  %v3827_v56 = vmul.f32 %v15913_v63, %v15913_v63  ;;  %v3857_v55 = vsel %vm455_vm2, %v3826_v1, 0.0  ;;  %v3801_v46 = vsel %vm455_vm2, %v15913_v63, 0.0 }
 0x8bd   :  { %v3800_v36 = vadd.f32 %v3799_v0, %v3798_v31 }
 0x8be   :  { %v3744_v51 = vadd.f32 %v15802_v6, %v3599_v17  ;;  %v11073_v54 = vpop.f32.mrb[50].mxu1  ;;  %v3785_v6 = vadd.f32 %v3784_v39, %v3783_v16  ;;  %v3856_v17 = vadd.f32 %v3855_v11, %v3854_v34  ;;  %v3843_v16 = vadd.f32 %v3842_v15, %v3841_v44 }
 0x8bf   :  { %v11074_v42 = vpop.f32.mrb[51].mxu1 }
 0x8c0   :  { %v11075_v2 = vadd.f32 %v11074_v42, %v11073_v54  ;;  %v15925_v26 = vadd.f32 %v3744_v51, %v18735_v22  ;;  %v3787_v13 = vadd.f32 %v3786_v18, %v3785_v6  ;;  %v3858_v18 = vadd.f32 %v3857_v55, %v3856_v17 }
 0x8c1   :  { %v3802_v54 = vadd.f32 %v3801_v46, %v3800_v36  ;;  %v3845_v6 = vadd.f32 %v3844_v38, %v3843_v16 }
 0x8c2   :  { %v3604_v20 = vadd.f32 %v11075_v2, %v15813_v7  ;;  %v3828_v25 = vmul.f32 %v15925_v26, %v15925_v26  ;;  %v3788_v10 = vrot.slane %v3787_v13, 4  ;;  %v3803_v35 = vsel %vm455_vm2, %v15925_v26, 0.0 }
 0x8c3   :  { %v3804_v9 = vadd.f32 %v3803_v35, %v3802_v54  ;;  %v3846_v8 = vrot.slane %v3845_v6, 4  ;;  %v361_v54 = vld [vmem:[%s18731_s12 + $0x18] sm:$0xff] }
 0x8c4   :  { %v11076_v61 = vpop.f32.mrb[52].mxu1  ;;  %v3749_v43 = vadd.f32 %v15808_v45, %v3604_v20  ;;  %v3859_v45 = vsel %vm455_vm2, %v3827_v56, 0.0  ;;  %v3861_v49 = vsel %vm455_vm2, %v3828_v25, 0.0  ;;  %v3789_v42 = vadd.f32 %v3788_v10, %v3787_v13 }
 0x8c5   :  { %v11077_v23 = vpop.f32.mrb[53].mxu1  ;;  %v3860_v32 = vadd.f32 %v3859_v45, %v3858_v18  ;;  %v3847_v15 = vadd.f32 %v3846_v8, %v3845_v6  ;;  %v360_v18 = vld [vmem:[%s18731_s12 + $0x10] sm:$0xff] }
 0x8c6   :  { %v11078_v4 = vadd.f32 %v11077_v23, %v11076_v61  ;;  %v15944_v39 = vadd.f32 %v3749_v43, %v18736_v14  ;;  %v3790_v30 = vrot.slane %v3789_v42, 2 }
 0x8c7   :  { %v3862_v19 = vadd.f32 %v3861_v49, %v3860_v32  ;;  %v3848_v55 = vrot.slane %v3847_v15, 2  ;;  %v354_v49 = vld [vmem:[%s18738_s22 + $0x8] sm:$0xff] }
 0x8c8   :  { %v3609_v51 = vadd.f32 %v11078_v4, %v15813_v7  ;;  %v3829_v58 = vmul.f32 %v15944_v39, %v15944_v39  ;;  %v3805_v40 = vsel %vm455_vm2, %v15944_v39, 0.0  ;;  %v18737_v7 = vld [vmem:[#allocation58_spill] sm:$0xff]  ;;  %v3791_v61 = vadd.f32 %v3790_v30, %v3789_v42  ;;  %v356_v42 = vld [vmem:[%s18738_s22 + $0x18] sm:$0xff] }
 0x8c9   :  { %v3806_v5 = vadd.f32 %v3805_v40, %v3804_v9  ;;  %v3849_v36 = vadd.f32 %v3848_v55, %v3847_v15  ;;  %v12478_v40 = vpack.c.bf16 %v361_v54, %v360_v18 }
 0x8ca   :  { %v3754_v37 = vadd.f32 %v15806_v60, %v3609_v51  ;;  %v3863_v2 = vsel %vm455_vm2, %v3829_v58, 0.0  ;;  %v3792_v43 = vrot.slane %v3791_v61, 1  ;;  %v353_v58 = vld [vmem:[%s18738_s22] sm:$0xff] }
 0x8cb   :  { %v3864_v60 = vadd.f32 %v3863_v2, %v3862_v19  ;;  %v3850_v45 = vrot.slane %v3849_v36, 1  ;;  %v12466_v6 = vpack.c.bf16 %v354_v49, %v353_v58  ;;  %12479 = vmatprep.subr.bf16.mxu1 %v12478_v40 }
 0x8cc   :  { %v15959_v44 = vadd.f32 %v3754_v37, %v18737_v7  ;;  %v3793_v10 = vadd.f32 %v3792_v43, %v3791_v61  ;;  %v355_v37 = vld [vmem:[%s18738_s22 + $0x10] sm:$0xff]  ;;  %12481 = vmatpush3.bf16.msra.mxu1 %v12478_v40 }
 0x8cd   :  { %v3851_v51 = vadd.f32 %v3850_v45, %v3849_v36  ;;  %v12470_v9 = vpack.c.bf16 %v356_v42, %v355_v37 }
 0x8ce   :  { %v3807_v1 = vsel %vm455_vm2, %v15959_v44, 0.0  ;;  %v3830_v22 = vmul.f32 %v15959_v44, %v15959_v44 }
 0x8cf   :  { %v3808_v13 = vadd.f32 %v3807_v1, %v3806_v5 }
 0x8d0   :  { %v3865_v20 = vsel %vm455_vm2, %v3830_v22, 0.0 }
 0x8d1   :  { %v3809_v3 = vrot.slane %v3808_v13, 4  ;;  %v3866_v11 = vadd.f32 %v3865_v20, %v3864_v60  ;;  %v18739_v60 = vld [vmem:[#allocation50_spill] sm:$0xff] }
 0x8d3   :  { %v3810_v0 = vadd.f32 %v3809_v3, %v3808_v13  ;;  %v3867_v56 = vrot.slane %v3866_v11, 4 }
 0x8d5   :  { %v3811_v34 = vrot.slane %v3810_v0, 2  ;;  %v3868_v31 = vadd.f32 %v3867_v56, %v3866_v11  ;;  %v18741_v56 = vld [vmem:[#allocation52_spill] sm:$0xff] }
 0x8d7   :  { %v3812_v23 = vadd.f32 %v3811_v34, %v3810_v0  ;;  %v3869_v46 = vrot.slane %v3868_v31, 2 }
 0x8d9   :  { %v3813_v25 = vrot.slane %v3812_v23, 1  ;;  %v3870_v4 = vadd.f32 %v3869_v46, %v3868_v31 }
 0x8db   :  { %v3814_v17 = vadd.f32 %v3813_v25, %v3812_v23  ;;  %v3871_v38 = vrot.slane %v3870_v4, 1 }
 0x8dd   :  { %v3875_v14 = vsel %vm865_vm3, %v3814_v17, %v3793_v10  ;;  %v3872_v35 = vadd.f32 %v3871_v38, %v3870_v4  ;;  %v15995_v17 = vld [vmem:[%s18740_s23] ss:$0 sm:$0xff] }
 0x8de   :  { %11646 = vmatmul.mubr.msk.f32.vlgmr.msra.gmra.mrb[54].mxu0 %vm455_vm2, %v3875_v14 }
 0x8df   :  { %12462 = vmatpush3.bf16.msra.mxu0 %v14392_v29  ;;  %11656 = vmatprep.mubr.msk.f32.mxu0 %vm13964_vm0, %v18727_v52  ;;  %v3950_v16 = vsel %vm865_vm3, %v3872_v35, %v3851_v51 }
 0x8e0   :  { %12463 = vmatprep.subr.bf16.mxu0 %v18728_v48 }
 0x8e3   :  { %12465 = vmatpush3.bf16.msra.mxu0 %v14400_v33 }
 0x8e4   :  { %12467 = vmatprep.subr.bf16.mxu0 %v12466_v6 }
 0x8e6   :  { %11657 = vmatmul.mubr.msk.f32.vlgmr.msra.gmra.mrb[56].mxu0 %vm455_vm2, %v3950_v16  ;;  %v16003_v16 = vld [vmem:[%s18742_s26] ss:$0 sm:$0xff] }
 0x8e7   :  { %12469 = vmatpush3.bf16.msra.mxu0 %v12466_v6 }
 0x8e8   :  { %12471 = vmatprep.subr.bf16.mxu0 %v12470_v9 }
 0x8eb   :  { %12473 = vmatpush3.bf16.msra.mxu0 %v12470_v9 }
 0x9b1   :  { %v3944_v32 = vpop.f32.mrb[54].mxu0 }
 0x9b2   :  { %v11647_v2 = vpop.f32.mrb[55].mxu0  ;;  %v4023_v7 = vmul.f32 0.00390625, %v3944_v32 }
 0x9b4   :  { %v4025_v19 = vmul.f32 %v4023_v7, %v4023_v7  ;;  %v4036_v13 = vrot.slane %v4023_v7, %v18739_v60 }
 0x9b6   :  { %v4037_v20 = vcombine.high %v4036_v13, %v4036_v13  ;;  %v4044_v3 = vrot.slane %v4036_v13, %v18739_v60 }
 0x9b8   :  { %v4051_v0 = vrot.slane %v4037_v20, %v18739_v60  ;;  %v4055_v61 = vrot.slane %v4044_v3, %v18741_v56 }
 0x9b9   :  { %v4019_v5 = vpop.f32.mrb[56].mxu0 }
 0x9ba   :  { %v4024_v1 = vmul.f32 0.00390625, %v4019_v5  ;;  %v11658_v22 = vpop.f32.mrb[57].mxu0  ;;  %v4059_v43 = vrot.slane %v4051_v0, %v18741_v56  ;;  %v4062_v23 = vsub.f32 %v15832_v62, %v4055_v61  ;;  %v4063_v55 = vsub.f32 %v15828_v12, %v4055_v61 }
 0x9bb   :  { %v4064_v4 = vsub.f32 %v15835_v24, %v4055_v61  ;;  %v4065_v10 = vsub.f32 %v15840_v50, %v4055_v61  ;;  %v4066_v36 = vsub.f32 %v15848_v57, %v4055_v61  ;;  %v4067_v14 = vsub.f32 %v15857_v53, %v4055_v61 }
 0x9bc   :  { %v4026_v30 = vsub.f32 %v4024_v1, %v4025_v19  ;;  %v4068_v38 = vsub.f32 %v15878_v47, %v4055_v61  ;;  %v4069_v62 = vsub.f32 %v15886_v27, %v4055_v61  ;;  %v4070_v27 = vsub.f32 %v15890_v41, %v4059_v43 }
 0x9bd   :  { %v4071_v40 = vsub.f32 %v15881_v21, %v4059_v43  ;;  %v4072_v49 = vsub.f32 %v15893_v28, %v4059_v43  ;;  %v4073_v6 = vsub.f32 %v15901_v59, %v4059_v43  ;;  %v4074_v9 = vsub.f32 %v15913_v63, %v4059_v43 }
 0x9be   :  { %v4027_v8 = vadd.f32 1e-05, %v4026_v30  ;;  %v4075_v41 = vsub.f32 %v15925_v26, %v4059_v43  ;;  %v4076_v21 = vsub.f32 %v15944_v39, %v4059_v43  ;;  %v4077_v19 = vsub.f32 %v15959_v44, %v4059_v43 }
 0x9c0   :  { %13410 = vrsqrt.f32 %v4027_v8 }
 0x9ca   :  { %v13411_v11 = vpop.eup %13410 }
 0x9cb   :  { %v4085_v15 = vrot.slane %v13411_v11, %v18739_v60 }
 0x9cd   :  { %v4086_v34 = vcombine.high %v4085_v15, %v4085_v15  ;;  %v4093_v31 = vrot.slane %v4085_v15, %v18739_v60 }
 0x9cf   :  { %v4100_v46 = vrot.slane %v4086_v34, %v18739_v60  ;;  %v4104_v25 = vrot.slane %v4093_v31, %v18741_v56 }
 0x9d1   :  { %v4108_v12 = vrot.slane %v4100_v46, %v18741_v56  ;;  %v4111_v45 = vmul.f32 %v4104_v25, %v4062_v23  ;;  %v4112_v35 = vmul.f32 %v4104_v25, %v4063_v55  ;;  %v4113_v51 = vmul.f32 %v4104_v25, %v4064_v4 }
 0x9d2   :  { %v4114_v24 = vmul.f32 %v4104_v25, %v4065_v10  ;;  %v4115_v18 = vmul.f32 %v4104_v25, %v4066_v36  ;;  %v4116_v50 = vmul.f32 %v4104_v25, %v4067_v14  ;;  %v4117_v54 = vmul.f32 %v4104_v25, %v4068_v38 }
 0x9d3   :  { %v4133_v58 = vmul.f32 %v15995_v17, %v4111_v45  ;;  %v4134_v57 = vmul.f32 %v15995_v17, %v4112_v35  ;;  %v4135_v53 = vmul.f32 %v15995_v17, %v4113_v51  ;;  %v4118_v47 = vmul.f32 %v4104_v25, %v4069_v62  ;;  %v16145_v45 = vld [vmem:[%s18757_s28] ss:$0 sm:$0xff]  ;;  %v438_v51 = vld [vmem:[%s14202_s19 + $0x8] sm:$0xff] }
 0x9d4   :  { %v4136_v32 = vmul.f32 %v15995_v17, %v4114_v24  ;;  %v4137_v2 = vmul.f32 %v15995_v17, %v4115_v18  ;;  %v4119_v59 = vmul.f32 %v4108_v12, %v4070_v27  ;;  %v4120_v7 = vmul.f32 %v4108_v12, %v4071_v40  ;;  %v437_v35 = vld [vmem:[%s14202_s19] sm:$0xff]  ;;  %v440_v27 = vld [vmem:[%s14202_s19 + $0x18] sm:$0xff] }
 0x9d5   :  { %v16012_v37 = vadd.f32 %v16003_v16, %v4133_v58  ;;  %v16015_v42 = vadd.f32 %v16003_v16, %v4134_v57  ;;  %v16028_v28 = vadd.f32 %v16003_v16, %v4135_v53  ;;  %v4121_v63 = vmul.f32 %v4108_v12, %v4072_v49 }
 0x9d6   :  { %v4122_v26 = vmul.f32 %v4108_v12, %v4073_v6  ;;  %v4123_v39 = vmul.f32 %v4108_v12, %v4074_v9  ;;  %v4124_v5 = vmul.f32 %v4108_v12, %v4075_v41  ;;  %v16040_v1 = vadd.f32 %v16003_v16, %v4136_v32 }
 0x9d7   :  { %18743 = vst [vmem:[#allocation54_spill] sm:$0xff] %v16012_v37  ;;  %18744 = vst [vmem:[#allocation55_spill] sm:$0xff] %v16015_v42  ;;  %11667 = vmatprep.mubr.msk.f32.mxu0 %vm455_vm2, %v16012_v37  ;;  %11699 = vmatprep.mubr.msk.f32.mxu1 %vm455_vm2, %v16012_v37  ;;  %v4138_v22 = vmul.f32 %v15995_v17, %v4116_v50  ;;  %v4125_v30 = vmul.f32 %v4108_v12, %v4076_v21 }
 0x9d8   :  { %18745 = vst [vmem:[#allocation56_spill] sm:$0xff] %v16028_v28  ;;  %11668 = vmatmul.mubr.msk.f32.vlgmr.msra.gmra.mrb[58].mxu0 %vm455_vm2, %v16015_v42  ;;  %11700 = vmatmul.mubr.msk.f32.vlgmr.msra.gmra.mrb[54].mxu1 %vm455_vm2, %v16015_v42  ;;  %18746 = vst [vmem:[#allocation57_spill] sm:$0xff] %v16040_v1  ;;  %v16044_v8 = vadd.f32 %v16003_v16, %v4137_v2  ;;  %v4139_v13 = vmul.f32 %v15995_v17, %v4117_v54 }
 0x9d9   :  { %11670 = vmatprep.mubr.msk.f32.mxu0 %vm455_vm2, %v16028_v28  ;;  %11702 = vmatprep.mubr.msk.f32.mxu1 %vm455_vm2, %v16028_v28  ;;  %v4126_v20 = vmul.f32 %v4108_v12, %v4077_v19  ;;  %v16056_v44 = vadd.f32 %v16003_v16, %v4138_v22  ;;  %v4140_v3 = vmul.f32 %v15995_v17, %v4118_v47  ;;  %v439_v47 = vld [vmem:[%s14202_s19 + $0x10] sm:$0xff] }
 0x9da   :  { %18747 = vst [vmem:[#allocation58_spill] sm:$0xff] %v16044_v8  ;;  %v16060_v11 = vadd.f32 %v16003_v16, %v4139_v13  ;;  %v4141_v0 = vmul.f32 %v15995_v17, %v4119_v59  ;;  %v4142_v15 = vmul.f32 %v15995_v17, %v4120_v7  ;;  %v4143_v31 = vmul.f32 %v15995_v17, %v4121_v63  ;;  %v441_v59 = vld [vmem:[%s14202_s19 + $0x20] sm:$0xff]  ;;  %v442_v7 = vld [vmem:[%s14202_s19 + $0x28] sm:$0xff] }
 0x9db   :  { %18748 = vst [vmem:[#allocation59_spill] sm:$0xff] %v16056_v44  ;;  %v16072_v61 = vadd.f32 %v16003_v16, %v4140_v3  ;;  %v4144_v23 = vmul.f32 %v15995_v17, %v4122_v26  ;;  %v4145_v46 = vmul.f32 %v15995_v17, %v4123_v39  ;;  %v4146_v4 = vmul.f32 %v15995_v17, %v4124_v5  ;;  %v444_v3 = vld [vmem:[%s14202_s19 + $0x38] sm:$0xff] }
 0x9dc   :  { %11671 = vmatmul.mubr.msk.f32.gmra.mrb[60].mxu0 %vm455_vm2, %v16040_v1  ;;  %11703 = vmatmul.mubr.msk.f32.gmra.mrb[56].mxu1 %vm455_vm2, %v16040_v1  ;;  %18749 = vst [vmem:[#allocation60_spill] sm:$0xff] %v16060_v11  ;;  %v16076_v34 = vadd.f32 %v16003_v16, %v4141_v0  ;;  %v16088_v43 = vadd.f32 %v16003_v16, %v4142_v15 }
 0x9dd   :  { %11673 = vmatprep.mubr.msk.f32.mxu0 %vm455_vm2, %v16044_v8  ;;  %11705 = vmatprep.mubr.msk.f32.mxu1 %vm455_vm2, %v16044_v8  ;;  %18750 = vst [vmem:[#allocation61_spill] sm:$0xff] %v16072_v61  ;;  %v16092_v55 = vadd.f32 %v16003_v16, %v4143_v31  ;;  %v16104_v25 = vadd.f32 %v16003_v16, %v4144_v23 }
 0x9de   :  { %18751 = vst [vmem:[#allocation62_spill] sm:$0xff] %v16076_v34  ;;  %18752 = vst [vmem:[#allocation63_spill] sm:$0xff] %v16088_v43  ;;  %v16108_v10 = vadd.f32 %v16003_v16, %v4145_v46  ;;  %v4147_v36 = vmul.f32 %v15995_v17, %v4125_v30  ;;  %v16120_v14 = vadd.f32 %v16003_v16, %v4146_v4 }
 0x9df   :  { %18753 = vst [vmem:[#allocation64_spill] sm:$0xff] %v16092_v55  ;;  %18754 = vst [vmem:[#allocation65_spill] sm:$0xff] %v16104_v25  ;;  %v4148_v38 = vmul.f32 %v15995_v17, %v4126_v20  ;;  %v16142_v17 = vld [vmem:[%s18756_s20] ss:$0 sm:$0xff]  ;;  %v16149_v24 = vpack.c.bf16 %v438_v51, %v437_v35  ;;  %v16166_v40 = vpack.c.bf16 %v440_v27, %v439_v47  ;;  %v443_v20 = vld [vmem:[%s14202_s19 + $0x30] sm:$0xff]  ;;  %s13970_s19 = smov 120  }
 0x9e0   :  { %11674 = vmatmul.mubr.msk.f32.gmra.mrb[62].mxu0 %vm455_vm2, %v16056_v44  ;;  %11706 = vmatmul.mubr.msk.f32.gmra.mrb[58].mxu1 %vm455_vm2, %v16056_v44  ;;  %18755 = vst [vmem:[#allocation66_spill] sm:$0xff] %v16108_v10  ;;  %18758 = vst [vmem:[#allocation67_spill] sm:$0xff] %v16120_v14  ;;  %v16124_v62 = vadd.f32 %v16003_v16, %v4147_v36  ;;  %v16183_v39 = vpack.c.bf16 %v442_v7, %v441_v59 }
 0x9e1   :  { %11676 = vmatprep.mubr.msk.f32.mxu0 %vm455_vm2, %v16060_v11  ;;  %11708 = vmatprep.mubr.msk.f32.mxu1 %vm455_vm2, %v16060_v11  ;;  %v16135_v12 = vadd.f32 %v16003_v16, %v4148_v38  ;;  %18761 = vst [vmem:[#allocation70_spill] sm:$0xff] %v16149_v24  ;;  %18762 = vst [vmem:[#allocation71_spill] sm:$0xff] %v16166_v40  ;;  %v16200_v31 = vpack.c.bf16 %v444_v3, %v443_v20 }
 0x9e2   :  { %18759 = vst [vmem:[#allocation68_spill] sm:$0xff] %v16124_v62  ;;  %12483 = vmatprep.subr.bf16.mxu0 %v16149_v24  ;;  %18763 = vst [vmem:[#allocation72_spill] sm:$0xff] %v16183_v39 }
 0x9e3   :  { %18760 = vst [vmem:[#allocation69_spill] sm:$0xff] %v16135_v12  ;;  %12485 = vmatpush3.bf16.msra.mxu0 %v16149_v24  ;;  %18764 = vst [vmem:[#allocation73_spill] sm:$0xff] %v16200_v31 }
 0x9e4   :  { %11677 = vmatmul.mubr.msk.f32.gmra.mrb[64].mxu0 %vm455_vm2, %v16072_v61  ;;  %11709 = vmatmul.mubr.msk.f32.gmra.mrb[60].mxu1 %vm455_vm2, %v16072_v61 }
 0x9e5   :  { %11679 = vmatprep.mubr.msk.f32.mxu0 %vm455_vm2, %v16076_v34  ;;  %11711 = vmatprep.mubr.msk.f32.mxu1 %vm455_vm2, %v16076_v34 }
 0x9e6   :  { %12487 = vmatprep.subr.bf16.mxu0 %v16166_v40 }
 0x9e7   :  { %12489 = vmatpush3.bf16.msra.mxu0 %v16166_v40 }
 0x9e8   :  { %11680 = vmatmul.mubr.msk.f32.gmra.mrb[66].mxu0 %vm455_vm2, %v16088_v43  ;;  %11712 = vmatmul.mubr.msk.f32.gmra.mrb[62].mxu1 %vm455_vm2, %v16088_v43 }
 0x9e9   :  { %11682 = vmatprep.mubr.msk.f32.mxu0 %vm455_vm2, %v16092_v55  ;;  %11714 = vmatprep.mubr.msk.f32.mxu1 %vm455_vm2, %v16092_v55 }
 0x9ea   :  { %12491 = vmatprep.subr.bf16.mxu0 %v16183_v39 }
 0x9eb   :  { %12493 = vmatpush3.bf16.msra.mxu0 %v16183_v39 }
 0x9ec   :  { %11683 = vmatmul.mubr.msk.f32.gmra.mrb[68].mxu0 %vm455_vm2, %v16104_v25  ;;  %11715 = vmatmul.mubr.msk.f32.gmra.mrb[64].mxu1 %vm455_vm2, %v16104_v25 }
 0x9ed   :  { %11685 = vmatprep.mubr.msk.f32.mxu0 %vm455_vm2, %v16108_v10  ;;  %11717 = vmatprep.mubr.msk.f32.mxu1 %vm455_vm2, %v16108_v10 }
 0x9ee   :  { %12495 = vmatprep.subr.bf16.mxu0 %v16200_v31 }
 0x9ef   :  { %12497 = vmatpush3.bf16.msra.mxu0 %v16200_v31 }
 0x9f0   :  { %11686 = vmatmul.mubr.msk.f32.gmra.mrb[70].mxu0 %vm455_vm2, %v16120_v14  ;;  %11718 = vmatmul.mubr.msk.f32.gmra.mrb[66].mxu1 %vm455_vm2, %v16120_v14 }
 0x9f1   :  { %11688 = vmatprep.mubr.msk.f32.mxu0 %vm455_vm2, %v16124_v62  ;;  %11720 = vmatprep.mubr.msk.f32.mxu1 %vm455_vm2, %v16124_v62 }
 0x9f4   :  { %11689 = vmatmul.mubr.msk.f32.gmra.mrb[72].mxu0 %vm455_vm2, %v16135_v12  ;;  %11721 = vmatmul.mubr.msk.f32.gmra.mrb[68].mxu1 %vm455_vm2, %v16135_v12 }
 0xaab   :  { %v11669_v18 = vpop.f32.mrb[58].mxu0  ;;  %v11701_v50 = vpop.f32.mrb[54].mxu1 }
 0xaac   :  { %v16152_v16 = vadd.f32 %v11669_v18, %v16142_v17  ;;  %v16155_v54 = vadd.f32 %v11701_v50, %v16145_v45  ;;  %v4291_v58 = vpop.f32.mrb[59].mxu0  ;;  %v4442_v57 = vpop.f32.mrb[55].mxu1 }
 0xaad   :  { %v16159_v53 = vadd.f32 %v16145_v45, %v4442_v57  ;;  %v16169_v9 = vadd.f32 %v16142_v17, %v4291_v58 }
 0xaae   :  { %4619 = vrot.lane.b32.xlu1 %v16152_v16, %s13968_s21 }
 0xaaf   :  { %v11672_v49 = vpop.f32.mrb[60].mxu0  ;;  %v11704_v6 = vpop.f32.mrb[56].mxu1 }
 0xab0   :  { %v16172_v32 = vadd.f32 %v11704_v6, %v16145_v45  ;;  %v4301_v2 = vpop.f32.mrb[61].mxu0  ;;  %v4452_v41 = vpop.f32.mrb[57].mxu1  ;;  %v16186_v5 = vadd.f32 %v11672_v49, %v16142_v17 }
 0xab1   :  { %v16176_v21 = vadd.f32 %v16145_v45, %v4452_v41  ;;  %v16203_v23 = vadd.f32 %v16142_v17, %v4301_v2 }
 0xab2   :  { %4617 = vrot.lane.b32.xlu1 %v16169_v9, %s13968_s21 }
 0xab3   :  { %v11675_v63 = vpop.f32.mrb[62].mxu0  ;;  %v11707_v26 = vpop.f32.mrb[58].mxu1 }
 0xab4   :  { %v16189_v19 = vadd.f32 %v11707_v26, %v16145_v45  ;;  %v4311_v22 = vpop.f32.mrb[63].mxu0  ;;  %v4462_v30 = vpop.f32.mrb[59].mxu1  ;;  %v16216_v18 = vadd.f32 %v11675_v63, %v16142_v17 }
 0xab5   :  { %v16192_v13 = vadd.f32 %v16145_v45, %v4462_v30  ;;  %v16226_v49 = vadd.f32 %v16142_v17, %v4311_v22 }
 0xab6   :  { %4623 = vrot.lane.b32.xlu1 %v16186_v5, %s13968_s21 }
 0xab7   :  { %v11678_v0 = vpop.f32.mrb[64].mxu0  ;;  %v11710_v15 = vpop.f32.mrb[60].mxu1 }
 0xab8   :  { %v16206_v46 = vadd.f32 %v11710_v15, %v16145_v45  ;;  %v4321_v4 = vpop.f32.mrb[65].mxu0  ;;  %v4472_v36 = vpop.f32.mrb[61].mxu1  ;;  %v16246_v15 = vadd.f32 %v11678_v0, %v16142_v17 }
 0xab9   :  { %v16209_v38 = vadd.f32 %v16145_v45, %v4472_v36  ;;  %v16236_v63 = vadd.f32 %v16142_v17, %v4321_v4 }
 0xaba   :  { %4621 = vrot.lane.b32.xlu1 %v16203_v23, %s13968_s21 }
 0xabb   :  { %v11681_v35 = vpop.f32.mrb[66].mxu0  ;;  %v11713_v51 = vpop.f32.mrb[62].mxu1 }
 0xabc   :  { %v16219_v50 = vadd.f32 %v11713_v51, %v16145_v45  ;;  %v4331_v58 = vpop.f32.mrb[67].mxu0  ;;  %v4482_v57 = vpop.f32.mrb[63].mxu1 }
 0xabd   :  { %v16229_v6 = vadd.f32 %v16145_v45, %v4482_v57  ;;  %v16256_v57 = vadd.f32 %v11681_v35, %v16142_v17 }
 0xabe   :  { %18765 = vst [vmem:[#allocation74_spill] sm:$0xff] %v16219_v50  ;;  %4531 = vrot.lane.b32.xlu0 %v16219_v50, %s13968_s21  ;;  %4627 = vrot.lane.b32.xlu1 %v16216_v18, %s13968_s21 }
 0xabf   :  { %v11684_v47 = vpop.f32.mrb[68].mxu0  ;;  %v11716_v27 = vpop.f32.mrb[64].mxu1  ;;  %18766 = vst [vmem:[#allocation75_spill] sm:$0xff] %v16229_v6 }
 0xac0   :  { %v4341_v2 = vpop.f32.mrb[69].mxu0  ;;  %v4492_v41 = vpop.f32.mrb[65].mxu1  ;;  %v16239_v26 = vadd.f32 %v11716_v27, %v16145_v45  ;;  %v16266_v0 = vadd.f32 %v11684_v47, %v16142_v17 }
 0xac1   :  { %v16249_v36 = vadd.f32 %v16145_v45, %v4492_v41 }
 0xac2   :  { %4529 = vrot.lane.b32.xlu0 %v16229_v6, %s13968_s21  ;;  %4625 = vrot.lane.b32.xlu1 %v16226_v49, %s13968_s21  ;;  %18767 = vst [vmem:[#allocation76_spill] sm:$0xff] %v16239_v26 }
 0xac3   :  { %v11687_v59 = vpop.f32.mrb[70].mxu0  ;;  %v11719_v7 = vpop.f32.mrb[66].mxu1  ;;  %18768 = vst [vmem:[#allocation77_spill] sm:$0xff] %v16249_v36 }
 0xac4   :  { %v4351_v22 = vpop.f32.mrb[71].mxu0  ;;  %v4502_v30 = vpop.f32.mrb[67].mxu1  ;;  %v16259_v27 = vadd.f32 %v11719_v7, %v16145_v45  ;;  %v16276_v35 = vadd.f32 %v11687_v59, %v16142_v17  ;;  %v4332_v59 = vadd.f32 %v16142_v17, %v4331_v58 }
 0xac5   :  { %v16269_v41 = vadd.f32 %v16145_v45, %v4502_v30 }
 0xac6   :  { %4535 = vrot.lane.b32.xlu0 %v16239_v26, %s13968_s21  ;;  %4629 = vrot.lane.b32.xlu1 %v16236_v63, %s13968_s21  ;;  %18769 = vst [vmem:[#allocation78_spill] sm:$0xff] %v16259_v27 }
 0xac7   :  { %v11690_v20 = vpop.f32.mrb[72].mxu0  ;;  %v11722_v3 = vpop.f32.mrb[68].mxu1  ;;  %18770 = vst [vmem:[#allocation79_spill] sm:$0xff] %v16269_v41 }
 0xac8   :  { %v4361_v4 = vpop.f32.mrb[73].mxu0  ;;  %v4512_v51 = vpop.f32.mrb[69].mxu1  ;;  %v16279_v7 = vadd.f32 %v11722_v3, %v16145_v45  ;;  %v16286_v47 = vadd.f32 %v11690_v20, %v16142_v17  ;;  %v16298_v3 = vadd.f32 %v16142_v17, %v4341_v2  ;;  %v16303_v20 = vadd.f32 %v16142_v17, %v4351_v22 }
 0xac9   :  { %v16289_v30 = vadd.f32 %v16145_v45, %v4512_v51  ;;  %v16308_v45 = vadd.f32 %v16142_v17, %v4361_v4 }
 0xaca   :  { %4533 = vrot.lane.b32.xlu0 %v16249_v36, %s13968_s21  ;;  %4631 = vrot.lane.b32.xlu1 %v16246_v15, %s13968_s21  ;;  %18771 = vst [vmem:[#allocation80_spill] sm:$0xff] %v16279_v7 }
 0xacb   :  { %18772 = vst [vmem:[#allocation81_spill] sm:$0xff] %v16289_v30 }
 0xace   :  { %4539 = vrot.lane.b32.xlu0 %v16259_v27, %s13968_s21  ;;  %4635 = vrot.lane.b32.xlu1 %v16256_v57, %s13968_s21 }
 0xad2   :  { %4537 = vrot.lane.b32.xlu0 %v16269_v41, %s13968_s21  ;;  %4639 = vrot.lane.b32.xlu1 %v16266_v0, %s13968_s21 }
 0xad6   :  { %4543 = vrot.lane.b32.xlu0 %v16279_v7, %s13968_s21  ;;  %4643 = vrot.lane.b32.xlu1 %v16276_v35, %s13968_s21 }
 0xada   :  { %4541 = vrot.lane.b32.xlu0 %v16289_v30, %s13968_s21  ;;  %4647 = vrot.lane.b32.xlu1 %v16286_v47, %s13968_s21 }
 0xade   :  { %4633 = vrot.lane.b32.xlu0 %v4332_v59, %s13968_s21 }
 0xae2   :  { %4637 = vrot.lane.b32.xlu0 %v16298_v3, %s13968_s21 }
 0xae6   :  { %4641 = vrot.lane.b32.xlu0 %v16303_v20, %s13968_s21 }
 0xaea   :  { %4645 = vrot.lane.b32.xlu0 %v16308_v45, %s13968_s21 }
 0xb20   :  { %v4620_v58 = vpop.permute.xlu1 %4619 }
 0xb21   :  { %v4666_v60 = vsel %vm455_vm2, %v16152_v16, %v4620_v58 }
 0xb24   :  { %v4618_v51 = vpop.permute.xlu1 %4617 }
 0xb25   :  { %v4665_v56 = vsel %vm455_vm2, %v16169_v9, %v4618_v51 }
 0xb28   :  { %v4624_v31 = vpop.permute.xlu1 %4623 }
 0xb2c   :  { %v4622_v2 = vpop.permute.xlu1 %4621 }
 0xb2d   :  { %v4667_v9 = vsel %vm455_vm2, %v16203_v23, %v4622_v2 }
 0xb30   :  { %v4532_v39 = vpop.permute.xlu0 %4531  ;;  %v4628_v40 = vpop.permute.xlu1 %4627 }
 0xb31   :  { %v4554_v24 = vsel %vm455_vm2, %v16155_v54, %v4532_v39 }
 0xb32   :  { %v4682_v12 = vmul.f32 %v4666_v60, %v4554_v24 }
 0xb34   :  { %v4530_v22 = vpop.permute.xlu0 %4529  ;;  %v4626_v4 = vpop.permute.xlu1 %4625 }
 0xb35   :  { %v4553_v17 = vsel %vm455_vm2, %v16159_v53, %v4530_v22  ;;  %v4669_v23 = vsel %vm455_vm2, %v16226_v49, %v4626_v4 }
 0xb36   :  { %v4681_v62 = vmul.f32 %v4665_v56, %v4553_v17  ;;  %v4668_v56 = vsel %vm455_vm2, %v16186_v5, %v4624_v31  ;;  %v4670_v5 = vsel %vm455_vm2, %v16216_v18, %v4628_v40 }
 0xb38   :  { %v4536_v10 = vpop.permute.xlu0 %4535  ;;  %11739 = vmatprep.mubr.msk.f32.mxu0 %vm1837_vm4, %v4681_v62  ;;  %v4630_v14 = vpop.permute.xlu1 %4629 }
 0xb39   :  { %11740 = vmatmul.mubr.msk.f32.vlgmr.msra.gmra.mrb[74].mxu0 %vm1837_vm4, %v4682_v12  ;;  %v4556_v39 = vsel %vm455_vm2, %v16172_v32, %v4536_v10  ;;  %v4671_v49 = vsel %vm455_vm2, %v16236_v63, %v4630_v14 }
 0xb3a   :  { %v4684_v16 = vmul.f32 %v4668_v56, %v4556_v39 }
 0xb3c   :  { %v4534_v55 = vpop.permute.xlu0 %4533  ;;  %v4632_v62 = vpop.permute.xlu1 %4631 }
 0xb3d   :  { %v4555_v51 = vsel %vm455_vm2, %v16176_v21, %v4534_v55  ;;  %v4672_v40 = vsel %vm455_vm2, %v16246_v15, %v4632_v62 }
 0xb3e   :  { %v4683_v60 = vmul.f32 %v4667_v9, %v4555_v51 }
 0xb40   :  { %v4540_v58 = vpop.permute.xlu0 %4539  ;;  %11742 = vmatprep.mubr.msk.f32.mxu0 %vm1837_vm4, %v4683_v60  ;;  %v4636_v22 = vpop.permute.xlu1 %4635 }
 0xb41   :  { %11743 = vmatmul.mubr.msk.f32.gmra.mrb[76].mxu0 %vm1837_vm4, %v4684_v16  ;;  %v4558_v10 = vsel %vm455_vm2, %v16189_v19, %v4540_v58 }
 0xb42   :  { %v4686_v2 = vmul.f32 %v4670_v5, %v4558_v10 }
 0xb44   :  { %v4538_v12 = vpop.permute.xlu0 %4537  ;;  %v4640_v4 = vpop.permute.xlu1 %4639 }
 0xb45   :  { %v4557_v55 = vsel %vm455_vm2, %v16192_v13, %v4538_v12  ;;  %v4674_v12 = vsel %vm455_vm2, %v16256_v57, %v4636_v22 }
 0xb46   :  { %v4685_v31 = vmul.f32 %v4669_v23, %v4557_v55  ;;  %v4690_v63 = vmul.f32 %v4674_v12, %v4554_v24 }
 0xb48   :  { %v4544_v9 = vpop.permute.xlu0 %4543  ;;  %11745 = vmatprep.mubr.msk.f32.mxu0 %vm1837_vm4, %v4685_v31  ;;  %v4644_v31 = vpop.permute.xlu1 %4643 }
 0xb49   :  { %11746 = vmatmul.mubr.msk.f32.gmra.mrb[78].mxu0 %vm1837_vm4, %v4686_v2  ;;  %v4560_v56 = vsel %vm455_vm2, %v16206_v46, %v4544_v9  ;;  %v4676_v2 = vsel %vm455_vm2, %v16266_v0, %v4640_v4 }
 0xb4a   :  { %v4688_v58 = vmul.f32 %v4672_v40, %v4560_v56  ;;  %v4692_v62 = vmul.f32 %v4676_v2, %v4556_v39 }
 0xb4c   :  { %v4542_v60 = vpop.permute.xlu0 %4541  ;;  %v4648_v24 = vpop.permute.xlu1 %4647 }
 0xb4d   :  { %v4559_v16 = vsel %vm455_vm2, %v16209_v38, %v4542_v60 }
 0xb4e   :  { %v4687_v18 = vmul.f32 %v4671_v49, %v4559_v16 }
 0xb50   :  { %v4634_v23 = vpop.permute.xlu0 %4633  ;;  %11748 = vmatprep.mubr.msk.f32.mxu0 %vm1837_vm4, %v4687_v18 }
 0xb51   :  { %v4673_v5 = vsel %vm455_vm2, %v4332_v59, %v4634_v23  ;;  %11749 = vmatmul.mubr.msk.f32.gmra.mrb[80].mxu0 %vm1837_vm4, %v4688_v58  ;;  %v4678_v59 = vsel %vm455_vm2, %v16276_v35, %v4644_v31 }
 0xb52   :  { %v4689_v14 = vmul.f32 %v4673_v5, %v4553_v17  ;;  %v4694_v60 = vmul.f32 %v4678_v59, %v4558_v10 }
 0xb54   :  { %v4638_v9 = vpop.permute.xlu0 %4637  ;;  %11751 = vmatprep.mubr.msk.f32.mxu0 %vm1837_vm4, %v4689_v14 }
 0xb55   :  { %v4675_v15 = vsel %vm455_vm2, %v16298_v3, %v4638_v9  ;;  %11752 = vmatmul.mubr.msk.f32.gmra.mrb[82].mxu0 %vm1837_vm4, %v4690_v63  ;;  %v4680_v3 = vsel %vm455_vm2, %v16286_v47, %v4648_v24 }
 0xb56   :  { %v4691_v57 = vmul.f32 %v4675_v15, %v4555_v51  ;;  %v4696_v51 = vmul.f32 %v4680_v3, %v4560_v56 }
 0xb58   :  { %v4642_v22 = vpop.permute.xlu0 %4641  ;;  %11754 = vmatprep.mubr.msk.f32.mxu0 %vm1837_vm4, %v4691_v57 }
 0xb59   :  { %v4677_v0 = vsel %vm455_vm2, %v16303_v20, %v4642_v22  ;;  %11755 = vmatmul.mubr.msk.f32.gmra.mrb[84].mxu0 %vm1837_vm4, %v4692_v62 }
 0xb5a   :  { %v4693_v17 = vmul.f32 %v4677_v0, %v4557_v55 }
 0xb5c   :  { %v4646_v49 = vpop.permute.xlu0 %4645  ;;  %11757 = vmatprep.mubr.msk.f32.mxu0 %vm1837_vm4, %v4693_v17 }
 0xb5d   :  { %v4679_v35 = vsel %vm455_vm2, %v16308_v45, %v4646_v49  ;;  %11758 = vmatmul.mubr.msk.f32.gmra.mrb[86].mxu0 %vm1837_vm4, %v4694_v60 }
 0xb5e   :  { %v4695_v39 = vmul.f32 %v4679_v35, %v4559_v16 }
 0xb60   :  { %11760 = vmatprep.mubr.msk.f32.mxu0 %vm1837_vm4, %v4695_v39 }
 0xb61   :  { %11761 = vmatmul.mubr.msk.f32.gmra.mrb[88].mxu0 %vm1837_vm4, %v4696_v51 }
 0xc0c   :  { %v11741_v20 = vpop.f32.mrb[74].mxu0 }
 0xc0d   :  { %v16375_v55 = vmul.f32 0.5, %v11741_v20  ;;  %v4811_v10 = vpop.f32.mrb[75].mxu0 }
 0xc0e   :  { %v16377_v4 = vmul.f32 0.5, %v4811_v10 }
 0xc0f   :  { %4924 = vrot.lane.b32.xlu1 %v16375_v55, %s13970_s19 }
 0xc10   :  { %4922 = vrot.lane.b32.xlu0 %v16377_v4, %s13970_s19 }
 0xc14   :  { %v11744_v47 = vpop.f32.mrb[76].mxu0 }
 0xc15   :  { %v16383_v45 = vmul.f32 0.5, %v11744_v47  ;;  %v4821_v56 = vpop.f32.mrb[77].mxu0 }
 0xc16   :  { %v16385_v16 = vmul.f32 0.5, %v4821_v56 }
 0xc17   :  { %4928 = vrot.lane.b32.xlu1 %v16383_v45, %s13970_s19 }
 0xc18   :  { %4926 = vrot.lane.b32.xlu0 %v16385_v16, %s13970_s19 }
 0xc1c   :  { %v11747_v40 = vpop.f32.mrb[78].mxu0 }
 0xc1d   :  { %v16391_v18 = vmul.f32 0.5, %v11747_v40  ;;  %v4831_v58 = vpop.f32.mrb[79].mxu0 }
 0xc1e   :  { %v16393_v12 = vmul.f32 0.5, %v4831_v58 }
 0xc1f   :  { %4932 = vrot.lane.b32.xlu1 %v16391_v18, %s13970_s19 }
 0xc20   :  { %4930 = vrot.lane.b32.xlu0 %v16393_v12, %s13970_s19 }
 0xc24   :  { %v11750_v23 = vpop.f32.mrb[80].mxu0 }
 0xc25   :  { %v16399_v5 = vmul.f32 0.5, %v11750_v23  ;;  %v4841_v14 = vpop.f32.mrb[81].mxu0 }
 0xc26   :  { %v16401_v63 = vmul.f32 0.5, %v4841_v14 }
 0xc27   :  { %4936 = vrot.lane.b32.xlu1 %v16399_v5, %s13970_s19 }
 0xc28   :  { %4934 = vrot.lane.b32.xlu0 %v16401_v63, %s13970_s19  ;;  %v11753_v31 = vpop.f32.mrb[82].mxu0 }
 0xc29   :  { %v16407_v2 = vmul.f32 0.5, %v11753_v31  ;;  %v4851_v9 = vpop.f32.mrb[83].mxu0 }
 0xc2a   :  { %v16409_v15 = vmul.f32 0.5, %v4851_v9 }
 0xc2b   :  { %4940 = vrot.lane.b32.xlu1 %v16407_v2, %s13970_s19 }
 0xc2c   :  { %4938 = vrot.lane.b32.xlu0 %v16409_v15, %s13970_s19  ;;  %v11756_v57 = vpop.f32.mrb[84].mxu0 }
 0xc2d   :  { %v16415_v62 = vmul.f32 0.5, %v11756_v57  ;;  %v4861_v59 = vpop.f32.mrb[85].mxu0 }
 0xc2e   :  { %v16417_v22 = vmul.f32 0.5, %v4861_v59 }
 0xc2f   :  { %4944 = vrot.lane.b32.xlu1 %v16415_v62, %s13970_s19 }
 0xc30   :  { %4942 = vrot.lane.b32.xlu0 %v16417_v22, %s13970_s19  ;;  %v11759_v24 = vpop.f32.mrb[86].mxu0 }
 0xc31   :  { %v16423_v0 = vmul.f32 0.5, %v11759_v24  ;;  %v4871_v17 = vpop.f32.mrb[87].mxu0 }
 0xc32   :  { %v16425_v60 = vmul.f32 0.5, %v4871_v17 }
 0xc33   :  { %4948 = vrot.lane.b32.xlu1 %v16423_v0, %s13970_s19 }
 0xc34   :  { %4946 = vrot.lane.b32.xlu0 %v16425_v60, %s13970_s19  ;;  %v11762_v3 = vpop.f32.mrb[88].mxu0 }
 0xc35   :  { %v16431_v49 = vmul.f32 0.5, %v11762_v3  ;;  %v4881_v35 = vpop.f32.mrb[89].mxu0 }
 0xc36   :  { %v16433_v39 = vmul.f32 0.5, %v4881_v35 }
 0xc37   :  { %4952 = vrot.lane.b32.xlu1 %v16431_v49, %s13970_s19 }
 0xc38   :  { %4950 = vrot.lane.b32.xlu0 %v16433_v39, %s13970_s19 }
 0xc81   :  { %v4925_v51 = vpop.permute.xlu1 %4924 }
 0xc82   :  { %v16440_v20 = vmax.f32 %v16375_v55, %v4925_v51  ;;  %v4923_v10 = vpop.permute.xlu0 %4922 }
 0xc83   :  { %v16443_v47 = vmax.f32 %v16377_v4, %v4923_v10 }
 0xc84   :  { %5052 = vrot.lane.b32.xlu1 %v16440_v20, %s13971_s1 }
 0xc85   :  { %5050 = vrot.lane.b32.xlu0 %v16443_v47, %s13971_s1  ;;  %v4986_v26 = vsub.f32 %v16377_v4, %v16443_v47 }
 0xc87   :  { %v5002_v50 = vmul.f32 1.442695, %v4986_v26 }
 0xc89   :  { %v4929_v56 = vpop.permute.xlu1 %4928 }
 0xc8a   :  { %v16450_v40 = vmax.f32 %v16383_v45, %v4929_v56  ;;  %v4927_v58 = vpop.permute.xlu0 %4926 }
 0xc8b   :  { %v16453_v23 = vmax.f32 %v16385_v16, %v4927_v58 }
 0xc8c   :  { %5056 = vrot.lane.b32.xlu1 %v16450_v40, %s13971_s1  ;;  %v4989_v48 = vsub.f32 %v16383_v45, %v16450_v40 }
 0xc8d   :  { %5054 = vrot.lane.b32.xlu0 %v16453_v23, %s13971_s1 }
 0xc91   :  { %v4933_v14 = vpop.permute.xlu1 %4932 }
 0xc92   :  { %v16460_v31 = vmax.f32 %v16391_v18, %v4933_v14  ;;  %v4931_v9 = vpop.permute.xlu0 %4930 }
 0xc93   :  { %v16463_v57 = vmax.f32 %v16393_v12, %v4931_v9 }
 0xc94   :  { %5060 = vrot.lane.b32.xlu1 %v16460_v31, %s13971_s1 }
 0xc95   :  { %5058 = vrot.lane.b32.xlu0 %v16463_v57, %s13971_s1 }
 0xc99   :  { %v4937_v59 = vpop.permute.xlu1 %4936 }
 0xc9a   :  { %v16470_v24 = vmax.f32 %v16399_v5, %v4937_v59  ;;  %v4935_v17 = vpop.permute.xlu0 %4934 }
 0xc9b   :  { %v16473_v3 = vmax.f32 %v16401_v63, %v4935_v17 }
 0xc9c   :  { %5064 = vrot.lane.b32.xlu1 %v16470_v24, %s13971_s1 }
 0xc9d   :  { %5062 = vrot.lane.b32.xlu0 %v16473_v3, %s13971_s1  ;;  %v4941_v35 = vpop.permute.xlu1 %4940 }
 0xc9e   :  { %v16480_v51 = vmax.f32 %v16407_v2, %v4941_v35  ;;  %v4939_v10 = vpop.permute.xlu0 %4938 }
 0xc9f   :  { %v16483_v56 = vmax.f32 %v16409_v15, %v4939_v10 }
 0xca0   :  { %5068 = vrot.lane.b32.xlu1 %v16480_v51, %s13971_s1 }
 0xca1   :  { %5066 = vrot.lane.b32.xlu0 %v16483_v56, %s13971_s1  ;;  %v4945_v58 = vpop.permute.xlu1 %4944 }
 0xca2   :  { %v16490_v14 = vmax.f32 %v16415_v62, %v4945_v58  ;;  %v4943_v9 = vpop.permute.xlu0 %4942 }
 0xca3   :  { %v16493_v59 = vmax.f32 %v16417_v22, %v4943_v9 }
 0xca4   :  { %5072 = vrot.lane.b32.xlu1 %v16490_v14, %s13971_s1 }
 0xca5   :  { %5070 = vrot.lane.b32.xlu0 %v16493_v59, %s13971_s1  ;;  %v4949_v17 = vpop.permute.xlu1 %4948 }
 0xca6   :  { %v16500_v35 = vmax.f32 %v16423_v0, %v4949_v17  ;;  %v4947_v10 = vpop.permute.xlu0 %4946 }
 0xca7   :  { %v16503_v25 = vmax.f32 %v16425_v60, %v4947_v10 }
 0xca8   :  { %5076 = vrot.lane.b32.xlu1 %v16500_v35, %s13971_s1 }
 0xca9   :  { %5074 = vrot.lane.b32.xlu0 %v16503_v25, %s13971_s1  ;;  %v4953_v58 = vpop.permute.xlu1 %4952 }
 0xcaa   :  { %v16510_v9 = vmax.f32 %v16431_v49, %v4953_v58  ;;  %v4951_v34 = vpop.permute.xlu0 %4950 }
 0xcab   :  { %v16513_v43 = vmax.f32 %v16433_v39, %v4951_v34 }
 0xcac   :  { %5080 = vrot.lane.b32.xlu1 %v16510_v9, %s13971_s1 }
 0xcad   :  { %5078 = vrot.lane.b32.xlu0 %v16513_v43, %s13971_s1 }
 0xcf6   :  { %v5053_v17 = vpop.permute.xlu1 %5052 }
 0xcf7   :  { %v5099_v10 = vsub.f32 %v16375_v55, %v5053_v17  ;;  %v5051_v61 = vpop.permute.xlu0 %5050 }
 0xcf8   :  { %v5098_v11 = vsub.f32 %v16377_v4, %v5051_v61 }
 0xcf9   :  { %v5116_v8 = vmul.f32 1.442695, %v5099_v10 }
 0xcfa   :  { %v5114_v44 = vmul.f32 1.442695, %v5098_v11 }
 0xcfb   :  { %13412 = vpow2.f32 %v5116_v8 }
 0xcfc   :  { %13414 = vpow2.f32 %v5114_v44 }
 0xcfe   :  { %v5057_v58 = vpop.permute.xlu1 %5056 }
 0xcff   :  { %v5101_v34 = vsub.f32 %v16383_v45, %v5057_v58  ;;  %v5055_v28 = vpop.permute.xlu0 %5054 }
 0xd00   :  { %v5100_v1 = vsub.f32 %v16385_v16, %v5055_v28 }
 0xd01   :  { %v5120_v37 = vmul.f32 1.442695, %v5101_v34 }
 0xd02   :  { %v5118_v42 = vmul.f32 1.442695, %v5100_v1 }
 0xd03   :  { %13416 = vpow2.f32 %v5120_v37 }
 0xd04   :  { %13418 = vpow2.f32 %v5118_v42 }
 0xd05   :  { %v16523_v52 = vpop.eup %13412 }
 0xd06   :  { %v16525_v17 = vpop.eup %13414  ;;  %5164 = vrot.lane.b32.xlu1 %v16523_v52, %s13970_s19  ;;  %v5061_v11 = vpop.permute.xlu1 %5060 }
 0xd07   :  { %v5103_v8 = vsub.f32 %v16391_v18, %v5061_v11  ;;  %5162 = vrot.lane.b32.xlu0 %v16525_v17, %s13970_s19  ;;  %v5059_v44 = vpop.permute.xlu0 %5058 }
 0xd08   :  { %v5102_v28 = vsub.f32 %v16393_v12, %v5059_v44 }
 0xd09   :  { %v5124_v61 = vmul.f32 1.442695, %v5103_v8 }
 0xd0a   :  { %v5122_v1 = vmul.f32 1.442695, %v5102_v28 }
 0xd0b   :  { %13420 = vpow2.f32 %v5124_v61 }
 0xd0c   :  { %13422 = vpow2.f32 %v5122_v1 }
 0xd0d   :  { %v16533_v37 = vpop.eup %13416 }
 0xd0e   :  { %v16535_v42 = vpop.eup %13418  ;;  %5168 = vrot.lane.b32.xlu1 %v16533_v37, %s13970_s19  ;;  %v5065_v10 = vpop.permute.xlu1 %5064 }
 0xd0f   :  { %v5105_v58 = vsub.f32 %v16399_v5, %v5065_v10  ;;  %5166 = vrot.lane.b32.xlu0 %v16535_v42, %s13970_s19  ;;  %v5063_v34 = vpop.permute.xlu0 %5062 }
 0xd10   :  { %v5104_v11 = vsub.f32 %v16401_v63, %v5063_v34 }
 0xd11   :  { %v5128_v8 = vmul.f32 1.442695, %v5105_v58 }
 0xd12   :  { %v5126_v44 = vmul.f32 1.442695, %v5104_v11  ;;  %v5069_v28 = vpop.permute.xlu1 %5068 }
 0xd13   :  { %13424 = vpow2.f32 %v5128_v8  ;;  %v5107_v61 = vsub.f32 %v16407_v2, %v5069_v28  ;;  %v5067_v1 = vpop.permute.xlu0 %5066 }
 0xd14   :  { %13426 = vpow2.f32 %v5126_v44  ;;  %v5106_v33 = vsub.f32 %v16409_v15, %v5067_v1 }
 0xd15   :  { %v16545_v29 = vpop.eup %13420  ;;  %v5132_v30 = vmul.f32 1.442695, %v5107_v61 }
 0xd16   :  { %v16547_v10 = vpop.eup %13422  ;;  %v5130_v7 = vmul.f32 1.442695, %v5106_v33  ;;  %5172 = vrot.lane.b32.xlu1 %v16545_v29, %s13970_s19  ;;  %v5073_v34 = vpop.permute.xlu1 %5072 }
 0xd17   :  { %13428 = vpow2.f32 %v5132_v30  ;;  %v5109_v58 = vsub.f32 %v16415_v62, %v5073_v34  ;;  %5170 = vrot.lane.b32.xlu0 %v16547_v10, %s13970_s19  ;;  %v5071_v11 = vpop.permute.xlu0 %5070 }
 0xd18   :  { %13430 = vpow2.f32 %v5130_v7  ;;  %v5108_v8 = vsub.f32 %v16417_v22, %v5071_v11 }
 0xd19   :  { %v5136_v44 = vmul.f32 1.442695, %v5109_v58 }
 0xd1a   :  { %v5134_v28 = vmul.f32 1.442695, %v5108_v8  ;;  %v5077_v61 = vpop.permute.xlu1 %5076 }
 0xd1b   :  { %13432 = vpow2.f32 %v5136_v44  ;;  %v5111_v33 = vsub.f32 %v16423_v0, %v5077_v61  ;;  %v5075_v1 = vpop.permute.xlu0 %5074 }
 0xd1c   :  { %13434 = vpow2.f32 %v5134_v28  ;;  %v5110_v41 = vsub.f32 %v16425_v60, %v5075_v1 }
 0xd1d   :  { %v16557_v30 = vpop.eup %13424  ;;  %v5140_v34 = vmul.f32 1.442695, %v5111_v33 }
 0xd1e   :  { %v16559_v27 = vpop.eup %13426  ;;  %v5138_v36 = vmul.f32 1.442695, %v5110_v41  ;;  %5176 = vrot.lane.b32.xlu1 %v16557_v30, %s13970_s19  ;;  %v5081_v7 = vpop.permute.xlu1 %5080 }
 0xd1f   :  { %13436 = vpow2.f32 %v5140_v34  ;;  %v5113_v58 = vsub.f32 %v16431_v49, %v5081_v7  ;;  %5174 = vrot.lane.b32.xlu0 %v16559_v27, %s13970_s19  ;;  %v5079_v11 = vpop.permute.xlu0 %5078 }
 0xd20   :  { %13438 = vpow2.f32 %v5138_v36  ;;  %v5112_v8 = vsub.f32 %v16433_v39, %v5079_v11  ;;  %v445_v11 = vld [vmem:[%s14207_s24] sm:$0xff] }
 0xd21   :  { %v16567_v44 = vpop.eup %13428  ;;  %v5144_v28 = vmul.f32 1.442695, %v5113_v58 }
 0xd22   :  { %v16569_v61 = vpop.eup %13430  ;;  %v5142_v41 = vmul.f32 1.442695, %v5112_v8  ;;  %5180 = vrot.lane.b32.xlu1 %v16567_v44, %s13970_s19  ;;  %v446_v8 = vld [vmem:[%s14207_s24 + $0x8] sm:$0xff]  ;;  %s18775_s24 = sld [smem:[#allocation34_spill]] }
 0xd23   :  { %13440 = vpow2.f32 %v5144_v28  ;;  %5178 = vrot.lane.b32.xlu0 %v16569_v61, %s13970_s19  ;;  %v16601_v28 = vpack.c.bf16 %v446_v8, %v445_v11  ;;  %v4988_v11 = vsub.f32 %v16385_v16, %v16453_v23  ;;  %v5008_v8 = vmul.f32 1.442695, %v4989_v48 }
 0xd24   :  { %13442 = vpow2.f32 %v5142_v41  ;;  %v4987_v41 = vsub.f32 %v16375_v55, %v16440_v20  ;;  %v4990_v55 = vsub.f32 %v16393_v12, %v16463_v57  ;;  %v4993_v48 = vsub.f32 %v16399_v5, %v16470_v24 }
 0xd25   :  { %v16575_v33 = vpop.eup %13432  ;;  %18774 = vst [vmem:[#allocation83_spill] sm:$0xff] %v16601_v28  ;;  %12499 = vmatprep.subr.bf16.mxu1 %v16601_v28  ;;  %v4992_v16 = vsub.f32 %v16401_v63, %v16473_v3  ;;  %v4997_v3 = vsub.f32 %v16415_v62, %v16490_v14 }
 0xd26   :  { %v16577_v36 = vpop.eup %13434  ;;  %5184 = vrot.lane.b32.xlu1 %v16575_v33, %s13970_s19  ;;  %12501 = vmatpush3.bf16.msra.mxu1 %v16601_v28  ;;  %v5004_v6 = vmul.f32 1.442695, %v4987_v41  ;;  %v4991_v28 = vsub.f32 %v16391_v18, %v16460_v31  ;;  %v5010_v40 = vmul.f32 1.442695, %v4990_v55  ;;  %v4995_v31 = vsub.f32 %v16407_v2, %v16480_v51 }
 0xd27   :  { %5182 = vrot.lane.b32.xlu0 %v16577_v36, %s13970_s19  ;;  %v4994_v41 = vsub.f32 %v16409_v15, %v16483_v56  ;;  %v4996_v15 = vsub.f32 %v16417_v22, %v16493_v59 }
 0xd28   :  { %13444 = vpow2.f32 %v5004_v6  ;;  %v5012_v45 = vmul.f32 1.442695, %v4991_v28  ;;  %v5016_v28 = vmul.f32 1.442695, %v4993_v48  ;;  %v5020_v24 = vmul.f32 1.442695, %v4995_v31 }
 0xd29   :  { %v16583_v1 = vpop.eup %13436  ;;  %13446 = vpow2.f32 %v5002_v50  ;;  %v5018_v63 = vmul.f32 1.442695, %v4994_v41  ;;  %v5022_v22 = vmul.f32 1.442695, %v4996_v15 }
 0xd2a   :  { %v16585_v34 = vpop.eup %13438  ;;  %5188 = vrot.lane.b32.xlu1 %v16583_v1, %s13970_s19  ;;  %13448 = vpow2.f32 %v5008_v8  ;;  %v5014_v8 = vmul.f32 1.442695, %v4992_v16 }
 0xd2b   :  { %5186 = vrot.lane.b32.xlu0 %v16585_v34, %s13970_s19 }
 0xd2d   :  { %v16591_v7 = vpop.eup %13440 }
 0xd2e   :  { %v16593_v58 = vpop.eup %13442  ;;  %5192 = vrot.lane.b32.xlu1 %v16591_v7, %s13970_s19 }
 0xd2f   :  { %18773 = vst [vmem:[#allocation82_spill] sm:$0xff] %v16593_v58  ;;  %5190 = vrot.lane.b32.xlu0 %v16593_v58, %s13970_s19  ;;  %v5006_v58 = vmul.f32 1.442695, %v4988_v11 }
 0xd31   :  { %13450 = vpow2.f32 %v5006_v58 }
 0xd32   :  { %v13445_v4 = vpop.eup %13444 }
 0xd33   :  { %v13447_v6 = vpop.eup %13446 }
 0xd34   :  { %v13449_v18 = vpop.eup %13448 }
 0xd3b   :  { %v13451_v23 = vpop.eup %13450 }
 0xd78   :  { %v5165_v26 = vpop.permute.xlu1 %5164 }
 0xd79   :  { %v5211_v20 = vadd.f32 %v13445_v4, %v5165_v26  ;;  %v5163_v47 = vpop.permute.xlu0 %5162 }
 0xd7a   :  { %v5210_v50 = vadd.f32 %v13447_v6, %v5163_v47  ;;  %v4999_v47 = vsub.f32 %v16423_v0, %v16500_v35  ;;  %v5000_v0 = vsub.f32 %v16433_v39, %v16513_v43 }
 0xd7b   :  { %13452 = vrcp.f32 %v5211_v20 }
 0xd7c   :  { %13454 = vrcp.f32 %v5210_v50 }
 0xd7d   :  { %13456 = vpow2.f32 %v5012_v45  ;;  %v4998_v45 = vsub.f32 %v16425_v60, %v16503_v25 }
 0xd7e   :  { %13458 = vpow2.f32 %v5010_v40  ;;  %v5001_v40 = vsub.f32 %v16431_v49, %v16510_v9 }
 0xd7f   :  { %v5026_v16 = vmul.f32 1.442695, %v4998_v45 }
 0xd80   :  { %v5169_v12 = vpop.permute.xlu1 %5168  ;;  %v5032_v49 = vmul.f32 1.442695, %v5001_v40 }
 0xd81   :  { %v5213_v57 = vadd.f32 %v13449_v18, %v5169_v12  ;;  %v5167_v58 = vpop.permute.xlu0 %5166 }
 0xd82   :  { %v5212_v11 = vadd.f32 %v13451_v23, %v5167_v58  ;;  %v5030_v58 = vmul.f32 1.442695, %v5000_v0 }
 0xd83   :  { %13460 = vrcp.f32 %v5213_v57 }
 0xd84   :  { %13462 = vrcp.f32 %v5212_v11 }
 0xd85   :  { %v13453_v5 = vpop.eup %13452  ;;  %13464 = vpow2.f32 %v5016_v28 }
 0xd86   :  { %v13455_v55 = vpop.eup %13454  ;;  %5292 = vrot.lane.b32.xlu1 %v13453_v5, %s13971_s1  ;;  %v16628_v2 = vmul.f32 %v13453_v5, %v13445_v4  ;;  %13466 = vpow2.f32 %v5014_v8  ;;  %v5024_v4 = vmul.f32 1.442695, %v4997_v3 }
 0xd87   :  { %5290 = vrot.lane.b32.xlu0 %v13455_v55, %s13971_s1  ;;  %v16633_v51 = vmul.f32 %v13455_v55, %v13447_v6  ;;  %v13457_v56 = vpop.eup %13456  ;;  %13468 = vpow2.f32 %v5020_v24  ;;  %v5028_v6 = vmul.f32 1.442695, %v4999_v47 }
 0xd88   :  { %v5173_v26 = vpop.permute.xlu1 %5172  ;;  %v13459_v20 = vpop.eup %13458  ;;  %13470 = vpow2.f32 %v5018_v63 }
 0xd89   :  { %v5215_v62 = vadd.f32 %v13457_v56, %v5173_v26  ;;  %v5171_v14 = vpop.permute.xlu0 %5170 }
 0xd8a   :  { %v5214_v50 = vadd.f32 %v13459_v20, %v5171_v14 }
 0xd8b   :  { %13472 = vrcp.f32 %v5215_v62 }
 0xd8c   :  { %13474 = vrcp.f32 %v5214_v50 }
 0xd8d   :  { %v13461_v59 = vpop.eup %13460  ;;  %13476 = vpow2.f32 %v5024_v4 }
 0xd8e   :  { %v13463_v48 = vpop.eup %13462  ;;  %5296 = vrot.lane.b32.xlu1 %v13461_v59, %s13971_s1  ;;  %v16644_v35 = vmul.f32 %v13461_v59, %v13449_v18  ;;  %13478 = vpow2.f32 %v5022_v22 }
 0xd8f   :  { %5294 = vrot.lane.b32.xlu0 %v13463_v48, %s13971_s1  ;;  %v16647_v25 = vmul.f32 %v13463_v48, %v13451_v23  ;;  %v13465_v60 = vpop.eup %13464  ;;  %13480 = vpow2.f32 %v5028_v6 }
 0xd90   :  { %v5177_v12 = vpop.permute.xlu1 %5176  ;;  %v13467_v31 = vpop.eup %13466  ;;  %13482 = vpow2.f32 %v5026_v16 }
 0xd91   :  { %v5217_v9 = vadd.f32 %v13465_v60, %v5177_v12  ;;  %v5175_v57 = vpop.permute.xlu0 %5174  ;;  %v13469_v43 = vpop.eup %13468 }
 0xd92   :  { %v5216_v28 = vadd.f32 %v13467_v31, %v5175_v57  ;;  %v13471_v39 = vpop.eup %13470 }
 0xd93   :  { %13484 = vrcp.f32 %v5217_v9 }
 0xd94   :  { %13486 = vrcp.f32 %v5216_v28  ;;  %v5181_v18 = vpop.permute.xlu1 %5180 }
 0xd95   :  { %v13473_v41 = vpop.eup %13472  ;;  %13488 = vpow2.f32 %v5032_v49  ;;  %v5219_v11 = vadd.f32 %v13469_v43, %v5181_v18  ;;  %v5179_v23 = vpop.permute.xlu0 %5178 }
 0xd96   :  { %v13475_v8 = vpop.eup %13474  ;;  %13490 = vpow2.f32 %v5030_v58  ;;  %v5218_v5 = vadd.f32 %v13471_v39, %v5179_v23  ;;  %5300 = vrot.lane.b32.xlu1 %v13473_v41, %s13971_s1  ;;  %v16650_v24 = vmul.f32 %v13473_v41, %v13457_v56 }
 0xd97   :  { %13492 = vrcp.f32 %v5219_v11  ;;  %5298 = vrot.lane.b32.xlu0 %v13475_v8, %s13971_s1  ;;  %v16653_v55 = vmul.f32 %v13475_v8, %v13459_v20  ;;  %v13477_v63 = vpop.eup %13476 }
 0xd98   :  { %13494 = vrcp.f32 %v5218_v5  ;;  %v5185_v3 = vpop.permute.xlu1 %5184  ;;  %v13479_v15 = vpop.eup %13478 }
 0xd99   :  { %v5221_v26 = vadd.f32 %v13477_v63, %v5185_v3  ;;  %v5183_v47 = vpop.permute.xlu0 %5182  ;;  %v13481_v14 = vpop.eup %13480 }
 0xd9a   :  { %v5220_v62 = vadd.f32 %v13479_v15, %v5183_v47  ;;  %v13483_v4 = vpop.eup %13482 }
 0xd9b   :  { %13496 = vrcp.f32 %v5221_v26 }
 0xd9c   :  { %13498 = vrcp.f32 %v5220_v62  ;;  %v5189_v45 = vpop.permute.xlu1 %5188 }
 0xd9d   :  { %v13485_v50 = vpop.eup %13484  ;;  %v5223_v56 = vadd.f32 %v13481_v14, %v5189_v45  ;;  %v5187_v22 = vpop.permute.xlu0 %5186 }
 0xd9e   :  { %v13487_v59 = vpop.eup %13486  ;;  %v5222_v6 = vadd.f32 %v13483_v4, %v5187_v22  ;;  %5304 = vrot.lane.b32.xlu1 %v13485_v50, %s13971_s1  ;;  %v16656_v20 = vmul.f32 %v13485_v50, %v13465_v60 }
 0xd9f   :  { %v13489_v40 = vpop.eup %13488  ;;  %13500 = vrcp.f32 %v5223_v56  ;;  %5302 = vrot.lane.b32.xlu0 %v13487_v59, %s13971_s1  ;;  %v16659_v48 = vmul.f32 %v13487_v59, %v13467_v31 }
 0xda0   :  { %v13491_v16 = vpop.eup %13490  ;;  %13502 = vrcp.f32 %v5222_v6  ;;  %v5193_v0 = vpop.permute.xlu1 %5192 }
 0xda1   :  { %v13493_v12 = vpop.eup %13492  ;;  %v5225_v49 = vadd.f32 %v13489_v40, %v5193_v0  ;;  %v5191_v9 = vpop.permute.xlu0 %5190 }
 0xda2   :  { %v13495_v57 = vpop.eup %13494  ;;  %v5224_v58 = vadd.f32 %v13491_v16, %v5191_v9  ;;  %5308 = vrot.lane.b32.xlu1 %v13493_v12, %s13971_s1  ;;  %v16662_v28 = vmul.f32 %v13493_v12, %v13469_v43  ;;  %v18776_v9 = vld [vmem:[#allocation82_spill] sm:$0xff] }
 0xda3   :  { %13504 = vrcp.f32 %v5225_v49  ;;  %5306 = vrot.lane.b32.xlu0 %v13495_v57, %s13971_s1  ;;  %v16665_v60 = vmul.f32 %v13495_v57, %v13471_v39 }
 0xda4   :  { %13506 = vrcp.f32 %v5224_v58 }
 0xda5   :  { %v13497_v31 = vpop.eup %13496 }
 0xda6   :  { %v13499_v18 = vpop.eup %13498  ;;  %5312 = vrot.lane.b32.xlu1 %v13497_v31, %s13971_s1  ;;  %v16668_v41 = vmul.f32 %v13497_v31, %v13477_v63  ;;  %v365_v31 = vld [vmem:[%s18775_s24 + $0x10] sm:$0xff] }
 0xda7   :  { %5310 = vrot.lane.b32.xlu0 %v13499_v18, %s13971_s1  ;;  %v16671_v11 = vmul.f32 %v13499_v18, %v13479_v15  ;;  %v366_v18 = vld [vmem:[%s18775_s24 + $0x18] sm:$0xff] }
 0xda9   :  { %v13501_v23 = vpop.eup %13500 }
 0xdaa   :  { %v13503_v8 = vpop.eup %13502  ;;  %5316 = vrot.lane.b32.xlu1 %v13501_v23, %s13971_s1  ;;  %v16674_v43 = vmul.f32 %v13501_v23, %v13481_v14 }
 0xdab   :  { %5314 = vrot.lane.b32.xlu0 %v13503_v8, %s13971_s1  ;;  %v16677_v39 = vmul.f32 %v13503_v8, %v13483_v4 }
 0xdad   :  { %v13505_v5 = vpop.eup %13504 }
 0xdae   :  { %v13507_v3 = vpop.eup %13506  ;;  %5320 = vrot.lane.b32.xlu1 %v13505_v5, %s13971_s1  ;;  %v16680_v63 = vmul.f32 %v13505_v5, %v13489_v40 }
 0xdaf   :  { %5318 = vrot.lane.b32.xlu0 %v13507_v3, %s13971_s1  ;;  %v16683_v15 = vmul.f32 %v13507_v3, %v13491_v16 }
 0xdb2   :  { %4571 = vrot.lane.b32.xlu1 %v16155_v54, %s13967_s9 }
 0xdb3   :  { %4569 = vrot.lane.b32.xlu0 %v16159_v53, %s13967_s9 }
 0xdb6   :  { %4575 = vrot.lane.b32.xlu1 %v16172_v32, %s13967_s9 }
 0xdb7   :  { %4573 = vrot.lane.b32.xlu0 %v16176_v21, %s13967_s9 }
 0xdba   :  { %4579 = vrot.lane.b32.xlu1 %v16189_v19, %s13967_s9 }
 0xdbb   :  { %4577 = vrot.lane.b32.xlu0 %v16192_v13, %s13967_s9 }
 0xdbe   :  { %4583 = vrot.lane.b32.xlu1 %v16206_v46, %s13967_s9 }
 0xdbf   :  { %4581 = vrot.lane.b32.xlu0 %v16209_v38, %s13967_s9 }
 0xdf8   :  { %v5293_v54 = vpop.permute.xlu1 %5292 }
 0xdf9   :  { %v5339_v53 = vmul.f32 %v16523_v52, %v5293_v54  ;;  %v5291_v32 = vpop.permute.xlu0 %5290 }
 0xdfa   :  { %v5338_v26 = vmul.f32 %v16525_v17, %v5291_v32 }
 0xdfb   :  { %v5356_v19 = vsel %vm5354_vm6, %v16628_v2, %v5339_v53 }
 0xdfc   :  { %v5355_v21 = vsel %vm5354_vm6, %v16633_v51, %v5338_v26 }
 0xdfd   :  { %11767 = vmatprep.mubr.msk.f32.mxu1 %vm539_vm1, %v5355_v21  ;;  %v18780_v21 = vld [vmem:[#allocation76_spill] sm:$0xff] }
 0xdfe   :  { %11768 = vmatmul.mubr.msk.f32.vlgmr.msra.gmra.mrb[70].mxu1 %vm539_vm1, %v5356_v19 }
 0xe00   :  { %v5297_v13 = vpop.permute.xlu1 %5296 }
 0xe01   :  { %v5341_v46 = vmul.f32 %v16533_v37, %v5297_v13  ;;  %v5295_v38 = vpop.permute.xlu0 %5294 }
 0xe02   :  { %v5340_v47 = vmul.f32 %v16535_v42, %v5295_v38  ;;  %v18781_v38 = vld [vmem:[#allocation77_spill] sm:$0xff] }
 0xe03   :  { %v5358_v17 = vsel %vm5354_vm6, %v16644_v35, %v5341_v46 }
 0xe04   :  { %v5357_v52 = vsel %vm5354_vm6, %v16647_v25, %v5340_v47 }
 0xe05   :  { %11770 = vmatprep.mubr.msk.f32.mxu1 %vm539_vm1, %v5357_v52 }
 0xe06   :  { %11771 = vmatmul.mubr.msk.f32.gmra.mrb[72].mxu1 %vm539_vm1, %v5358_v17 }
 0xe08   :  { %v5301_v2 = vpop.permute.xlu1 %5300 }
 0xe09   :  { %v5343_v51 = vmul.f32 %v16545_v29, %v5301_v2  ;;  %v5299_v62 = vpop.permute.xlu0 %5298 }
 0xe0a   :  { %v5342_v14 = vmul.f32 %v16547_v10, %v5299_v62  ;;  %v18782_v62 = vld [vmem:[#allocation78_spill] sm:$0xff] }
 0xe0b   :  { %v5360_v42 = vsel %vm5354_vm6, %v16650_v24, %v5343_v51 }
 0xe0c   :  { %v5359_v37 = vsel %vm5354_vm6, %v16653_v55, %v5342_v14 }
 0xe0d   :  { %11773 = vmatprep.mubr.msk.f32.mxu1 %vm539_vm1, %v5359_v37 }
 0xe0e   :  { %11774 = vmatmul.mubr.msk.f32.gmra.mrb[74].mxu1 %vm539_vm1, %v5360_v42 }
 0xe10   :  { %v5305_v25 = vpop.permute.xlu1 %5304 }
 0xe11   :  { %v5345_v35 = vmul.f32 %v16557_v30, %v5305_v25  ;;  %v5303_v4 = vpop.permute.xlu0 %5302  ;;  %v18783_v25 = vld [vmem:[#allocation79_spill] sm:$0xff] }
 0xe12   :  { %v5344_v45 = vmul.f32 %v16559_v27, %v5303_v4 }
 0xe13   :  { %v5362_v24 = vsel %vm5354_vm6, %v16656_v20, %v5345_v35 }
 0xe14   :  { %v5309_v29 = vpop.permute.xlu1 %5308  ;;  %v5361_v10 = vsel %vm5354_vm6, %v16659_v48, %v5344_v45 }
 0xe15   :  { %v5347_v50 = vmul.f32 %v16567_v44, %v5309_v29  ;;  %v5307_v55 = vpop.permute.xlu0 %5306  ;;  %11776 = vmatprep.mubr.msk.f32.mxu1 %vm539_vm1, %v5361_v10 }
 0xe16   :  { %v5346_v56 = vmul.f32 %v16569_v61, %v5307_v55  ;;  %11777 = vmatmul.mubr.msk.f32.gmra.mrb[76].mxu1 %vm539_vm1, %v5362_v24 }
 0xe17   :  { %v5364_v44 = vsel %vm5354_vm6, %v16662_v28, %v5347_v50  ;;  %v364_v28 = vld [vmem:[%s18775_s24 + $0x8] sm:$0xff]  ;;  %v18784_v50 = vld [vmem:[#allocation80_spill] sm:$0xff] }
 0xe18   :  { %v5313_v30 = vpop.permute.xlu1 %5312  ;;  %v5363_v27 = vsel %vm5354_vm6, %v16665_v60, %v5346_v56 }
 0xe19   :  { %v5349_v22 = vmul.f32 %v16575_v33, %v5313_v30  ;;  %v5311_v59 = vpop.permute.xlu0 %5310  ;;  %11779 = vmatprep.mubr.msk.f32.mxu1 %vm539_vm1, %v5363_v27  ;;  %v18785_v30 = vld [vmem:[#allocation81_spill] sm:$0xff] }
 0xe1a   :  { %v5348_v6 = vmul.f32 %v16577_v36, %v5311_v59  ;;  %11780 = vmatmul.mubr.msk.f32.gmra.mrb[78].mxu1 %vm539_vm1, %v5364_v44 }
 0xe1b   :  { %v5366_v33 = vsel %vm5354_vm6, %v16668_v41, %v5349_v22  ;;  %v12506_v41 = vpack.c.bf16 %v366_v18, %v365_v31  ;;  %v18786_v31 = vld [vmem:[#allocation51_spill] sm:$0xff] }
 0xe1c   :  { %v5317_v20 = vpop.permute.xlu1 %5316  ;;  %v5365_v61 = vsel %vm5354_vm6, %v16671_v11, %v5348_v6  ;;  %v18777_v11 = vmov 0.0|0.0  }
 0xe1d   :  { %v5351_v40 = vmul.f32 %v16583_v1, %v5317_v20  ;;  %v5315_v48 = vpop.permute.xlu0 %5314  ;;  %11782 = vmatprep.mubr.msk.f32.mxu1 %vm539_vm1, %v5365_v61 }
 0xe1e   :  { %v5350_v16 = vmul.f32 %v16585_v34, %v5315_v48  ;;  %11783 = vmatmul.mubr.msk.f32.gmra.mrb[80].mxu1 %vm539_vm1, %v5366_v33 }
 0xe1f   :  { %v5368_v49 = vsel %vm5354_vm6, %v16674_v43, %v5351_v40  ;;  %v18778_v43 = vld [vmem:[#allocation74_spill] sm:$0xff] }
 0xe20   :  { %v5321_v36 = vpop.permute.xlu1 %5320  ;;  %v5367_v0 = vsel %vm5354_vm6, %v16677_v39, %v5350_v16 }
 0xe21   :  { %v5353_v12 = vmul.f32 %v16591_v7, %v5321_v36  ;;  %v5319_v1 = vpop.permute.xlu0 %5318  ;;  %11785 = vmatprep.mubr.msk.f32.mxu1 %vm539_vm1, %v5367_v0  ;;  %v363_v7 = vld [vmem:[%s18775_s24] sm:$0xff] }
 0xe22   :  { %v5352_v57 = vmul.f32 %v18776_v9, %v5319_v1  ;;  %11786 = vmatmul.mubr.msk.f32.gmra.mrb[82].mxu1 %vm539_vm1, %v5368_v49  ;;  %v12502_v60 = vpack.c.bf16 %v364_v28, %v363_v7 }
 0xe23   :  { %v5370_v58 = vsel %vm5354_vm6, %v16680_v63, %v5353_v12  ;;  %v18779_v63 = vld [vmem:[#allocation75_spill] sm:$0xff] }
 0xe24   :  { %v5369_v34 = vsel %vm5354_vm6, %v16683_v15, %v5352_v57  ;;  %12503 = vmatprep.subr.bf16.mxu0 %v12502_v60  ;;  %v4572_v23 = vpop.permute.xlu1 %4571 }
 0xe25   :  { %11788 = vmatprep.mubr.msk.f32.mxu1 %vm539_vm1, %v5369_v34  ;;  %12505 = vmatpush3.bf16.msra.mxu0 %v12502_v60  ;;  %v4570_v8 = vpop.permute.xlu0 %4569  ;;  %v4594_v39 = vsel %vm455_vm2, %v4572_v23, %v18778_v43 }
 0xe26   :  { %11789 = vmatmul.mubr.msk.f32.gmra.mrb[84].mxu1 %vm539_vm1, %v5370_v58  ;;  %12507 = vmatprep.subr.bf16.mxu0 %v12506_v41  ;;  %v4593_v15 = vsel %vm455_vm2, %v4570_v8, %v18779_v63  ;;  %v18787_v8 = vld [vmem:[#allocation53_spill] sm:$0xff] }
 0xe28   :  { %v4576_v32 = vpop.permute.xlu1 %4575 }
 0xe29   :  { %12509 = vmatpush3.bf16.msra.mxu0 %v12506_v41  ;;  %v4574_v26 = vpop.permute.xlu0 %4573  ;;  %v4596_v19 = vsel %vm455_vm2, %v4576_v32, %v18780_v21 }
 0xe2a   :  { %12542 = vmatprep.subr.bf16.mxu0 %v18777_v11  ;;  %v4595_v47 = vsel %vm455_vm2, %v4574_v26, %v18781_v38 }
 0xe2c   :  { %v4580_v2 = vpop.permute.xlu1 %4579 }
 0xe2d   :  { %v4578_v51 = vpop.permute.xlu0 %4577  ;;  %v4598_v14 = vsel %vm455_vm2, %v4580_v2, %v18782_v62 }
 0xe2e   :  { %v4597_v35 = vsel %vm455_vm2, %v4578_v51, %v18783_v25 }
 0xe30   :  { %v4584_v29 = vpop.permute.xlu1 %4583 }
 0xe31   :  { %v4582_v10 = vpop.permute.xlu0 %4581  ;;  %v4600_v55 = vsel %vm455_vm2, %v4584_v29, %v18784_v50 }
 0xe32   :  { %v4599_v27 = vsel %vm455_vm2, %v4582_v10, %v18785_v30 }
 0xed1   :  { %v11769_v5 = vpop.f32.mrb[70].mxu1 }
 0xed2   :  { %v16772_v3 = vmul.f32 %v11769_v5, %v4594_v39  ;;  %v5485_v54 = vpop.f32.mrb[71].mxu1 }
 0xed3   :  { %v5564_v53 = vmul.f32 %v5485_v54, %v4593_v15 }
 0xed4   :  { %5598 = vrot.lane.b32.xlu1 %v16772_v3, %s13967_s9 }
 0xed5   :  { %5596 = vrot.lane.b32.xlu0 %v5564_v53, %s13967_s9 }
 0xed9   :  { %v11772_v13 = vpop.f32.mrb[72].mxu1 }
 0xeda   :  { %v5567_v46 = vmul.f32 %v11772_v13, %v4596_v19  ;;  %v5495_v52 = vpop.f32.mrb[73].mxu1 }
 0xedb   :  { %v5566_v17 = vmul.f32 %v5495_v52, %v4595_v47 }
 0xedc   :  { %5602 = vrot.lane.b32.xlu1 %v5567_v46, %s13967_s9 }
 0xedd   :  { %5600 = vrot.lane.b32.xlu0 %v5566_v17, %s13967_s9 }
 0xee1   :  { %v11775_v37 = vpop.f32.mrb[74].mxu1 }
 0xee2   :  { %v5569_v42 = vmul.f32 %v11775_v37, %v4598_v14  ;;  %v5505_v4 = vpop.f32.mrb[75].mxu1 }
 0xee3   :  { %v5568_v45 = vmul.f32 %v5505_v4, %v4597_v35  ;;  %v10691_v4 = vld [vmem:[%s18788_s0] ss:$0 sm:$0xff] }
 0xee4   :  { %5606 = vrot.lane.b32.xlu1 %v5569_v42, %s13967_s9 }
 0xee5   :  { %5604 = vrot.lane.b32.xlu0 %v5568_v45, %s13967_s9 }
 0xee9   :  { %v11778_v24 = vpop.f32.mrb[76].mxu1 }
 0xeea   :  { %v5571_v56 = vmul.f32 %v11778_v24, %v4600_v55  ;;  %v5515_v22 = vpop.f32.mrb[77].mxu1 }
 0xeeb   :  { %v5570_v59 = vmul.f32 %v5515_v22, %v4599_v27 }
 0xeec   :  { %5610 = vrot.lane.b32.xlu1 %v5571_v56, %s13967_s9 }
 0xeed   :  { %5608 = vrot.lane.b32.xlu0 %v5570_v59, %s13967_s9  ;;  %v11781_v44 = vpop.f32.mrb[78].mxu1 }
 0xeee   :  { %v5573_v6 = vmul.f32 %v11781_v44, %v4594_v39  ;;  %v5525_v20 = vpop.f32.mrb[79].mxu1 }
 0xeef   :  { %v5572_v61 = vmul.f32 %v5525_v20, %v4593_v15 }
 0xef0   :  { %5614 = vrot.lane.b32.xlu1 %v5573_v6, %s13967_s9 }
 0xef1   :  { %5612 = vrot.lane.b32.xlu0 %v5572_v61, %s13967_s9  ;;  %v11784_v40 = vpop.f32.mrb[80].mxu1 }
 0xef2   :  { %v5575_v48 = vmul.f32 %v11784_v40, %v4596_v19  ;;  %v5535_v33 = vpop.f32.mrb[81].mxu1 }
 0xef3   :  { %v5574_v16 = vmul.f32 %v5535_v33, %v4595_v47 }
 0xef4   :  { %5618 = vrot.lane.b32.xlu1 %v5575_v48, %s13967_s9 }
 0xef5   :  { %5616 = vrot.lane.b32.xlu0 %v5574_v16, %s13967_s9  ;;  %v11787_v36 = vpop.f32.mrb[82].mxu1 }
 0xef6   :  { %v5577_v0 = vmul.f32 %v11787_v36, %v4598_v14  ;;  %v5545_v12 = vpop.f32.mrb[83].mxu1 }
 0xef7   :  { %v5576_v1 = vmul.f32 %v5545_v12, %v4597_v35  ;;  %v18789_v35 = vmov 0.0  }
 0xef8   :  { %5622 = vrot.lane.b32.xlu1 %v5577_v0, %s13967_s9 }
 0xef9   :  { %5620 = vrot.lane.b32.xlu0 %v5576_v1, %s13967_s9  ;;  %v11790_v49 = vpop.f32.mrb[84].mxu1 }
 0xefa   :  { %v5579_v9 = vmul.f32 %v11790_v49, %v4600_v55  ;;  %v5555_v57 = vpop.f32.mrb[85].mxu1 }
 0xefb   :  { %v5578_v34 = vmul.f32 %v5555_v57, %v4599_v27 }
 0xefc   :  { %5626 = vrot.lane.b32.xlu1 %v5579_v9, %s13967_s9 }
 0xefd   :  { %5624 = vrot.lane.b32.xlu0 %v5578_v34, %s13967_s9 }
 0xf46   :  { %v5599_v58 = vpop.permute.xlu1 %5598 }
 0xf47   :  { %v5597_v7 = vpop.permute.xlu0 %5596  ;;  %v5645_v60 = vadd.f32 %v5599_v58, %v16772_v3 }
 0xf48   :  { %v5644_v28 = vadd.f32 %v5597_v7, %v5564_v53 }
 0xf4a   :  { %11799 = vmatprep.mubr.msk.f32.mxu0 %vm455_vm2, %v5644_v28  ;;  %v447_v28 = vld [vmem:[%s14212_s8] sm:$0xff] }
 0xf4b   :  { %11800 = vmatmul.mubr.msk.f32.vlgmr.msra.gmra.mrb[90].mxu0 %vm455_vm2, %v5645_v60  ;;  %11839 = vmatprep.mubr.msk.f32.mxu1 %vm1837_vm4, %v447_v28 }
 0xf4c   :  { %12544 = vmatpush3.bf16.msra.mxu0 %v18786_v31 }
 0xf4d   :  { %12545 = vmatprep.subr.bf16.mxu0 %v18777_v11 }
 0xf4e   :  { %v5603_v18 = vpop.permute.xlu1 %5602 }
 0xf4f   :  { %v5601_v41 = vpop.permute.xlu0 %5600  ;;  %v5647_v43 = vadd.f32 %v5603_v18, %v5567_v46 }
 0xf50   :  { %v5646_v23 = vadd.f32 %v5601_v41, %v5566_v17  ;;  %12547 = vmatpush3.bf16.msra.mxu0 %v18787_v8 }
 0xf51   :  { %12594 = vmatprep.subr.bf16.mxu0 %v18777_v11 }
 0xf52   :  { %11802 = vmatprep.mubr.msk.f32.mxu0 %vm455_vm2, %v5646_v23 }
 0xf53   :  { %11803 = vmatmul.mubr.msk.f32.gmra.mrb[92].mxu0 %vm455_vm2, %v5647_v43 }
 0xf56   :  { %v5607_v39 = vpop.permute.xlu1 %5606 }
 0xf57   :  { %v5605_v5 = vpop.permute.xlu0 %5604  ;;  %v5649_v63 = vadd.f32 %v5607_v39, %v5569_v42 }
 0xf58   :  { %v5648_v3 = vadd.f32 %v5605_v5, %v5568_v45 }
 0xf5a   :  { %11805 = vmatprep.mubr.msk.f32.mxu0 %vm455_vm2, %v5648_v3 }
 0xf5b   :  { %11806 = vmatmul.mubr.msk.f32.gmra.mrb[94].mxu0 %vm455_vm2, %v5649_v63 }
 0xf5e   :  { %v5611_v15 = vpop.permute.xlu1 %5610 }
 0xf5f   :  { %v5609_v54 = vpop.permute.xlu0 %5608  ;;  %v5651_v32 = vadd.f32 %v5611_v15, %v5571_v56 }
 0xf60   :  { %v5650_v53 = vadd.f32 %v5609_v54, %v5570_v59 }
 0xf62   :  { %11808 = vmatprep.mubr.msk.f32.mxu0 %vm455_vm2, %v5650_v53  ;;  %v5615_v26 = vpop.permute.xlu1 %5614 }
 0xf63   :  { %v5613_v21 = vpop.permute.xlu0 %5612  ;;  %11809 = vmatmul.mubr.msk.f32.gmra.mrb[96].mxu0 %vm455_vm2, %v5651_v32  ;;  %v5653_v13 = vadd.f32 %v5615_v26, %v5573_v6 }
 0xf64   :  { %v5652_v19 = vadd.f32 %v5613_v21, %v5572_v61 }
 0xf66   :  { %11811 = vmatprep.mubr.msk.f32.mxu0 %vm455_vm2, %v5652_v19  ;;  %v5619_v46 = vpop.permute.xlu1 %5618 }
 0xf67   :  { %v5617_v38 = vpop.permute.xlu0 %5616  ;;  %11812 = vmatmul.mubr.msk.f32.gmra.mrb[98].mxu0 %vm455_vm2, %v5653_v13  ;;  %v5655_v52 = vadd.f32 %v5619_v46, %v5575_v48 }
 0xf68   :  { %v5654_v47 = vadd.f32 %v5617_v38, %v5574_v16 }
 0xf6a   :  { %11814 = vmatprep.mubr.msk.f32.mxu0 %vm455_vm2, %v5654_v47  ;;  %v5623_v17 = vpop.permute.xlu1 %5622 }
 0xf6b   :  { %v5621_v2 = vpop.permute.xlu0 %5620  ;;  %11815 = vmatmul.mubr.msk.f32.gmra.mrb[100].mxu0 %vm455_vm2, %v5655_v52  ;;  %v5657_v62 = vadd.f32 %v5623_v17, %v5577_v0  ;;  %v448_v17 = vld [vmem:[%s14212_s8 + $0x8] sm:$0xff] }
 0xf6c   :  { %v5656_v51 = vadd.f32 %v5621_v2, %v5576_v1  ;;  %v449_v2 = vld [vmem:[%s14212_s8 + $0x10] sm:$0xff] }
 0xf6e   :  { %11817 = vmatprep.mubr.msk.f32.mxu0 %vm455_vm2, %v5656_v51  ;;  %v5627_v14 = vpop.permute.xlu1 %5626 }
 0xf6f   :  { %v5625_v37 = vpop.permute.xlu0 %5624  ;;  %11818 = vmatmul.mubr.msk.f32.gmra.mrb[102].mxu0 %vm455_vm2, %v5657_v62  ;;  %v5659_v25 = vadd.f32 %v5627_v14, %v5579_v9  ;;  %v450_v14 = vld [vmem:[%s14212_s8 + $0x18] sm:$0xff] }
 0xf70   :  { %v5658_v42 = vadd.f32 %v5625_v37, %v5578_v34  ;;  %v451_v37 = vld [vmem:[%s14212_s8 + $0x20] sm:$0xff] }
 0xf72   :  { %11820 = vmatprep.mubr.msk.f32.mxu0 %vm455_vm2, %v5658_v42 }
 0xf73   :  { %11821 = vmatmul.mubr.msk.f32.gmra.mrb[104].mxu0 %vm455_vm2, %v5659_v25 }
 0xf74   :  { %11887 = vmatprep.mubr.msk.f32.mxu0 %vm13964_vm0, %v18789_v35 }
0x101e   :  { %v11801_v45 = vpop.f32.mrb[90].mxu0 }
0x101f   :  { %v5780_v29 = vpop.f32.mrb[91].mxu0  ;;  %v5786_v50 = vadd.f32 %v11801_v45, %v10691_v4  ;;  %v453_v45 = vld [vmem:[%s14212_s8 + $0x30] sm:$0xff] }
0x1020   :  { %v5781_v10 = vadd.f32 %v10691_v4, %v5780_v29 }
0x1022   :  { %5859 = vxpose.xlu0.b32.start [1/4] (short) (narrow) %v5781_v10, 32  ;;  %v454_v10 = vld [vmem:[%s14212_s8 + $0x38] sm:$0xff] }
0x1026   :  { %5860 = vxpose.xlu0.b32.cont [2/4] (short) (narrow) %v5786_v50, 32  ;;  %v11804_v55 = vpop.f32.mrb[92].mxu0 }
0x1027   :  { %v5790_v24 = vpop.f32.mrb[93].mxu0  ;;  %v5796_v30 = vadd.f32 %v11804_v55, %v10691_v4 }
0x1028   :  { %v5791_v56 = vadd.f32 %v10691_v4, %v5790_v24  ;;  %v18790_v24 = vld [vmem:[#allocation55_spill] sm:$0xff] }
0x102a   :  { %5861 = vxpose.xlu0.b32.cont [3/4] (short) (narrow) %v5791_v56, 32 }
0x102e   :  { %5862 = vxpose.xlu0.b32.end [4/4] (short) (narrow) %v5796_v30, 32  ;;  %v11807_v27 = vpop.f32.mrb[94].mxu0 }
0x102f   :  { %v5800_v22 = vpop.f32.mrb[95].mxu0  ;;  %v5806_v44 = vadd.f32 %v11807_v27, %v10691_v4  ;;  %v18791_v27 = vld [vmem:[#allocation54_spill] sm:$0xff] }
0x1030   :  { %v5801_v59 = vadd.f32 %v10691_v4, %v5800_v22 }
0x1032   :  { %6052 = vxpose.xlu0.b32.start [1/4] (short) (narrow) %v5801_v59, 32 }
0x1036   :  { %6053 = vxpose.xlu0.b32.cont [2/4] (short) (narrow) %v5806_v44, 32  ;;  %v11810_v6 = vpop.f32.mrb[96].mxu0 }
0x1037   :  { %v5810_v20 = vpop.f32.mrb[97].mxu0  ;;  %v5816_v33 = vadd.f32 %v11810_v6, %v10691_v4 }
0x1038   :  { %v5811_v61 = vadd.f32 %v10691_v4, %v5810_v20 }
0x103a   :  { %6054 = vxpose.xlu0.b32.cont [3/4] (short) (narrow) %v5811_v61, 32  ;;  %v11813_v40 = vpop.f32.mrb[98].mxu0 }
0x103b   :  { %v5820_v48 = vpop.f32.mrb[99].mxu0  ;;  %v5826_v12 = vadd.f32 %v11813_v40, %v10691_v4  ;;  %v18792_v40 = vld [vmem:[#allocation57_spill] sm:$0xff] }
0x103c   :  { %v5821_v16 = vadd.f32 %v10691_v4, %v5820_v48 }
0x103e   :  { %6055 = vxpose.xlu0.b32.end [4/4] (short) (narrow) %v5816_v33, 32  ;;  %5891 = vxpose.xlu1.b32.start [1/4] (short) (narrow) %v5821_v16, 32  ;;  %v11816_v36 = vpop.f32.mrb[100].mxu0 }
0x103f   :  { %v5830_v0 = vpop.f32.mrb[101].mxu0  ;;  %v5836_v58 = vadd.f32 %v11816_v36, %v10691_v4 }
0x1040   :  { %v5831_v9 = vadd.f32 %v10691_v4, %v5830_v0  ;;  %v18793_v0 = vld [vmem:[#allocation56_spill] sm:$0xff] }
0x1042   :  { %5892 = vxpose.xlu1.b32.cont [2/4] (short) (narrow) %v5826_v12, 32  ;;  %v11819_v1 = vpop.f32.mrb[102].mxu0 }
0x1043   :  { %v5840_v49 = vpop.f32.mrb[103].mxu0  ;;  %v5846_v60 = vadd.f32 %v11819_v1, %v10691_v4 }
0x1044   :  { %v5841_v7 = vadd.f32 %v10691_v4, %v5840_v49 }
0x1046   :  { %5893 = vxpose.xlu1.b32.cont [3/4] (short) (narrow) %v5831_v9, 32  ;;  %v11822_v57 = vpop.f32.mrb[104].mxu0 }
0x1047   :  { %v5850_v34 = vpop.f32.mrb[105].mxu0  ;;  %v5856_v41 = vadd.f32 %v11822_v57, %v10691_v4 }
0x1048   :  { %v5851_v18 = vadd.f32 %v10691_v4, %v5850_v34  ;;  %v452_v4 = vld [vmem:[%s14212_s8 + $0x28] sm:$0xff] }
0x104a   :  { %5894 = vxpose.xlu1.b32.end [4/4] (short) (narrow) %v5836_v58, 32 }
0x104e   :  { %6084 = vxpose.xlu1.b32.start [1/4] (short) (narrow) %v5841_v7, 32 }
0x1052   :  { %6085 = vxpose.xlu1.b32.cont [2/4] (short) (narrow) %v5846_v60, 32 }
0x1056   :  { %6086 = vxpose.xlu1.b32.cont [3/4] (short) (narrow) %v5851_v18, 32 }
0x105a   :  { %6087 = vxpose.xlu1.b32.end [4/4] (short) (narrow) %v5856_v41, 32 }
0x10a2   :  { %v5875_v23 = vpop.trf.xlu0 }
0x10a6   :  { %v5876_v43 = vpop.trf.xlu0 }
0x10a7   :  { %v12510_v39 = vpack.c.bf16 %v5876_v43, %v5875_v23  ;;  %v18795_v43 = vld [vmem:[#allocation58_spill] sm:$0xff] }
0x10a9   :  { %12511 = vmatprep.subr.bf16.mxu1 %v12510_v39 }
0x10aa   :  { %12513 = vmatpush3.bf16.msra.mxu1 %v12510_v39  ;;  %v5877_v5 = vpop.trf.xlu0 }
0x10ae   :  { %v5878_v3 = vpop.trf.xlu0 }
0x10af   :  { %v12514_v63 = vpack.c.bf16 %v5878_v3, %v5877_v5 }
0x10b1   :  { %12515 = vmatprep.subr.bf16.mxu1 %v12514_v63 }
0x10b2   :  { %12517 = vmatpush3.bf16.msra.mxu1 %v12514_v63  ;;  %v6068_v15 = vpop.trf.xlu0 }
0x10b6   :  { %v6069_v32 = vpop.trf.xlu0 }
0x10b7   :  { %v12526_v38 = vpack.c.bf16 %v6069_v32, %v6068_v15 }
0x10ba   :  { %v6070_v19 = vpop.trf.xlu0 }
0x10be   :  { %v5907_v54 = vpop.trf.xlu1  ;;  %v6071_v47 = vpop.trf.xlu0 }
0x10bf   :  { %v12530_v51 = vpack.c.bf16 %v6071_v47, %v6070_v19 }
0x10c2   :  { %v5908_v53 = vpop.trf.xlu1 }
0x10c3   :  { %v12518_v26 = vpack.c.bf16 %v5908_v53, %v5907_v54 }
0x10c5   :  { %12519 = vmatprep.subr.bf16.mxu1 %v12518_v26 }
0x10c6   :  { %12521 = vmatpush3.bf16.msra.mxu1 %v12518_v26  ;;  %v5909_v21 = vpop.trf.xlu1 }
0x10ca   :  { %v5910_v13 = vpop.trf.xlu1 }
0x10cb   :  { %v12522_v46 = vpack.c.bf16 %v5910_v13, %v5909_v21 }
0x10cd   :  { %12523 = vmatprep.subr.bf16.mxu1 %v12522_v46 }
0x10ce   :  { %12525 = vmatpush3.bf16.msra.mxu1 %v12522_v46  ;;  %v6100_v52 = vpop.trf.xlu1 }
0x10cf   :  { %12527 = vmatprep.subr.bf16.mxu1 %v12526_v38 }
0x10d1   :  { %11840 = vmatmul.mubr.msk.f32.vlgmr.msra.gmra.mrb[86].mxu1 %vm1837_vm4, %v448_v17 }
0x10d2   :  { %12529 = vmatpush3.bf16.msra.mxu1 %v12526_v38  ;;  %v6101_v62 = vpop.trf.xlu1  ;;  %11842 = vmatprep.mubr.msk.f32.mxu1 %vm1837_vm4, %v449_v2  ;;  %v18796_v38 = vld [vmem:[#allocation60_spill] sm:$0xff] }
0x10d3   :  { %12531 = vmatprep.subr.bf16.mxu1 %v12530_v51  ;;  %v12534_v42 = vpack.c.bf16 %v6101_v62, %v6100_v52 }
0x10d5   :  { %11843 = vmatmul.mubr.msk.f32.gmra.mrb[88].mxu1 %vm1837_vm4, %v450_v14 }
0x10d6   :  { %12533 = vmatpush3.bf16.msra.mxu1 %v12530_v51  ;;  %v6102_v25 = vpop.trf.xlu1  ;;  %11845 = vmatprep.mubr.msk.f32.mxu1 %vm1837_vm4, %v451_v37  ;;  %v18797_v51 = vld [vmem:[#allocation61_spill] sm:$0xff] }
0x10d7   :  { %12535 = vmatprep.subr.bf16.mxu1 %v12534_v42 }
0x10d9   :  { %11846 = vmatmul.mubr.msk.f32.gmra.mrb[90].mxu1 %vm1837_vm4, %v452_v4 }
0x10da   :  { %12537 = vmatpush3.bf16.msra.mxu1 %v12534_v42  ;;  %v6103_v29 = vpop.trf.xlu1  ;;  %11848 = vmatprep.mubr.msk.f32.mxu1 %vm1837_vm4, %v453_v45 }
0x10db   :  { %v12538_v50 = vpack.c.bf16 %v6103_v29, %v6102_v25 }
0x10dd   :  { %11849 = vmatmul.mubr.msk.f32.gmra.mrb[92].mxu1 %vm1837_vm4, %v454_v10  ;;  %12539 = vmatprep.subr.bf16.mxu1 %v12538_v50 }
0x10de   :  { %12541 = vmatpush3.bf16.msra.mxu1 %v12538_v50  ;;  %11867 = vmatprep.mubr.msk.f32.mxu1 %vm1837_vm4, %v447_v28  ;;  %v18794_v28 = vld [vmem:[#allocation59_spill] sm:$0xff]  ;;  %v18799_v50 = vld [vmem:[#allocation62_spill] sm:$0xff] }
0x10df   :  { %12548 = vmatprep.subr.bf16.mxu1 %v18777_v11 }
0x10e1   :  { %11868 = vmatmul.mubr.msk.f32.vlgmr.msra.gmra.mrb[94].mxu1 %vm1837_vm4, %v448_v17 }
0x10e2   :  { %11870 = vmatprep.mubr.msk.f32.mxu1 %vm1837_vm4, %v449_v2  ;;  %12550 = vmatpush3.bf16.msra.mxu1 %v18786_v31 }
0x10e3   :  { %12551 = vmatprep.subr.bf16.mxu1 %v18777_v11 }
0x10e5   :  { %11871 = vmatmul.mubr.msk.f32.gmra.mrb[96].mxu1 %vm1837_vm4, %v450_v14 }
0x10e6   :  { %11873 = vmatprep.mubr.msk.f32.mxu1 %vm1837_vm4, %v451_v37  ;;  %12553 = vmatpush3.bf16.msra.mxu1 %v18787_v8 }
0x10e9   :  { %11874 = vmatmul.mubr.msk.f32.gmra.mrb[98].mxu1 %vm1837_vm4, %v452_v4  ;;  %v18798_v4 = vld [vmem:[#allocation63_spill] sm:$0xff] }
0x10ea   :  { %11876 = vmatprep.mubr.msk.f32.mxu1 %vm1837_vm4, %v453_v45 }
0x10ed   :  { %11877 = vmatmul.mubr.msk.f32.gmra.mrb[100].mxu1 %vm1837_vm4, %v454_v10 }
0x10ee   :  { %11898 = vmatprep.mubr.msk.f32.mxu1 %vm13964_vm0, %v18789_v35 }
0x11a4   :  { %v11841_v55 = vpop.f32.mrb[86].mxu1 }
0x11a5   :  { %v16860_v56 = vadd.f32 %v11841_v55, %v18790_v24  ;;  %v6013_v30 = vpop.f32.mrb[87].mxu1 }
0x11a6   :  { %v16863_v22 = vadd.f32 %v6013_v30, %v18791_v27 }
0x11a7   :  { %v6280_v59 = vmul.f32 %v16860_v56, %v16860_v56  ;;  %v6238_v44 = vsel %vm455_vm2, %v16860_v56, 0.0 }
0x11a8   :  { %v6237_v6 = vsel %vm455_vm2, %v16863_v22, 0.0  ;;  %v6279_v20 = vmul.f32 %v16863_v22, %v16863_v22  ;;  %v11844_v61 = vpop.f32.mrb[88].mxu1 }
0x11a9   :  { %v16874_v48 = vadd.f32 %v11844_v61, %v18792_v40  ;;  %v6023_v33 = vpop.f32.mrb[89].mxu1  ;;  %v6296_v16 = vsel %vm455_vm2, %v6280_v59, 0.0  ;;  %v6239_v1 = vadd.f32 %v6238_v44, %v6237_v6 }
0x11aa   :  { %v6295_v36 = vsel %vm455_vm2, %v6279_v20, 0.0  ;;  %v16879_v12 = vadd.f32 %v6023_v33, %v18793_v0  ;;  %v18800_v0 = vld [vmem:[#allocation65_spill] sm:$0xff] }
0x11ab   :  { %v6282_v49 = vmul.f32 %v16874_v48, %v16874_v48  ;;  %v6297_v58 = vadd.f32 %v6296_v16, %v6295_v36  ;;  %v6242_v41 = vsel %vm455_vm2, %v16874_v48, 0.0 }
0x11ac   :  { %v6240_v9 = vsel %vm455_vm2, %v16879_v12, 0.0  ;;  %v6281_v57 = vmul.f32 %v16879_v12, %v16879_v12  ;;  %v11847_v34 = vpop.f32.mrb[90].mxu1 }
0x11ad   :  { %v6241_v7 = vadd.f32 %v6240_v9, %v6239_v1  ;;  %v16888_v60 = vadd.f32 %v11847_v34, %v18794_v28  ;;  %v6033_v18 = vpop.f32.mrb[91].mxu1  ;;  %v6300_v63 = vsel %vm455_vm2, %v6282_v49, 0.0  ;;  %v18801_v49 = vld [vmem:[#allocation64_spill] sm:$0xff] }
0x11ae   :  { %v6298_v23 = vsel %vm455_vm2, %v6281_v57, 0.0  ;;  %v16894_v39 = vadd.f32 %v6033_v18, %v18795_v43 }
0x11af   :  { %v6299_v5 = vadd.f32 %v6298_v23, %v6297_v58  ;;  %v6243_v3 = vadd.f32 %v6242_v41, %v6241_v7  ;;  %v6284_v15 = vmul.f32 %v16888_v60, %v16888_v60  ;;  %v6246_v13 = vsel %vm455_vm2, %v16888_v60, 0.0 }
0x11b0   :  { %v6244_v54 = vsel %vm455_vm2, %v16894_v39, 0.0  ;;  %v6283_v53 = vmul.f32 %v16894_v39, %v16894_v39  ;;  %v11850_v32 = vpop.f32.mrb[92].mxu1 }
0x11b1   :  { %v6245_v26 = vadd.f32 %v6244_v54, %v6243_v3  ;;  %v6301_v21 = vadd.f32 %v6300_v63, %v6299_v5  ;;  %v6043_v19 = vpop.f32.mrb[93].mxu1  ;;  %v6304_v2 = vsel %vm455_vm2, %v6284_v15, 0.0  ;;  %v16911_v62 = vadd.f32 %v11850_v32, %v18797_v51  ;;  %v18802_v3 = vld [vmem:[#allocation67_spill] sm:$0xff] }
0x11b2   :  { %v6302_v46 = vsel %vm455_vm2, %v6283_v53, 0.0  ;;  %v16907_v47 = vadd.f32 %v6043_v19, %v18796_v38  ;;  %v18803_v53 = vld [vmem:[#allocation66_spill] sm:$0xff] }
0x11b3   :  { %v6303_v52 = vadd.f32 %v6302_v46, %v6301_v21  ;;  %v6247_v17 = vadd.f32 %v6246_v13, %v6245_v26  ;;  %v6286_v27 = vmul.f32 %v16911_v62, %v16911_v62  ;;  %v6250_v61 = vsel %vm455_vm2, %v16911_v62, 0.0 }
0x11b4   :  { %v6248_v14 = vsel %vm455_vm2, %v16907_v47, 0.0  ;;  %v6285_v37 = vmul.f32 %v16907_v47, %v16907_v47  ;;  %v11869_v42 = vpop.f32.mrb[94].mxu1 }
0x11b5   :  { %v6305_v25 = vadd.f32 %v6304_v2, %v6303_v52  ;;  %v16918_v45 = vadd.f32 %v11869_v42, %v18798_v4  ;;  %v6182_v29 = vpop.f32.mrb[95].mxu1  ;;  %v6249_v24 = vadd.f32 %v6248_v14, %v6247_v17  ;;  %v6308_v58 = vsel %vm455_vm2, %v6286_v27, 0.0 }
0x11b6   :  { %v6306_v10 = vsel %vm455_vm2, %v6285_v37, 0.0  ;;  %v16922_v55 = vadd.f32 %v6182_v29, %v18799_v50  ;;  %v18804_v37 = vld [vmem:[#allocation69_spill] sm:$0xff] }
0x11b7   :  { %v6288_v30 = vmul.f32 %v16918_v45, %v16918_v45  ;;  %v6259_v59 = vsel %vm455_vm2, %v16918_v45, 0.0  ;;  %v6307_v40 = vadd.f32 %v6306_v10, %v6305_v25  ;;  %v6251_v57 = vadd.f32 %v6250_v61, %v6249_v24  ;;  %v18805_v10 = vld [vmem:[#allocation68_spill] sm:$0xff] }
0x11b8   :  { %v6258_v44 = vsel %vm455_vm2, %v16922_v55, 0.0  ;;  %v6287_v6 = vmul.f32 %v16922_v55, %v16922_v55  ;;  %v11872_v20 = vpop.f32.mrb[96].mxu1 }
0x11b9   :  { %v6192_v33 = vpop.f32.mrb[97].mxu1  ;;  %v6317_v16 = vsel %vm455_vm2, %v6288_v30, 0.0  ;;  %v16939_v1 = vadd.f32 %v11872_v20, %v18800_v0  ;;  %v6260_v34 = vadd.f32 %v6259_v59, %v6258_v44  ;;  %v6309_v23 = vadd.f32 %v6308_v58, %v6307_v40 }
0x11ba   :  { %v6316_v36 = vsel %vm455_vm2, %v6287_v6, 0.0  ;;  %v16942_v9 = vadd.f32 %v6192_v33, %v18801_v49  ;;  %v6252_v26 = vrot.slane %v6251_v57, 4 }
0x11bb   :  { %v6290_v7 = vmul.f32 %v16939_v1, %v16939_v1  ;;  %v6318_v43 = vadd.f32 %v6317_v16, %v6316_v36  ;;  %v6263_v21 = vsel %vm455_vm2, %v16939_v1, 0.0  ;;  %v6310_v51 = vrot.slane %v6309_v23, 4 }
0x11bc   :  { %v6261_v28 = vsel %vm455_vm2, %v16942_v9, 0.0  ;;  %v6289_v18 = vmul.f32 %v16942_v9, %v16942_v9  ;;  %v11875_v41 = vpop.f32.mrb[98].mxu1  ;;  %v6253_v24 = vadd.f32 %v6252_v26, %v6251_v57 }
0x11bd   :  { %v6262_v5 = vadd.f32 %v6261_v28, %v6260_v34  ;;  %v16952_v63 = vadd.f32 %v11875_v41, %v18802_v3  ;;  %v6202_v15 = vpop.f32.mrb[99].mxu1  ;;  %v6321_v19 = vsel %vm455_vm2, %v6290_v7, 0.0  ;;  %v6311_v40 = vadd.f32 %v6310_v51, %v6309_v23 }
0x11be   :  { %v6319_v54 = vsel %vm455_vm2, %v6289_v18, 0.0  ;;  %v16956_v32 = vadd.f32 %v6202_v15, %v18803_v53  ;;  %v6254_v57 = vrot.slane %v6253_v24, 2 }
0x11bf   :  { %v6320_v13 = vadd.f32 %v6319_v54, %v6318_v43  ;;  %v6292_v46 = vmul.f32 %v16952_v63, %v16952_v63  ;;  %v6264_v38 = vadd.f32 %v6263_v21, %v6262_v5  ;;  %v6267_v30 = vsel %vm455_vm2, %v16952_v63, 0.0 }
0x11c0   :  { %v6265_v52 = vsel %vm455_vm2, %v16956_v32, 0.0  ;;  %v6291_v17 = vmul.f32 %v16956_v32, %v16956_v32  ;;  %v11878_v2 = vpop.f32.mrb[100].mxu1  ;;  %v6312_v7 = vrot.slane %v6311_v40, 2  ;;  %v6255_v43 = vadd.f32 %v6254_v57, %v6253_v24 }
0x11c1   :  { %v6322_v14 = vadd.f32 %v6321_v19, %v6320_v13  ;;  %v16968_v42 = vadd.f32 %v11878_v2, %v18804_v37  ;;  %v6212_v25 = vpop.f32.mrb[101].mxu1  ;;  %v6266_v4 = vadd.f32 %v6265_v52, %v6264_v38  ;;  %v6325_v27 = vsel %vm455_vm2, %v6292_v46, 0.0  ;;  %v370_v37 = vld [vmem:[%s18806_s13] sm:$0xff] }
0x11c2   :  { %v6323_v29 = vsel %vm455_vm2, %v6291_v17, 0.0  ;;  %v16972_v50 = vadd.f32 %v6212_v25, %v18805_v10  ;;  %v6313_v3 = vadd.f32 %v6312_v7, %v6311_v40  ;;  %v6256_v53 = vrot.slane %v6255_v43, 1  ;;  %v371_v25 = vld [vmem:[%s18806_s13 + $0x8] sm:$0xff]  ;;  %v373_v10 = vld [vmem:[%s18806_s13 + $0x18] sm:$0xff] }
0x11c3   :  { %v6324_v59 = vadd.f32 %v6323_v29, %v6322_v14  ;;  %v6294_v44 = vmul.f32 %v16968_v42, %v16968_v42  ;;  %v6268_v6 = vadd.f32 %v6267_v30, %v6266_v4  ;;  %v6271_v0 = vsel %vm455_vm2, %v16968_v42, 0.0  ;;  %v372_v4 = vld [vmem:[%s18806_s13 + $0x10] sm:$0xff] }
0x11c4   :  { %v6269_v20 = vsel %vm455_vm2, %v16972_v50, 0.0  ;;  %v6293_v61 = vmul.f32 %v16972_v50, %v16972_v50  ;;  %v6314_v19 = vrot.slane %v6313_v3, 1  ;;  %v6257_v38 = vadd.f32 %v6256_v53, %v6255_v43 }
0x11c5   :  { %v6326_v33 = vadd.f32 %v6325_v27, %v6324_v59  ;;  %v6270_v16 = vadd.f32 %v6269_v20, %v6268_v6  ;;  %v6329_v34 = vsel %vm455_vm2, %v6294_v44, 0.0  ;;  %v12554_v29 = vpack.c.bf16 %v371_v25, %v370_v37 }
0x11c6   :  { %v6327_v36 = vsel %vm455_vm2, %v6293_v61, 0.0  ;;  %v6315_v17 = vadd.f32 %v6314_v19, %v6313_v3  ;;  %v12558_v24 = vpack.c.bf16 %v373_v10, %v372_v4 }
0x11c7   :  { %v6328_v49 = vadd.f32 %v6327_v36, %v6326_v33  ;;  %v6272_v58 = vadd.f32 %v6271_v0, %v6270_v16  ;;  %12555 = vmatprep.subr.bf16.mxu1 %v12554_v29  ;;  %v18807_v16 = vld [vmem:[#allocation50_spill] sm:$0xff] }
0x11c9   :  { %v6330_v28 = vadd.f32 %v6329_v34, %v6328_v49  ;;  %v6273_v18 = vrot.slane %v6272_v58, 4 }
0x11cb   :  { %v6331_v41 = vrot.slane %v6330_v28, 4  ;;  %v6274_v5 = vadd.f32 %v6273_v18, %v6272_v58  ;;  %v18809_v58 = vld [vmem:[#allocation52_spill] sm:$0xff] }
0x11cd   :  { %v6332_v23 = vadd.f32 %v6331_v41, %v6330_v28  ;;  %v6275_v15 = vrot.slane %v6274_v5, 2 }
0x11cf   :  { %v6333_v54 = vrot.slane %v6332_v23, 2  ;;  %v6276_v26 = vadd.f32 %v6275_v15, %v6274_v5 }
0x11d1   :  { %v6334_v21 = vadd.f32 %v6333_v54, %v6332_v23  ;;  %v6277_v13 = vrot.slane %v6276_v26, 1 }
0x11d3   :  { %v6335_v46 = vrot.slane %v6334_v21, 1  ;;  %v6278_v52 = vadd.f32 %v6277_v13, %v6276_v26  ;;  %v17015_v26 = vld [vmem:[%s18808_s2] ss:$0 sm:$0xff] }
0x11d5   :  { %v6336_v2 = vadd.f32 %v6335_v46, %v6334_v21  ;;  %v6339_v51 = vsel %vm865_vm3, %v6278_v52, %v6257_v38 }
0x11d6   :  { %11888 = vmatmul.mubr.msk.f32.vlgmr.msra.gmra.mrb[106].mxu0 %vm455_vm2, %v6339_v51 }
0x11d7   :  { %v6414_v14 = vsel %vm865_vm3, %v6336_v2, %v6315_v17  ;;  %12596 = vmatpush3.bf16.msra.mxu0 %v18786_v31  ;;  %11997 = vmatprep.mubr.msk.f32.mxu0 %vm13964_vm0, %v18789_v35  ;;  %v17023_v17 = vld [vmem:[%s18810_s7] ss:$0 sm:$0xff] }
0x11d8   :  { %11899 = vmatmul.mubr.msk.f32.vlgmr.msra.gmra.mrb[102].mxu1 %vm455_vm2, %v6414_v14  ;;  %12597 = vmatprep.subr.bf16.mxu0 %v18777_v11 }
0x11d9   :  { %12557 = vmatpush3.bf16.msra.mxu1 %v12554_v29 }
0x11da   :  { %12559 = vmatprep.subr.bf16.mxu1 %v12558_v24 }
0x11db   :  { %12599 = vmatpush3.bf16.msra.mxu0 %v18787_v8 }
0x11dc   :  { %12600 = vmatprep.subr.bf16.mxu0 %v18777_v11 }
0x11dd   :  { %12561 = vmatpush3.bf16.msra.mxu1 %v12558_v24 }
0x12a9   :  { %v6408_v30 = vpop.f32.mrb[106].mxu0 }
0x12aa   :  { %v6487_v27 = vmul.f32 0.00390625, %v6408_v30  ;;  %v11889_v59 = vpop.f32.mrb[107].mxu0 }
0x12ab   :  { %v6483_v44 = vpop.f32.mrb[102].mxu1 }
0x12ac   :  { %v6488_v6 = vmul.f32 0.00390625, %v6483_v44  ;;  %v11900_v20 = vpop.f32.mrb[103].mxu1  ;;  %v6489_v61 = vmul.f32 %v6487_v27, %v6487_v27  ;;  %v6500_v36 = vrot.slane %v6487_v27, %v18807_v16 }
0x12ae   :  { %v6490_v40 = vsub.f32 %v6488_v6, %v6489_v61  ;;  %v6501_v0 = vcombine.high %v6500_v36, %v6500_v36  ;;  %v6508_v49 = vrot.slane %v6500_v36, %v18807_v16 }
0x12b0   :  { %v6491_v33 = vadd.f32 1e-05, %v6490_v40  ;;  %v6515_v34 = vrot.slane %v6501_v0, %v18807_v16  ;;  %v6519_v7 = vrot.slane %v6508_v49, %v18809_v58 }
0x12b2   :  { %13508 = vrsqrt.f32 %v6491_v33  ;;  %v6523_v43 = vrot.slane %v6515_v34, %v18809_v58  ;;  %v6526_v5 = vsub.f32 %v16863_v22, %v6519_v7  ;;  %v6527_v3 = vsub.f32 %v16860_v56, %v6519_v7 }
0x12b3   :  { %v6528_v54 = vsub.f32 %v16879_v12, %v6519_v7  ;;  %v6529_v53 = vsub.f32 %v16874_v48, %v6519_v7  ;;  %v6530_v21 = vsub.f32 %v16894_v39, %v6519_v7  ;;  %v6531_v19 = vsub.f32 %v16888_v60, %v6519_v7 }
0x12b4   :  { %v6532_v13 = vsub.f32 %v16907_v47, %v6519_v7  ;;  %v6533_v22 = vsub.f32 %v16911_v62, %v6519_v7  ;;  %v6534_v62 = vsub.f32 %v16922_v55, %v6523_v43  ;;  %v6535_v37 = vsub.f32 %v16918_v45, %v6523_v43 }
0x12b5   :  { %v6536_v25 = vsub.f32 %v16942_v9, %v6523_v43  ;;  %v6537_v4 = vsub.f32 %v16939_v1, %v6523_v43  ;;  %v6538_v24 = vsub.f32 %v16956_v32, %v6523_v43  ;;  %v6539_v30 = vsub.f32 %v16952_v63, %v6523_v43 }
0x12b6   :  { %v6540_v45 = vsub.f32 %v16972_v50, %v6523_v43  ;;  %v6541_v9 = vsub.f32 %v16968_v42, %v6523_v43 }
0x12bc   :  { %v13509_v57 = vpop.eup %13508 }
0x12bd   :  { %v6549_v28 = vrot.slane %v13509_v57, %v18807_v16 }
0x12bf   :  { %v6550_v18 = vcombine.high %v6549_v28, %v6549_v28  ;;  %v6557_v41 = vrot.slane %v6549_v28, %v18807_v16 }
0x12c1   :  { %v6564_v23 = vrot.slane %v6550_v18, %v18807_v16  ;;  %v6568_v15 = vrot.slane %v6557_v41, %v18809_v58 }
0x12c3   :  { %v6572_v56 = vrot.slane %v6564_v23, %v18809_v58  ;;  %v6575_v46 = vmul.f32 %v6568_v15, %v6526_v5  ;;  %v6576_v38 = vmul.f32 %v6568_v15, %v6527_v3  ;;  %v6577_v52 = vmul.f32 %v6568_v15, %v6528_v54 }
0x12c4   :  { %v6578_v12 = vmul.f32 %v6568_v15, %v6529_v53  ;;  %v6579_v2 = vmul.f32 %v6568_v15, %v6530_v21  ;;  %v6580_v48 = vmul.f32 %v6568_v15, %v6531_v19  ;;  %v6581_v51 = vmul.f32 %v6568_v15, %v6532_v13 }
0x12c5   :  { %v6597_v14 = vmul.f32 %v17015_v26, %v6575_v46  ;;  %v6598_v39 = vmul.f32 %v17015_v26, %v6576_v38  ;;  %v6599_v60 = vmul.f32 %v17015_v26, %v6577_v52  ;;  %v6582_v47 = vmul.f32 %v6568_v15, %v6533_v22  ;;  %v375_v46 = vld [vmem:[%s18811_s10] sm:$0xff]  ;;  %v377_v52 = vld [vmem:[%s18811_s10 + $0x10] sm:$0xff] }
0x12c6   :  { %v6600_v27 = vmul.f32 %v17015_v26, %v6578_v12  ;;  %v6601_v55 = vmul.f32 %v17015_v26, %v6579_v2  ;;  %v6583_v59 = vmul.f32 %v6572_v56, %v6534_v62  ;;  %v6584_v44 = vmul.f32 %v6572_v56, %v6535_v37  ;;  %v378_v12 = vld [vmem:[%s18811_s10 + $0x18] sm:$0xff]  ;;  %v384_v62 = vld [vmem:[%s18811_s10 + $0x48] sm:$0xff] }
0x12c7   :  { %v17033_v29 = vadd.f32 %v17023_v17, %v6597_v14  ;;  %v17036_v10 = vadd.f32 %v17023_v17, %v6598_v39  ;;  %v17047_v1 = vadd.f32 %v17023_v17, %v6599_v60  ;;  %v6585_v6 = vmul.f32 %v6572_v56, %v6536_v25  ;;  %v381_v14 = vld [vmem:[%s18811_s10 + $0x30] sm:$0xff]  ;;  %v382_v39 = vld [vmem:[%s18811_s10 + $0x38] sm:$0xff] }
0x12c8   :  { %v6586_v63 = vmul.f32 %v6572_v56, %v6537_v4  ;;  %v6587_v32 = vmul.f32 %v6572_v56, %v6538_v24  ;;  %v6588_v20 = vmul.f32 %v6572_v56, %v6539_v30  ;;  %v6589_v61 = vmul.f32 %v6572_v56, %v6540_v45  ;;  %v385_v25 = vld [vmem:[%s18811_s10 + $0x50] sm:$0xff]  ;;  %v386_v4 = vld [vmem:[%s18811_s10 + $0x58] sm:$0xff]  ;;  %v387_v30 = vld [vmem:[%s18811_s10 + $0x60] sm:$0xff] }
0x12c9   :  { %11909 = vmatprep.mubr.msk.f32.mxu1 %vm455_vm2, %v17033_v29  ;;  %v6590_v42 = vmul.f32 %v6572_v56, %v6541_v9  ;;  %v17054_v50 = vadd.f32 %v17023_v17, %v6600_v27  ;;  %v6602_v40 = vmul.f32 %v17015_v26, %v6580_v48  ;;  %v17058_v33 = vadd.f32 %v17023_v17, %v6601_v55  ;;  %v380_v48 = vld [vmem:[%s18811_s10 + $0x28] sm:$0xff]  ;;  %v389_v45 = vld [vmem:[%s18811_s10 + $0x70] sm:$0xff]  ;;  %v390_v9 = vld [vmem:[%s18811_s10 + $0x78] sm:$0xff] }
0x12ca   :  { %11910 = vmatmul.mubr.msk.f32.vlgmr.msra.gmra.mrb[104].mxu1 %vm455_vm2, %v17036_v10  ;;  %v6603_v36 = vmul.f32 %v17015_v26, %v6581_v51  ;;  %v6604_v49 = vmul.f32 %v17015_v26, %v6582_v47  ;;  %v6605_v34 = vmul.f32 %v17015_v26, %v6583_v59  ;;  %v6606_v28 = vmul.f32 %v17015_v26, %v6584_v44  ;;  %v383_v47 = vld [vmem:[%s18811_s10 + $0x40] sm:$0xff]  ;;  %v388_v27 = vld [vmem:[%s18811_s10 + $0x68] sm:$0xff] }
0x12cb   :  { %11912 = vmatprep.mubr.msk.f32.mxu1 %vm455_vm2, %v17047_v1  ;;  %v17066_v0 = vadd.f32 %v17023_v17, %v6602_v40  ;;  %v6607_v41 = vmul.f32 %v17015_v26, %v6585_v6  ;;  %v6608_v5 = vmul.f32 %v17015_v26, %v6586_v63  ;;  %v6609_v23 = vmul.f32 %v17015_v26, %v6587_v32  ;;  %v17146_v44 = vld [vmem:[%s18812_s11] ss:$0 sm:$0xff] }
0x12cc   :  { %v17070_v57 = vadd.f32 %v17023_v17, %v6603_v36  ;;  %v17078_v7 = vadd.f32 %v17023_v17, %v6604_v49  ;;  %v17082_v18 = vadd.f32 %v17023_v17, %v6605_v34  ;;  %v17090_v43 = vadd.f32 %v17023_v17, %v6606_v28 }
0x12cd   :  { %v17094_v3 = vadd.f32 %v17023_v17, %v6607_v41  ;;  %v17102_v15 = vadd.f32 %v17023_v17, %v6608_v5  ;;  %v6610_v54 = vmul.f32 %v17015_v26, %v6588_v20  ;;  %v17106_v53 = vadd.f32 %v17023_v17, %v6609_v23 }
0x12ce   :  { %11913 = vmatmul.mubr.msk.f32.gmra.mrb[106].mxu1 %vm455_vm2, %v17054_v50  ;;  %v6611_v21 = vmul.f32 %v17015_v26, %v6589_v61  ;;  %v6612_v13 = vmul.f32 %v17015_v26, %v6590_v42  ;;  %v376_v26 = vld [vmem:[%s18811_s10 + $0x8] sm:$0xff]  ;;  %v12566_v2 = vpack.c.bf16 %v378_v12, %v377_v52  ;;  %v12574_v60 = vpack.c.bf16 %v382_v39, %v381_v14 }
0x12cf   :  { %11915 = vmatprep.mubr.msk.f32.mxu1 %vm455_vm2, %v17058_v33  ;;  %v17114_v19 = vadd.f32 %v17023_v17, %v6610_v54  ;;  %v12562_v38 = vpack.c.bf16 %v376_v26, %v375_v46  ;;  %v12578_v37 = vpack.c.bf16 %v384_v62, %v383_v47  ;;  %v12582_v24 = vpack.c.bf16 %v386_v4, %v385_v25 }
0x12d0   :  { %v17118_v22 = vadd.f32 %v17023_v17, %v6611_v21  ;;  %v17125_v56 = vadd.f32 %v17023_v17, %v6612_v13  ;;  %v379_v17 = vld [vmem:[%s18811_s10 + $0x20] sm:$0xff]  ;;  %v12586_v55 = vpack.c.bf16 %v388_v27, %v387_v30  ;;  %v12590_v59 = vpack.c.bf16 %v390_v9, %v389_v45 }
0x12d1   :  { %12563 = vmatprep.subr.bf16.mxu1 %v12562_v38  ;;  %v12570_v51 = vpack.c.bf16 %v380_v48, %v379_v17 }
0x12d2   :  { %11916 = vmatmul.mubr.msk.f32.gmra.mrb[108].mxu1 %vm455_vm2, %v17066_v0 }
0x12d3   :  { %11918 = vmatprep.mubr.msk.f32.mxu1 %vm455_vm2, %v17070_v57  ;;  %12565 = vmatpush3.bf16.msra.mxu1 %v12562_v38 }
0x12d4   :  { %12567 = vmatprep.subr.bf16.mxu1 %v12566_v2 }
0x12d6   :  { %11919 = vmatmul.mubr.msk.f32.gmra.mrb[110].mxu1 %vm455_vm2, %v17078_v7 }
0x12d7   :  { %11921 = vmatprep.mubr.msk.f32.mxu1 %vm455_vm2, %v17082_v18  ;;  %12569 = vmatpush3.bf16.msra.mxu1 %v12566_v2 }
0x12d8   :  { %12571 = vmatprep.subr.bf16.mxu1 %v12570_v51 }
0x12da   :  { %11922 = vmatmul.mubr.msk.f32.gmra.mrb[112].mxu1 %vm455_vm2, %v17090_v43 }
0x12db   :  { %11924 = vmatprep.mubr.msk.f32.mxu1 %vm455_vm2, %v17094_v3  ;;  %12573 = vmatpush3.bf16.msra.mxu1 %v12570_v51 }
0x12dc   :  { %12575 = vmatprep.subr.bf16.mxu1 %v12574_v60 }
0x12de   :  { %11925 = vmatmul.mubr.msk.f32.gmra.mrb[114].mxu1 %vm455_vm2, %v17102_v15 }
0x12df   :  { %11927 = vmatprep.mubr.msk.f32.mxu1 %vm455_vm2, %v17106_v53  ;;  %12577 = vmatpush3.bf16.msra.mxu1 %v12574_v60 }
0x12e0   :  { %12579 = vmatprep.subr.bf16.mxu1 %v12578_v37 }
0x12e2   :  { %11928 = vmatmul.mubr.msk.f32.gmra.mrb[116].mxu1 %vm455_vm2, %v17114_v19 }
0x12e3   :  { %11930 = vmatprep.mubr.msk.f32.mxu1 %vm455_vm2, %v17118_v22  ;;  %12581 = vmatpush3.bf16.msra.mxu1 %v12578_v37 }
0x12e4   :  { %12583 = vmatprep.subr.bf16.mxu1 %v12582_v24 }
0x12e6   :  { %11931 = vmatmul.mubr.msk.f32.gmra.mrb[118].mxu1 %vm455_vm2, %v17125_v56 }
0x12e7   :  { %12585 = vmatpush3.bf16.msra.mxu1 %v12582_v24 }
0x12e8   :  { %12587 = vmatprep.subr.bf16.mxu1 %v12586_v55 }
0x12eb   :  { %12589 = vmatpush3.bf16.msra.mxu1 %v12586_v55 }
0x12ec   :  { %12591 = vmatprep.subr.bf16.mxu1 %v12590_v59 }
0x12ef   :  { %12593 = vmatpush3.bf16.msra.mxu1 %v12590_v59 }
0x139d   :  { %v11911_v6 = vpop.f32.mrb[104].mxu1 }
0x139e   :  { %v17149_v63 = vadd.f32 %v11911_v6, %v17146_v44  ;;  %v6755_v32 = vpop.f32.mrb[105].mxu1 }
0x139f   :  { %v17152_v20 = vadd.f32 %v17146_v44, %v6755_v32 }
0x13a0   :  { %v6835_v61 = vsub.f32 0.0, %v17149_v63 }
0x13a1   :  { %v6834_v42 = vsub.f32 0.0, %v17152_v20  ;;  %v11914_v40 = vpop.f32.mrb[106].mxu1 }
0x13a2   :  { %v6852_v36 = vmul.f32 1.442695, %v6835_v61  ;;  %v17157_v49 = vadd.f32 %v11914_v40, %v17146_v44  ;;  %v6765_v34 = vpop.f32.mrb[107].mxu1 }
0x13a3   :  { %v6850_v28 = vmul.f32 1.442695, %v6834_v42  ;;  %v17160_v41 = vadd.f32 %v17146_v44, %v6765_v34 }
0x13a4   :  { %13510 = vpow2.f32 %v6852_v36  ;;  %v6837_v5 = vsub.f32 0.0, %v17157_v49 }
0x13a5   :  { %13512 = vpow2.f32 %v6850_v28  ;;  %v6836_v23 = vsub.f32 0.0, %v17160_v41  ;;  %v11917_v54 = vpop.f32.mrb[108].mxu1 }
0x13a6   :  { %v6856_v21 = vmul.f32 1.442695, %v6837_v5  ;;  %v17165_v13 = vadd.f32 %v11917_v54, %v17146_v44  ;;  %v6775_v46 = vpop.f32.mrb[109].mxu1 }
0x13a7   :  { %v6854_v26 = vmul.f32 1.442695, %v6836_v23  ;;  %v17168_v38 = vadd.f32 %v17146_v44, %v6775_v46 }
0x13a8   :  { %13514 = vpow2.f32 %v6856_v21  ;;  %v6839_v52 = vsub.f32 0.0, %v17165_v13 }
0x13a9   :  { %13516 = vpow2.f32 %v6854_v26  ;;  %v6838_v12 = vsub.f32 0.0, %v17168_v38  ;;  %v11920_v2 = vpop.f32.mrb[110].mxu1 }
0x13aa   :  { %v6860_v17 = vmul.f32 1.442695, %v6839_v52  ;;  %v17173_v48 = vadd.f32 %v11920_v2, %v17146_v44  ;;  %v6785_v51 = vpop.f32.mrb[111].mxu1 }
0x13ab   :  { %v6858_v14 = vmul.f32 1.442695, %v6838_v12  ;;  %v17176_v39 = vadd.f32 %v17146_v44, %v6785_v51 }
0x13ac   :  { %13518 = vpow2.f32 %v6860_v17  ;;  %v6841_v60 = vsub.f32 0.0, %v17173_v48 }
0x13ad   :  { %13520 = vpow2.f32 %v6858_v14  ;;  %v6840_v47 = vsub.f32 0.0, %v17176_v39  ;;  %v11923_v62 = vpop.f32.mrb[112].mxu1 }
0x13ae   :  { %v13511_v37 = vpop.eup %13510  ;;  %v6864_v25 = vmul.f32 1.442695, %v6841_v60  ;;  %v17181_v4 = vadd.f32 %v11923_v62, %v17146_v44  ;;  %v6795_v24 = vpop.f32.mrb[113].mxu1 }
0x13af   :  { %v13513_v30 = vpop.eup %13512  ;;  %v6883_v27 = vadd.f32 1.0, %v13511_v37  ;;  %v6862_v55 = vmul.f32 1.442695, %v6840_v47  ;;  %v17184_v45 = vadd.f32 %v17146_v44, %v6795_v24 }
0x13b0   :  { %v6882_v9 = vadd.f32 1.0, %v13513_v30  ;;  %13522 = vpow2.f32 %v6864_v25  ;;  %v6843_v59 = vsub.f32 0.0, %v17181_v4 }
0x13b1   :  { %13524 = vrcp.f32 %v6883_v27  ;;  %v6842_v6 = vsub.f32 0.0, %v17184_v45  ;;  %v11926_v32 = vpop.f32.mrb[114].mxu1 }
0x13b2   :  { %v13515_v61 = vpop.eup %13514  ;;  %13526 = vrcp.f32 %v6882_v9  ;;  %v6868_v42 = vmul.f32 1.442695, %v6843_v59  ;;  %v17189_v40 = vadd.f32 %v11926_v32, %v17146_v44  ;;  %v6805_v36 = vpop.f32.mrb[115].mxu1 }
0x13b3   :  { %v13517_v34 = vpop.eup %13516  ;;  %v6885_v28 = vadd.f32 1.0, %v13515_v61  ;;  %13528 = vpow2.f32 %v6862_v55  ;;  %v6866_v5 = vmul.f32 1.442695, %v6842_v6  ;;  %v17192_v23 = vadd.f32 %v17146_v44, %v6805_v36 }
0x13b4   :  { %v6884_v54 = vadd.f32 1.0, %v13517_v34  ;;  %13530 = vpow2.f32 %v6868_v42  ;;  %v6845_v21 = vsub.f32 0.0, %v17189_v40 }
0x13b5   :  { %13532 = vrcp.f32 %v6885_v28  ;;  %v6844_v46 = vsub.f32 0.0, %v17192_v23  ;;  %v11929_v26 = vpop.f32.mrb[116].mxu1 }
0x13b6   :  { %v13519_v52 = vpop.eup %13518  ;;  %13534 = vrcp.f32 %v6884_v54  ;;  %v6872_v12 = vmul.f32 1.442695, %v6845_v21  ;;  %v17197_v2 = vadd.f32 %v11929_v26, %v17146_v44  ;;  %v6815_v17 = vpop.f32.mrb[117].mxu1 }
0x13b7   :  { %v13521_v51 = vpop.eup %13520  ;;  %v6887_v14 = vadd.f32 1.0, %v13519_v52  ;;  %13536 = vpow2.f32 %v6866_v5  ;;  %v6870_v60 = vmul.f32 1.442695, %v6844_v46  ;;  %v17200_v47 = vadd.f32 %v17146_v44, %v6815_v17 }
0x13b8   :  { %v6886_v62 = vadd.f32 1.0, %v13521_v51  ;;  %13538 = vpow2.f32 %v6872_v12  ;;  %v6847_v37 = vsub.f32 0.0, %v17197_v2 }
0x13b9   :  { %13540 = vrcp.f32 %v6887_v14  ;;  %v6846_v25 = vsub.f32 0.0, %v17200_v47  ;;  %v11932_v24 = vpop.f32.mrb[118].mxu1 }
0x13ba   :  { %v13523_v30 = vpop.eup %13522  ;;  %13542 = vrcp.f32 %v6886_v62  ;;  %v6876_v27 = vmul.f32 1.442695, %v6847_v37  ;;  %v17205_v55 = vadd.f32 %v11932_v24, %v17146_v44  ;;  %v6825_v9 = vpop.f32.mrb[119].mxu1 }
0x13bb   :  { %v13525_v59 = vpop.eup %13524  ;;  %v6889_v6 = vadd.f32 1.0, %v13523_v30  ;;  %13544 = vpow2.f32 %v6870_v60  ;;  %v6874_v32 = vmul.f32 1.442695, %v6846_v25  ;;  %v17208_v61 = vadd.f32 %v17146_v44, %v6825_v9 }
0x13bc   :  { %v13527_v42 = vpop.eup %13526  ;;  %13546 = vpow2.f32 %v6876_v27  ;;  %v6849_v36 = vsub.f32 0.0, %v17205_v55  ;;  %v6931_v21 = vmul.f32 %v13525_v59, %v17149_v63 }
0x13bd   :  { %v13529_v34 = vpop.eup %13528  ;;  %v6930_v28 = vmul.f32 %v13527_v42, %v17152_v20  ;;  %v6848_v5 = vsub.f32 0.0, %v17208_v61  ;;  %13548 = vpow2.f32 %v6874_v32 }
0x13be   :  { %v13531_v54 = vpop.eup %13530  ;;  %v6888_v46 = vadd.f32 1.0, %v13529_v34  ;;  %v6880_v26 = vmul.f32 1.442695, %v6849_v36  ;;  %13550 = vrcp.f32 %v6889_v6 }
0x13bf   :  { %v13533_v52 = vpop.eup %13532  ;;  %v6891_v12 = vadd.f32 1.0, %v13531_v54  ;;  %v6878_v44 = vmul.f32 1.442695, %v6848_v5  ;;  %11965 = vmatprep.mubr.f32.mxu1 %v6930_v28 }
0x13c0   :  { %v13535_v17 = vpop.eup %13534  ;;  %13552 = vrcp.f32 %v6888_v46  ;;  %11966 = vmatmul.mubr.f32.vlgmr.msra.gmra.mrb[120].mxu1 %v6931_v21  ;;  %v6933_v60 = vmul.f32 %v13533_v52, %v17157_v49 }
0x13c1   :  { %v13537_v51 = vpop.eup %13536  ;;  %v6932_v14 = vmul.f32 %v13535_v17, %v17160_v41  ;;  %13554 = vrcp.f32 %v6891_v12 }
0x13c2   :  { %v13539_v20 = vpop.eup %13538  ;;  %v6890_v62 = vadd.f32 1.0, %v13537_v51  ;;  %13556 = vpow2.f32 %v6880_v26 }
0x13c3   :  { %v13541_v63 = vpop.eup %13540  ;;  %v6893_v37 = vadd.f32 1.0, %v13539_v20  ;;  %13558 = vpow2.f32 %v6878_v44  ;;  %11968 = vmatprep.mubr.f32.mxu1 %v6932_v14 }
0x13c4   :  { %v13543_v25 = vpop.eup %13542  ;;  %13560 = vrcp.f32 %v6890_v62  ;;  %11969 = vmatmul.mubr.f32.gmra.mrb[122].mxu1 %v6933_v60  ;;  %v6935_v9 = vmul.f32 %v13541_v63, %v17165_v13  ;;  %v400_v60 = vld [vmem:[%s18813_s15 + $0x8] sm:$0xff]  ;;  %v402_v63 = vld [vmem:[%s18813_s15 + $0x18] sm:$0xff] }
0x13c5   :  { %v13545_v24 = vpop.eup %13544  ;;  %v6934_v30 = vmul.f32 %v13543_v25, %v17168_v38  ;;  %13562 = vrcp.f32 %v6893_v37  ;;  %v18815_v25 = vld [vmem:[#allocation83_spill] sm:$0xff] }
0x13c6   :  { %v13547_v27 = vpop.eup %13546  ;;  %v6892_v41 = vadd.f32 1.0, %v13545_v24  ;;  %v7116_v24 = vld [vmem:[%s18814_s4 + $0x18] sm:$0xff] }
0x13c7   :  { %v6895_v59 = vadd.f32 1.0, %v13547_v27  ;;  %11971 = vmatprep.mubr.f32.mxu1 %v6934_v30  ;;  %v13549_v49 = vpop.eup %13548  ;;  %v7117_v30 = vld [vmem:[%s18814_s4 + $0x20] sm:$0xff]  ;;  %v7118_v27 = vld [vmem:[%s18814_s4 + $0x28] sm:$0xff] }
0x13c8   :  { %13564 = vrcp.f32 %v6892_v41  ;;  %11972 = vmatmul.mubr.f32.gmra.mrb[124].mxu1 %v6935_v9  ;;  %v13551_v6 = vpop.eup %13550  ;;  %v6894_v32 = vadd.f32 1.0, %v13549_v49  ;;  %v7119_v9 = vld [vmem:[%s18814_s4 + $0x30] sm:$0xff]  ;;  %v7120_v41 = vld [vmem:[%s18814_s4 + $0x38] sm:$0xff]  ;;  %v7122_v49 = vld [vmem:[%s18814_s4 + $0x48] sm:$0xff] }
0x13c9   :  { %13566 = vrcp.f32 %v6895_v59  ;;  %v6937_v38 = vmul.f32 %v13551_v6, %v17173_v48  ;;  %v7121_v59 = vld [vmem:[%s18814_s4 + $0x40] sm:$0xff]  ;;  %v7123_v6 = vld [vmem:[%s18814_s4 + $0x50] sm:$0xff] }
0x13ca   :  { %v13553_v42 = vpop.eup %13552  ;;  %13568 = vrcp.f32 %v6894_v32  ;;  %v7124_v32 = vld [vmem:[%s18814_s4 + $0x58] sm:$0xff] }
0x13cb   :  { %v13555_v36 = vpop.eup %13554  ;;  %v6936_v34 = vmul.f32 %v13553_v42, %v17176_v39  ;;  %v7125_v42 = vld [vmem:[%s18814_s4 + $0x60] sm:$0xff] }
0x13cc   :  { %v13557_v28 = vpop.eup %13556  ;;  %v6939_v26 = vmul.f32 %v13555_v36, %v17181_v4  ;;  %v7126_v36 = vld [vmem:[%s18814_s4 + $0x68] sm:$0xff] }
0x13cd   :  { %v13559_v5 = vpop.eup %13558  ;;  %v6897_v13 = vadd.f32 1.0, %v13557_v28  ;;  %11974 = vmatprep.mubr.f32.mxu1 %v6936_v34  ;;  %v7127_v34 = vld [vmem:[%s18814_s4 + $0x70] sm:$0xff]  ;;  %v7128_v28 = vld [vmem:[%s18814_s4 + $0x78] sm:$0xff] }
0x13ce   :  { %v13561_v54 = vpop.eup %13560  ;;  %v6896_v21 = vadd.f32 1.0, %v13559_v5  ;;  %11975 = vmatmul.mubr.f32.gmra.mrb[126].mxu1 %v6937_v38  ;;  %v17267_v38 = vld [vmem:[%s18816_s27] ss:$0 sm:$0xff] }
0x13cf   :  { %v6938_v46 = vmul.f32 %v13561_v54, %v17184_v45  ;;  %13570 = vrcp.f32 %v6897_v13  ;;  %v13563_v52 = vpop.eup %13562 }
0x13d0   :  { %13572 = vrcp.f32 %v6896_v21  ;;  %v6941_v44 = vmul.f32 %v13563_v52, %v17189_v40  ;;  %v399_v40 = vld [vmem:[%s18813_s15] sm:$0xff] }
0x13d1   :  { %11977 = vmatprep.mubr.f32.mxu1 %v6938_v46  ;;  %v12614_v62 = vpack.c.bf16 %v400_v60, %v399_v40 }
0x13d2   :  { %v13565_v12 = vpop.eup %13564  ;;  %11978 = vmatmul.mubr.f32.gmra.mrb[128].mxu1 %v6939_v26 }
0x13d3   :  { %v6940_v39 = vmul.f32 %v13565_v12, %v17192_v23  ;;  %v13567_v48 = vpop.eup %13566  ;;  %12615 = vmatprep.subr.bf16.mxu1 %v12614_v62 }
0x13d4   :  { %v13569_v17 = vpop.eup %13568  ;;  %v6943_v4 = vmul.f32 %v13567_v48, %v17197_v2  ;;  %v7113_v2 = vld [vmem:[%s18814_s4] sm:$0xff]  ;;  %12617 = vmatpush3.bf16.msra.mxu1 %v12614_v62 }
0x13d5   :  { %11980 = vmatprep.mubr.f32.mxu1 %v6940_v39  ;;  %v6942_v45 = vmul.f32 %v13569_v17, %v17200_v47  ;;  %v401_v47 = vld [vmem:[%s18813_s15 + $0x10] sm:$0xff] }
0x13d6   :  { %11981 = vmatmul.mubr.f32.gmra.mrb[130].mxu1 %v6941_v44  ;;  %v12618_v37 = vpack.c.bf16 %v402_v63, %v401_v47 }
0x13d7   :  { %11983 = vmatprep.mubr.f32.mxu1 %v6942_v45 }
0x13d8   :  { %12619 = vmatprep.subr.bf16.mxu1 %v12618_v37 }
0x13d9   :  { %v13571_v51 = vpop.eup %13570  ;;  %12621 = vmatpush3.bf16.msra.mxu1 %v12618_v37 }
0x13da   :  { %v13573_v14 = vpop.eup %13572  ;;  %11984 = vmatmul.mubr.f32.gmra.mrb[132].mxu1 %v6943_v4  ;;  %v6945_v20 = vmul.f32 %v13571_v51, %v17205_v55  ;;  %v7114_v55 = vld [vmem:[%s18814_s4 + $0x8] sm:$0xff]  ;;  %12639 = vmatprep.subr.bf16.mxu1 %v18815_v25 }
0x13db   :  { %v6944_v23 = vmul.f32 %v13573_v14, %v17208_v61  ;;  %v7115_v61 = vld [vmem:[%s18814_s4 + $0x10] sm:$0xff] }
0x13dd   :  { %11986 = vmatprep.mubr.f32.mxu1 %v6944_v23 }
0x13de   :  { %11987 = vmatmul.mubr.f32.gmra.mrb[134].mxu1 %v6945_v20 }
0x13df   :  { %12051 = vmatprep.mubr.msk.f32.mxu1 %vm455_vm2, %v7113_v2 }
0x13e2   :  { %12052 = vmatmul.mubr.msk.f32.vlgmr.msra.gmra.mrb[136].mxu1 %vm455_vm2, %v7114_v55 }
0x13e3   :  { %12054 = vmatprep.mubr.msk.f32.mxu1 %vm455_vm2, %v7115_v61  ;;  %12641 = vmatpush3.bf16.msra.mxu1 %v18815_v25 }
0x13e6   :  { %12055 = vmatmul.mubr.msk.f32.gmra.mrb[138].mxu1 %vm455_vm2, %v7116_v24 }
0x13e7   :  { %12057 = vmatprep.mubr.msk.f32.mxu1 %vm455_vm2, %v7117_v30 }
0x13ea   :  { %12058 = vmatmul.mubr.msk.f32.gmra.mrb[140].mxu1 %vm455_vm2, %v7118_v27 }
0x13eb   :  { %12060 = vmatprep.mubr.msk.f32.mxu1 %vm455_vm2, %v7119_v9 }
0x13ee   :  { %12061 = vmatmul.mubr.msk.f32.gmra.mrb[142].mxu1 %vm455_vm2, %v7120_v41 }
0x13ef   :  { %12063 = vmatprep.mubr.msk.f32.mxu1 %vm455_vm2, %v7121_v59 }
0x13f2   :  { %12064 = vmatmul.mubr.msk.f32.gmra.mrb[144].mxu1 %vm455_vm2, %v7122_v49 }
0x13f3   :  { %12066 = vmatprep.mubr.msk.f32.mxu1 %vm455_vm2, %v7123_v6 }
0x13f6   :  { %12067 = vmatmul.mubr.msk.f32.gmra.mrb[146].mxu1 %vm455_vm2, %v7124_v32 }
0x13f7   :  { %12069 = vmatprep.mubr.msk.f32.mxu1 %vm455_vm2, %v7125_v42 }
0x13fa   :  { %12070 = vmatmul.mubr.msk.f32.gmra.mrb[148].mxu1 %vm455_vm2, %v7126_v36 }
0x13fb   :  { %12072 = vmatprep.mubr.msk.f32.mxu1 %vm455_vm2, %v7127_v34 }
0x13fe   :  { %12073 = vmatmul.mubr.msk.f32.gmra.mrb[150].mxu1 %vm455_vm2, %v7128_v28 }
0x1493   :  { %v11967_v5 = vpop.f32.mrb[120].mxu1 }
0x1494   :  { %v7024_v13 = vadd.f32 %v11967_v5, %v17267_v38  ;;  %v7018_v54 = vpop.f32.mrb[121].mxu1 }
0x1495   :  { %v7019_v21 = vadd.f32 %v17267_v38, %v7018_v54 }
0x1496   :  { %v17272_v46 = vadd.f32 %v7024_v13, %v17036_v10 }
0x1497   :  { %v17275_v26 = vadd.f32 %v7019_v21, %v17033_v29  ;;  %v11970_v52 = vpop.f32.mrb[122].mxu1 }
0x1498   :  { %v7172_v12 = vmul.f32 %v17272_v46, %v17272_v46  ;;  %v7034_v39 = vadd.f32 %v11970_v52, %v17267_v38  ;;  %v7028_v48 = vpop.f32.mrb[123].mxu1  ;;  %v7130_v44 = vsel %vm455_vm2, %v17272_v46, 0.0 }
0x1499   :  { %v7129_v17 = vsel %vm455_vm2, %v17275_v26, 0.0  ;;  %v7171_v10 = vmul.f32 %v17275_v26, %v17275_v26  ;;  %v7029_v45 = vadd.f32 %v17267_v38, %v7028_v48 }
0x149a   :  { %v7188_v29 = vsel %vm455_vm2, %v7172_v12, 0.0  ;;  %v17290_v51 = vadd.f32 %v7034_v39, %v17054_v50  ;;  %v7131_v20 = vadd.f32 %v7130_v44, %v7129_v17 }
0x149b   :  { %v7187_v4 = vsel %vm455_vm2, %v7171_v10, 0.0  ;;  %v17293_v14 = vadd.f32 %v7029_v45, %v17047_v1  ;;  %v11973_v23 = vpop.f32.mrb[124].mxu1 }
0x149c   :  { %v7038_v40 = vpop.f32.mrb[125].mxu1  ;;  %v7189_v63 = vadd.f32 %v7188_v29, %v7187_v4  ;;  %v7134_v50 = vsel %vm455_vm2, %v17290_v51, 0.0  ;;  %v7044_v1 = vadd.f32 %v11973_v23, %v17267_v38  ;;  %v7174_v61 = vmul.f32 %v17290_v51, %v17290_v51 }
0x149d   :  { %v7132_v60 = vsel %vm455_vm2, %v17293_v14, 0.0  ;;  %v7173_v47 = vmul.f32 %v17293_v14, %v17293_v14  ;;  %v7039_v62 = vadd.f32 %v17267_v38, %v7038_v40 }
0x149e   :  { %v7133_v2 = vadd.f32 %v7132_v60, %v7131_v20  ;;  %v17314_v59 = vadd.f32 %v7044_v1, %v17066_v0 }
0x149f   :  { %v7190_v37 = vsel %vm455_vm2, %v7173_v47, 0.0  ;;  %v17305_v55 = vadd.f32 %v7039_v62, %v17058_v33  ;;  %v7192_v33 = vsel %vm455_vm2, %v7174_v61, 0.0 }
0x14a0   :  { %v7135_v25 = vadd.f32 %v7134_v50, %v7133_v2  ;;  %v7191_v24 = vadd.f32 %v7190_v37, %v7189_v63  ;;  %v7138_v0 = vsel %vm455_vm2, %v17314_v59, 0.0  ;;  %v7176_v21 = vmul.f32 %v17314_v59, %v17314_v59 }
0x14a1   :  { %v7136_v30 = vsel %vm455_vm2, %v17305_v55, 0.0  ;;  %v11976_v27 = vpop.f32.mrb[126].mxu1  ;;  %v7175_v9 = vmul.f32 %v17305_v55, %v17305_v55 }
0x14a2   :  { %v7048_v41 = vpop.f32.mrb[127].mxu1  ;;  %v7137_v6 = vadd.f32 %v7136_v30, %v7135_v25  ;;  %v7193_v32 = vadd.f32 %v7192_v33, %v7191_v24  ;;  %v7054_v28 = vadd.f32 %v11976_v27, %v17267_v38  ;;  %v7196_v20 = vsel %vm455_vm2, %v7176_v21, 0.0 }
0x14a3   :  { %v7049_v49 = vadd.f32 %v17267_v38, %v7048_v41  ;;  %v7194_v34 = vsel %vm455_vm2, %v7175_v9, 0.0 }
0x14a4   :  { %v7139_v52 = vadd.f32 %v7138_v0, %v7137_v6  ;;  %v7195_v12 = vadd.f32 %v7194_v34, %v7193_v32  ;;  %v17338_v17 = vadd.f32 %v7054_v28, %v17078_v7 }
0x14a5   :  { %v17319_v42 = vadd.f32 %v7049_v49, %v17070_v57  ;;  %v11979_v36 = vpop.f32.mrb[128].mxu1 }
0x14a6   :  { %v7064_v5 = vadd.f32 %v11979_v36, %v17267_v38  ;;  %v7058_v13 = vpop.f32.mrb[129].mxu1  ;;  %v7142_v50 = vsel %vm455_vm2, %v17338_v17, 0.0  ;;  %v7197_v37 = vadd.f32 %v7196_v20, %v7195_v12  ;;  %v7178_v34 = vmul.f32 %v17338_v17, %v17338_v17 }
0x14a7   :  { %v7059_v54 = vadd.f32 %v17267_v38, %v7058_v13  ;;  %v7140_v39 = vsel %vm455_vm2, %v17319_v42, 0.0  ;;  %v7177_v10 = vmul.f32 %v17319_v42, %v17319_v42 }
0x14a8   :  { %v17330_v57 = vadd.f32 %v7064_v5, %v17090_v43  ;;  %v7141_v40 = vadd.f32 %v7140_v39, %v7139_v52 }
0x14a9   :  { %v17335_v48 = vadd.f32 %v7059_v54, %v17082_v18  ;;  %v11982_v44 = vpop.f32.mrb[130].mxu1  ;;  %v7198_v24 = vsel %vm455_vm2, %v7177_v10, 0.0 }
0x14aa   :  { %v7151_v45 = vsel %vm455_vm2, %v17330_v57, 0.0  ;;  %v7180_v43 = vmul.f32 %v17330_v57, %v17330_v57  ;;  %v7068_v29 = vpop.f32.mrb[131].mxu1  ;;  %v7074_v23 = vadd.f32 %v11982_v44, %v17267_v38  ;;  %v7143_v27 = vadd.f32 %v7142_v50, %v7141_v40 }
0x14ab   :  { %v7150_v4 = vsel %vm455_vm2, %v17335_v48, 0.0  ;;  %v7179_v18 = vmul.f32 %v17335_v48, %v17335_v48  ;;  %v7069_v7 = vadd.f32 %v17267_v38, %v7068_v29  ;;  %v7199_v28 = vadd.f32 %v7198_v24, %v7197_v37 }
0x14ac   :  { %v7209_v60 = vsel %vm455_vm2, %v7180_v43, 0.0  ;;  %v17356_v62 = vadd.f32 %v7074_v23, %v17102_v15  ;;  %v7152_v1 = vadd.f32 %v7151_v45, %v7150_v4  ;;  %v7144_v12 = vrot.slane %v7143_v27, 4 }
0x14ad   :  { %v7208_v47 = vsel %vm455_vm2, %v7179_v18, 0.0  ;;  %v17359_v63 = vadd.f32 %v7069_v7, %v17094_v3  ;;  %v11985_v2 = vpop.f32.mrb[132].mxu1  ;;  %v7200_v29 = vsel %vm455_vm2, %v7178_v34, 0.0 }
0x14ae   :  { %v7084_v61 = vadd.f32 %v11985_v2, %v17267_v38  ;;  %v7078_v25 = vpop.f32.mrb[133].mxu1  ;;  %v7182_v30 = vmul.f32 %v17356_v62, %v17356_v62  ;;  %v7210_v9 = vadd.f32 %v7209_v60, %v7208_v47  ;;  %v7155_v33 = vsel %vm455_vm2, %v17356_v62, 0.0 }
0x14af   :  { %v7153_v15 = vsel %vm455_vm2, %v17359_v63, 0.0  ;;  %v7181_v3 = vmul.f32 %v17359_v63, %v17359_v63  ;;  %v7079_v32 = vadd.f32 %v17267_v38, %v7078_v25  ;;  %v7201_v4 = vadd.f32 %v7200_v29, %v7199_v28 }
0x14b0   :  { %v7154_v41 = vadd.f32 %v7153_v15, %v7152_v1  ;;  %v17372_v49 = vadd.f32 %v7084_v61, %v17114_v19  ;;  %v7213_v54 = vsel %vm455_vm2, %v7182_v30, 0.0  ;;  %v7145_v20 = vadd.f32 %v7144_v12, %v7143_v27 }
0x14b1   :  { %v7211_v6 = vsel %vm455_vm2, %v7181_v3, 0.0  ;;  %v11988_v36 = vpop.f32.mrb[134].mxu1  ;;  %v17382_v19 = vadd.f32 %v7079_v32, %v17106_v53  ;;  %v7202_v25 = vrot.slane %v7201_v4, 4 }
0x14b2   :  { %v7212_v5 = vadd.f32 %v7211_v6, %v7210_v9  ;;  %v7156_v13 = vadd.f32 %v7155_v33, %v7154_v41  ;;  %v7088_v0 = vpop.f32.mrb[135].mxu1  ;;  %v7094_v21 = vadd.f32 %v11988_v36, %v17267_v38  ;;  %v7184_v39 = vmul.f32 %v17372_v49, %v17372_v49 }
0x14b3   :  { %v7089_v52 = vadd.f32 %v17267_v38, %v7088_v0  ;;  %v7157_v10 = vsel %vm455_vm2, %v17382_v19, 0.0  ;;  %v7183_v45 = vmul.f32 %v17382_v19, %v17382_v19  ;;  %v7159_v18 = vsel %vm455_vm2, %v17372_v49, 0.0 }
0x14b4   :  { %v7214_v44 = vadd.f32 %v7213_v54, %v7212_v5  ;;  %v17393_v43 = vadd.f32 %v7094_v21, %v17125_v56  ;;  %v7158_v38 = vadd.f32 %v7157_v10, %v7156_v13  ;;  %v7146_v61 = vrot.slane %v7145_v20, 2 }
0x14b5   :  { %v17396_v53 = vadd.f32 %v7089_v52, %v17118_v22  ;;  %v7215_v23 = vsel %vm455_vm2, %v7183_v45, 0.0  ;;  %v7217_v22 = vsel %vm455_vm2, %v7184_v39, 0.0  ;;  %v7203_v9 = vadd.f32 %v7202_v25, %v7201_v4  ;;  %v394_v4 = vld [vmem:[%s18817_s16] sm:$0xff] }
0x14b6   :  { %v7216_v40 = vadd.f32 %v7215_v23, %v7214_v44  ;;  %v7160_v60 = vadd.f32 %v7159_v18, %v7158_v38  ;;  %v7186_v47 = vmul.f32 %v17393_v43, %v17393_v43  ;;  %v7163_v1 = vsel %vm455_vm2, %v17393_v43, 0.0  ;;  %v395_v18 = vld [vmem:[%s18817_s16 + $0x8] sm:$0xff]  ;;  %v396_v23 = vld [vmem:[%s18817_s16 + $0x10] sm:$0xff] }
0x14b7   :  { %v7161_v7 = vsel %vm455_vm2, %v17396_v53, 0.0  ;;  %v7185_v56 = vmul.f32 %v17396_v53, %v17396_v53  ;;  %v7147_v6 = vadd.f32 %v7146_v61, %v7145_v20  ;;  %v7204_v5 = vrot.slane %v7203_v9, 2  ;;  %v397_v20 = vld [vmem:[%s18817_s16 + $0x18] sm:$0xff] }
0x14b8   :  { %v7162_v2 = vadd.f32 %v7161_v7, %v7160_v60  ;;  %v7218_v50 = vadd.f32 %v7217_v22, %v7216_v40  ;;  %v7221_v15 = vsel %vm455_vm2, %v7186_v47, 0.0  ;;  %v12606_v7 = vpack.c.bf16 %v395_v18, %v394_v4  ;;  %v18818_v60 = vld [vmem:[#allocation70_spill] sm:$0xff]  ;;  %v10767_v22 = vld [vmem:[#allocation3] ss:$0 sm:$0xff] }
0x14b9   :  { %v7219_v37 = vsel %vm455_vm2, %v7185_v56, 0.0  ;;  %v7148_v34 = vrot.slane %v7147_v6, 1  ;;  %v7205_v12 = vadd.f32 %v7204_v5, %v7203_v9  ;;  %v12610_v40 = vpack.c.bf16 %v397_v20, %v396_v23  ;;  %v12053_v56 = vpop.f32.mrb[136].mxu1 }
0x14ba   :  { %v7164_v24 = vadd.f32 %v7163_v1, %v7162_v2  ;;  %v7220_v30 = vadd.f32 %v7219_v37, %v7218_v50  ;;  %v17427_v47 = vadd.f32 %v12053_v56, %v10767_v22  ;;  %v7846_v2 = vpop.f32.mrb[137].mxu1 }
0x14bb   :  { %v7149_v21 = vadd.f32 %v7148_v34, %v7147_v6  ;;  %v7206_v10 = vrot.slane %v7205_v12, 1  ;;  %v17429_v50 = vadd.f32 %v10767_v22, %v7846_v2  ;;  %v12056_v37 = vpop.f32.mrb[138].mxu1 }
0x14bc   :  { %v7165_v3 = vrot.slane %v7164_v24, 4  ;;  %v7222_v27 = vadd.f32 %v7221_v15, %v7220_v30  ;;  %v17431_v1 = vadd.f32 %v12056_v37, %v10767_v22  ;;  %v7856_v61 = vpop.f32.mrb[139].mxu1 }
0x14bd   :  { %v7207_v29 = vadd.f32 %v7206_v10, %v7205_v12  ;;  %v17433_v25 = vadd.f32 %v10767_v22, %v7856_v61 }
0x14be   :  { %v7166_v41 = vadd.f32 %v7165_v3, %v7164_v24  ;;  %v7223_v33 = vrot.slane %v7222_v27, 4  ;;  %v12059_v24 = vpop.f32.mrb[140].mxu1 }
0x14bf   :  { %v17435_v30 = vadd.f32 %v12059_v24, %v10767_v22  ;;  %v7866_v15 = vpop.f32.mrb[141].mxu1 }
0x14c0   :  { %v7167_v32 = vrot.slane %v7166_v41, 2  ;;  %v7224_v36 = vadd.f32 %v7223_v33, %v7222_v27  ;;  %v17437_v3 = vadd.f32 %v10767_v22, %v7866_v15 }
0x14c1   :  { %v12062_v27 = vpop.f32.mrb[142].mxu1 }
0x14c2   :  { %v7168_v28 = vadd.f32 %v7167_v32, %v7166_v41  ;;  %v7225_v13 = vrot.slane %v7224_v36, 2  ;;  %v17439_v9 = vadd.f32 %v12062_v27, %v10767_v22  ;;  %v7876_v41 = vpop.f32.mrb[143].mxu1 }
0x14c3   :  { %v17441_v33 = vadd.f32 %v10767_v22, %v7876_v41 }
0x14c4   :  { %v7169_v0 = vrot.slane %v7168_v28, 1  ;;  %v7226_v54 = vadd.f32 %v7225_v13, %v7224_v36 }
0x14c5   :  { %v12065_v6 = vpop.f32.mrb[144].mxu1 }
0x14c6   :  { %v7170_v52 = vadd.f32 %v7169_v0, %v7168_v28  ;;  %v7227_v44 = vrot.slane %v7226_v54, 1  ;;  %v17443_v32 = vadd.f32 %v12065_v6, %v10767_v22  ;;  %v7886_v36 = vpop.f32.mrb[145].mxu1 }
0x14c7   :  { %v17447_v28 = vadd.f32 %v10767_v22, %v7886_v36 }
0x14c8   :  { %v7231_v39 = vsel %vm865_vm3, %v7170_v52, %v7149_v21  ;;  %v7228_v45 = vadd.f32 %v7227_v44, %v7226_v54  ;;  %18819 = vst [vmem:[#allocation82_spill] sm:$0xff] %v17443_v32  ;;  %7935 = vrot.lane.b32.xlu0 %v17443_v32, %s13968_s21 }
0x14c9   :  { %11998 = vmatmul.mubr.msk.f32.vlgmr.msra.gmra.mrb[108].mxu0 %vm455_vm2, %v7231_v39  ;;  %v12068_v34 = vpop.f32.mrb[146].mxu1  ;;  %18820 = vst [vmem:[#allocation74_spill] sm:$0xff] %v17447_v28 }
0x14ca   :  { %12602 = vmatpush3.bf16.msra.mxu0 %v18786_v31  ;;  %12008 = vmatprep.mubr.msk.f32.mxu0 %vm13964_vm0, %v18789_v35  ;;  %v7306_v38 = vsel %vm865_vm3, %v7228_v45, %v7207_v29  ;;  %v7896_v5 = vpop.f32.mrb[147].mxu1  ;;  %v17451_v21 = vadd.f32 %v12068_v34, %v10767_v22 }
0x14cb   :  { %12603 = vmatprep.subr.bf16.mxu0 %v18777_v11  ;;  %v17455_v12 = vadd.f32 %v10767_v22, %v7896_v5 }
0x14cc   :  { %7933 = vrot.lane.b32.xlu0 %v17447_v28, %s13968_s21  ;;  %18821 = vst [vmem:[#allocation75_spill] sm:$0xff] %v17451_v21 }
0x14cd   :  { %v12071_v13 = vpop.f32.mrb[148].mxu1  ;;  %18822 = vst [vmem:[#allocation76_spill] sm:$0xff] %v17455_v12 }
0x14ce   :  { %12605 = vmatpush3.bf16.msra.mxu0 %v18787_v8  ;;  %v7906_v0 = vpop.f32.mrb[149].mxu1  ;;  %v17459_v39 = vadd.f32 %v12071_v13, %v10767_v22 }
0x14cf   :  { %12607 = vmatprep.subr.bf16.mxu0 %v12606_v7  ;;  %v17463_v44 = vadd.f32 %v10767_v22, %v7906_v0 }
0x14d0   :  { %7939 = vrot.lane.b32.xlu0 %v17451_v21, %s13968_s21  ;;  %18823 = vst [vmem:[#allocation77_spill] sm:$0xff] %v17459_v39 }
0x14d1   :  { %12009 = vmatmul.mubr.msk.f32.vlgmr.msra.gmra.mrb[110].mxu0 %vm455_vm2, %v7306_v38  ;;  %v12074_v54 = vpop.f32.mrb[150].mxu1  ;;  %18824 = vst [vmem:[#allocation78_spill] sm:$0xff] %v17463_v44 }
0x14d2   :  { %12609 = vmatpush3.bf16.msra.mxu0 %v12606_v7  ;;  %v7916_v52 = vpop.f32.mrb[151].mxu1  ;;  %v17467_v10 = vadd.f32 %v12074_v54, %v10767_v22 }
0x14d3   :  { %12611 = vmatprep.subr.bf16.mxu0 %v12610_v40  ;;  %v17471_v45 = vadd.f32 %v10767_v22, %v7916_v52 }
0x14d4   :  { %7937 = vrot.lane.b32.xlu0 %v17455_v12, %s13968_s21  ;;  %18825 = vst [vmem:[#allocation79_spill] sm:$0xff] %v17467_v10 }
0x14d5   :  { %18826 = vst [vmem:[#allocation80_spill] sm:$0xff] %v17471_v45 }
0x14d6   :  { %12613 = vmatpush3.bf16.msra.mxu0 %v12610_v40 }
0x14d7   :  { %12623 = vmatprep.subr.bf16.mxu0 %v18818_v60 }
0x14d8   :  { %7943 = vrot.lane.b32.xlu0 %v17459_v39, %s13968_s21 }
0x14dc   :  { %7941 = vrot.lane.b32.xlu0 %v17463_v44, %s13968_s21 }
0x14e0   :  { %7947 = vrot.lane.b32.xlu0 %v17467_v10, %s13968_s21 }
0x14e4   :  { %7945 = vrot.lane.b32.xlu0 %v17471_v45, %s13968_s21 }
0x159c   :  { %v7300_v29 = vpop.f32.mrb[108].mxu0 }
0x159d   :  { %v11999_v38 = vpop.f32.mrb[109].mxu0  ;;  %v7379_v4 = vmul.f32 0.00390625, %v7300_v29  ;;  %v17489_v29 = vld [vmem:[%s18827_s5] ss:$0 sm:$0xff] }
0x159f   :  { %v7381_v23 = vmul.f32 %v7379_v4, %v7379_v4  ;;  %v7392_v2 = vrot.slane %v7379_v4, %v18807_v16 }
0x15a1   :  { %v7393_v37 = vcombine.high %v7392_v2, %v7392_v2  ;;  %v7400_v22 = vrot.slane %v7392_v2, %v18807_v16 }
0x15a3   :  { %v7407_v24 = vrot.slane %v7393_v37, %v18807_v16  ;;  %v7411_v15 = vrot.slane %v7400_v22, %v18809_v58 }
0x15a4   :  { %v7375_v18 = vpop.f32.mrb[110].mxu0 }
0x15a5   :  { %v7380_v7 = vmul.f32 0.00390625, %v7375_v18  ;;  %v12010_v20 = vpop.f32.mrb[111].mxu0  ;;  %v7415_v36 = vrot.slane %v7407_v24, %v18809_v58  ;;  %v7418_v34 = vsub.f32 %v17275_v26, %v7411_v15  ;;  %v7419_v5 = vsub.f32 %v17272_v46, %v7411_v15 }
0x15a6   :  { %v7420_v54 = vsub.f32 %v17293_v14, %v7411_v15  ;;  %v7421_v52 = vsub.f32 %v17290_v51, %v7411_v15  ;;  %v7422_v38 = vsub.f32 %v17305_v55, %v7411_v15  ;;  %v7423_v4 = vsub.f32 %v17314_v59, %v7411_v15 }
0x15a7   :  { %v7382_v40 = vsub.f32 %v7380_v7, %v7381_v23  ;;  %v7424_v18 = vsub.f32 %v17319_v42, %v7411_v15  ;;  %v7425_v26 = vsub.f32 %v17338_v17, %v7411_v15  ;;  %v7426_v17 = vsub.f32 %v17335_v48, %v7415_v36 }
0x15a8   :  { %v7427_v22 = vsub.f32 %v17330_v57, %v7415_v36  ;;  %v7429_v24 = vsub.f32 %v17356_v62, %v7415_v36  ;;  %v7432_v57 = vsub.f32 %v17396_v53, %v7415_v36 }
0x15a9   :  { %v7383_v56 = vadd.f32 1e-05, %v7382_v40  ;;  %v17497_v40 = vld [vmem:[%s18828_s17] ss:$0 sm:$0xff] }
0x15ab   :  { %13574 = vrsqrt.f32 %v7383_v56 }
0x15b5   :  { %v13575_v61 = vpop.eup %13574 }
0x15b6   :  { %v7441_v27 = vrot.slane %v13575_v61, %v18807_v16  ;;  %v7428_v61 = vsub.f32 %v17359_v63, %v7415_v36  ;;  %v7433_v63 = vsub.f32 %v17393_v43, %v7415_v36 }
0x15b8   :  { %v7442_v41 = vcombine.high %v7441_v27, %v7441_v27  ;;  %v7449_v6 = vrot.slane %v7441_v27, %v18807_v16 }
0x15ba   :  { %v7456_v13 = vrot.slane %v7442_v41, %v18807_v16  ;;  %v7460_v0 = vrot.slane %v7449_v6, %v18809_v58  ;;  %v7430_v41 = vsub.f32 %v17382_v19, %v7415_v36  ;;  %v7431_v6 = vsub.f32 %v17372_v49, %v7415_v36 }
0x15bc   :  { %v7464_v46 = vrot.slane %v7456_v13, %v18809_v58  ;;  %v7467_v23 = vmul.f32 %v7460_v0, %v7418_v34  ;;  %v7468_v7 = vmul.f32 %v7460_v0, %v7419_v5  ;;  %v7469_v20 = vmul.f32 %v7460_v0, %v7420_v54 }
0x15bd   :  { %v7470_v14 = vmul.f32 %v7460_v0, %v7421_v52  ;;  %v7471_v56 = vmul.f32 %v7460_v0, %v7422_v38  ;;  %v7472_v51 = vmul.f32 %v7460_v0, %v7423_v4  ;;  %v7473_v2 = vmul.f32 %v7460_v0, %v7424_v18  ;;  %v18834_v18 = vld [vmem:[#allocation71_spill] sm:$0xff] }
0x15be   :  { %v7489_v37 = vmul.f32 %v17489_v29, %v7467_v23  ;;  %v7490_v55 = vmul.f32 %v17489_v29, %v7468_v7  ;;  %v7491_v59 = vmul.f32 %v17489_v29, %v7469_v20  ;;  %v7474_v42 = vmul.f32 %v7460_v0, %v7425_v26  ;;  %v18837_v7 = vld [vmem:[#allocation72_spill] sm:$0xff] }
0x15bf   :  { %v7492_v34 = vmul.f32 %v17489_v29, %v7470_v14  ;;  %v7493_v48 = vmul.f32 %v17489_v29, %v7471_v56  ;;  %v7475_v5 = vmul.f32 %v7464_v46, %v7426_v17  ;;  %v7476_v13 = vmul.f32 %v7464_v46, %v7427_v22 }
0x15c0   :  { %v17507_v15 = vadd.f32 %v17497_v40, %v7489_v37  ;;  %v17510_v27 = vadd.f32 %v17497_v40, %v7490_v55  ;;  %v17521_v62 = vadd.f32 %v17497_v40, %v7491_v59  ;;  %v7477_v0 = vmul.f32 %v7464_v46, %v7428_v61 }
0x15c1   :  { %v7478_v49 = vmul.f32 %v7464_v46, %v7429_v24  ;;  %v7479_v19 = vmul.f32 %v7464_v46, %v7430_v41  ;;  %v7480_v54 = vmul.f32 %v7464_v46, %v7431_v6  ;;  %v7481_v52 = vmul.f32 %v7464_v46, %v7432_v57  ;;  %v10750_v57 = vld [vmem:[%s18843_s25] ss:$0 sm:$0xff] }
0x15c2   :  { %18829 = vst [vmem:[#allocation81_spill] sm:$0xff] %v17507_v15  ;;  %18830 = vst [vmem:[#allocation55_spill] sm:$0xff] %v17510_v27  ;;  %12019 = vmatprep.mubr.msk.f32.mxu0 %vm455_vm2, %v17507_v15  ;;  %v7482_v43 = vmul.f32 %v7464_v46, %v7433_v63  ;;  %v17528_v53 = vadd.f32 %v17497_v40, %v7492_v34  ;;  %v7494_v36 = vmul.f32 %v17489_v29, %v7472_v51 }
0x15c3   :  { %18831 = vst [vmem:[#allocation54_spill] sm:$0xff] %v17521_v62  ;;  %12020 = vmatmul.mubr.msk.f32.vlgmr.msra.gmra.mrb[112].mxu0 %vm455_vm2, %v17510_v27  ;;  %v17533_v38 = vadd.f32 %v17497_v40, %v7493_v48  ;;  %v7495_v4 = vmul.f32 %v17489_v29, %v7473_v2  ;;  %v7496_v46 = vmul.f32 %v17489_v29, %v7474_v42  ;;  %v18840_v2 = vld [vmem:[#allocation73_spill] sm:$0xff] }
0x15c4   :  { %12022 = vmatprep.mubr.msk.f32.mxu0 %vm455_vm2, %v17521_v62  ;;  %18832 = vst [vmem:[#allocation57_spill] sm:$0xff] %v17528_v53  ;;  %12625 = vmatpush3.bf16.msra.mxu0 %v18818_v60  ;;  %v17542_v26 = vadd.f32 %v17497_v40, %v7494_v36  ;;  %v7497_v23 = vmul.f32 %v17489_v29, %v7475_v5 }
0x15c5   :  { %18833 = vst [vmem:[#allocation56_spill] sm:$0xff] %v17533_v38  ;;  %12627 = vmatprep.subr.bf16.mxu0 %v18834_v18  ;;  %v17547_v60 = vadd.f32 %v17497_v40, %v7495_v4  ;;  %v17556_v20 = vadd.f32 %v17497_v40, %v7496_v46  ;;  %v7498_v14 = vmul.f32 %v17489_v29, %v7476_v13 }
0x15c6   :  { %18835 = vst [vmem:[#allocation59_spill] sm:$0xff] %v17542_v26  ;;  %v17561_v56 = vadd.f32 %v17497_v40, %v7497_v23  ;;  %v7499_v51 = vmul.f32 %v17489_v29, %v7477_v0  ;;  %v7500_v55 = vmul.f32 %v17489_v29, %v7478_v49  ;;  %v7501_v42 = vmul.f32 %v17489_v29, %v7479_v19 }
0x15c7   :  { %12023 = vmatmul.mubr.msk.f32.gmra.mrb[114].mxu0 %vm455_vm2, %v17528_v53  ;;  %18836 = vst [vmem:[#allocation58_spill] sm:$0xff] %v17547_v60  ;;  %18838 = vst [vmem:[#allocation60_spill] sm:$0xff] %v17556_v20  ;;  %v17570_v37 = vadd.f32 %v17497_v40, %v7498_v14  ;;  %v7502_v22 = vmul.f32 %v17489_v29, %v7480_v54  ;;  %v7503_v24 = vmul.f32 %v17489_v29, %v7481_v52 }
0x15c8   :  { %12025 = vmatprep.mubr.msk.f32.mxu0 %vm455_vm2, %v17533_v38  ;;  %12629 = vmatpush3.bf16.msra.mxu0 %v18834_v18  ;;  %18839 = vst [vmem:[#allocation61_spill] sm:$0xff] %v17561_v56  ;;  %v17575_v59 = vadd.f32 %v17497_v40, %v7499_v51  ;;  %v17583_v17 = vadd.f32 %v17497_v40, %v7500_v55 }
0x15c9   :  { %12631 = vmatprep.subr.bf16.mxu0 %v18837_v7  ;;  %18841 = vst [vmem:[#allocation63_spill] sm:$0xff] %v17570_v37  ;;  %v17587_v61 = vadd.f32 %v17497_v40, %v7501_v42  ;;  %v17595_v41 = vadd.f32 %v17497_v40, %v7502_v22  ;;  %v7504_v6 = vmul.f32 %v17489_v29, %v7482_v43 }
0x15ca   :  { %18842 = vst [vmem:[#allocation62_spill] sm:$0xff] %v17575_v59  ;;  %18844 = vst [vmem:[#allocation65_spill] sm:$0xff] %v17583_v17  ;;  %v17599_v34 = vadd.f32 %v17497_v40, %v7503_v24 }
0x15cb   :  { %12026 = vmatmul.mubr.msk.f32.gmra.mrb[116].mxu0 %vm455_vm2, %v17542_v26  ;;  %18845 = vst [vmem:[#allocation64_spill] sm:$0xff] %v17587_v61  ;;  %18846 = vst [vmem:[#allocation67_spill] sm:$0xff] %v17595_v41  ;;  %v17606_v48 = vadd.f32 %v17497_v40, %v7504_v6 }
0x15cc   :  { %12028 = vmatprep.mubr.msk.f32.mxu0 %vm455_vm2, %v17547_v60  ;;  %12633 = vmatpush3.bf16.msra.mxu0 %v18837_v7  ;;  %18847 = vst [vmem:[#allocation66_spill] sm:$0xff] %v17599_v34 }
0x15cd   :  { %12635 = vmatprep.subr.bf16.mxu0 %v18840_v2  ;;  %18848 = vst [vmem:[#allocation69_spill] sm:$0xff] %v17606_v48 }
0x15cf   :  { %12029 = vmatmul.mubr.msk.f32.gmra.mrb[118].mxu0 %vm455_vm2, %v17556_v20 }
0x15d0   :  { %12031 = vmatprep.mubr.msk.f32.mxu0 %vm455_vm2, %v17561_v56  ;;  %12637 = vmatpush3.bf16.msra.mxu0 %v18840_v2 }
0x15d3   :  { %12032 = vmatmul.mubr.msk.f32.gmra.mrb[120].mxu0 %vm455_vm2, %v17570_v37 }
0x15d4   :  { %12034 = vmatprep.mubr.msk.f32.mxu0 %vm455_vm2, %v17575_v59 }
0x15d7   :  { %12035 = vmatmul.mubr.msk.f32.gmra.mrb[122].mxu0 %vm455_vm2, %v17583_v17 }
0x15d8   :  { %12037 = vmatprep.mubr.msk.f32.mxu0 %vm455_vm2, %v17587_v61 }
0x15db   :  { %12038 = vmatmul.mubr.msk.f32.gmra.mrb[124].mxu0 %vm455_vm2, %v17595_v41 }
0x15dc   :  { %12040 = vmatprep.mubr.msk.f32.mxu0 %vm455_vm2, %v17599_v34 }
0x15df   :  { %12041 = vmatmul.mubr.msk.f32.gmra.mrb[126].mxu0 %vm455_vm2, %v17606_v48 }
0x1696   :  { %v12021_v63 = vpop.f32.mrb[112].mxu0 }
0x1697   :  { %v7653_v5 = vadd.f32 %v12021_v63, %v10750_v57  ;;  %v7647_v13 = vpop.f32.mrb[113].mxu0 }
0x1698   :  { %v7648_v0 = vadd.f32 %v10750_v57, %v7647_v13 }
0x1699   :  { %8023 = vrot.lane.b32.xlu1 %v7653_v5, %s13968_s21 }
0x169a   :  { %v12024_v29 = vpop.f32.mrb[114].mxu0 }
0x169b   :  { %v7657_v49 = vpop.f32.mrb[115].mxu0  ;;  %v7663_v54 = vadd.f32 %v12024_v29, %v10750_v57 }
0x169c   :  { %v7658_v43 = vadd.f32 %v10750_v57, %v7657_v49 }
0x169d   :  { %8021 = vrot.lane.b32.xlu1 %v7648_v0, %s13968_s21 }
0x169e   :  { %v12027_v19 = vpop.f32.mrb[116].mxu0 }
0x169f   :  { %v7667_v52 = vpop.f32.mrb[117].mxu0  ;;  %v7673_v18 = vadd.f32 %v12027_v19, %v10750_v57 }
0x16a0   :  { %v7668_v14 = vadd.f32 %v10750_v57, %v7667_v52 }
0x16a1   :  { %8027 = vrot.lane.b32.xlu1 %v7663_v54, %s13968_s21 }
0x16a2   :  { %v12030_v40 = vpop.f32.mrb[118].mxu0 }
0x16a3   :  { %v7677_v36 = vpop.f32.mrb[119].mxu0  ;;  %v7683_v63 = vadd.f32 %v12030_v40, %v10750_v57 }
0x16a4   :  { %v7678_v42 = vadd.f32 %v10750_v57, %v7677_v36  ;;  %v7936_v36 = vpop.permute.xlu0 %7935 }
0x16a5   :  { %8025 = vrot.lane.b32.xlu1 %v7658_v43, %s13968_s21 }
0x16a6   :  { %v12033_v4 = vpop.f32.mrb[120].mxu0 }
0x16a7   :  { %v7687_v46 = vpop.f32.mrb[121].mxu0  ;;  %v17635_v49 = vadd.f32 %v12033_v4, %v10750_v57 }
0x16a8   :  { %v17615_v23 = vadd.f32 %v10750_v57, %v7687_v46  ;;  %v7934_v4 = vpop.permute.xlu0 %7933 }
0x16a9   :  { %8031 = vrot.lane.b32.xlu1 %v7673_v18, %s13968_s21 }
0x16aa   :  { %v12036_v7 = vpop.f32.mrb[122].mxu0  ;;  %8037 = vrot.lane.b32.xlu0 %v17615_v23, %s13968_s21 }
0x16ab   :  { %v7697_v51 = vpop.f32.mrb[123].mxu0  ;;  %v17639_v19 = vadd.f32 %v12036_v7, %v10750_v57 }
0x16ac   :  { %v17620_v2 = vadd.f32 %v10750_v57, %v7697_v51  ;;  %v7940_v46 = vpop.permute.xlu0 %7939 }
0x16ad   :  { %8029 = vrot.lane.b32.xlu1 %v7668_v14, %s13968_s21 }
0x16ae   :  { %v12039_v55 = vpop.f32.mrb[124].mxu0  ;;  %8041 = vrot.lane.b32.xlu0 %v17620_v2, %s13968_s21 }
0x16af   :  { %v7707_v22 = vpop.f32.mrb[125].mxu0  ;;  %v17643_v52 = vadd.f32 %v12039_v55, %v10750_v57  ;;  %v7957_v55 = vsel %vm455_vm2, %v17429_v50, %v7934_v4 }
0x16b0   :  { %v17625_v24 = vadd.f32 %v10750_v57, %v7707_v22  ;;  %v7938_v51 = vpop.permute.xlu0 %7937 }
0x16b1   :  { %8033 = vrot.lane.b32.xlu1 %v7678_v42, %s13968_s21 }
0x16b2   :  { %v12042_v6 = vpop.f32.mrb[126].mxu0  ;;  %8045 = vrot.lane.b32.xlu0 %v17625_v24, %s13968_s21 }
0x16b3   :  { %v7717_v13 = vpop.f32.mrb[127].mxu0  ;;  %v17647_v40 = vadd.f32 %v12042_v6, %v10750_v57 }
0x16b4   :  { %v17630_v29 = vadd.f32 %v10750_v57, %v7717_v13  ;;  %v7944_v22 = vpop.permute.xlu0 %7943  ;;  %v7958_v57 = vsel %vm455_vm2, %v17427_v47, %v7936_v36 }
0x16b5   :  { %8035 = vrot.lane.b32.xlu1 %v7683_v63, %s13968_s21 }
0x16b6   :  { %8049 = vrot.lane.b32.xlu0 %v17630_v29, %s13968_s21 }
0x16b8   :  { %v7942_v13 = vpop.permute.xlu0 %7941 }
0x16b9   :  { %8039 = vrot.lane.b32.xlu1 %v17635_v49, %s13968_s21 }
0x16bc   :  { %v7948_v41 = vpop.permute.xlu0 %7947 }
0x16bd   :  { %8043 = vrot.lane.b32.xlu1 %v17639_v19, %s13968_s21 }
0x16c1   :  { %8047 = vrot.lane.b32.xlu1 %v17643_v52, %s13968_s21 }
0x16c5   :  { %8051 = vrot.lane.b32.xlu1 %v17647_v40, %s13968_s21  ;;  %s18850_s21 = sld [smem:[#allocation47_spill]] }
0x170b   :  { %v8024_v7 = vpop.permute.xlu1 %8023 }
0x170c   :  { %v8070_v58 = vsel %vm455_vm2, %v7653_v5, %v8024_v7  ;;  %v7959_v7 = vsel %vm455_vm2, %v17433_v25, %v7938_v51  ;;  %v7961_v51 = vsel %vm455_vm2, %v17437_v3, %v7942_v13  ;;  %v7964_v13 = vsel %vm455_vm2, %v17439_v9, %v7948_v41 }
0x170d   :  { %v8086_v48 = vmul.f32 %v8070_v58, %v7958_v57 }
0x170f   :  { %v8022_v16 = vpop.permute.xlu1 %8021 }
0x1710   :  { %v8069_v34 = vsel %vm455_vm2, %v7648_v0, %v8022_v16  ;;  %v7960_v16 = vsel %vm455_vm2, %v17431_v1, %v7940_v46  ;;  %v7962_v46 = vsel %vm455_vm2, %v17435_v30, %v7944_v22 }
0x1711   :  { %v8085_v6 = vmul.f32 %v8069_v34, %v7957_v55  ;;  %v7946_v34 = vpop.permute.xlu0 %7945 }
0x1713   :  { %12091 = vmatprep.mubr.msk.f32.mxu0 %vm1837_vm4, %v8085_v6  ;;  %v8028_v61 = vpop.permute.xlu1 %8027 }
0x1714   :  { %12092 = vmatmul.mubr.msk.f32.vlgmr.msra.gmra.mrb[128].mxu0 %vm1837_vm4, %v8086_v48  ;;  %v8072_v59 = vsel %vm455_vm2, %v7663_v54, %v8028_v61 }
0x1715   :  { %v8088_v58 = vmul.f32 %v8072_v59, %v7960_v16 }
0x1717   :  { %v8026_v5 = vpop.permute.xlu1 %8025 }
0x1718   :  { %v8071_v4 = vsel %vm455_vm2, %v7658_v43, %v8026_v5 }
0x1719   :  { %v8087_v0 = vmul.f32 %v8071_v4, %v7959_v7  ;;  %v7963_v4 = vsel %vm455_vm2, %v17441_v33, %v7946_v34 }
0x171b   :  { %12094 = vmatprep.mubr.msk.f32.mxu0 %vm1837_vm4, %v8087_v0  ;;  %v8032_v36 = vpop.permute.xlu1 %8031 }
0x171c   :  { %12095 = vmatmul.mubr.msk.f32.gmra.mrb[130].mxu0 %vm1837_vm4, %v8088_v58  ;;  %v8038_v48 = vpop.permute.xlu0 %8037  ;;  %v8074_v61 = vsel %vm455_vm2, %v7673_v18, %v8032_v36 }
0x171d   :  { %v8090_v5 = vmul.f32 %v8074_v61, %v7962_v46 }
0x171f   :  { %v8030_v54 = vpop.permute.xlu1 %8029 }
0x1720   :  { %v8073_v43 = vsel %vm455_vm2, %v7668_v14, %v8030_v54  ;;  %v8042_v0 = vpop.permute.xlu0 %8041  ;;  %v8077_v14 = vsel %vm455_vm2, %v17615_v23, %v8038_v48 }
0x1721   :  { %v8089_v6 = vmul.f32 %v8073_v43, %v7961_v51  ;;  %v8093_v54 = vmul.f32 %v8077_v14, %v7957_v55 }
0x1723   :  { %12097 = vmatprep.mubr.msk.f32.mxu0 %vm1837_vm4, %v8089_v6  ;;  %v8034_v59 = vpop.permute.xlu1 %8033 }
0x1724   :  { %v8075_v18 = vsel %vm455_vm2, %v7678_v42, %v8034_v59  ;;  %12098 = vmatmul.mubr.msk.f32.gmra.mrb[132].mxu0 %vm1837_vm4, %v8090_v5  ;;  %v8046_v34 = vpop.permute.xlu0 %8045  ;;  %v8079_v42 = vsel %vm455_vm2, %v17620_v2, %v8042_v0 }
0x1725   :  { %v8091_v58 = vmul.f32 %v8075_v18, %v7963_v4  ;;  %v8095_v6 = vmul.f32 %v8079_v42, %v7959_v7  ;;  %v8081_v41 = vsel %vm455_vm2, %v17625_v24, %v8046_v34 }
0x1726   :  { %v8097_v59 = vmul.f32 %v8081_v41, %v7961_v51 }
0x1727   :  { %12100 = vmatprep.mubr.msk.f32.mxu0 %vm1837_vm4, %v8091_v58  ;;  %v8036_v22 = vpop.permute.xlu1 %8035 }
0x1728   :  { %v8076_v36 = vsel %vm455_vm2, %v7683_v63, %v8036_v22  ;;  %v8050_v55 = vpop.permute.xlu0 %8049 }
0x1729   :  { %v8092_v61 = vmul.f32 %v8076_v36, %v7964_v13 }
0x172b   :  { %12101 = vmatmul.mubr.msk.f32.gmra.mrb[134].mxu0 %vm1837_vm4, %v8092_v61  ;;  %v8040_v43 = vpop.permute.xlu1 %8039 }
0x172c   :  { %v8078_v23 = vsel %vm455_vm2, %v17635_v49, %v8040_v43  ;;  %12103 = vmatprep.mubr.msk.f32.mxu0 %vm1837_vm4, %v8093_v54  ;;  %v8083_v49 = vsel %vm455_vm2, %v17630_v29, %v8050_v55 }
0x172d   :  { %v8094_v48 = vmul.f32 %v8078_v23, %v7958_v57  ;;  %v8099_v0 = vmul.f32 %v8083_v49, %v7963_v4 }
0x172f   :  { %12104 = vmatmul.mubr.msk.f32.gmra.mrb[136].mxu0 %vm1837_vm4, %v8094_v48  ;;  %v8044_v63 = vpop.permute.xlu1 %8043 }
0x1730   :  { %v8080_v2 = vsel %vm455_vm2, %v17639_v19, %v8044_v63  ;;  %12106 = vmatprep.mubr.msk.f32.mxu0 %vm1837_vm4, %v8095_v6 }
0x1731   :  { %v8096_v5 = vmul.f32 %v8080_v2, %v7960_v16 }
0x1733   :  { %12107 = vmatmul.mubr.msk.f32.gmra.mrb[138].mxu0 %vm1837_vm4, %v8096_v5  ;;  %v8048_v57 = vpop.permute.xlu1 %8047 }
0x1734   :  { %v8082_v24 = vsel %vm455_vm2, %v17643_v52, %v8048_v57  ;;  %12109 = vmatprep.mubr.msk.f32.mxu0 %vm1837_vm4, %v8097_v59 }
0x1735   :  { %v8098_v7 = vmul.f32 %v8082_v24, %v7962_v46 }
0x1737   :  { %12110 = vmatmul.mubr.msk.f32.gmra.mrb[140].mxu0 %vm1837_vm4, %v8098_v7  ;;  %v8052_v19 = vpop.permute.xlu1 %8051 }
0x1738   :  { %v8084_v16 = vsel %vm455_vm2, %v17647_v40, %v8052_v19  ;;  %12112 = vmatprep.mubr.msk.f32.mxu0 %vm1837_vm4, %v8099_v0 }
0x1739   :  { %v8100_v51 = vmul.f32 %v8084_v16, %v7964_v13 }
0x173b   :  { %12113 = vmatmul.mubr.msk.f32.gmra.mrb[142].mxu0 %vm1837_vm4, %v8100_v51 }
0x17e7   :  { %v12093_v29 = vpop.f32.mrb[128].mxu0 }
0x17e8   :  { %v17707_v18 = vmul.f32 0.5, %v12093_v29  ;;  %v8215_v58 = vpop.f32.mrb[129].mxu0 }
0x17e9   :  { %v17709_v52 = vmul.f32 0.5, %v8215_v58 }
0x17ea   :  { %8328 = vrot.lane.b32.xlu1 %v17707_v18, %s13970_s19 }
0x17eb   :  { %8326 = vrot.lane.b32.xlu0 %v17709_v52, %s13970_s19 }
0x17ef   :  { %v12096_v46 = vpop.f32.mrb[130].mxu0 }
0x17f0   :  { %v17715_v4 = vmul.f32 0.5, %v12096_v46  ;;  %v8225_v40 = vpop.f32.mrb[131].mxu0 }
0x17f1   :  { %v17717_v14 = vmul.f32 0.5, %v8225_v40 }
0x17f2   :  { %8332 = vrot.lane.b32.xlu1 %v17715_v4, %s13970_s19 }
0x17f3   :  { %8330 = vrot.lane.b32.xlu0 %v17717_v14, %s13970_s19 }
0x17f7   :  { %v12099_v22 = vpop.f32.mrb[132].mxu0 }
0x17f8   :  { %v17723_v13 = vmul.f32 0.5, %v12099_v22  ;;  %v8235_v36 = vpop.f32.mrb[133].mxu0 }
0x17f9   :  { %v17725_v61 = vmul.f32 0.5, %v8235_v36 }
0x17fa   :  { %8336 = vrot.lane.b32.xlu1 %v17723_v13, %s13970_s19 }
0x17fb   :  { %8334 = vrot.lane.b32.xlu0 %v17725_v61, %s13970_s19 }
0x17fe   :  { %v12102_v54 = vpop.f32.mrb[134].mxu0 }
0x17ff   :  { %v17731_v34 = vmul.f32 0.5, %v12102_v54  ;;  %v8245_v42 = vpop.f32.mrb[135].mxu0 }
0x1800   :  { %v17733_v43 = vmul.f32 0.5, %v8245_v42 }
0x1801   :  { %8340 = vrot.lane.b32.xlu1 %v17731_v34, %s13970_s19 }
0x1802   :  { %8338 = vrot.lane.b32.xlu0 %v17733_v43, %s13970_s19  ;;  %v12105_v23 = vpop.f32.mrb[136].mxu0 }
0x1803   :  { %v17739_v48 = vmul.f32 0.5, %v12105_v23  ;;  %v8255_v6 = vpop.f32.mrb[137].mxu0 }
0x1804   :  { %v17741_v41 = vmul.f32 0.5, %v8255_v6 }
0x1805   :  { %8344 = vrot.lane.b32.xlu1 %v17739_v48, %s13970_s19 }
0x1806   :  { %8342 = vrot.lane.b32.xlu0 %v17741_v41, %s13970_s19  ;;  %v12108_v63 = vpop.f32.mrb[138].mxu0 }
0x1807   :  { %v17747_v55 = vmul.f32 0.5, %v12108_v63  ;;  %v8265_v2 = vpop.f32.mrb[139].mxu0 }
0x1808   :  { %v17749_v5 = vmul.f32 0.5, %v8265_v2 }
0x1809   :  { %8348 = vrot.lane.b32.xlu1 %v17747_v55, %s13970_s19 }
0x180a   :  { %8346 = vrot.lane.b32.xlu0 %v17749_v5, %s13970_s19  ;;  %v12111_v59 = vpop.f32.mrb[140].mxu0 }
0x180b   :  { %v17755_v49 = vmul.f32 0.5, %v12111_v59  ;;  %v8275_v57 = vpop.f32.mrb[141].mxu0 }
0x180c   :  { %v17757_v24 = vmul.f32 0.5, %v8275_v57 }
0x180d   :  { %8352 = vrot.lane.b32.xlu1 %v17755_v49, %s13970_s19 }
0x180e   :  { %8350 = vrot.lane.b32.xlu0 %v17757_v24, %s13970_s19  ;;  %v12114_v7 = vpop.f32.mrb[142].mxu0 }
0x180f   :  { %v17763_v0 = vmul.f32 0.5, %v12114_v7  ;;  %v8285_v19 = vpop.f32.mrb[143].mxu0 }
0x1810   :  { %v17765_v16 = vmul.f32 0.5, %v8285_v19 }
0x1811   :  { %8356 = vrot.lane.b32.xlu1 %v17763_v0, %s13970_s19 }
0x1812   :  { %8354 = vrot.lane.b32.xlu0 %v17765_v16, %s13970_s19 }
0x185c   :  { %v8329_v51 = vpop.permute.xlu1 %8328 }
0x185d   :  { %v17772_v29 = vmax.f32 %v17707_v18, %v8329_v51  ;;  %v8327_v58 = vpop.permute.xlu0 %8326 }
0x185e   :  { %v17775_v46 = vmax.f32 %v17709_v52, %v8327_v58 }
0x185f   :  { %8456 = vrot.lane.b32.xlu1 %v17772_v29, %s13971_s1 }
0x1860   :  { %8454 = vrot.lane.b32.xlu0 %v17775_v46, %s13971_s1 }
0x1864   :  { %v8333_v40 = vpop.permute.xlu1 %8332 }
0x1865   :  { %v17782_v22 = vmax.f32 %v17715_v4, %v8333_v40  ;;  %v8331_v36 = vpop.permute.xlu0 %8330 }
0x1866   :  { %v17785_v54 = vmax.f32 %v17717_v14, %v8331_v36 }
0x1867   :  { %8460 = vrot.lane.b32.xlu1 %v17782_v22, %s13971_s1  ;;  %v8393_v21 = vsub.f32 %v17715_v4, %v17782_v22 }
0x1868   :  { %8458 = vrot.lane.b32.xlu0 %v17785_v54, %s13971_s1  ;;  %v8392_v28 = vsub.f32 %v17717_v14, %v17785_v54 }
0x1869   :  { %v8412_v32 = vmul.f32 1.442695, %v8393_v21 }
0x186a   :  { %v8410_v11 = vmul.f32 1.442695, %v8392_v28 }
0x186c   :  { %v8337_v42 = vpop.permute.xlu1 %8336 }
0x186d   :  { %v17792_v23 = vmax.f32 %v17723_v13, %v8337_v42  ;;  %v8335_v6 = vpop.permute.xlu0 %8334 }
0x186e   :  { %v17795_v63 = vmax.f32 %v17725_v61, %v8335_v6 }
0x186f   :  { %8464 = vrot.lane.b32.xlu1 %v17792_v23, %s13971_s1 }
0x1870   :  { %8462 = vrot.lane.b32.xlu0 %v17795_v63, %s13971_s1 }
0x1873   :  { %v8341_v2 = vpop.permute.xlu1 %8340 }
0x1874   :  { %v17802_v59 = vmax.f32 %v17731_v34, %v8341_v2  ;;  %v8339_v57 = vpop.permute.xlu0 %8338 }
0x1875   :  { %v17805_v7 = vmax.f32 %v17733_v43, %v8339_v57 }
0x1876   :  { %8468 = vrot.lane.b32.xlu1 %v17802_v59, %s13971_s1 }
0x1877   :  { %8466 = vrot.lane.b32.xlu0 %v17805_v7, %s13971_s1  ;;  %v8345_v19 = vpop.permute.xlu1 %8344 }
0x1878   :  { %v17812_v51 = vmax.f32 %v17739_v48, %v8345_v19  ;;  %v8343_v58 = vpop.permute.xlu0 %8342 }
0x1879   :  { %v17815_v40 = vmax.f32 %v17741_v41, %v8343_v58 }
0x187a   :  { %8472 = vrot.lane.b32.xlu1 %v17812_v51, %s13971_s1 }
0x187b   :  { %8470 = vrot.lane.b32.xlu0 %v17815_v40, %s13971_s1  ;;  %v8349_v36 = vpop.permute.xlu1 %8348 }
0x187c   :  { %v17822_v42 = vmax.f32 %v17747_v55, %v8349_v36  ;;  %v8347_v6 = vpop.permute.xlu0 %8346 }
0x187d   :  { %v17825_v2 = vmax.f32 %v17749_v5, %v8347_v6 }
0x187e   :  { %8476 = vrot.lane.b32.xlu1 %v17822_v42, %s13971_s1 }
0x187f   :  { %8474 = vrot.lane.b32.xlu0 %v17825_v2, %s13971_s1  ;;  %v8353_v57 = vpop.permute.xlu1 %8352 }
0x1880   :  { %v17832_v19 = vmax.f32 %v17755_v49, %v8353_v57  ;;  %v8351_v58 = vpop.permute.xlu0 %8350 }
0x1881   :  { %v17835_v17 = vmax.f32 %v17757_v24, %v8351_v58 }
0x1882   :  { %8480 = vrot.lane.b32.xlu1 %v17832_v19, %s13971_s1 }
0x1883   :  { %8478 = vrot.lane.b32.xlu0 %v17835_v17, %s13971_s1  ;;  %v8357_v36 = vpop.permute.xlu1 %8356 }
0x1884   :  { %v17842_v6 = vmax.f32 %v17763_v0, %v8357_v36  ;;  %v8355_v56 = vpop.permute.xlu0 %8354 }
0x1885   :  { %v17845_v37 = vmax.f32 %v17765_v16, %v8355_v56 }
0x1886   :  { %8484 = vrot.lane.b32.xlu1 %v17842_v6, %s13971_s1 }
0x1887   :  { %8482 = vrot.lane.b32.xlu0 %v17845_v37, %s13971_s1 }
0x18d1   :  { %v8457_v57 = vpop.permute.xlu1 %8456 }
0x18d2   :  { %v8503_v58 = vsub.f32 %v17707_v18, %v8457_v57  ;;  %v8455_v20 = vpop.permute.xlu0 %8454 }
0x18d3   :  { %v8502_v60 = vsub.f32 %v17709_v52, %v8455_v20 }
0x18d4   :  { %v8520_v38 = vmul.f32 1.442695, %v8503_v58 }
0x18d5   :  { %v8518_v26 = vmul.f32 1.442695, %v8502_v60 }
0x18d6   :  { %13576 = vpow2.f32 %v8520_v38 }
0x18d7   :  { %13578 = vpow2.f32 %v8518_v26 }
0x18d9   :  { %v8461_v36 = vpop.permute.xlu1 %8460 }
0x18da   :  { %v8505_v56 = vsub.f32 %v17715_v4, %v8461_v36  ;;  %v8459_v62 = vpop.permute.xlu0 %8458 }
0x18db   :  { %v8504_v53 = vsub.f32 %v17717_v14, %v8459_v62 }
0x18dc   :  { %v8524_v15 = vmul.f32 1.442695, %v8505_v56 }
0x18dd   :  { %v8522_v27 = vmul.f32 1.442695, %v8504_v53 }
0x18de   :  { %13580 = vpow2.f32 %v8524_v15 }
0x18df   :  { %13582 = vpow2.f32 %v8522_v27 }
0x18e0   :  { %v17855_v35 = vpop.eup %13576 }
0x18e1   :  { %v17857_v57 = vpop.eup %13578  ;;  %8568 = vrot.lane.b32.xlu1 %v17855_v35, %s13970_s19  ;;  %v8465_v60 = vpop.permute.xlu1 %8464 }
0x18e2   :  { %v8507_v38 = vsub.f32 %v17723_v13, %v8465_v60  ;;  %8566 = vrot.lane.b32.xlu0 %v17857_v57, %s13970_s19  ;;  %v8463_v26 = vpop.permute.xlu0 %8462 }
0x18e3   :  { %v8506_v62 = vsub.f32 %v17725_v61, %v8463_v26 }
0x18e4   :  { %v8528_v20 = vmul.f32 1.442695, %v8507_v38 }
0x18e5   :  { %v8526_v53 = vmul.f32 1.442695, %v8506_v62 }
0x18e6   :  { %13584 = vpow2.f32 %v8528_v20 }
0x18e7   :  { %13586 = vpow2.f32 %v8526_v53 }
0x18e8   :  { %v17865_v15 = vpop.eup %13580  ;;  %v8469_v27 = vpop.permute.xlu1 %8468 }
0x18e9   :  { %v17867_v58 = vpop.eup %13582  ;;  %v8509_v36 = vsub.f32 %v17731_v34, %v8469_v27  ;;  %v8467_v56 = vpop.permute.xlu0 %8466  ;;  %8572 = vrot.lane.b32.xlu1 %v17865_v15, %s13970_s19 }
0x18ea   :  { %v8508_v60 = vsub.f32 %v17733_v43, %v8467_v56  ;;  %8570 = vrot.lane.b32.xlu0 %v17867_v58, %s13970_s19 }
0x18eb   :  { %v8532_v38 = vmul.f32 1.442695, %v8509_v36 }
0x18ec   :  { %v8530_v26 = vmul.f32 1.442695, %v8508_v60  ;;  %v8473_v62 = vpop.permute.xlu1 %8472 }
0x18ed   :  { %13588 = vpow2.f32 %v8532_v38  ;;  %v8511_v20 = vsub.f32 %v17739_v48, %v8473_v62  ;;  %v8471_v53 = vpop.permute.xlu0 %8470 }
0x18ee   :  { %13590 = vpow2.f32 %v8530_v26  ;;  %v8510_v8 = vsub.f32 %v17741_v41, %v8471_v53 }
0x18ef   :  { %v8536_v27 = vmul.f32 1.442695, %v8511_v20 }
0x18f0   :  { %v17877_v31 = vpop.eup %13584  ;;  %v8534_v45 = vmul.f32 1.442695, %v8510_v8  ;;  %v8477_v10 = vpop.permute.xlu1 %8476 }
0x18f1   :  { %v17879_v44 = vpop.eup %13586  ;;  %13592 = vpow2.f32 %v8536_v27  ;;  %v8513_v56 = vsub.f32 %v17747_v55, %v8477_v10  ;;  %v8475_v36 = vpop.permute.xlu0 %8474  ;;  %8576 = vrot.lane.b32.xlu1 %v17877_v31, %s13970_s19 }
0x18f2   :  { %13594 = vpow2.f32 %v8534_v45  ;;  %v8512_v60 = vsub.f32 %v17749_v5, %v8475_v36  ;;  %8574 = vrot.lane.b32.xlu0 %v17879_v44, %s13970_s19 }
0x18f3   :  { %v8540_v38 = vmul.f32 1.442695, %v8513_v56 }
0x18f4   :  { %v8538_v26 = vmul.f32 1.442695, %v8512_v60  ;;  %v8481_v62 = vpop.permute.xlu1 %8480 }
0x18f5   :  { %13596 = vpow2.f32 %v8540_v38  ;;  %v8515_v8 = vsub.f32 %v17755_v49, %v8481_v62  ;;  %v8479_v20 = vpop.permute.xlu0 %8478 }
0x18f6   :  { %13598 = vpow2.f32 %v8538_v26  ;;  %v8514_v10 = vsub.f32 %v17757_v24, %v8479_v20 }
0x18f7   :  { %v17889_v53 = vpop.eup %13588  ;;  %v8544_v27 = vmul.f32 1.442695, %v8515_v8 }
0x18f8   :  { %v17891_v39 = vpop.eup %13590  ;;  %v8542_v45 = vmul.f32 1.442695, %v8514_v10  ;;  %8580 = vrot.lane.b32.xlu1 %v17889_v53, %s13970_s19  ;;  %v8485_v36 = vpop.permute.xlu1 %8484 }
0x18f9   :  { %13600 = vpow2.f32 %v8544_v27  ;;  %v8517_v56 = vsub.f32 %v17763_v0, %v8485_v36  ;;  %8578 = vrot.lane.b32.xlu0 %v17891_v39, %s13970_s19  ;;  %v8483_v60 = vpop.permute.xlu0 %8482 }
0x18fa   :  { %13602 = vpow2.f32 %v8542_v45  ;;  %v8516_v38 = vsub.f32 %v17765_v16, %v8483_v60 }
0x18fb   :  { %v17899_v26 = vpop.eup %13592  ;;  %v8548_v62 = vmul.f32 1.442695, %v8517_v56 }
0x18fc   :  { %v17901_v8 = vpop.eup %13594  ;;  %v8546_v20 = vmul.f32 1.442695, %v8516_v38  ;;  %8584 = vrot.lane.b32.xlu1 %v17899_v26, %s13970_s19  ;;  %v8391_v38 = vsub.f32 %v17707_v18, %v17772_v29  ;;  %v8394_v18 = vsub.f32 %v17725_v61, %v17795_v63  ;;  %v8399_v61 = vsub.f32 %v17739_v48, %v17812_v51 }
0x18fd   :  { %13604 = vpow2.f32 %v8548_v62  ;;  %8582 = vrot.lane.b32.xlu0 %v17901_v8, %s13970_s19  ;;  %v8390_v62 = vsub.f32 %v17709_v52, %v17775_v46  ;;  %v8400_v48 = vsub.f32 %v17749_v5, %v17825_v2 }
0x18fe   :  { %13606 = vpow2.f32 %v8546_v20  ;;  %v8408_v20 = vmul.f32 1.442695, %v8391_v38  ;;  %v8414_v22 = vmul.f32 1.442695, %v8394_v18 }
0x18ff   :  { %v17907_v10 = vpop.eup %13596  ;;  %v8406_v12 = vmul.f32 1.442695, %v8390_v62 }
0x1900   :  { %v17909_v27 = vpop.eup %13598  ;;  %8588 = vrot.lane.b32.xlu1 %v17907_v10, %s13970_s19  ;;  %13608 = vpow2.f32 %v8408_v20 }
0x1901   :  { %8586 = vrot.lane.b32.xlu0 %v17909_v27, %s13970_s19  ;;  %13610 = vpow2.f32 %v8406_v12 }
0x1902   :  { %13612 = vpow2.f32 %v8412_v32  ;;  %v8397_v32 = vsub.f32 %v17731_v34, %v17802_v59  ;;  %v8401_v59 = vsub.f32 %v17747_v55, %v17822_v42 }
0x1903   :  { %v17915_v45 = vpop.eup %13600  ;;  %13614 = vpow2.f32 %v8410_v11  ;;  %v8396_v11 = vsub.f32 %v17733_v43, %v17805_v7  ;;  %v8424_v43 = vmul.f32 1.442695, %v8399_v61 }
0x1904   :  { %v17917_v36 = vpop.eup %13602  ;;  %8592 = vrot.lane.b32.xlu1 %v17915_v45, %s13970_s19  ;;  %v8428_v42 = vmul.f32 1.442695, %v8401_v59 }
0x1905   :  { %8590 = vrot.lane.b32.xlu0 %v17917_v36, %s13970_s19  ;;  %v8418_v63 = vmul.f32 1.442695, %v8396_v11 }
0x1907   :  { %v17923_v56 = vpop.eup %13604 }
0x1908   :  { %v17925_v60 = vpop.eup %13606  ;;  %8596 = vrot.lane.b32.xlu1 %v17923_v56, %s13970_s19 }
0x1909   :  { %18849 = vst [vmem:[#allocation68_spill] sm:$0xff] %v17925_v60  ;;  %8594 = vrot.lane.b32.xlu0 %v17925_v60, %s13970_s19  ;;  %v8395_v60 = vsub.f32 %v17723_v13, %v17792_v23  ;;  %v8420_v13 = vmul.f32 1.442695, %v8397_v32 }
0x190a   :  { %v13609_v52 = vpop.eup %13608 }
0x190b   :  { %v13611_v46 = vpop.eup %13610  ;;  %v8416_v4 = vmul.f32 1.442695, %v8395_v60  ;;  %v8398_v60 = vsub.f32 %v17741_v41, %v17815_v40 }
0x190c   :  { %v13613_v28 = vpop.eup %13612 }
0x190d   :  { %v13615_v14 = vpop.eup %13614  ;;  %v8422_v18 = vmul.f32 1.442695, %v8398_v60 }
0x1953   :  { %v8569_v29 = vpop.permute.xlu1 %8568 }
0x1954   :  { %v8615_v38 = vadd.f32 %v13609_v52, %v8569_v29  ;;  %v8567_v62 = vpop.permute.xlu0 %8566  ;;  %v8403_v29 = vsub.f32 %v17755_v49, %v17832_v19  ;;  %v8404_v19 = vsub.f32 %v17765_v16, %v17845_v37 }
0x1955   :  { %v8614_v12 = vadd.f32 %v13611_v46, %v8567_v62  ;;  %v8402_v62 = vsub.f32 %v17757_v24, %v17835_v17 }
0x1956   :  { %13616 = vrcp.f32 %v8615_v38 }
0x1957   :  { %13618 = vrcp.f32 %v8614_v12  ;;  %v8432_v12 = vmul.f32 1.442695, %v8403_v29  ;;  %v8430_v49 = vmul.f32 1.442695, %v8402_v62 }
0x1958   :  { %13620 = vpow2.f32 %v8416_v4 }
0x1959   :  { %13622 = vpow2.f32 %v8414_v22 }
0x195b   :  { %v8573_v21 = vpop.permute.xlu1 %8572 }
0x195c   :  { %v8617_v54 = vadd.f32 %v13613_v28, %v8573_v21  ;;  %v8571_v23 = vpop.permute.xlu0 %8570 }
0x195d   :  { %v8616_v20 = vadd.f32 %v13615_v14, %v8571_v23 }
0x195e   :  { %13624 = vrcp.f32 %v8617_v54  ;;  %v8434_v54 = vmul.f32 1.442695, %v8404_v19 }
0x195f   :  { %13626 = vrcp.f32 %v8616_v20 }
0x1960   :  { %v13617_v34 = vpop.eup %13616  ;;  %13628 = vpow2.f32 %v8420_v13 }
0x1961   :  { %v13619_v7 = vpop.eup %13618  ;;  %13630 = vpow2.f32 %v8418_v63  ;;  %8696 = vrot.lane.b32.xlu1 %v13617_v34, %s13971_s1  ;;  %v17956_v51 = vmul.f32 %v13617_v34, %v13609_v52  ;;  %v8426_v52 = vmul.f32 1.442695, %v8400_v48 }
0x1962   :  { %8694 = vrot.lane.b32.xlu0 %v13619_v7, %s13971_s1  ;;  %v17959_v41 = vmul.f32 %v13619_v7, %v13611_v46  ;;  %v13621_v40 = vpop.eup %13620  ;;  %13632 = vpow2.f32 %v8424_v43  ;;  %v8405_v46 = vsub.f32 %v17763_v0, %v17842_v6 }
0x1963   :  { %v8577_v38 = vpop.permute.xlu1 %8576  ;;  %v13623_v55 = vpop.eup %13622  ;;  %13634 = vpow2.f32 %v8422_v18 }
0x1964   :  { %v8619_v5 = vadd.f32 %v13621_v40, %v8577_v38  ;;  %v8575_v2 = vpop.permute.xlu0 %8574  ;;  %v8436_v6 = vmul.f32 1.442695, %v8405_v46 }
0x1965   :  { %v8618_v4 = vadd.f32 %v13623_v55, %v8575_v2 }
0x1966   :  { %13636 = vrcp.f32 %v8619_v5 }
0x1967   :  { %13638 = vrcp.f32 %v8618_v4 }
0x1968   :  { %v13625_v22 = vpop.eup %13624  ;;  %13640 = vpow2.f32 %v8428_v42 }
0x1969   :  { %v13627_v32 = vpop.eup %13626  ;;  %13642 = vpow2.f32 %v8426_v52  ;;  %8700 = vrot.lane.b32.xlu1 %v13625_v22, %s13971_s1  ;;  %v17970_v17 = vmul.f32 %v13625_v22, %v13613_v28 }
0x196a   :  { %v13629_v24 = vpop.eup %13628  ;;  %8698 = vrot.lane.b32.xlu0 %v13627_v32, %s13971_s1  ;;  %v8581_v11 = vpop.permute.xlu1 %8580  ;;  %v17973_v21 = vmul.f32 %v13627_v32, %v13615_v14  ;;  %13644 = vpow2.f32 %v8432_v12 }
0x196b   :  { %v13631_v0 = vpop.eup %13630  ;;  %v8621_v13 = vadd.f32 %v13629_v24, %v8581_v11  ;;  %v8579_v61 = vpop.permute.xlu0 %8578  ;;  %13646 = vpow2.f32 %v8430_v49 }
0x196c   :  { %v8620_v37 = vadd.f32 %v13631_v0, %v8579_v61  ;;  %v13633_v16 = vpop.eup %13632 }
0x196d   :  { %13648 = vrcp.f32 %v8621_v13  ;;  %v13635_v28 = vpop.eup %13634 }
0x196e   :  { %13650 = vrcp.f32 %v8620_v37  ;;  %v8585_v23 = vpop.permute.xlu1 %8584 }
0x196f   :  { %13652 = vpow2.f32 %v8436_v6  ;;  %v8623_v63 = vadd.f32 %v13633_v16, %v8585_v23  ;;  %v8583_v60 = vpop.permute.xlu0 %8582 }
0x1970   :  { %v13637_v20 = vpop.eup %13636  ;;  %13654 = vpow2.f32 %v8434_v54  ;;  %v8622_v14 = vadd.f32 %v13635_v28, %v8583_v60 }
0x1971   :  { %v13639_v34 = vpop.eup %13638  ;;  %13656 = vrcp.f32 %v8623_v63  ;;  %8704 = vrot.lane.b32.xlu1 %v13637_v20, %s13971_s1  ;;  %v17976_v43 = vmul.f32 %v13637_v20, %v13621_v40 }
0x1972   :  { %v13641_v59 = vpop.eup %13640  ;;  %13658 = vrcp.f32 %v8622_v14  ;;  %8702 = vrot.lane.b32.xlu0 %v13639_v34, %s13971_s1  ;;  %v8589_v7 = vpop.permute.xlu1 %8588  ;;  %v17979_v18 = vmul.f32 %v13639_v34, %v13623_v55 }
0x1973   :  { %v13643_v48 = vpop.eup %13642  ;;  %v8625_v29 = vadd.f32 %v13641_v59, %v8589_v7  ;;  %v8587_v38 = vpop.permute.xlu0 %8586 }
0x1974   :  { %v8624_v42 = vadd.f32 %v13643_v48, %v8587_v38  ;;  %v13645_v62 = vpop.eup %13644 }
0x1975   :  { %13660 = vrcp.f32 %v8625_v29  ;;  %v13647_v5 = vpop.eup %13646 }
0x1976   :  { %13662 = vrcp.f32 %v8624_v42  ;;  %v8593_v2 = vpop.permute.xlu1 %8592 }
0x1977   :  { %v13649_v52 = vpop.eup %13648  ;;  %v8627_v4 = vadd.f32 %v13645_v62, %v8593_v2  ;;  %v8591_v40 = vpop.permute.xlu0 %8590 }
0x1978   :  { %v13651_v12 = vpop.eup %13650  ;;  %v8626_v46 = vadd.f32 %v13647_v5, %v8591_v40  ;;  %8708 = vrot.lane.b32.xlu1 %v13649_v52, %s13971_s1  ;;  %v17982_v22 = vmul.f32 %v13649_v52, %v13629_v24 }
0x1979   :  { %v13653_v55 = vpop.eup %13652  ;;  %13664 = vrcp.f32 %v8627_v4  ;;  %8706 = vrot.lane.b32.xlu0 %v13651_v12, %s13971_s1  ;;  %v17985_v49 = vmul.f32 %v13651_v12, %v13631_v0 }
0x197a   :  { %v13655_v19 = vpop.eup %13654  ;;  %13666 = vrcp.f32 %v8626_v46  ;;  %v8597_v32 = vpop.permute.xlu1 %8596 }
0x197b   :  { %v13657_v11 = vpop.eup %13656  ;;  %v8629_v6 = vadd.f32 %v13653_v55, %v8597_v32  ;;  %v8595_v13 = vpop.permute.xlu0 %8594 }
0x197c   :  { %v13659_v61 = vpop.eup %13658  ;;  %v8628_v54 = vadd.f32 %v13655_v19, %v8595_v13  ;;  %8712 = vrot.lane.b32.xlu1 %v13657_v11, %s13971_s1  ;;  %v17988_v37 = vmul.f32 %v13657_v11, %v13633_v16  ;;  %v18851_v13 = vld [vmem:[#allocation68_spill] sm:$0xff] }
0x197d   :  { %13668 = vrcp.f32 %v8629_v6  ;;  %8710 = vrot.lane.b32.xlu0 %v13659_v61, %s13971_s1  ;;  %v17991_v24 = vmul.f32 %v13659_v61, %v13635_v28 }
0x197e   :  { %13670 = vrcp.f32 %v8628_v54  ;;  %v18092_v54 = vld [vmem:[%s14212_s8] sm:$0xff] }
0x197f   :  { %v13661_v0 = vpop.eup %13660 }
0x1980   :  { %v13663_v23 = vpop.eup %13662  ;;  %8716 = vrot.lane.b32.xlu1 %v13661_v0, %s13971_s1  ;;  %v17994_v63 = vmul.f32 %v13661_v0, %v13641_v59 }
0x1981   :  { %8714 = vrot.lane.b32.xlu0 %v13663_v23, %s13971_s1  ;;  %v17997_v60 = vmul.f32 %v13663_v23, %v13643_v48  ;;  %v406_v23 = vld [vmem:[%s18850_s21 + $0x10] sm:$0xff] }
0x1983   :  { %v13665_v20 = vpop.eup %13664 }
0x1984   :  { %v13667_v14 = vpop.eup %13666  ;;  %8720 = vrot.lane.b32.xlu1 %v13665_v20, %s13971_s1  ;;  %v18000_v16 = vmul.f32 %v13665_v20, %v13645_v62  ;;  %v18852_v20 = vmov 0.0|0.0  }
0x1985   :  { %8718 = vrot.lane.b32.xlu0 %v13667_v14, %s13971_s1  ;;  %v18003_v28 = vmul.f32 %v13667_v14, %v13647_v5 }
0x1987   :  { %v13669_v34 = vpop.eup %13668 }
0x1988   :  { %v13671_v7 = vpop.eup %13670  ;;  %8724 = vrot.lane.b32.xlu1 %v13669_v34, %s13971_s1  ;;  %v18006_v59 = vmul.f32 %v13669_v34, %v13653_v55 }
0x1989   :  { %8722 = vrot.lane.b32.xlu0 %v13671_v7, %s13971_s1  ;;  %v18009_v48 = vmul.f32 %v13671_v7, %v13655_v19 }
0x198c   :  { %7975 = vrot.lane.b32.xlu1 %v17427_v47, %s13967_s9 }
0x198d   :  { %7973 = vrot.lane.b32.xlu0 %v17429_v50, %s13967_s9 }
0x1990   :  { %7979 = vrot.lane.b32.xlu1 %v17431_v1, %s13967_s9 }
0x1991   :  { %7977 = vrot.lane.b32.xlu0 %v17433_v25, %s13967_s9 }
0x1994   :  { %7983 = vrot.lane.b32.xlu1 %v17435_v30, %s13967_s9 }
0x1995   :  { %7981 = vrot.lane.b32.xlu0 %v17437_v3, %s13967_s9 }
0x1998   :  { %7987 = vrot.lane.b32.xlu1 %v17439_v9, %s13967_s9 }
0x1999   :  { %7985 = vrot.lane.b32.xlu0 %v17441_v33, %s13967_s9 }
0x19d3   :  { %v8697_v47 = vpop.permute.xlu1 %8696 }
0x19d4   :  { %v8743_v50 = vmul.f32 %v17855_v35, %v8697_v47  ;;  %v8695_v29 = vpop.permute.xlu0 %8694 }
0x19d5   :  { %v8742_v1 = vmul.f32 %v17857_v57, %v8695_v29 }
0x19d6   :  { %v8759_v30 = vsel %vm5354_vm6, %v17956_v51, %v8743_v50 }
0x19d7   :  { %v8758_v25 = vsel %vm5354_vm6, %v17959_v41, %v8742_v1 }
0x19d8   :  { %12119 = vmatprep.mubr.msk.f32.mxu1 %vm539_vm1, %v8758_v25 }
0x19d9   :  { %12120 = vmatmul.mubr.msk.f32.vlgmr.msra.gmra.mrb[152].mxu1 %vm539_vm1, %v8759_v30  ;;  %v18855_v30 = vld [vmem:[#allocation75_spill] sm:$0xff] }
0x19db   :  { %v8701_v3 = vpop.permute.xlu1 %8700 }
0x19dc   :  { %v8745_v9 = vmul.f32 %v17865_v15, %v8701_v3  ;;  %v8699_v33 = vpop.permute.xlu0 %8698 }
0x19dd   :  { %v8744_v38 = vmul.f32 %v17867_v58, %v8699_v33 }
0x19de   :  { %v8761_v57 = vsel %vm5354_vm6, %v17970_v17, %v8745_v9 }
0x19df   :  { %v8760_v35 = vsel %vm5354_vm6, %v17973_v21, %v8744_v38  ;;  %v18856_v38 = vld [vmem:[#allocation76_spill] sm:$0xff] }
0x19e0   :  { %12122 = vmatprep.mubr.msk.f32.mxu1 %vm539_vm1, %v8760_v35 }
0x19e1   :  { %12123 = vmatmul.mubr.msk.f32.gmra.mrb[154].mxu1 %vm539_vm1, %v8761_v57 }
0x19e3   :  { %v8705_v51 = vpop.permute.xlu1 %8704 }
0x19e4   :  { %v8747_v41 = vmul.f32 %v17877_v31, %v8705_v51  ;;  %v8703_v42 = vpop.permute.xlu0 %8702 }
0x19e5   :  { %v8746_v62 = vmul.f32 %v17879_v44, %v8703_v42 }
0x19e6   :  { %v8763_v58 = vsel %vm5354_vm6, %v17976_v43, %v8747_v41 }
0x19e7   :  { %v8762_v15 = vsel %vm5354_vm6, %v17979_v18, %v8746_v62  ;;  %v18857_v62 = vld [vmem:[#allocation77_spill] sm:$0xff] }
0x19e8   :  { %12125 = vmatprep.mubr.msk.f32.mxu1 %vm539_vm1, %v8762_v15 }
0x19e9   :  { %12126 = vmatmul.mubr.msk.f32.gmra.mrb[156].mxu1 %vm539_vm1, %v8763_v58 }
0x19ea   :  { %v8709_v21 = vpop.permute.xlu1 %8708 }
0x19eb   :  { %v8749_v17 = vmul.f32 %v17889_v53, %v8709_v21  ;;  %v8707_v5 = vpop.permute.xlu0 %8706 }
0x19ec   :  { %v8748_v2 = vmul.f32 %v17891_v39, %v8707_v5 }
0x19ed   :  { %v8765_v43 = vsel %vm5354_vm6, %v17982_v22, %v8749_v17  ;;  %v18858_v17 = vld [vmem:[#allocation78_spill] sm:$0xff] }
0x19ee   :  { %v8713_v31 = vpop.permute.xlu1 %8712  ;;  %v8764_v44 = vsel %vm5354_vm6, %v17985_v49, %v8748_v2 }
0x19ef   :  { %v8751_v52 = vmul.f32 %v17899_v26, %v8713_v31  ;;  %v8711_v18 = vpop.permute.xlu0 %8710  ;;  %12128 = vmatprep.mubr.msk.f32.mxu1 %vm539_vm1, %v8764_v44 }
0x19f0   :  { %v8750_v4 = vmul.f32 %v17901_v8, %v8711_v18  ;;  %12129 = vmatmul.mubr.msk.f32.gmra.mrb[158].mxu1 %vm539_vm1, %v8765_v43  ;;  %v18859_v18 = vld [vmem:[#allocation79_spill] sm:$0xff] }
0x19f1   :  { %v8767_v26 = vsel %vm5354_vm6, %v17988_v37, %v8751_v52  ;;  %v404_v37 = vld [vmem:[%s18850_s21] sm:$0xff] }
0x19f2   :  { %v8717_v53 = vpop.permute.xlu1 %8716  ;;  %v8766_v39 = vsel %vm5354_vm6, %v17991_v24, %v8750_v4  ;;  %v405_v24 = vld [vmem:[%s18850_s21 + $0x8] sm:$0xff] }
0x19f3   :  { %v8753_v40 = vmul.f32 %v17907_v10, %v8717_v53  ;;  %v8715_v12 = vpop.permute.xlu0 %8714  ;;  %12131 = vmatprep.mubr.msk.f32.mxu1 %vm539_vm1, %v8766_v39  ;;  %v12642_v0 = vpack.c.bf16 %v405_v24, %v404_v37  ;;  %v18860_v39 = vld [vmem:[#allocation80_spill] sm:$0xff] }
0x19f4   :  { %v8752_v46 = vmul.f32 %v17909_v27, %v8715_v12  ;;  %12132 = vmatmul.mubr.msk.f32.gmra.mrb[160].mxu1 %vm539_vm1, %v8767_v26 }
0x19f5   :  { %v8769_v10 = vsel %vm5354_vm6, %v17994_v63, %v8753_v40  ;;  %12643 = vmatprep.subr.bf16.mxu0 %v12642_v0  ;;  %v407_v63 = vld [vmem:[%s18850_s21 + $0x18] sm:$0xff] }
0x19f6   :  { %v8721_v22 = vpop.permute.xlu1 %8720  ;;  %v8768_v8 = vsel %vm5354_vm6, %v17997_v60, %v8752_v46  ;;  %12645 = vmatpush3.bf16.msra.mxu0 %v12642_v0  ;;  %v12646_v60 = vpack.c.bf16 %v407_v63, %v406_v23  ;;  %v18861_v63 = vld [vmem:[#allocation51_spill] sm:$0xff] }
0x19f7   :  { %v8755_v55 = vmul.f32 %v17915_v45, %v8721_v22  ;;  %v8719_v49 = vpop.permute.xlu0 %8718  ;;  %12134 = vmatprep.mubr.msk.f32.mxu1 %vm539_vm1, %v8768_v8 }
0x19f8   :  { %v8754_v19 = vmul.f32 %v17917_v36, %v8719_v49  ;;  %12135 = vmatmul.mubr.msk.f32.gmra.mrb[162].mxu1 %vm539_vm1, %v8769_v10  ;;  %12647 = vmatprep.subr.bf16.mxu0 %v12646_v60 }
0x19f9   :  { %v8771_v6 = vsel %vm5354_vm6, %v18000_v16, %v8755_v55 }
0x19fa   :  { %v8725_v27 = vpop.permute.xlu1 %8724  ;;  %v8770_v32 = vsel %vm5354_vm6, %v18003_v28, %v8754_v19  ;;  %12649 = vmatpush3.bf16.msra.mxu0 %v12646_v60  ;;  %v18853_v28 = vld [vmem:[#allocation82_spill] sm:$0xff] }
0x19fb   :  { %v8757_v11 = vmul.f32 %v17923_v56, %v8725_v27  ;;  %v8723_v45 = vpop.permute.xlu0 %8722  ;;  %12137 = vmatprep.mubr.msk.f32.mxu1 %vm539_vm1, %v8770_v32  ;;  %12682 = vmatprep.subr.bf16.mxu0 %v18852_v20 }
0x19fc   :  { %v8756_v36 = vmul.f32 %v18851_v13, %v8723_v45  ;;  %12138 = vmatmul.mubr.msk.f32.gmra.mrb[164].mxu1 %vm539_vm1, %v8771_v6 }
0x19fd   :  { %v8773_v56 = vsel %vm5354_vm6, %v18006_v59, %v8757_v11 }
0x19fe   :  { %v8772_v61 = vsel %vm5354_vm6, %v18009_v48, %v8756_v36  ;;  %v7976_v14 = vpop.permute.xlu1 %7975  ;;  %v18854_v48 = vld [vmem:[#allocation74_spill] sm:$0xff] }
0x19ff   :  { %12140 = vmatprep.mubr.msk.f32.mxu1 %vm539_vm1, %v8772_v61  ;;  %v7974_v16 = vpop.permute.xlu0 %7973  ;;  %v7998_v34 = vsel %vm455_vm2, %v7976_v14, %v18853_v28  ;;  %v18862_v28 = vld [vmem:[#allocation53_spill] sm:$0xff] }
0x1a00   :  { %12141 = vmatmul.mubr.msk.f32.gmra.mrb[166].mxu1 %vm539_vm1, %v8773_v56  ;;  %v7997_v47 = vsel %vm455_vm2, %v7974_v16, %v18854_v48 }
0x1a01   :  { %12191 = vmatprep.mubr.msk.f32.mxu1 %vm1837_vm4, %v18092_v54 }
0x1a02   :  { %v7980_v1 = vpop.permute.xlu1 %7979 }
0x1a03   :  { %v7978_v25 = vpop.permute.xlu0 %7977  ;;  %v8000_v3 = vsel %vm455_vm2, %v7980_v1, %v18855_v30 }
0x1a04   :  { %v7999_v35 = vsel %vm455_vm2, %v7978_v25, %v18856_v38 }
0x1a06   :  { %v7984_v41 = vpop.permute.xlu1 %7983 }
0x1a07   :  { %v7982_v42 = vpop.permute.xlu0 %7981  ;;  %v8002_v15 = vsel %vm455_vm2, %v7984_v41, %v18857_v62 }
0x1a08   :  { %v8001_v5 = vsel %vm455_vm2, %v7982_v42, %v18858_v17 }
0x1a0a   :  { %v7988_v44 = vpop.permute.xlu1 %7987 }
0x1a0b   :  { %v7986_v52 = vpop.permute.xlu0 %7985  ;;  %v8004_v43 = vsel %vm455_vm2, %v7988_v44, %v18859_v18 }
0x1a0c   :  { %v8003_v40 = vsel %vm455_vm2, %v7986_v52, %v18860_v39 }
0x1aac   :  { %v12121_v7 = vpop.f32.mrb[152].mxu1 }
0x1aad   :  { %v18103_v59 = vmul.f32 %v12121_v7, %v7998_v34  ;;  %v8888_v50 = vpop.f32.mrb[153].mxu1 }
0x1aae   :  { %v8967_v29 = vmul.f32 %v8888_v50, %v7997_v47 }
0x1aaf   :  { %9001 = vrot.lane.b32.xlu1 %v18103_v59, %s13967_s9 }
0x1ab0   :  { %8999 = vrot.lane.b32.xlu0 %v8967_v29, %s13967_s9 }
0x1ab4   :  { %v12124_v9 = vpop.f32.mrb[154].mxu1 }
0x1ab5   :  { %v8970_v33 = vmul.f32 %v12124_v9, %v8000_v3  ;;  %v8898_v57 = vpop.f32.mrb[155].mxu1 }
0x1ab6   :  { %v8969_v51 = vmul.f32 %v8898_v57, %v7999_v35 }
0x1ab7   :  { %9005 = vrot.lane.b32.xlu1 %v8970_v33, %s13967_s9 }
0x1ab8   :  { %9003 = vrot.lane.b32.xlu0 %v8969_v51, %s13967_s9 }
0x1abc   :  { %v12127_v58 = vpop.f32.mrb[156].mxu1 }
0x1abd   :  { %v8972_v21 = vmul.f32 %v12127_v58, %v8002_v15  ;;  %v8908_v2 = vpop.f32.mrb[157].mxu1 }
0x1abe   :  { %v8971_v31 = vmul.f32 %v8908_v2, %v8001_v5  ;;  %v18863_v2 = vmov 0.0  }
0x1abf   :  { %9009 = vrot.lane.b32.xlu1 %v8972_v21, %s13967_s9 }
0x1ac0   :  { %9007 = vrot.lane.b32.xlu0 %v8971_v31, %s13967_s9 }
0x1ac3   :  { %v12130_v4 = vpop.f32.mrb[158].mxu1 }
0x1ac4   :  { %v8974_v53 = vmul.f32 %v12130_v4, %v8004_v43  ;;  %v8918_v12 = vpop.f32.mrb[159].mxu1 }
0x1ac5   :  { %v8973_v26 = vmul.f32 %v8918_v12, %v8003_v40 }
0x1ac6   :  { %9013 = vrot.lane.b32.xlu1 %v8974_v53, %s13967_s9 }
0x1ac7   :  { %9011 = vrot.lane.b32.xlu0 %v8973_v26, %s13967_s9  ;;  %v12133_v46 = vpop.f32.mrb[160].mxu1 }
0x1ac8   :  { %v8976_v22 = vmul.f32 %v12133_v46, %v7998_v34  ;;  %v8928_v8 = vpop.f32.mrb[161].mxu1 }
0x1ac9   :  { %v8975_v55 = vmul.f32 %v8928_v8, %v7997_v47 }
0x1aca   :  { %9017 = vrot.lane.b32.xlu1 %v8976_v22, %s13967_s9 }
0x1acb   :  { %9015 = vrot.lane.b32.xlu0 %v8975_v55, %s13967_s9  ;;  %v12136_v49 = vpop.f32.mrb[162].mxu1 }
0x1acc   :  { %v8978_v10 = vmul.f32 %v12136_v49, %v8000_v3  ;;  %v8938_v19 = vpop.f32.mrb[163].mxu1 }
0x1acd   :  { %v8977_v27 = vmul.f32 %v8938_v19, %v7999_v35 }
0x1ace   :  { %9021 = vrot.lane.b32.xlu1 %v8978_v10, %s13967_s9 }
0x1acf   :  { %9019 = vrot.lane.b32.xlu0 %v8977_v27, %s13967_s9  ;;  %v12139_v32 = vpop.f32.mrb[164].mxu1 }
0x1ad0   :  { %v8980_v11 = vmul.f32 %v12139_v32, %v8002_v15  ;;  %v8948_v45 = vpop.f32.mrb[165].mxu1 }
0x1ad1   :  { %v8979_v6 = vmul.f32 %v8948_v45, %v8001_v5 }
0x1ad2   :  { %9025 = vrot.lane.b32.xlu1 %v8980_v11, %s13967_s9 }
0x1ad3   :  { %9023 = vrot.lane.b32.xlu0 %v8979_v6, %s13967_s9  ;;  %v12142_v13 = vpop.f32.mrb[166].mxu1 }
0x1ad4   :  { %v8982_v36 = vmul.f32 %v12142_v13, %v8004_v43  ;;  %v8958_v61 = vpop.f32.mrb[167].mxu1 }
0x1ad5   :  { %v8981_v56 = vmul.f32 %v8958_v61, %v8003_v40 }
0x1ad6   :  { %9029 = vrot.lane.b32.xlu1 %v8982_v36, %s13967_s9 }
0x1ad7   :  { %9027 = vrot.lane.b32.xlu0 %v8981_v56, %s13967_s9  ;;  %s18883_s9 = sld [smem:[#allocation49_spill]] }
0x1b21   :  { %v9002_v37 = vpop.permute.xlu1 %9001 }
0x1b22   :  { %v9000_v24 = vpop.permute.xlu0 %8999  ;;  %v9048_v23 = vadd.f32 %v9002_v37, %v18103_v59 }
0x1b23   :  { %v9047_v0 = vadd.f32 %v9000_v24, %v8967_v29 }
0x1b25   :  { %12151 = vmatprep.mubr.msk.f32.mxu0 %vm455_vm2, %v9047_v0 }
0x1b26   :  { %12152 = vmatmul.mubr.msk.f32.vlgmr.msra.gmra.mrb[144].mxu0 %vm455_vm2, %v9048_v23 }
0x1b27   :  { %12684 = vmatpush3.bf16.msra.mxu0 %v18861_v63 }
0x1b28   :  { %12685 = vmatprep.subr.bf16.mxu0 %v18852_v20 }
0x1b29   :  { %v9006_v60 = vpop.permute.xlu1 %9005 }
0x1b2a   :  { %v9004_v14 = vpop.permute.xlu0 %9003  ;;  %v9050_v34 = vadd.f32 %v9006_v60, %v8970_v33 }
0x1b2b   :  { %v9049_v16 = vadd.f32 %v9004_v14, %v8969_v51  ;;  %12687 = vmatpush3.bf16.msra.mxu0 %v18862_v28 }
0x1b2c   :  { %12688 = vmatprep.subr.bf16.mxu0 %v18852_v20 }
0x1b2d   :  { %12154 = vmatprep.mubr.msk.f32.mxu0 %vm455_vm2, %v9049_v16 }
0x1b2e   :  { %12155 = vmatmul.mubr.msk.f32.gmra.mrb[146].mxu0 %vm455_vm2, %v9050_v34 }
0x1b31   :  { %v9010_v7 = vpop.permute.xlu1 %9009 }
0x1b32   :  { %v9008_v59 = vpop.permute.xlu0 %9007  ;;  %v9052_v47 = vadd.f32 %v9010_v7, %v8972_v21 }
0x1b33   :  { %v9051_v48 = vadd.f32 %v9008_v59, %v8971_v31  ;;  %v10816_v31 = vld [vmem:[#allocation6] ss:$0 sm:$0xff] }
0x1b35   :  { %12157 = vmatprep.mubr.msk.f32.mxu0 %vm455_vm2, %v9051_v48 }
0x1b36   :  { %12158 = vmatmul.mubr.msk.f32.gmra.mrb[148].mxu0 %vm455_vm2, %v9052_v47 }
0x1b38   :  { %v9014_v50 = vpop.permute.xlu1 %9013 }
0x1b39   :  { %v9012_v29 = vpop.permute.xlu0 %9011  ;;  %v9054_v25 = vadd.f32 %v9014_v50, %v8974_v53 }
0x1b3a   :  { %v9053_v1 = vadd.f32 %v9012_v29, %v8973_v26 }
0x1b3c   :  { %12160 = vmatprep.mubr.msk.f32.mxu0 %vm455_vm2, %v9053_v1  ;;  %v9018_v30 = vpop.permute.xlu1 %9017 }
0x1b3d   :  { %v9016_v3 = vpop.permute.xlu0 %9015  ;;  %12161 = vmatmul.mubr.msk.f32.gmra.mrb[150].mxu0 %vm455_vm2, %v9054_v25  ;;  %v9056_v33 = vadd.f32 %v9018_v30, %v8976_v22 }
0x1b3e   :  { %v9055_v9 = vadd.f32 %v9016_v3, %v8975_v55 }
0x1b40   :  { %12163 = vmatprep.mubr.msk.f32.mxu0 %vm455_vm2, %v9055_v9  ;;  %v9022_v38 = vpop.permute.xlu1 %9021 }
0x1b41   :  { %v9020_v35 = vpop.permute.xlu0 %9019  ;;  %12164 = vmatmul.mubr.msk.f32.gmra.mrb[152].mxu0 %vm455_vm2, %v9056_v33  ;;  %v9058_v51 = vadd.f32 %v9022_v38, %v8978_v10 }
0x1b42   :  { %v9057_v57 = vadd.f32 %v9020_v35, %v8977_v27 }
0x1b44   :  { %12166 = vmatprep.mubr.msk.f32.mxu0 %vm455_vm2, %v9057_v57  ;;  %v9026_v41 = vpop.permute.xlu1 %9025 }
0x1b45   :  { %v9024_v42 = vpop.permute.xlu0 %9023  ;;  %12167 = vmatmul.mubr.msk.f32.gmra.mrb[154].mxu0 %vm455_vm2, %v9058_v51  ;;  %v9060_v15 = vadd.f32 %v9026_v41, %v8980_v11  ;;  %v13739_v41 = vld [vmem:[%s14212_s8 + $0x8] sm:$0xff] }
0x1b46   :  { %v9059_v62 = vadd.f32 %v9024_v42, %v8979_v6 }
0x1b48   :  { %12169 = vmatprep.mubr.msk.f32.mxu0 %vm455_vm2, %v9059_v62  ;;  %v9030_v58 = vpop.permute.xlu1 %9029 }
0x1b49   :  { %v9028_v21 = vpop.permute.xlu0 %9027  ;;  %12170 = vmatmul.mubr.msk.f32.gmra.mrb[156].mxu0 %vm455_vm2, %v9060_v15  ;;  %v9062_v5 = vadd.f32 %v9030_v58, %v8982_v36  ;;  %v13740_v15 = vld [vmem:[%s14212_s8 + $0x10] sm:$0xff] }
0x1b4a   :  { %v9061_v17 = vadd.f32 %v9028_v21, %v8981_v56  ;;  %v13741_v21 = vld [vmem:[%s14212_s8 + $0x18] sm:$0xff] }
0x1b4c   :  { %12172 = vmatprep.mubr.msk.f32.mxu0 %vm455_vm2, %v9061_v17 }
0x1b4d   :  { %12173 = vmatmul.mubr.msk.f32.gmra.mrb[158].mxu0 %vm455_vm2, %v9062_v5  ;;  %v13742_v5 = vld [vmem:[%s14212_s8 + $0x20] sm:$0xff] }
0x1b4e   :  { %12239 = vmatprep.mubr.msk.f32.mxu0 %vm13964_vm0, %v18863_v2 }
0x1bf9   :  { %v12153_v44 = vpop.f32.mrb[144].mxu0 }
0x1bfa   :  { %v9183_v52 = vpop.f32.mrb[145].mxu0  ;;  %v9189_v43 = vadd.f32 %v12153_v44, %v10816_v31 }
0x1bfb   :  { %v9184_v18 = vadd.f32 %v10816_v31, %v9183_v52  ;;  %v13744_v52 = vld [vmem:[%s14212_s8 + $0x30] sm:$0xff] }
0x1bfd   :  { %9262 = vxpose.xlu0.b32.start [1/4] (short) (narrow) %v9184_v18, 32 }
0x1c01   :  { %9263 = vxpose.xlu0.b32.cont [2/4] (short) (narrow) %v9189_v43, 32  ;;  %v12156_v4 = vpop.f32.mrb[146].mxu0  ;;  %v13745_v43 = vld [vmem:[%s14212_s8 + $0x38] sm:$0xff] }
0x1c02   :  { %v9193_v53 = vpop.f32.mrb[147].mxu0  ;;  %v9199_v40 = vadd.f32 %v12156_v4, %v10816_v31 }
0x1c03   :  { %v9194_v39 = vadd.f32 %v10816_v31, %v9193_v53  ;;  %v18864_v53 = vld [vmem:[#allocation55_spill] sm:$0xff] }
0x1c05   :  { %9264 = vxpose.xlu0.b32.cont [3/4] (short) (narrow) %v9194_v39, 32 }
0x1c09   :  { %9265 = vxpose.xlu0.b32.end [4/4] (short) (narrow) %v9199_v40, 32  ;;  %v12159_v12 = vpop.f32.mrb[148].mxu0 }
0x1c0a   :  { %v9203_v26 = vpop.f32.mrb[149].mxu0  ;;  %v9209_v22 = vadd.f32 %v12159_v12, %v10816_v31 }
0x1c0b   :  { %v9204_v46 = vadd.f32 %v10816_v31, %v9203_v26 }
0x1c0d   :  { %9431 = vxpose.xlu0.b32.start [1/4] (short) (narrow) %v9204_v46, 32 }
0x1c10   :  { %v12162_v8 = vpop.f32.mrb[150].mxu0 }
0x1c11   :  { %9432 = vxpose.xlu0.b32.cont [2/4] (short) (narrow) %v9209_v22, 32  ;;  %v9213_v55 = vpop.f32.mrb[151].mxu0  ;;  %v9219_v32 = vadd.f32 %v12162_v8, %v10816_v31 }
0x1c12   :  { %v9214_v49 = vadd.f32 %v10816_v31, %v9213_v55 }
0x1c14   :  { %v12165_v10 = vpop.f32.mrb[152].mxu0 }
0x1c15   :  { %9433 = vxpose.xlu0.b32.cont [3/4] (short) (narrow) %v9214_v49, 32  ;;  %v9223_v19 = vpop.f32.mrb[153].mxu0  ;;  %v9229_v6 = vadd.f32 %v12165_v10, %v10816_v31  ;;  %v18866_v49 = vld [vmem:[#allocation57_spill] sm:$0xff] }
0x1c16   :  { %v9224_v27 = vadd.f32 %v10816_v31, %v9223_v19 }
0x1c18   :  { %9294 = vxpose.xlu1.b32.start [1/4] (short) (narrow) %v9224_v27, 32  ;;  %v12168_v11 = vpop.f32.mrb[154].mxu0 }
0x1c19   :  { %9434 = vxpose.xlu0.b32.end [4/4] (short) (narrow) %v9219_v32, 32  ;;  %v9233_v45 = vpop.f32.mrb[155].mxu0  ;;  %v9239_v24 = vadd.f32 %v12168_v11, %v10816_v31  ;;  %v18867_v11 = vld [vmem:[#allocation54_spill] sm:$0xff] }
0x1c1a   :  { %v9234_v61 = vadd.f32 %v10816_v31, %v9233_v45 }
0x1c1c   :  { %9295 = vxpose.xlu1.b32.cont [2/4] (short) (narrow) %v9229_v6, 32  ;;  %v12171_v13 = vpop.f32.mrb[156].mxu0 }
0x1c1d   :  { %v9243_v36 = vpop.f32.mrb[157].mxu0  ;;  %v9249_v23 = vadd.f32 %v12171_v13, %v10816_v31 }
0x1c1e   :  { %v9244_v0 = vadd.f32 %v10816_v31, %v9243_v36 }
0x1c20   :  { %9296 = vxpose.xlu1.b32.cont [3/4] (short) (narrow) %v9234_v61, 32  ;;  %v12174_v56 = vpop.f32.mrb[158].mxu0 }
0x1c21   :  { %v9253_v37 = vpop.f32.mrb[159].mxu0  ;;  %v9259_v14 = vadd.f32 %v12174_v56, %v10816_v31 }
0x1c22   :  { %v9254_v60 = vadd.f32 %v10816_v31, %v9253_v37  ;;  %v13743_v31 = vld [vmem:[%s14212_s8 + $0x28] sm:$0xff]  ;;  %s18880_s8 = sld [smem:[#allocation48_spill]] }
0x1c24   :  { %9297 = vxpose.xlu1.b32.end [4/4] (short) (narrow) %v9239_v24, 32 }
0x1c28   :  { %9463 = vxpose.xlu1.b32.start [1/4] (short) (narrow) %v9244_v0, 32 }
0x1c2c   :  { %9464 = vxpose.xlu1.b32.cont [2/4] (short) (narrow) %v9249_v23, 32 }
0x1c30   :  { %9465 = vxpose.xlu1.b32.cont [3/4] (short) (narrow) %v9254_v60, 32 }
0x1c34   :  { %9466 = vxpose.xlu1.b32.end [4/4] (short) (narrow) %v9259_v14, 32  ;;  %v18868_v14 = vld [vmem:[#allocation59_spill] sm:$0xff] }
0x1c7d   :  { %v9278_v16 = vpop.trf.xlu0 }
0x1c81   :  { %v9279_v34 = vpop.trf.xlu0 }
0x1c82   :  { %v12650_v7 = vpack.c.bf16 %v9279_v34, %v9278_v16  ;;  %v18869_v34 = vld [vmem:[#allocation56_spill] sm:$0xff] }
0x1c84   :  { %12651 = vmatprep.subr.bf16.mxu1 %v12650_v7 }
0x1c85   :  { %12653 = vmatpush3.bf16.msra.mxu1 %v12650_v7  ;;  %v9280_v59 = vpop.trf.xlu0 }
0x1c89   :  { %v9281_v48 = vpop.trf.xlu0 }
0x1c8a   :  { %v12654_v47 = vpack.c.bf16 %v9281_v48, %v9280_v59 }
0x1c8c   :  { %12655 = vmatprep.subr.bf16.mxu1 %v12654_v47 }
0x1c8d   :  { %12657 = vmatpush3.bf16.msra.mxu1 %v12654_v47  ;;  %v9447_v50 = vpop.trf.xlu0 }
0x1c91   :  { %v9448_v25 = vpop.trf.xlu0 }
0x1c92   :  { %v12666_v35 = vpack.c.bf16 %v9448_v25, %v9447_v50 }
0x1c95   :  { %v9449_v9 = vpop.trf.xlu0 }
0x1c98   :  { %v9310_v29 = vpop.trf.xlu1 }
0x1c99   :  { %v9450_v51 = vpop.trf.xlu0 }
0x1c9a   :  { %v12670_v42 = vpack.c.bf16 %v9450_v51, %v9449_v9 }
0x1c9c   :  { %v9311_v1 = vpop.trf.xlu1 }
0x1c9d   :  { %v12658_v30 = vpack.c.bf16 %v9311_v1, %v9310_v29 }
0x1c9f   :  { %12659 = vmatprep.subr.bf16.mxu1 %v12658_v30 }
0x1ca0   :  { %12661 = vmatpush3.bf16.msra.mxu1 %v12658_v30  ;;  %v9312_v3 = vpop.trf.xlu1 }
0x1ca4   :  { %v9313_v33 = vpop.trf.xlu1 }
0x1ca5   :  { %v12662_v38 = vpack.c.bf16 %v9313_v33, %v9312_v3 }
0x1ca7   :  { %12663 = vmatprep.subr.bf16.mxu1 %v12662_v38 }
0x1ca8   :  { %12665 = vmatpush3.bf16.msra.mxu1 %v12662_v38  ;;  %v9479_v57 = vpop.trf.xlu1  ;;  %v18870_v38 = vld [vmem:[#allocation58_spill] sm:$0xff] }
0x1ca9   :  { %12667 = vmatprep.subr.bf16.mxu1 %v12666_v35 }
0x1cab   :  { %12192 = vmatmul.mubr.msk.f32.vlgmr.msra.gmra.mrb[168].mxu1 %vm1837_vm4, %v13739_v41 }
0x1cac   :  { %12669 = vmatpush3.bf16.msra.mxu1 %v12666_v35  ;;  %v9480_v62 = vpop.trf.xlu1  ;;  %12194 = vmatprep.mubr.msk.f32.mxu1 %vm1837_vm4, %v13740_v15 }
0x1cad   :  { %12671 = vmatprep.subr.bf16.mxu1 %v12670_v42  ;;  %v12674_v58 = vpack.c.bf16 %v9480_v62, %v9479_v57 }
0x1caf   :  { %12195 = vmatmul.mubr.msk.f32.gmra.mrb[170].mxu1 %vm1837_vm4, %v13741_v21 }
0x1cb0   :  { %12673 = vmatpush3.bf16.msra.mxu1 %v12670_v42  ;;  %v9481_v17 = vpop.trf.xlu1  ;;  %12197 = vmatprep.mubr.msk.f32.mxu1 %vm1837_vm4, %v13742_v5 }
0x1cb1   :  { %12675 = vmatprep.subr.bf16.mxu1 %v12674_v58 }
0x1cb3   :  { %12198 = vmatmul.mubr.msk.f32.gmra.mrb[172].mxu1 %vm1837_vm4, %v13743_v31 }
0x1cb4   :  { %12677 = vmatpush3.bf16.msra.mxu1 %v12674_v58  ;;  %v9482_v44 = vpop.trf.xlu1  ;;  %12200 = vmatprep.mubr.msk.f32.mxu1 %vm1837_vm4, %v13744_v52 }
0x1cb5   :  { %v12678_v18 = vpack.c.bf16 %v9482_v44, %v9481_v17 }
0x1cb7   :  { %12201 = vmatmul.mubr.msk.f32.gmra.mrb[174].mxu1 %vm1837_vm4, %v13745_v43  ;;  %12679 = vmatprep.subr.bf16.mxu1 %v12678_v18 }
0x1cb8   :  { %12681 = vmatpush3.bf16.msra.mxu1 %v12678_v18  ;;  %12219 = vmatprep.mubr.msk.f32.mxu1 %vm1837_vm4, %v18092_v54  ;;  %v18865_v54 = vld [vmem:[#allocation81_spill] sm:$0xff] }
0x1cbb   :  { %12220 = vmatmul.mubr.msk.f32.vlgmr.msra.gmra.mrb[176].mxu1 %vm1837_vm4, %v13739_v41 }
0x1cbc   :  { %12222 = vmatprep.mubr.msk.f32.mxu1 %vm1837_vm4, %v13740_v15  ;;  %v18871_v15 = vld [vmem:[#allocation60_spill] sm:$0xff] }
0x1cbf   :  { %12223 = vmatmul.mubr.msk.f32.gmra.mrb[178].mxu1 %vm1837_vm4, %v13741_v21  ;;  %v18872_v21 = vld [vmem:[#allocation63_spill] sm:$0xff] }
0x1cc0   :  { %12225 = vmatprep.mubr.msk.f32.mxu1 %vm1837_vm4, %v13742_v5 }
0x1cc3   :  { %12226 = vmatmul.mubr.msk.f32.gmra.mrb[180].mxu1 %vm1837_vm4, %v13743_v31  ;;  %v18873_v31 = vld [vmem:[#allocation61_spill] sm:$0xff] }
0x1cc4   :  { %12228 = vmatprep.mubr.msk.f32.mxu1 %vm1837_vm4, %v13744_v52 }
0x1cc7   :  { %12229 = vmatmul.mubr.msk.f32.gmra.mrb[182].mxu1 %vm1837_vm4, %v13745_v43 }
0x1d7e   :  { %v12193_v4 = vpop.f32.mrb[168].mxu1 }
0x1d7f   :  { %v18183_v39 = vadd.f32 %v12193_v4, %v18864_v53  ;;  %v9392_v40 = vpop.f32.mrb[169].mxu1 }
0x1d80   :  { %v18186_v12 = vadd.f32 %v9392_v40, %v18865_v54 }
0x1d81   :  { %v9659_v26 = vmul.f32 %v18183_v39, %v18183_v39  ;;  %v9617_v46 = vsel %vm455_vm2, %v18183_v39, 0.0 }
0x1d82   :  { %v9616_v22 = vsel %vm455_vm2, %v18186_v12, 0.0  ;;  %v9658_v8 = vmul.f32 %v18186_v12, %v18186_v12  ;;  %v12196_v55 = vpop.f32.mrb[170].mxu1 }
0x1d83   :  { %v18197_v10 = vadd.f32 %v12196_v55, %v18866_v49  ;;  %v9402_v19 = vpop.f32.mrb[171].mxu1  ;;  %v9675_v27 = vsel %vm455_vm2, %v9659_v26, 0.0  ;;  %v9618_v6 = vadd.f32 %v9617_v46, %v9616_v22 }
0x1d84   :  { %v9674_v32 = vsel %vm455_vm2, %v9658_v8, 0.0  ;;  %v18202_v45 = vadd.f32 %v9402_v19, %v18867_v11  ;;  %v18874_v19 = vld [vmem:[#allocation65_spill] sm:$0xff] }
0x1d85   :  { %v9661_v13 = vmul.f32 %v18197_v10, %v18197_v10  ;;  %v9676_v37 = vadd.f32 %v9675_v27, %v9674_v32  ;;  %v9621_v23 = vsel %vm455_vm2, %v18197_v10, 0.0  ;;  %v18875_v32 = vld [vmem:[#allocation62_spill] sm:$0xff] }
0x1d86   :  { %v9619_v36 = vsel %vm455_vm2, %v18202_v45, 0.0  ;;  %v9660_v61 = vmul.f32 %v18202_v45, %v18202_v45  ;;  %v12199_v56 = vpop.f32.mrb[172].mxu1 }
0x1d87   :  { %v9620_v24 = vadd.f32 %v9619_v36, %v9618_v6  ;;  %v9412_v0 = vpop.f32.mrb[173].mxu1  ;;  %v18214_v16 = vadd.f32 %v12199_v56, %v18868_v14  ;;  %v9679_v47 = vsel %vm455_vm2, %v9661_v13, 0.0  ;;  %v18876_v14 = vld [vmem:[#allocation67_spill] sm:$0xff] }
0x1d88   :  { %v9677_v60 = vsel %vm455_vm2, %v9660_v61, 0.0  ;;  %v18217_v7 = vadd.f32 %v9412_v0, %v18869_v34 }
0x1d89   :  { %v9678_v59 = vadd.f32 %v9677_v60, %v9676_v37  ;;  %v9622_v48 = vadd.f32 %v9621_v23, %v9620_v24  ;;  %v9625_v9 = vsel %vm455_vm2, %v18214_v16, 0.0  ;;  %v9663_v51 = vmul.f32 %v18214_v16, %v18214_v16 }
0x1d8a   :  { %v9623_v50 = vsel %vm455_vm2, %v18217_v7, 0.0  ;;  %v9662_v29 = vmul.f32 %v18217_v7, %v18217_v7  ;;  %v12202_v1 = vpop.f32.mrb[174].mxu1 }
0x1d8b   :  { %v9624_v25 = vadd.f32 %v9623_v50, %v9622_v48  ;;  %v9680_v30 = vadd.f32 %v9679_v47, %v9678_v59  ;;  %v9422_v3 = vpop.f32.mrb[175].mxu1  ;;  %v18235_v58 = vadd.f32 %v12202_v1, %v18871_v15  ;;  %v9683_v4 = vsel %vm455_vm2, %v9663_v51, 0.0  ;;  %v18877_v50 = vld [vmem:[#allocation64_spill] sm:$0xff] }
0x1d8c   :  { %v9681_v33 = vsel %vm455_vm2, %v9662_v29, 0.0  ;;  %v18228_v35 = vadd.f32 %v9422_v3, %v18870_v38 }
0x1d8d   :  { %v9626_v57 = vadd.f32 %v9625_v9, %v9624_v25  ;;  %v9682_v62 = vadd.f32 %v9681_v33, %v9680_v30  ;;  %v9629_v46 = vsel %vm455_vm2, %v18235_v58, 0.0  ;;  %v9665_v0 = vmul.f32 %v18235_v58, %v18235_v58 }
0x1d8e   :  { %v9627_v41 = vsel %vm455_vm2, %v18228_v35, 0.0  ;;  %v12221_v42 = vpop.f32.mrb[176].mxu1  ;;  %v9664_v18 = vmul.f32 %v18228_v35, %v18228_v35 }
0x1d8f   :  { %v18238_v17 = vadd.f32 %v12221_v42, %v18872_v21  ;;  %v9561_v5 = vpop.f32.mrb[177].mxu1  ;;  %v9628_v52 = vadd.f32 %v9627_v41, %v9626_v57  ;;  %v9684_v22 = vadd.f32 %v9683_v4, %v9682_v62  ;;  %v9687_v41 = vsel %vm455_vm2, %v9665_v0, 0.0  ;;  %v18878_v62 = vld [vmem:[#allocation69_spill] sm:$0xff] }
0x1d90   :  { %v18241_v44 = vadd.f32 %v9561_v5, %v18873_v31  ;;  %v9685_v13 = vsel %vm455_vm2, %v9664_v18, 0.0  ;;  %v18879_v18 = vld [vmem:[#allocation66_spill] sm:$0xff] }
0x1d91   :  { %v9667_v43 = vmul.f32 %v18238_v17, %v18238_v17  ;;  %v9638_v53 = vsel %vm455_vm2, %v18238_v17, 0.0  ;;  %v9630_v6 = vadd.f32 %v9629_v46, %v9628_v52  ;;  %v9686_v48 = vadd.f32 %v9685_v13, %v9684_v22 }
0x1d92   :  { %v9637_v40 = vsel %vm455_vm2, %v18241_v44, 0.0  ;;  %v9666_v54 = vmul.f32 %v18241_v44, %v18241_v44  ;;  %v12224_v26 = vpop.f32.mrb[178].mxu1 }
0x1d93   :  { %v9571_v8 = vpop.f32.mrb[179].mxu1  ;;  %v9696_v55 = vsel %vm455_vm2, %v9667_v43, 0.0  ;;  %v18259_v27 = vadd.f32 %v12224_v26, %v18874_v19  ;;  %v9639_v36 = vadd.f32 %v9638_v53, %v9637_v40  ;;  %v9631_v1 = vrot.slane %v9630_v6, 4 }
0x1d94   :  { %v9695_v49 = vsel %vm455_vm2, %v9666_v54, 0.0  ;;  %v18262_v11 = vadd.f32 %v9571_v8, %v18875_v32  ;;  %v9688_v5 = vadd.f32 %v9687_v41, %v9686_v48 }
0x1d95   :  { %v9669_v61 = vmul.f32 %v18259_v27, %v18259_v27  ;;  %v9697_v23 = vadd.f32 %v9696_v55, %v9695_v49  ;;  %v9642_v25 = vsel %vm455_vm2, %v18259_v27, 0.0  ;;  %v9632_v4 = vadd.f32 %v9631_v1, %v9630_v6 }
0x1d96   :  { %v9640_v56 = vsel %vm455_vm2, %v18262_v11, 0.0  ;;  %v9668_v37 = vmul.f32 %v18262_v11, %v18262_v11  ;;  %v12227_v24 = vpop.f32.mrb[180].mxu1 }
0x1d97   :  { %v9641_v60 = vadd.f32 %v9640_v56, %v9639_v36  ;;  %v18274_v34 = vadd.f32 %v12227_v24, %v18876_v14  ;;  %v9581_v59 = vpop.f32.mrb[181].mxu1  ;;  %v9700_v30 = vsel %vm455_vm2, %v9669_v61, 0.0  ;;  %v9633_v13 = vrot.slane %v9632_v4, 2 }
0x1d98   :  { %v9698_v47 = vsel %vm455_vm2, %v9668_v37, 0.0  ;;  %v18278_v29 = vadd.f32 %v9581_v59, %v18877_v50  ;;  %v9689_v36 = vrot.slane %v9688_v5, 4 }
0x1d99   :  { %v9699_v3 = vadd.f32 %v9698_v47, %v9697_v23  ;;  %v9671_v9 = vmul.f32 %v18274_v34, %v18274_v34  ;;  %v9643_v33 = vadd.f32 %v9642_v25, %v9641_v60  ;;  %v9646_v53 = vsel %vm455_vm2, %v18274_v34, 0.0 }
0x1d9a   :  { %v9644_v38 = vsel %vm455_vm2, %v18278_v29, 0.0  ;;  %v9670_v57 = vmul.f32 %v18278_v29, %v18278_v29  ;;  %v12230_v51 = vpop.f32.mrb[182].mxu1  ;;  %v9634_v23 = vadd.f32 %v9633_v13, %v9632_v4  ;;  %v9690_v60 = vadd.f32 %v9689_v36, %v9688_v5  ;;  %v411_v5 = vld [vmem:[%s18880_s8] sm:$0xff]  ;;  %v414_v4 = vld [vmem:[%s18880_s8 + $0x18] sm:$0xff] }
0x1d9b   :  { %v9701_v42 = vadd.f32 %v9700_v30, %v9699_v3  ;;  %v18291_v15 = vadd.f32 %v12230_v51, %v18878_v62  ;;  %v9591_v21 = vpop.f32.mrb[183].mxu1  ;;  %v9645_v31 = vadd.f32 %v9644_v38, %v9643_v33  ;;  %v9704_v40 = vsel %vm455_vm2, %v9671_v9, 0.0  ;;  %v18882_v13 = vld [vmem:[#allocation52_spill] sm:$0xff] }
0x1d9c   :  { %v9702_v52 = vsel %vm455_vm2, %v9670_v57, 0.0  ;;  %v18295_v43 = vadd.f32 %v9591_v21, %v18879_v18  ;;  %v9635_v50 = vrot.slane %v9634_v23, 1  ;;  %v9691_v1 = vrot.slane %v9690_v60, 2 }
0x1d9d   :  { %v9703_v54 = vadd.f32 %v9702_v52, %v9701_v42  ;;  %v9673_v26 = vmul.f32 %v18291_v15, %v18291_v15  ;;  %v9647_v46 = vadd.f32 %v9646_v53, %v9645_v31  ;;  %v9650_v32 = vsel %vm455_vm2, %v18291_v15, 0.0  ;;  %v412_v31 = vld [vmem:[%s18880_s8 + $0x8] sm:$0xff]  ;;  %v413_v52 = vld [vmem:[%s18880_s8 + $0x10] sm:$0xff] }
0x1d9e   :  { %v9648_v22 = vsel %vm455_vm2, %v18295_v43, 0.0  ;;  %v9672_v8 = vmul.f32 %v18295_v43, %v18295_v43  ;;  %v9636_v9 = vadd.f32 %v9635_v50, %v9634_v23  ;;  %v9692_v38 = vadd.f32 %v9691_v1, %v9690_v60 }
0x1d9f   :  { %v9705_v55 = vadd.f32 %v9704_v40, %v9703_v54  ;;  %v9649_v49 = vadd.f32 %v9648_v22, %v9647_v46  ;;  %v9708_v61 = vsel %vm455_vm2, %v9673_v26, 0.0  ;;  %v12694_v18 = vpack.c.bf16 %v412_v31, %v411_v5 }
0x1da0   :  { %v9706_v19 = vsel %vm455_vm2, %v9672_v8, 0.0  ;;  %v9693_v41 = vrot.slane %v9692_v38, 1  ;;  %v18881_v8 = vld [vmem:[#allocation50_spill] sm:$0xff] }
0x1da1   :  { %v9707_v6 = vadd.f32 %v9706_v19, %v9705_v55  ;;  %v9651_v56 = vadd.f32 %v9650_v32, %v9649_v49  ;;  %12695 = vmatprep.subr.bf16.mxu1 %v12694_v18 }
0x1da2   :  { %v9694_v62 = vadd.f32 %v9693_v41, %v9692_v38  ;;  %12697 = vmatpush3.bf16.msra.mxu1 %v12694_v18 }
0x1da3   :  { %v9709_v37 = vadd.f32 %v9708_v61, %v9707_v6  ;;  %v9652_v24 = vrot.slane %v9651_v56, 4 }
0x1da5   :  { %v9710_v0 = vrot.slane %v9709_v37, 4  ;;  %v9653_v14 = vadd.f32 %v9652_v24, %v9651_v56 }
0x1da7   :  { %v9711_v59 = vadd.f32 %v9710_v0, %v9709_v37  ;;  %v9654_v48 = vrot.slane %v9653_v14, 2 }
0x1da9   :  { %v9712_v47 = vrot.slane %v9711_v59, 2  ;;  %v9655_v25 = vadd.f32 %v9654_v48, %v9653_v14 }
0x1dab   :  { %v9656_v30 = vrot.slane %v9655_v25, 1  ;;  %v9713_v3 = vadd.f32 %v9712_v47, %v9711_v59  ;;  %v18336_v47 = vld [vmem:[#allocation8] ss:$0 sm:$0xff] }
0x1dad   :  { %v9657_v33 = vadd.f32 %v9656_v30, %v9655_v25  ;;  %v9714_v51 = vrot.slane %v9713_v3, 1 }
0x1daf   :  { %v9718_v57 = vsel %vm865_vm3, %v9657_v33, %v9636_v9  ;;  %v9715_v42 = vadd.f32 %v9714_v51, %v9713_v3  ;;  %v18343_v33 = vld [vmem:[#allocation9] ss:$0 sm:$0xff] }
0x1db0   :  { %12240 = vmatmul.mubr.msk.f32.vlgmr.msra.gmra.mrb[160].mxu0 %vm455_vm2, %v9718_v57 }
0x1db1   :  { %12690 = vmatpush3.bf16.msra.mxu0 %v18861_v63  ;;  %12250 = vmatprep.mubr.msk.f32.mxu0 %vm13964_vm0, %v18863_v2  ;;  %v9793_v21 = vsel %vm865_vm3, %v9715_v42, %v9694_v62  ;;  %v12698_v63 = vpack.c.bf16 %v414_v4, %v413_v52 }
0x1db2   :  { %12691 = vmatprep.subr.bf16.mxu0 %v18852_v20 }
0x1db3   :  { %12699 = vmatprep.subr.bf16.mxu1 %v12698_v63 }
0x1db4   :  { %12701 = vmatpush3.bf16.msra.mxu1 %v12698_v63 }
0x1db5   :  { %12693 = vmatpush3.bf16.msra.mxu0 %v18862_v28 }
0x1db8   :  { %12251 = vmatmul.mubr.msk.f32.vlgmr.msra.gmra.mrb[162].mxu0 %vm455_vm2, %v9793_v21 }
0x1e83   :  { %v9787_v2 = vpop.f32.mrb[160].mxu0 }
0x1e84   :  { %v12241_v20 = vpop.f32.mrb[161].mxu0  ;;  %v9866_v53 = vmul.f32 0.00390625, %v9787_v2 }
0x1e86   :  { %v9868_v28 = vmul.f32 %v9866_v53, %v9866_v53  ;;  %v9879_v55 = vrot.slane %v9866_v53, %v18881_v8 }
0x1e88   :  { %v9880_v49 = vcombine.high %v9879_v55, %v9879_v55  ;;  %v9887_v19 = vrot.slane %v9879_v55, %v18881_v8 }
0x1e8a   :  { %v9894_v6 = vrot.slane %v9880_v49, %v18881_v8  ;;  %v9898_v36 = vrot.slane %v9887_v19, %v18882_v13 }
0x1e8b   :  { %v9862_v40 = vpop.f32.mrb[162].mxu0 }
0x1e8c   :  { %v9867_v54 = vmul.f32 0.00390625, %v9862_v40  ;;  %v12252_v26 = vpop.f32.mrb[163].mxu0  ;;  %v9902_v24 = vrot.slane %v9894_v6, %v18882_v13  ;;  %v9905_v0 = vsub.f32 %v18186_v12, %v9898_v36  ;;  %v9906_v23 = vsub.f32 %v18183_v39, %v9898_v36 }
0x1e8d   :  { %v9907_v59 = vsub.f32 %v18202_v45, %v9898_v36  ;;  %v9908_v48 = vsub.f32 %v18197_v10, %v9898_v36  ;;  %v9909_v50 = vsub.f32 %v18217_v7, %v9898_v36  ;;  %v9910_v1 = vsub.f32 %v18214_v16, %v9898_v36 }
0x1e8e   :  { %v9869_v46 = vsub.f32 %v9867_v54, %v9868_v28  ;;  %v9911_v25 = vsub.f32 %v18228_v35, %v9898_v36  ;;  %v9912_v12 = vsub.f32 %v18235_v58, %v9898_v36  ;;  %v9913_v58 = vsub.f32 %v18241_v44, %v9902_v24 }
0x1e8f   :  { %v9914_v41 = vsub.f32 %v18238_v17, %v9902_v24  ;;  %v9915_v42 = vsub.f32 %v18262_v11, %v9902_v24  ;;  %v9916_v62 = vsub.f32 %v18259_v27, %v9902_v24  ;;  %v9917_v31 = vsub.f32 %v18278_v29, %v9902_v24 }
0x1e90   :  { %v9870_v22 = vadd.f32 1e-05, %v9869_v46  ;;  %v9918_v52 = vsub.f32 %v18274_v34, %v9902_v24  ;;  %v9919_v17 = vsub.f32 %v18295_v43, %v9902_v24  ;;  %v9920_v11 = vsub.f32 %v18291_v15, %v9902_v24 }
0x1e92   :  { %13672 = vrsqrt.f32 %v9870_v22 }
0x1e9c   :  { %v13673_v32 = vpop.eup %13672 }
0x1e9d   :  { %v9928_v61 = vrot.slane %v13673_v32, %v18881_v8 }
0x1e9f   :  { %v9929_v56 = vcombine.high %v9928_v61, %v9928_v61  ;;  %v9936_v37 = vrot.slane %v9928_v61, %v18881_v8 }
0x1ea1   :  { %v9943_v60 = vrot.slane %v9929_v56, %v18881_v8  ;;  %v9947_v14 = vrot.slane %v9936_v37, %v18882_v13 }
0x1ea3   :  { %v9951_v39 = vrot.slane %v9943_v60, %v18882_v13  ;;  %v9954_v30 = vmul.f32 %v9947_v14, %v9905_v0  ;;  %v9955_v3 = vmul.f32 %v9947_v14, %v9906_v23  ;;  %v9956_v9 = vmul.f32 %v9947_v14, %v9907_v59 }
0x1ea4   :  { %v9957_v45 = vmul.f32 %v9947_v14, %v9908_v48  ;;  %v9958_v38 = vmul.f32 %v9947_v14, %v9909_v50  ;;  %v9959_v10 = vmul.f32 %v9947_v14, %v9910_v1  ;;  %v9960_v57 = vmul.f32 %v9947_v14, %v9911_v25  ;;  %v416_v48 = vld [vmem:[%s18883_s9] sm:$0xff]  ;;  %v418_v1 = vld [vmem:[%s18883_s9 + $0x10] sm:$0xff]  ;;  %v419_v25 = vld [vmem:[%s18883_s9 + $0x18] sm:$0xff] }
0x1ea5   :  { %v9976_v51 = vmul.f32 %v18336_v47, %v9954_v30  ;;  %v9977_v7 = vmul.f32 %v18336_v47, %v9955_v3  ;;  %v9978_v16 = vmul.f32 %v18336_v47, %v9956_v9  ;;  %v9961_v35 = vmul.f32 %v9947_v14, %v9912_v12  ;;  %v421_v30 = vld [vmem:[%s18883_s9 + $0x28] sm:$0xff]  ;;  %v422_v9 = vld [vmem:[%s18883_s9 + $0x30] sm:$0xff] }
0x1ea6   :  { %v9979_v18 = vmul.f32 %v18336_v47, %v9957_v45  ;;  %v9980_v44 = vmul.f32 %v18336_v47, %v9958_v38  ;;  %v9962_v4 = vmul.f32 %v9951_v39, %v9913_v58  ;;  %v9963_v63 = vmul.f32 %v9951_v39, %v9914_v41  ;;  %v424_v38 = vld [vmem:[%s18883_s9 + $0x40] sm:$0xff]  ;;  %v429_v58 = vld [vmem:[%s18883_s9 + $0x68] sm:$0xff] }
0x1ea7   :  { %v18353_v21 = vadd.f32 %v18343_v33, %v9976_v51  ;;  %v18356_v5 = vadd.f32 %v18343_v33, %v9977_v7  ;;  %v18367_v27 = vadd.f32 %v18343_v33, %v9978_v16  ;;  %v9964_v2 = vmul.f32 %v9951_v39, %v9915_v42  ;;  %v426_v51 = vld [vmem:[%s18883_s9 + $0x50] sm:$0xff]  ;;  %v427_v7 = vld [vmem:[%s18883_s9 + $0x58] sm:$0xff] }
0x1ea8   :  { %v9965_v34 = vmul.f32 %v9951_v39, %v9916_v62  ;;  %v9966_v29 = vmul.f32 %v9951_v39, %v9917_v31  ;;  %v9967_v20 = vmul.f32 %v9951_v39, %v9918_v52  ;;  %v9968_v53 = vmul.f32 %v9951_v39, %v9919_v17  ;;  %v430_v42 = vld [vmem:[%s18883_s9 + $0x70] sm:$0xff]  ;;  %v431_v62 = vld [vmem:[%s18883_s9 + $0x78] sm:$0xff]  ;;  %v18465_v52 = vld [vmem:[#allocation11] ss:$0 sm:$0xff] }
0x1ea9   :  { %12261 = vmatprep.mubr.msk.f32.mxu1 %vm455_vm2, %v18353_v21  ;;  %v9969_v15 = vmul.f32 %v9951_v39, %v9920_v11  ;;  %v18374_v43 = vadd.f32 %v18343_v33, %v9979_v18  ;;  %v9981_v40 = vmul.f32 %v18336_v47, %v9959_v10  ;;  %v18378_v28 = vadd.f32 %v18343_v33, %v9980_v44  ;;  %v420_v39 = vld [vmem:[%s18883_s9 + $0x20] sm:$0xff]  ;;  %v425_v10 = vld [vmem:[%s18883_s9 + $0x48] sm:$0xff] }
0x1eaa   :  { %12262 = vmatmul.mubr.msk.f32.vlgmr.msra.gmra.mrb[184].mxu1 %vm455_vm2, %v18356_v5  ;;  %v9982_v54 = vmul.f32 %v18336_v47, %v9960_v57  ;;  %v9983_v46 = vmul.f32 %v18336_v47, %v9961_v35  ;;  %v9984_v8 = vmul.f32 %v18336_v47, %v9962_v4  ;;  %v9985_v49 = vmul.f32 %v18336_v47, %v9963_v63  ;;  %v428_v35 = vld [vmem:[%s18883_s9 + $0x60] sm:$0xff] }
0x1eab   :  { %12264 = vmatprep.mubr.msk.f32.mxu1 %vm455_vm2, %v18367_v27  ;;  %v18386_v26 = vadd.f32 %v18343_v33, %v9981_v40  ;;  %v9986_v32 = vmul.f32 %v18336_v47, %v9964_v2  ;;  %v9987_v13 = vmul.f32 %v18336_v47, %v9965_v34  ;;  %v9988_v61 = vmul.f32 %v18336_v47, %v9966_v29 }
0x1eac   :  { %v18390_v22 = vadd.f32 %v18343_v33, %v9982_v54  ;;  %v18398_v55 = vadd.f32 %v18343_v33, %v9983_v46  ;;  %v18402_v19 = vadd.f32 %v18343_v33, %v9984_v8  ;;  %v18410_v6 = vadd.f32 %v18343_v33, %v9985_v49 }
0x1ead   :  { %v18414_v36 = vadd.f32 %v18343_v33, %v9986_v32  ;;  %v18422_v56 = vadd.f32 %v18343_v33, %v9987_v13  ;;  %v9989_v37 = vmul.f32 %v18336_v47, %v9967_v20  ;;  %v18426_v24 = vadd.f32 %v18343_v33, %v9988_v61 }
0x1eae   :  { %12265 = vmatmul.mubr.msk.f32.gmra.mrb[186].mxu1 %vm455_vm2, %v18374_v43  ;;  %v9990_v0 = vmul.f32 %v18336_v47, %v9968_v53  ;;  %v9991_v60 = vmul.f32 %v18336_v47, %v9969_v15  ;;  %v417_v47 = vld [vmem:[%s18883_s9 + $0x8] sm:$0xff]  ;;  %v12706_v12 = vpack.c.bf16 %v419_v25, %v418_v1  ;;  %v12710_v3 = vpack.c.bf16 %v421_v30, %v420_v39 }
0x1eaf   :  { %12267 = vmatprep.mubr.msk.f32.mxu1 %vm455_vm2, %v18378_v28  ;;  %v18434_v23 = vadd.f32 %v18343_v33, %v9989_v37  ;;  %v12702_v50 = vpack.c.bf16 %v417_v47, %v416_v48  ;;  %v12718_v57 = vpack.c.bf16 %v425_v10, %v424_v38  ;;  %v12722_v16 = vpack.c.bf16 %v427_v7, %v426_v51 }
0x1eb0   :  { %v18438_v14 = vadd.f32 %v18343_v33, %v9990_v0  ;;  %v18445_v59 = vadd.f32 %v18343_v33, %v9991_v60  ;;  %v423_v33 = vld [vmem:[%s18883_s9 + $0x38] sm:$0xff]  ;;  %v12726_v41 = vpack.c.bf16 %v429_v58, %v428_v35  ;;  %v12730_v31 = vpack.c.bf16 %v431_v62, %v430_v42 }
0x1eb1   :  { %12703 = vmatprep.subr.bf16.mxu0 %v12702_v50  ;;  %v12714_v45 = vpack.c.bf16 %v423_v33, %v422_v9 }
0x1eb2   :  { %12268 = vmatmul.mubr.msk.f32.gmra.mrb[188].mxu1 %vm455_vm2, %v18386_v26  ;;  %12705 = vmatpush3.bf16.msra.mxu0 %v12702_v50 }
0x1eb3   :  { %12270 = vmatprep.mubr.msk.f32.mxu1 %vm455_vm2, %v18390_v22  ;;  %12707 = vmatprep.subr.bf16.mxu0 %v12706_v12 }
0x1eb6   :  { %12271 = vmatmul.mubr.msk.f32.gmra.mrb[190].mxu1 %vm455_vm2, %v18398_v55  ;;  %12709 = vmatpush3.bf16.msra.mxu0 %v12706_v12 }
0x1eb7   :  { %12273 = vmatprep.mubr.msk.f32.mxu1 %vm455_vm2, %v18402_v19  ;;  %12711 = vmatprep.subr.bf16.mxu0 %v12710_v3 }
0x1eba   :  { %12274 = vmatmul.mubr.msk.f32.gmra.mrb[192].mxu1 %vm455_vm2, %v18410_v6  ;;  %12713 = vmatpush3.bf16.msra.mxu0 %v12710_v3 }
0x1ebb   :  { %12276 = vmatprep.mubr.msk.f32.mxu1 %vm455_vm2, %v18414_v36  ;;  %12715 = vmatprep.subr.bf16.mxu0 %v12714_v45 }
0x1ebe   :  { %12277 = vmatmul.mubr.msk.f32.gmra.mrb[194].mxu1 %vm455_vm2, %v18422_v56  ;;  %12717 = vmatpush3.bf16.msra.mxu0 %v12714_v45 }
0x1ebf   :  { %12279 = vmatprep.mubr.msk.f32.mxu1 %vm455_vm2, %v18426_v24  ;;  %12719 = vmatprep.subr.bf16.mxu0 %v12718_v57 }
0x1ec2   :  { %12280 = vmatmul.mubr.msk.f32.gmra.mrb[196].mxu1 %vm455_vm2, %v18434_v23  ;;  %12721 = vmatpush3.bf16.msra.mxu0 %v12718_v57 }
0x1ec3   :  { %12282 = vmatprep.mubr.msk.f32.mxu1 %vm455_vm2, %v18438_v14  ;;  %12723 = vmatprep.subr.bf16.mxu0 %v12722_v16 }
0x1ec6   :  { %12283 = vmatmul.mubr.msk.f32.gmra.mrb[198].mxu1 %vm455_vm2, %v18445_v59  ;;  %12725 = vmatpush3.bf16.msra.mxu0 %v12722_v16 }
0x1ec7   :  { %12727 = vmatprep.subr.bf16.mxu0 %v12726_v41 }
0x1eca   :  { %12729 = vmatpush3.bf16.msra.mxu0 %v12726_v41 }
0x1ecb   :  { %12731 = vmatprep.subr.bf16.mxu0 %v12730_v31 }
0x1ece   :  { %12733 = vmatpush3.bf16.msra.mxu0 %v12730_v31 }
0x1f7d   :  { %v12263_v18 = vpop.f32.mrb[184].mxu1 }
0x1f7e   :  { %v18468_v44 = vadd.f32 %v12263_v18, %v18465_v52  ;;  %v10134_v17 = vpop.f32.mrb[185].mxu1 }
0x1f7f   :  { %v18471_v11 = vadd.f32 %v18465_v52, %v10134_v17 }
0x1f80   :  { %v10214_v4 = vsub.f32 0.0, %v18468_v44 }
0x1f81   :  { %v10213_v63 = vsub.f32 0.0, %v18471_v11  ;;  %v12266_v2 = vpop.f32.mrb[186].mxu1 }
0x1f82   :  { %v10231_v34 = vmul.f32 1.442695, %v10214_v4  ;;  %v18476_v29 = vadd.f32 %v12266_v2, %v18465_v52  ;;  %v10144_v20 = vpop.f32.mrb[187].mxu1 }
0x1f83   :  { %v10229_v53 = vmul.f32 1.442695, %v10213_v63  ;;  %v18479_v15 = vadd.f32 %v18465_v52, %v10144_v20 }
0x1f84   :  { %13674 = vpow2.f32 %v10231_v34  ;;  %v10216_v40 = vsub.f32 0.0, %v18476_v29 }
0x1f85   :  { %13676 = vpow2.f32 %v10229_v53  ;;  %v10215_v54 = vsub.f32 0.0, %v18479_v15  ;;  %v12269_v46 = vpop.f32.mrb[188].mxu1 }
0x1f86   :  { %v10235_v8 = vmul.f32 1.442695, %v10216_v40  ;;  %v18484_v49 = vadd.f32 %v12269_v46, %v18465_v52  ;;  %v10154_v32 = vpop.f32.mrb[189].mxu1 }
0x1f87   :  { %v10233_v13 = vmul.f32 1.442695, %v10215_v54  ;;  %v18487_v61 = vadd.f32 %v18465_v52, %v10154_v32 }
0x1f88   :  { %13678 = vpow2.f32 %v10235_v8  ;;  %v10218_v37 = vsub.f32 0.0, %v18484_v49 }
0x1f89   :  { %13680 = vpow2.f32 %v10233_v13  ;;  %v10217_v0 = vsub.f32 0.0, %v18487_v61  ;;  %v12272_v60 = vpop.f32.mrb[190].mxu1 }
0x1f8a   :  { %v10239_v48 = vmul.f32 1.442695, %v10218_v37  ;;  %v18492_v47 = vadd.f32 %v12272_v60, %v18465_v52  ;;  %v10164_v50 = vpop.f32.mrb[191].mxu1 }
0x1f8b   :  { %v10237_v1 = vmul.f32 1.442695, %v10217_v0  ;;  %v18495_v25 = vadd.f32 %v18465_v52, %v10164_v50 }
0x1f8c   :  { %13682 = vpow2.f32 %v10239_v48  ;;  %v10220_v12 = vsub.f32 0.0, %v18492_v47 }
0x1f8d   :  { %13684 = vpow2.f32 %v10237_v1  ;;  %v10219_v39 = vsub.f32 0.0, %v18495_v25  ;;  %v12275_v30 = vpop.f32.mrb[192].mxu1 }
0x1f8e   :  { %v13675_v3 = vpop.eup %13674  ;;  %v10243_v9 = vmul.f32 1.442695, %v10220_v12  ;;  %v18500_v33 = vadd.f32 %v12275_v30, %v18465_v52  ;;  %v10174_v45 = vpop.f32.mrb[193].mxu1 }
0x1f8f   :  { %v13677_v38 = vpop.eup %13676  ;;  %v10262_v10 = vadd.f32 1.0, %v13675_v3  ;;  %v10241_v57 = vmul.f32 1.442695, %v10219_v39  ;;  %v18503_v51 = vadd.f32 %v18465_v52, %v10174_v45 }
0x1f90   :  { %v10261_v7 = vadd.f32 1.0, %v13677_v38  ;;  %13686 = vpow2.f32 %v10243_v9  ;;  %v10222_v16 = vsub.f32 0.0, %v18500_v33 }
0x1f91   :  { %13688 = vrcp.f32 %v10262_v10  ;;  %v10221_v35 = vsub.f32 0.0, %v18503_v51  ;;  %v12278_v58 = vpop.f32.mrb[194].mxu1 }
0x1f92   :  { %v13679_v41 = vpop.eup %13678  ;;  %13690 = vrcp.f32 %v10261_v7  ;;  %v10247_v42 = vmul.f32 1.442695, %v10222_v16  ;;  %v18508_v62 = vadd.f32 %v12278_v58, %v18465_v52  ;;  %v10184_v31 = vpop.f32.mrb[195].mxu1 }
0x1f93   :  { %v13681_v18 = vpop.eup %13680  ;;  %v10264_v17 = vadd.f32 1.0, %v13679_v41  ;;  %13692 = vpow2.f32 %v10241_v57  ;;  %v10245_v4 = vmul.f32 1.442695, %v10221_v35  ;;  %v18511_v63 = vadd.f32 %v18465_v52, %v10184_v31 }
0x1f94   :  { %v10263_v2 = vadd.f32 1.0, %v13681_v18  ;;  %13694 = vpow2.f32 %v10247_v42  ;;  %v10224_v34 = vsub.f32 0.0, %v18508_v62 }
0x1f95   :  { %13696 = vrcp.f32 %v10264_v17  ;;  %v10223_v20 = vsub.f32 0.0, %v18511_v63  ;;  %v12281_v53 = vpop.f32.mrb[196].mxu1 }
0x1f96   :  { %v13683_v40 = vpop.eup %13682  ;;  %13698 = vrcp.f32 %v10263_v2  ;;  %v10251_v54 = vmul.f32 1.442695, %v10224_v34  ;;  %v18516_v46 = vadd.f32 %v12281_v53, %v18465_v52  ;;  %v10194_v8 = vpop.f32.mrb[197].mxu1 }
0x1f97   :  { %v13685_v32 = vpop.eup %13684  ;;  %v10266_v13 = vadd.f32 1.0, %v13683_v40  ;;  %13700 = vpow2.f32 %v10245_v4  ;;  %v10249_v37 = vmul.f32 1.442695, %v10223_v20  ;;  %v18519_v0 = vadd.f32 %v18465_v52, %v10194_v8 }
0x1f98   :  { %v10265_v60 = vadd.f32 1.0, %v13685_v32  ;;  %13702 = vpow2.f32 %v10251_v54  ;;  %v10226_v48 = vsub.f32 0.0, %v18516_v46 }
0x1f99   :  { %13704 = vrcp.f32 %v10266_v13  ;;  %v10225_v50 = vsub.f32 0.0, %v18519_v0  ;;  %v12284_v1 = vpop.f32.mrb[198].mxu1 }
0x1f9a   :  { %v13687_v12 = vpop.eup %13686  ;;  %13706 = vrcp.f32 %v10265_v60  ;;  %v10255_v39 = vmul.f32 1.442695, %v10226_v48  ;;  %v18524_v30 = vadd.f32 %v12284_v1, %v18465_v52  ;;  %v10204_v3 = vpop.f32.mrb[199].mxu1 }
0x1f9b   :  { %v13689_v9 = vpop.eup %13688  ;;  %v10268_v45 = vadd.f32 1.0, %v13687_v12  ;;  %13708 = vpow2.f32 %v10249_v37  ;;  %v10253_v38 = vmul.f32 1.442695, %v10225_v50  ;;  %v18527_v10 = vadd.f32 %v18465_v52, %v10204_v3 }
0x1f9c   :  { %v13691_v57 = vpop.eup %13690  ;;  %13710 = vpow2.f32 %v10255_v39  ;;  %v10228_v7 = vsub.f32 0.0, %v18524_v30  ;;  %v10310_v42 = vmul.f32 %v13689_v9, %v18468_v44 }
0x1f9d   :  { %v13693_v16 = vpop.eup %13692  ;;  %v10309_v35 = vmul.f32 %v13691_v57, %v18471_v11  ;;  %v10227_v58 = vsub.f32 0.0, %v18527_v10  ;;  %13712 = vpow2.f32 %v10253_v38 }
0x1f9e   :  { %v13695_v41 = vpop.eup %13694  ;;  %v10267_v31 = vadd.f32 1.0, %v13693_v16  ;;  %v10259_v18 = vmul.f32 1.442695, %v10228_v7  ;;  %13714 = vrcp.f32 %v10268_v45 }
0x1f9f   :  { %v13697_v17 = vpop.eup %13696  ;;  %v10270_v4 = vadd.f32 1.0, %v13695_v41  ;;  %v10257_v52 = vmul.f32 1.442695, %v10227_v58  ;;  %12317 = vmatprep.mubr.f32.mxu0 %v10309_v35 }
0x1fa0   :  { %v13699_v2 = vpop.eup %13698  ;;  %13716 = vrcp.f32 %v10267_v31  ;;  %12318 = vmatmul.mubr.f32.vlgmr.msra.gmra.mrb[164].mxu0 %v10310_v42  ;;  %v10312_v53 = vmul.f32 %v13697_v17, %v18476_v29 }
0x1fa1   :  { %v13701_v34 = vpop.eup %13700  ;;  %v10311_v20 = vmul.f32 %v13699_v2, %v18479_v15  ;;  %13718 = vrcp.f32 %v10270_v4 }
0x1fa2   :  { %v13703_v11 = vpop.eup %13702  ;;  %v10269_v40 = vadd.f32 1.0, %v13701_v34  ;;  %13720 = vpow2.f32 %v10259_v18 }
0x1fa3   :  { %v13705_v44 = vpop.eup %13704  ;;  %v10272_v54 = vadd.f32 1.0, %v13703_v11  ;;  %13722 = vpow2.f32 %v10257_v52  ;;  %12320 = vmatprep.mubr.f32.mxu0 %v10311_v20 }
0x1fa4   :  { %v13707_v8 = vpop.eup %13706  ;;  %13724 = vrcp.f32 %v10269_v40  ;;  %12321 = vmatmul.mubr.f32.gmra.mrb[166].mxu0 %v10312_v53  ;;  %v10314_v60 = vmul.f32 %v13705_v44, %v18484_v49 }
0x1fa5   :  { %v13709_v32 = vpop.eup %13708  ;;  %v10313_v13 = vmul.f32 %v13707_v8, %v18487_v61  ;;  %13726 = vrcp.f32 %v10272_v54 }
0x1fa6   :  { %v13711_v37 = vpop.eup %13710  ;;  %v10271_v15 = vadd.f32 1.0, %v13709_v32 }
0x1fa7   :  { %v10274_v48 = vadd.f32 1.0, %v13711_v37  ;;  %12323 = vmatprep.mubr.f32.mxu0 %v10313_v13  ;;  %v13713_v29 = vpop.eup %13712 }
0x1fa8   :  { %13728 = vrcp.f32 %v10271_v15  ;;  %12324 = vmatmul.mubr.f32.gmra.mrb[168].mxu0 %v10314_v60  ;;  %v13715_v50 = vpop.eup %13714  ;;  %v10273_v1 = vadd.f32 1.0, %v13713_v29 }
0x1fa9   :  { %13730 = vrcp.f32 %v10274_v48  ;;  %v10316_v61 = vmul.f32 %v13715_v50, %v18492_v47 }
0x1faa   :  { %v13717_v12 = vpop.eup %13716  ;;  %13732 = vrcp.f32 %v10273_v1 }
0x1fab   :  { %v13719_v39 = vpop.eup %13718  ;;  %v10315_v3 = vmul.f32 %v13717_v12, %v18495_v25 }
0x1fac   :  { %v13721_v9 = vpop.eup %13720  ;;  %v10318_v16 = vmul.f32 %v13719_v39, %v18500_v33 }
0x1fad   :  { %v13723_v45 = vpop.eup %13722  ;;  %v10276_v49 = vadd.f32 1.0, %v13721_v9  ;;  %12326 = vmatprep.mubr.f32.mxu0 %v10315_v3 }
0x1fae   :  { %v13725_v38 = vpop.eup %13724  ;;  %v10275_v57 = vadd.f32 1.0, %v13723_v45  ;;  %12327 = vmatmul.mubr.f32.gmra.mrb[170].mxu0 %v10316_v61 }
0x1faf   :  { %v10317_v7 = vmul.f32 %v13725_v38, %v18503_v51  ;;  %13734 = vrcp.f32 %v10276_v49  ;;  %v13727_v35 = vpop.eup %13726 }
0x1fb0   :  { %13736 = vrcp.f32 %v10275_v57  ;;  %v10320_v47 = vmul.f32 %v13727_v35, %v18508_v62 }
0x1fb1   :  { %12329 = vmatprep.mubr.f32.mxu0 %v10317_v7 }
0x1fb2   :  { %v13729_v58 = vpop.eup %13728  ;;  %12330 = vmatmul.mubr.f32.gmra.mrb[172].mxu0 %v10318_v16 }
0x1fb3   :  { %v10319_v25 = vmul.f32 %v13729_v58, %v18511_v63  ;;  %v13731_v41 = vpop.eup %13730  ;;  %v10870_v63 = vld [vmem:[#allocation12] ss:$0 sm:$0xff] }
0x1fb4   :  { %v13733_v42 = vpop.eup %13732  ;;  %v10322_v51 = vmul.f32 %v13731_v41, %v18516_v46 }
0x1fb5   :  { %12332 = vmatprep.mubr.f32.mxu0 %v10319_v25  ;;  %v10321_v31 = vmul.f32 %v13733_v42, %v18519_v0 }
0x1fb6   :  { %12333 = vmatmul.mubr.f32.gmra.mrb[174].mxu0 %v10320_v47 }
0x1fb7   :  { %12335 = vmatprep.mubr.f32.mxu0 %v10321_v31 }
0x1fb9   :  { %v13735_v18 = vpop.eup %13734 }
0x1fba   :  { %v13737_v33 = vpop.eup %13736  ;;  %12336 = vmatmul.mubr.f32.gmra.mrb[176].mxu0 %v10322_v51  ;;  %v10324_v4 = vmul.f32 %v13735_v18, %v18524_v30 }
0x1fbb   :  { %v10323_v17 = vmul.f32 %v13737_v33, %v18527_v10 }
0x1fbd   :  { %12338 = vmatprep.mubr.f32.mxu0 %v10323_v17 }
0x1fbe   :  { %12339 = vmatmul.mubr.f32.gmra.mrb[178].mxu0 %v10324_v4 }
0x2073   :  { %v12319_v52 = vpop.f32.mrb[164].mxu0 }
0x2074   :  { %v10403_v62 = vadd.f32 %v12319_v52, %v10870_v63  ;;  %v10397_v2 = vpop.f32.mrb[165].mxu0 }
0x2075   :  { %v10398_v34 = vadd.f32 %v10870_v63, %v10397_v2 }
0x2076   :  { %v10477_v0 = vadd.f32 %v10403_v62, %v18356_v5 }
0x2077   :  { %v10476_v20 = vadd.f32 %v10398_v34, %v18353_v21  ;;  %v12322_v46 = vpop.f32.mrb[166].mxu0 }
0x2078   :  { %10493 = vst.msk [vmem:[#allocation14 + $0x8] sm:$0xff] %vm455_vm2, %v10477_v0  ;;  %v10413_v11 = vadd.f32 %v12322_v46, %v10870_v63  ;;  %v10407_v53 = vpop.f32.mrb[167].mxu0 }
0x2079   :  { %10492 = vst.msk [vmem:[#allocation14] sm:$0xff] %vm455_vm2, %v10476_v20  ;;  %v10408_v10 = vadd.f32 %v10870_v63, %v10407_v53 }
0x207a   :  { %v10479_v30 = vadd.f32 %v10413_v11, %v18374_v43 }
0x207b   :  { %v10478_v40 = vadd.f32 %v10408_v10, %v18367_v27  ;;  %v12325_v44 = vpop.f32.mrb[168].mxu0 }
0x207c   :  { %10495 = vst.msk [vmem:[#allocation14 + $0x18] sm:$0xff] %vm455_vm2, %v10479_v30  ;;  %v10423_v54 = vadd.f32 %v12325_v44, %v10870_v63  ;;  %v10417_v8 = vpop.f32.mrb[169].mxu0 }
0x207d   :  { %10494 = vst.msk [vmem:[#allocation14 + $0x10] sm:$0xff] %vm455_vm2, %v10478_v40  ;;  %v10418_v21 = vadd.f32 %v10870_v63, %v10417_v8 }
0x207e   :  { %v10481_v5 = vadd.f32 %v10423_v54, %v18386_v26 }
0x207f   :  { %v10480_v32 = vadd.f32 %v10418_v21, %v18378_v28 }
0x2080   :  { %10497 = vst.msk [vmem:[#allocation14 + $0x28] sm:$0xff] %vm455_vm2, %v10481_v5 }
0x2081   :  { %10496 = vst.msk [vmem:[#allocation14 + $0x20] sm:$0xff] %vm455_vm2, %v10480_v32  ;;  %v12328_v13 = vpop.f32.mrb[170].mxu0 }
0x2082   :  { %v10433_v43 = vadd.f32 %v12328_v13, %v10870_v63  ;;  %v10427_v37 = vpop.f32.mrb[171].mxu0 }
0x2083   :  { %v10428_v27 = vadd.f32 %v10870_v63, %v10427_v37 }
0x2084   :  { %v10483_v60 = vadd.f32 %v10433_v43, %v18398_v55 }
0x2085   :  { %v10482_v15 = vadd.f32 %v10428_v27, %v18390_v22  ;;  %v12331_v48 = vpop.f32.mrb[172].mxu0 }
0x2086   :  { %10499 = vst.msk [vmem:[#allocation14 + $0x38] sm:$0xff] %vm455_vm2, %v10483_v60  ;;  %v10443_v29 = vadd.f32 %v12331_v48, %v10870_v63  ;;  %v10437_v50 = vpop.f32.mrb[173].mxu0 }
0x2087   :  { %10498 = vst.msk [vmem:[#allocation14 + $0x30] sm:$0xff] %vm455_vm2, %v10482_v15  ;;  %v10438_v28 = vadd.f32 %v10870_v63, %v10437_v50 }
0x2088   :  { %v10485_v26 = vadd.f32 %v10443_v29, %v18410_v6 }
0x2089   :  { %v10484_v1 = vadd.f32 %v10438_v28, %v18402_v19  ;;  %v12334_v12 = vpop.f32.mrb[174].mxu0 }
0x208a   :  { %10501 = vst.msk [vmem:[#allocation14 + $0x48] sm:$0xff] %vm455_vm2, %v10485_v26  ;;  %v10453_v39 = vadd.f32 %v12334_v12, %v10870_v63  ;;  %v10447_v3 = vpop.f32.mrb[175].mxu0 }
0x208b   :  { %10500 = vst.msk [vmem:[#allocation14 + $0x40] sm:$0xff] %vm455_vm2, %v10484_v1  ;;  %v10448_v22 = vadd.f32 %v10870_v63, %v10447_v3 }
0x208c   :  { %v10487_v55 = vadd.f32 %v10453_v39, %v18422_v56 }
0x208d   :  { %v10486_v9 = vadd.f32 %v10448_v22, %v18414_v36  ;;  %v12337_v61 = vpop.f32.mrb[176].mxu0 }
0x208e   :  { %10503 = vst.msk [vmem:[#allocation14 + $0x58] sm:$0xff] %vm455_vm2, %v10487_v55  ;;  %v10463_v45 = vadd.f32 %v12337_v61, %v10870_v63  ;;  %v10457_v49 = vpop.f32.mrb[177].mxu0 }
0x208f   :  { %10502 = vst.msk [vmem:[#allocation14 + $0x50] sm:$0xff] %vm455_vm2, %v10486_v9  ;;  %v10458_v19 = vadd.f32 %v10870_v63, %v10457_v49 }
0x2090   :  { %v10489_v6 = vadd.f32 %v10463_v45, %v18434_v23 }
0x2091   :  { %v10488_v38 = vadd.f32 %v10458_v19, %v18426_v24  ;;  %v12340_v57 = vpop.f32.mrb[178].mxu0 }
0x2092   :  { %10505 = vst.msk [vmem:[#allocation14 + $0x68] sm:$0xff] %vm455_vm2, %v10489_v6  ;;  %v10473_v7 = vadd.f32 %v12340_v57, %v10870_v63  ;;  %v10467_v16 = vpop.f32.mrb[179].mxu0 }
0x2093   :  { %10504 = vst.msk [vmem:[#allocation14 + $0x60] sm:$0xff] %vm455_vm2, %v10488_v38  ;;  %v10468_v36 = vadd.f32 %v10870_v63, %v10467_v16 }
0x2094   :  { %v10491_v56 = vadd.f32 %v10473_v7, %v18445_v59 }
0x2095   :  { %v10490_v35 = vadd.f32 %v10468_v36, %v18438_v14 }
0x2096   :  { %10507 = vst.msk [vmem:[#allocation14 + $0x78] sm:$0xff] %vm455_vm2, %v10491_v56 }
0x2097   :  { %10506 = vst.msk [vmem:[#allocation14 + $0x70] sm:$0xff] %vm455_vm2, %v10490_v35 }
0x2098   :  { %13889 = shalt.err (!%p13886_p10)
}
0x2099   :  { %s13890_s6 = scalar_lea.hbm %s14217_s3, 2048 }
0x209a   :  { %p13891_p11 = scmp.ne.s32.totalorder %s14217_s3, %s13890_s6  ;;  %p13894_p12 = scmp.lt.u32.totalorder %s13890_s6, %s14217_s3 }
0x209c   :  { %p13896_p13 = pnand %p13894_p12, %p13891_p11 }
0x209e   :  { %13899 = shalt.err (!%p13896_p13)
}
0x209f   :  { %s13973_s12 = smov 128  }
0x20a0   :  { %10519 = dma.vmem_to_hbm [thread:$0]  %s10514_s14, 2048, %s14217_s3, [#allocation5], %s13973_s12, %s13973_s12, %s13971_s1  }
0x20a1   :  { %13908 = dma.done.wait [#allocation5], 2048  }
0x20a2   :  { %13909 = vsyncadd [#allocation5], 4294965248 }
0x20a3   :  { %10523 = vsyncpa [#allocation4], 1 }
0x20a4   :  { %10524 = vsyncpa [#allocation7], 1 }
0x20a5   :  { %10525 = vsyncpa [#allocation10], 1 }
0x20a6   :  { %10526 = vsyncpa [#allocation13], 1 }
0x20a7   :  { %10527 = vsyncpa [#allocation5], 1 }

</bundles_post_ra>
